<compile_context>
chip_gen: v6e
topology: v6e:2x2x1
jax: 0.10.0
libtpu: 0.0.40
codegen_flags: <defaults>
</compile_context>

<pallas_src>
import functools
import math

import jax
import jax.numpy as jnp
from jax import lax
from jax.experimental import pallas as pl
from jax.experimental.pallas import tpu as pltpu

EPS = 1e-5


# ----------------------------------------------------------------------------
# helpers
# ----------------------------------------------------------------------------
def _full_spec(shape):
    nd = len(shape)
    return pl.BlockSpec(shape, lambda i, _nd=nd: (0,) * _nd)


# ----------------------------------------------------------------------------
# downsampling convs: im2col (wrapper) + fused matmul+bias+BN+ReLU kernel
# ----------------------------------------------------------------------------
def _ds_conv_kernel(p_ref, w_ref, b_ref, g_ref, be_ref, o_ref, *,
                    apply_bn, apply_relu):
    """p_ref:(M,K) w_ref:(K,Cout) b/g/be:(1,Cout) o_ref:(M,Cout)."""
    acc = jnp.dot(p_ref[...], w_ref[...],
                  preferred_element_type=jnp.float32) + b_ref[...]
    if apply_bn:
        # training-mode BatchNorm2d: stats over N*H*W rows, biased variance,
        # applied as a single scale/shift FMA.
        mean = jnp.mean(acc, axis=0, keepdims=True)
        diff = acc - mean
        var = jnp.mean(diff * diff, axis=0, keepdims=True)
        scale = g_ref[...] * lax.rsqrt(var + EPS)
        acc = acc * scale + (be_ref[...] - mean * scale)
    if apply_relu:
        acc = jnp.maximum(acc, 0.0)
    o_ref[...] = acc.astype(o_ref.dtype)


def _im2col(x, kh, kw, stride, pad):
    """x:(N,H,W,C) -> patches (N*Ho*Wo, kh*kw*C), feature order (di, dj, c)."""
    N, H, W, C = x.shape
    xp = jnp.pad(x, ((0, 0), (pad, pad), (pad, pad), (0, 0)))
    Ho = (H + 2 * pad - kh) // stride + 1
    Wo = (W + 2 * pad - kw) // stride + 1
    cols = []
    for di in range(kh):
        for dj in range(kw):
            cols.append(xp[:, di:di + stride * Ho:stride,
                           dj:dj + stride * Wo:stride, :])
    patches = jnp.concatenate(cols, axis=-1)
    return patches.reshape(N * Ho * Wo, kh * kw * C), Ho, Wo


def conv2d_fused(x, w, b, gamma, beta, *, stride, pad, apply_bn, apply_relu):
    """x:(N,H,W,Cin)  w:(KH,KW,Cin,Cout)."""
    N = x.shape[0]
    KH, KW, Cin, Cout = w.shape
    patches, Ho, Wo = _im2col(x, KH, KW, stride, pad)
    wmat = w.reshape(KH * KW * Cin, Cout)
    K = wmat.shape[0]
    Kp = ((K + 127) // 128) * 128        # pad K to a lane multiple (unmasked loads)
    if Kp != K:
        patches = jnp.pad(patches, ((0, 0), (0, Kp - K)))
        wmat = jnp.pad(wmat, ((0, Kp - K), (0, 0)))
    M = patches.shape[0]
    kern = functools.partial(_ds_conv_kernel, apply_bn=apply_bn,
                             apply_relu=apply_relu)
    out = pl.pallas_call(
        kern,
        out_shape=jax.ShapeDtypeStruct((M, Cout), jnp.float32),
        grid=(1,),
        in_specs=[_full_spec((M, Kp)), _full_spec((Kp, Cout)),
                  _full_spec((1, Cout)), _full_spec((1, Cout)),
                  _full_spec((1, Cout))],
        out_specs=_full_spec((M, Cout)),
    )(patches, wmat, b, gamma, beta)
    return out.reshape(N, Ho, Wo, Cout)


# ----------------------------------------------------------------------------
# fully fused NeuralODE (20 Euler steps x ConvODEF) + classifier head kernel
# ----------------------------------------------------------------------------
def _ode_head_kernel(z0_ref, w1_ref, w2_ref, tb1_ref, tb2_ref,
                     g1_ref, be1_ref, g2_ref, be2_ref,
                     dmask_ref, pm_ref, hg_ref, hbe_ref, fcw_ref, fcb_ref,
                     out_ref, zbuf, hbuf,
                     *, n_steps, h_step, wp, nb, pe, inv_count):
    """Whole ODE block + head, VMEM resident.

    z0_ref:   (nb, C)    z(0) in flattened zero-padded row layout
                         (per image: (H+2)*(W+2) rows, interior = data).
    w1/w2:    (9, C, C)  conv taps (di*3+dj) over the 64 z channels.
    tb1/tb2:  (nb, C)    border-aware per-pixel time-channel bias maps.
    g/be:     (1, C)     BN gamma/beta (ODE norms 1 & 2).
    dmask:    (nb, 1)    1 at data rows, 0 at halo rows.
    pm:       (N, nb)    per-image average-pool matrix (rows sum to 1).
    hg/hbe:   (1, C)     head BN gamma/beta.
    fcw/fcb:  (C,10)/(1,10)
    zbuf/hbuf:(nb+2*pe, C) VMEM scratch (extra halo so shifted slices stay
              in-bounds); data region lives at rows [pe, pe+nb).
    """
    zbuf[...] = jnp.zeros_like(zbuf)
    hbuf[...] = jnp.zeros_like(hbuf)
    zbuf[pe:pe + nb, :] = z0_ref[...]

    # hoist loop-invariant loads once (not per Euler step)
    dmask = dmask_ref[...]
    tb1 = tb1_ref[...]
    tb2 = tb2_ref[...]
    g1 = g1_ref[...]
    be1 = be1_ref[...]
    g2 = g2_ref[...]
    be2 = be2_ref[...]

    def masked_bn(a, g, be):
        # batch statistics over data rows only (halo rows masked out);
        # applied as one scale/shift FMA.
        mean = jnp.sum(a * dmask, axis=0, keepdims=True) * inv_count
        diff = a - mean
        var = jnp.sum(diff * diff * dmask, axis=0, keepdims=True) * inv_count
        scale = g * lax.rsqrt(var + EPS)
        return a * scale + (be - mean * scale)

    def conv_relu_bn(src, w_ref, tbias, t, g, be):
        # conv3x3(pad=1, no bias) on the flattened padded layout: 9 statically
        # shifted row slices, one MXU matmul per tap, f32 accumulation; the
        # spatially constant time channel contributes t * tbias (border-aware).
        acc = t * tbias
        for tap in range(9):
            di, dj = tap // 3, tap % 3
            off = (di - 1) * wp + (dj - 1)
            acc = acc + jnp.dot(src[pe + off:pe + off + nb, :], w_ref[tap],
                                preferred_element_type=jnp.float32)
        return masked_bn(jnp.maximum(acc, 0.0), g, be)

    def step(_, t):
        # ConvODEF: h = BN1(relu(conv1([z, t])));  dxdt = BN2(relu(conv2([h, t])))
        h_mid = conv_relu_bn(zbuf, w1_ref, tb1, t, g1, be1)
        hbuf[pe:pe + nb, :] = h_mid * dmask        # keep halo rows exactly zero
        dxdt = conv_relu_bn(hbuf, w2_ref, tb2, t, g2, be2)
        zbuf[pe:pe + nb, :] = (zbuf[pe:pe + nb, :]
                               + h_step * (dxdt * dmask))   # Euler update
        return t + h_step

    lax.fori_loop(0, n_steps, step, jnp.zeros((1, 1), jnp.float32))

    # head: BN (batch stats over data rows) + adaptive-avg-pool(1,1) + Linear
    z = zbuf[pe:pe + nb, :]
    zn = masked_bn(z, hg_ref[...], hbe_ref[...])
    pooled = jnp.dot(pm_ref[...], zn, preferred_element_type=jnp.float32)
    out = jnp.dot(pooled, fcw_ref[...],
                  preferred_element_type=jnp.float32) + fcb_ref[...]
    out_ref[...] = out.astype(out_ref.dtype)


def _time_bias_map(w_time, H, W):
    """w_time: (3,3,C) time-channel weights.

    Returns (H,W,C): tb[y,x,:] = sum over taps whose input pixel lies inside
    the HxW image of w_time[di,dj,:]  (zero padding => border pixels see
    fewer valid time taps).
    """
    onesp = jnp.pad(jnp.ones((H, W), jnp.float32), ((1, 1), (1, 1)))
    tb = jnp.zeros((H, W, w_time.shape[-1]), jnp.float32)
    for di in range(3):
        for dj in range(3):
            tb = tb + (onesp[di:di + H, dj:dj + W][:, :, None]
                       * w_time[di, dj][None, None, :])
    return tb


def _embed_padded_rows(arr_hwk, n):
    """(H,W,k) -> (n*(H+2)*(W+2), k): interior rows = data, halo rows = 0."""
    H, W, k = arr_hwk.shape
    padded = jnp.pad(arr_hwk, ((1, 1), (1, 1), (0, 0)))
    return jnp.tile(padded.reshape((H + 2) * (W + 2), k), (n, 1))


def neural_ode_and_head(z0, params):
    """z0: (N,H,W,C) output of downsampling.  Returns logits (N, 10)."""
    N, H, W, C = z0.shape
    Hp, Wp = H + 2, W + 2
    B = Hp * Wp
    NB = N * B
    pe = ((Wp + 1 + 7) // 8) * 8          # halo >= Wp+1, rounded to 8 sublanes

    # reference Euler solver: t0=0, t1=1, h_max=0.05 -> exactly 20 steps
    # (round() guards against float rounding giving 21).
    t0, t1, h_max = 0.0, 1.0, 0.05
    n_steps = int(math.ceil(round(abs(t1 - t0) / h_max, 12)))
    h_step = (t1 - t0) / n_steps

    # z(0) in flattened zero-padded row layout
    z0_rows = jnp.pad(z0, ((0, 0), (1, 1), (1, 1), (0, 0))).reshape(NB, C)

    w1 = params['ode_w1']                 # (3,3,C+1,C)
    w2 = params['ode_w2']
    w1_z = w1[:, :, :C, :].reshape(9, C, C)
    w2_z = w2[:, :, :C, :].reshape(9, C, C)
    tb1 = _embed_padded_rows(_time_bias_map(w1[:, :, C, :], H, W), N)
    tb2 = _embed_padded_rows(_time_bias_map(w2[:, :, C, :], H, W), N)
    dmask = _embed_padded_rows(jnp.ones((H, W, 1), jnp.float32), N)  # (NB,1)

    # per-image average-pool matrix (N, NB)
    dm_img = _embed_padded_rows(jnp.ones((H, W, 1), jnp.float32), 1)[:, 0]
    dm_img = dm_img / float(H * W)
    pm = jnp.zeros((N, NB), jnp.float32)
    for n_i in range(N):
        pm = pm.at[n_i, n_i * B:(n_i + 1) * B].set(dm_img)

    kern = functools.partial(_ode_head_kernel, n_steps=n_steps,
                             h_step=float(h_step), wp=Wp, nb=NB, pe=pe,
                             inv_count=1.0 / float(N * H * W))
    args = (z0_rows, w1_z, w2_z, tb1, tb2,
            params['ode_g1'], params['ode_be1'],
            params['ode_g2'], params['ode_be2'],
            dmask, pm,
            params['head_g'], params['head_be'],
            params['fc_w'], params['fc_b'])
    return pl.pallas_call(
        kern,
        out_shape=jax.ShapeDtypeStruct((N, 10), jnp.float32),
        grid=(1,),
        in_specs=[_full_spec(a.shape) for a in args],
        out_specs=_full_spec((N, 10)),
        scratch_shapes=[pltpu.VMEM((NB + 2 * pe, C), jnp.float32),
                        pltpu.VMEM((NB + 2 * pe, C), jnp.float32)],
    )(*args)


# ----------------------------------------------------------------------------
# full forward pass
# ----------------------------------------------------------------------------
def forward(x_nchw, params):
    # NCHW (PyTorch) -> NHWC (kernel layout)
    x = jnp.transpose(x_nchw, (0, 2, 3, 1)).astype(jnp.float32)
    ones64 = jnp.ones((1, 64), jnp.float32)
    zeros64 = jnp.zeros((1, 64), jnp.float32)

    # downsampling: Conv(3,64,3,1) -> BN -> ReLU
    #               -> Conv(64,64,4,2,1) -> BN -> ReLU -> Conv(64,64,4,2,1)
    x = conv2d_fused(x, params['ds_w1'], params['ds_b1'],
                     params['ds_g1'], params['ds_be1'],
                     stride=1, pad=0, apply_bn=True, apply_relu=True)
    x = conv2d_fused(x, params['ds_w2'], params['ds_b2'],
                     params['ds_g2'], params['ds_be2'],
                     stride=2, pad=1, apply_bn=True, apply_relu=True)
    x = conv2d_fused(x, params['ds_w3'], params['ds_b3'], ones64, zeros64,
                     stride=2, pad=1, apply_bn=False, apply_relu=False)

    # NeuralODE feature block (20 Euler steps) + BN + avg-pool + FC head,
    # all inside one fused, VMEM-resident Pallas kernel.
    return neural_ode_and_head(x, params)


# ----------------------------------------------------------------------------
# deterministic parameter construction (shapes dictated by the nn.Module)
# ----------------------------------------------------------------------------
def make_params(key):
    ks = jax.random.split(key, 16)

    def w(k, shape, scale):
        return scale * jax.random.normal(k, shape, jnp.float32)

    dim = 64
    params = {
        # downsampling convs (PyTorch (Cout,Cin,KH,KW) stored as (KH,KW,Cin,Cout))
        'ds_w1': w(ks[0], (3, 3, 3, dim), 0.2),
        'ds_b1': w(ks[1], (1, dim), 0.1),
        'ds_g1': 1.0 + w(ks[2], (1, dim), 0.1),
        'ds_be1': w(ks[3], (1, dim), 0.1),
        'ds_w2': w(ks[4], (4, 4, dim, dim), 0.05),
        'ds_b2': w(ks[5], (1, dim), 0.1),
        'ds_g2': 1.0 + w(ks[6], (1, dim), 0.1),
        'ds_be2': w(ks[7], (1, dim), 0.1),
        'ds_w3': w(ks[8], (4, 4, dim, dim), 0.05),
        'ds_b3': w(ks[9], (1, dim), 0.1),
        # ConvODEF(64): conv3x3(65,64, bias=False) + BN, twice
        'ode_w1': w(ks[10], (3, 3, dim + 1, dim), 0.05),
        'ode_g1': 1.0 + w(ks[11], (1, dim), 0.1),
        'ode_be1': w(ks[11], (1, dim), 0.05),
        'ode_w2': w(ks[12], (3, 3, dim + 1, dim), 0.05),
        'ode_g2': 1.0 + w(ks[13], (1, dim), 0.1),
        'ode_be2': w(ks[13], (1, dim), 0.05),
        # head: BN(64) + Linear(64, 10)
        'head_g': 1.0 + w(ks[14], (1, dim), 0.1),
        'head_be': w(ks[14], (1, dim), 0.05),
        'fc_w': w(ks[15], (dim, 10), 0.1),
        'fc_b': w(ks[15], (1, 10), 0.1),
    }
    return params


if __name__ == "__main__":
    key = jax.random.PRNGKey(0)
    kp, kx = jax.random.split(key)
    params = make_params(kp)

    # CIFAR-like input at small spatial size: (batch=2, C=3, H=W=16), NCHW.
    x = jax.random.normal(kx, (2, 3, 16, 16), jnp.float32)

    out = jax.jit(forward)(x, params)
    out = jax.block_until_ready(out)

    assert out.shape == (2, 10), out.shape
    assert bool(jnp.all(jnp.isfinite(out)))
    print("KERNEL_OK")
</pallas_src>

<mosaic_0001>
module attributes {stable_mosaic.version = 11 : i64} {
  func.func @_ds_conv_kernel(%arg0: i32, %arg1: memref<392x128xf32, #tpu.memory_space<vmem>>, %arg2: memref<128x64xf32, #tpu.memory_space<vmem>>, %arg3: memref<1x64xf32, #tpu.memory_space<vmem>>, %arg4: memref<1x64xf32, #tpu.memory_space<vmem>>, %arg5: memref<1x64xf32, #tpu.memory_space<vmem>>, %arg6: memref<392x64xf32, #tpu.memory_space<vmem>>) attributes {dimension_semantics = [#tpu.dimension_semantics<arbitrary>], iteration_bounds = array<i64: 1>, scalar_prefetch = 0 : i64, scratch_operands = 0 : i64, tpu.core_type = #tpu.core_type<tc>, window_params = [{pipeline_mode = #tpu.pipeline_mode<synchronous>, transform_indices = @transform_0, window_bounds = array<i64: 392, 128>}, {pipeline_mode = #tpu.pipeline_mode<synchronous>, transform_indices = @transform_1, window_bounds = array<i64: 128, 64>}, {pipeline_mode = #tpu.pipeline_mode<synchronous>, transform_indices = @transform_2, window_bounds = array<i64: 1, 64>}, {pipeline_mode = #tpu.pipeline_mode<synchronous>, transform_indices = @transform_3, window_bounds = array<i64: 1, 64>}, {pipeline_mode = #tpu.pipeline_mode<synchronous>, transform_indices = @transform_4, window_bounds = array<i64: 1, 64>}, {pipeline_mode = #tpu.pipeline_mode<synchronous>, transform_indices = @transform_5, window_bounds = array<i64: 392, 64>}]} {
    %c0 = arith.constant 0 : index
    %c0_0 = arith.constant 0 : index
    %0 = vector.load %arg1[%c0, %c0_0] : memref<392x128xf32, #tpu.memory_space<vmem>>, vector<392x128xf32>
    %c0_1 = arith.constant 0 : index
    %c0_2 = arith.constant 0 : index
    %1 = vector.load %arg2[%c0_1, %c0_2] : memref<128x64xf32, #tpu.memory_space<vmem>>, vector<128x64xf32>
    %cst = arith.constant dense<0.000000e+00> : vector<392x64xf32>
    %2 = tpu.matmul %0, %1, %cst {dimension_numbers = #tpu.dot_dimension_numbers<[1], [0], [0], [1], [0, 0, 1, 1], [], []>} : vector<392x128xf32>, vector<128x64xf32>, vector<392x64xf32> -> vector<392x64xf32>
    %c0_3 = arith.constant 0 : index
    %c0_4 = arith.constant 0 : index
    %3 = vector.load %arg3[%c0_3, %c0_4] : memref<1x64xf32, #tpu.memory_space<vmem>>, vector<1x64xf32>
    %4 = vector.broadcast %3 : vector<1x64xf32> to vector<392x64xf32>
    %5 = arith.addf %2, %4 : vector<392x64xf32>
    %cst_5 = arith.constant dense<0.000000e+00> : vector<64xf32>
    %6 = vector.multi_reduction <add>, %5, %cst_5 [0] : vector<392x64xf32> to vector<64xf32>
    %7 = vector.shape_cast %6 : vector<64xf32> to vector<1x64xf32>
    %cst_6 = arith.constant 3.920000e+02 : f32
    %8 = vector.broadcast %cst_6 : f32 to vector<1x64xf32>
    %9 = arith.divf %7, %8 : vector<1x64xf32>
    %10 = vector.broadcast %9 : vector<1x64xf32> to vector<392x64xf32>
    %11 = arith.subf %5, %10 : vector<392x64xf32>
    %12 = arith.mulf %11, %11 : vector<392x64xf32>
    %cst_7 = arith.constant dense<0.000000e+00> : vector<64xf32>
    %13 = vector.multi_reduction <add>, %12, %cst_7 [0] : vector<392x64xf32> to vector<64xf32>
    %14 = vector.shape_cast %13 : vector<64xf32> to vector<1x64xf32>
    %cst_8 = arith.constant 3.920000e+02 : f32
    %15 = vector.broadcast %cst_8 : f32 to vector<1x64xf32>
    %16 = arith.divf %14, %15 : vector<1x64xf32>
    %c0_9 = arith.constant 0 : index
    %c0_10 = arith.constant 0 : index
    %17 = vector.load %arg4[%c0_9, %c0_10] : memref<1x64xf32, #tpu.memory_space<vmem>>, vector<1x64xf32>
    %cst_11 = arith.constant 9.99999974E-6 : f32
    %18 = vector.broadcast %cst_11 : f32 to vector<1x64xf32>
    %19 = arith.addf %16, %18 : vector<1x64xf32>
    %20 = math.rsqrt %19 : vector<1x64xf32>
    %21 = arith.mulf %17, %20 : vector<1x64xf32>
    %22 = vector.broadcast %21 : vector<1x64xf32> to vector<392x64xf32>
    %23 = arith.mulf %5, %22 : vector<392x64xf32>
    %c0_12 = arith.constant 0 : index
    %c0_13 = arith.constant 0 : index
    %24 = vector.load %arg5[%c0_12, %c0_13] : memref<1x64xf32, #tpu.memory_space<vmem>>, vector<1x64xf32>
    %25 = arith.mulf %9, %21 : vector<1x64xf32>
    %26 = arith.subf %24, %25 : vector<1x64xf32>
    %27 = vector.broadcast %26 : vector<1x64xf32> to vector<392x64xf32>
    %28 = arith.addf %23, %27 : vector<392x64xf32>
    %cst_14 = arith.constant 0.000000e+00 : f32
    %29 = vector.broadcast %cst_14 : f32 to vector<392x64xf32>
    %30 = arith.maximumf %28, %29 : vector<392x64xf32>
    %c0_15 = arith.constant 0 : index
    %c0_16 = arith.constant 0 : index
    %31 = vector.load %arg6[%c0_15, %c0_16] : memref<392x64xf32, #tpu.memory_space<vmem>>, vector<392x64xf32>
    tpu.vector_store %arg6[%c0_15, %c0_16], %30 {strides = array<i32>} : memref<392x64xf32, #tpu.memory_space<vmem>>, vector<392x64xf32>,
    return
  }
  func.func @transform_0(%arg0: i32) -> (i32, i32) {
    %c0_i32 = arith.constant 0 : i32
    %c0_i32_0 = arith.constant 0 : i32
    %c0_i32_1 = arith.constant 0 : i32
    return %c0_i32, %c0_i32_0 : i32, i32
  }
  func.func @transform_1(%arg0: i32) -> (i32, i32) {
    %c0_i32 = arith.constant 0 : i32
    %c0_i32_0 = arith.constant 0 : i32
    %c0_i32_1 = arith.constant 0 : i32
    return %c0_i32, %c0_i32_0 : i32, i32
  }
  func.func @transform_2(%arg0: i32) -> (i32, i32) {
    %c0_i32 = arith.constant 0 : i32
    %c0_i32_0 = arith.constant 0 : i32
    %c0_i32_1 = arith.constant 0 : i32
    return %c0_i32, %c0_i32_0 : i32, i32
  }
  func.func @transform_3(%arg0: i32) -> (i32, i32) {
    %c0_i32 = arith.constant 0 : i32
    %c0_i32_0 = arith.constant 0 : i32
    %c0_i32_1 = arith.constant 0 : i32
    return %c0_i32, %c0_i32_0 : i32, i32
  }
  func.func @transform_4(%arg0: i32) -> (i32, i32) {
    %c0_i32 = arith.constant 0 : i32
    %c0_i32_0 = arith.constant 0 : i32
    %c0_i32_1 = arith.constant 0 : i32
    return %c0_i32, %c0_i32_0 : i32, i32
  }
  func.func @transform_5(%arg0: i32) -> (i32, i32) {
    %c0_i32 = arith.constant 0 : i32
    %c0_i32_0 = arith.constant 0 : i32
    %c0_i32_1 = arith.constant 0 : i32
    return %c0_i32, %c0_i32_0 : i32, i32
  }
}

module attributes {stable_mosaic.version = 11 : i64} {
  func.func @_ds_conv_kernel(%arg0: i32, %arg1: memref<98x1024xf32, #tpu.memory_space<vmem>>, %arg2: memref<1024x64xf32, #tpu.memory_space<vmem>>, %arg3: memref<1x64xf32, #tpu.memory_space<vmem>>, %arg4: memref<1x64xf32, #tpu.memory_space<vmem>>, %arg5: memref<1x64xf32, #tpu.memory_space<vmem>>, %arg6: memref<98x64xf32, #tpu.memory_space<vmem>>) attributes {dimension_semantics = [#tpu.dimension_semantics<arbitrary>], iteration_bounds = array<i64: 1>, scalar_prefetch = 0 : i64, scratch_operands = 0 : i64, tpu.core_type = #tpu.core_type<tc>, window_params = [{pipeline_mode = #tpu.pipeline_mode<synchronous>, transform_indices = @transform_0, window_bounds = array<i64: 98, 1024>}, {pipeline_mode = #tpu.pipeline_mode<synchronous>, transform_indices = @transform_1, window_bounds = array<i64: 1024, 64>}, {pipeline_mode = #tpu.pipeline_mode<synchronous>, transform_indices = @transform_2, window_bounds = array<i64: 1, 64>}, {pipeline_mode = #tpu.pipeline_mode<synchronous>, transform_indices = @transform_3, window_bounds = array<i64: 1, 64>}, {pipeline_mode = #tpu.pipeline_mode<synchronous>, transform_indices = @transform_4, window_bounds = array<i64: 1, 64>}, {pipeline_mode = #tpu.pipeline_mode<synchronous>, transform_indices = @transform_5, window_bounds = array<i64: 98, 64>}]} {
    %c0 = arith.constant 0 : index
    %c0_0 = arith.constant 0 : index
    %0 = vector.load %arg1[%c0, %c0_0] : memref<98x1024xf32, #tpu.memory_space<vmem>>, vector<98x1024xf32>
    %c0_1 = arith.constant 0 : index
    %c0_2 = arith.constant 0 : index
    %1 = vector.load %arg2[%c0_1, %c0_2] : memref<1024x64xf32, #tpu.memory_space<vmem>>, vector<1024x64xf32>
    %cst = arith.constant dense<0.000000e+00> : vector<98x64xf32>
    %2 = tpu.matmul %0, %1, %cst {dimension_numbers = #tpu.dot_dimension_numbers<[1], [0], [0], [1], [0, 0, 1, 1], [], []>} : vector<98x1024xf32>, vector<1024x64xf32>, vector<98x64xf32> -> vector<98x64xf32>
    %c0_3 = arith.constant 0 : index
    %c0_4 = arith.constant 0 : index
    %3 = vector.load %arg3[%c0_3, %c0_4] : memref<1x64xf32, #tpu.memory_space<vmem>>, vector<1x64xf32>
    %4 = vector.broadcast %3 : vector<1x64xf32> to vector<98x64xf32>
    %5 = arith.addf %2, %4 : vector<98x64xf32>
    %cst_5 = arith.constant dense<0.000000e+00> : vector<64xf32>
    %6 = vector.multi_reduction <add>, %5, %cst_5 [0] : vector<98x64xf32> to vector<64xf32>
    %7 = vector.shape_cast %6 : vector<64xf32> to vector<1x64xf32>
    %cst_6 = arith.constant 9.800000e+01 : f32
    %8 = vector.broadcast %cst_6 : f32 to vector<1x64xf32>
    %9 = arith.divf %7, %8 : vector<1x64xf32>
    %10 = vector.broadcast %9 : vector<1x64xf32> to vector<98x64xf32>
    %11 = arith.subf %5, %10 : vector<98x64xf32>
    %12 = arith.mulf %11, %11 : vector<98x64xf32>
    %cst_7 = arith.constant dense<0.000000e+00> : vector<64xf32>
    %13 = vector.multi_reduction <add>, %12, %cst_7 [0] : vector<98x64xf32> to vector<64xf32>
    %14 = vector.shape_cast %13 : vector<64xf32> to vector<1x64xf32>
    %cst_8 = arith.constant 9.800000e+01 : f32
    %15 = vector.broadcast %cst_8 : f32 to vector<1x64xf32>
    %16 = arith.divf %14, %15 : vector<1x64xf32>
    %c0_9 = arith.constant 0 : index
    %c0_10 = arith.constant 0 : index
    %17 = vector.load %arg4[%c0_9, %c0_10] : memref<1x64xf32, #tpu.memory_space<vmem>>, vector<1x64xf32>
    %cst_11 = arith.constant 9.99999974E-6 : f32
    %18 = vector.broadcast %cst_11 : f32 to vector<1x64xf32>
    %19 = arith.addf %16, %18 : vector<1x64xf32>
    %20 = math.rsqrt %19 : vector<1x64xf32>
    %21 = arith.mulf %17, %20 : vector<1x64xf32>
    %22 = vector.broadcast %21 : vector<1x64xf32> to vector<98x64xf32>
    %23 = arith.mulf %5, %22 : vector<98x64xf32>
    %c0_12 = arith.constant 0 : index
    %c0_13 = arith.constant 0 : index
    %24 = vector.load %arg5[%c0_12, %c0_13] : memref<1x64xf32, #tpu.memory_space<vmem>>, vector<1x64xf32>
    %25 = arith.mulf %9, %21 : vector<1x64xf32>
    %26 = arith.subf %24, %25 : vector<1x64xf32>
    %27 = vector.broadcast %26 : vector<1x64xf32> to vector<98x64xf32>
    %28 = arith.addf %23, %27 : vector<98x64xf32>
    %cst_14 = arith.constant 0.000000e+00 : f32
    %29 = vector.broadcast %cst_14 : f32 to vector<98x64xf32>
    %30 = arith.maximumf %28, %29 : vector<98x64xf32>
    %c0_15 = arith.constant 0 : index
    %c0_16 = arith.constant 0 : index
    %31 = vector.load %arg6[%c0_15, %c0_16] : memref<98x64xf32, #tpu.memory_space<vmem>>, vector<98x64xf32>
    tpu.vector_store %arg6[%c0_15, %c0_16], %30 {strides = array<i32>} : memref<98x64xf32, #tpu.memory_space<vmem>>, vector<98x64xf32>,
    return
  }
  func.func @transform_0(%arg0: i32) -> (i32, i32) {
    %c0_i32 = arith.constant 0 : i32
    %c0_i32_0 = arith.constant 0 : i32
    %c0_i32_1 = arith.constant 0 : i32
    return %c0_i32, %c0_i32_0 : i32, i32
  }
  func.func @transform_1(%arg0: i32) -> (i32, i32) {
    %c0_i32 = arith.constant 0 : i32
    %c0_i32_0 = arith.constant 0 : i32
    %c0_i32_1 = arith.constant 0 : i32
    return %c0_i32, %c0_i32_0 : i32, i32
  }
  func.func @transform_2(%arg0: i32) -> (i32, i32) {
    %c0_i32 = arith.constant 0 : i32
    %c0_i32_0 = arith.constant 0 : i32
    %c0_i32_1 = arith.constant 0 : i32
    return %c0_i32, %c0_i32_0 : i32, i32
  }
  func.func @transform_3(%arg0: i32) -> (i32, i32) {
    %c0_i32 = arith.constant 0 : i32
    %c0_i32_0 = arith.constant 0 : i32
    %c0_i32_1 = arith.constant 0 : i32
    return %c0_i32, %c0_i32_0 : i32, i32
  }
  func.func @transform_4(%arg0: i32) -> (i32, i32) {
    %c0_i32 = arith.constant 0 : i32
    %c0_i32_0 = arith.constant 0 : i32
    %c0_i32_1 = arith.constant 0 : i32
    return %c0_i32, %c0_i32_0 : i32, i32
  }
  func.func @transform_5(%arg0: i32) -> (i32, i32) {
    %c0_i32 = arith.constant 0 : i32
    %c0_i32_0 = arith.constant 0 : i32
    %c0_i32_1 = arith.constant 0 : i32
    return %c0_i32, %c0_i32_0 : i32, i32
  }
}

module attributes {stable_mosaic.version = 11 : i64} {
  func.func @_ds_conv_kernel(%arg0: i32, %arg1: memref<18x1024xf32, #tpu.memory_space<vmem>>, %arg2: memref<1024x64xf32, #tpu.memory_space<vmem>>, %arg3: memref<1x64xf32, #tpu.memory_space<vmem>>, %arg4: memref<1x64xf32, #tpu.memory_space<vmem>>, %arg5: memref<1x64xf32, #tpu.memory_space<vmem>>, %arg6: memref<18x64xf32, #tpu.memory_space<vmem>>) attributes {dimension_semantics = [#tpu.dimension_semantics<arbitrary>], iteration_bounds = array<i64: 1>, scalar_prefetch = 0 : i64, scratch_operands = 0 : i64, tpu.core_type = #tpu.core_type<tc>, window_params = [{pipeline_mode = #tpu.pipeline_mode<synchronous>, transform_indices = @transform_0, window_bounds = array<i64: 18, 1024>}, {pipeline_mode = #tpu.pipeline_mode<synchronous>, transform_indices = @transform_1, window_bounds = array<i64: 1024, 64>}, {pipeline_mode = #tpu.pipeline_mode<synchronous>, transform_indices = @transform_2, window_bounds = array<i64: 1, 64>}, {pipeline_mode = #tpu.pipeline_mode<synchronous>, transform_indices = @transform_3, window_bounds = array<i64: 1, 64>}, {pipeline_mode = #tpu.pipeline_mode<synchronous>, transform_indices = @transform_4, window_bounds = array<i64: 1, 64>}, {pipeline_mode = #tpu.pipeline_mode<synchronous>, transform_indices = @transform_5, window_bounds = array<i64: 18, 64>}]} {
    %c0 = arith.constant 0 : index
    %c0_0 = arith.constant 0 : index
    %0 = vector.load %arg1[%c0, %c0_0] : memref<18x1024xf32, #tpu.memory_space<vmem>>, vector<18x1024xf32>
    %c0_1 = arith.constant 0 : index
    %c0_2 = arith.constant 0 : index
    %1 = vector.load %arg2[%c0_1, %c0_2] : memref<1024x64xf32, #tpu.memory_space<vmem>>, vector<1024x64xf32>
    %cst = arith.constant dense<0.000000e+00> : vector<18x64xf32>
    %2 = tpu.matmul %0, %1, %cst {dimension_numbers = #tpu.dot_dimension_numbers<[1], [0], [0], [1], [0, 0, 1, 1], [], []>} : vector<18x1024xf32>, vector<1024x64xf32>, vector<18x64xf32> -> vector<18x64xf32>
    %c0_3 = arith.constant 0 : index
    %c0_4 = arith.constant 0 : index
    %3 = vector.load %arg3[%c0_3, %c0_4] : memref<1x64xf32, #tpu.memory_space<vmem>>, vector<1x64xf32>
    %4 = vector.broadcast %3 : vector<1x64xf32> to vector<18x64xf32>
    %5 = arith.addf %2, %4 : vector<18x64xf32>
    %c0_5 = arith.constant 0 : index
    %c0_6 = arith.constant 0 : index
    %6 = vector.load %arg6[%c0_5, %c0_6] : memref<18x64xf32, #tpu.memory_space<vmem>>, vector<18x64xf32>
    tpu.vector_store %arg6[%c0_5, %c0_6], %5 {strides = array<i32>} : memref<18x64xf32, #tpu.memory_space<vmem>>, vector<18x64xf32>,
    return
  }
  func.func @transform_0(%arg0: i32) -> (i32, i32) {
    %c0_i32 = arith.constant 0 : i32
    %c0_i32_0 = arith.constant 0 : i32
    %c0_i32_1 = arith.constant 0 : i32
    return %c0_i32, %c0_i32_0 : i32, i32
  }
  func.func @transform_1(%arg0: i32) -> (i32, i32) {
    %c0_i32 = arith.constant 0 : i32
    %c0_i32_0 = arith.constant 0 : i32
    %c0_i32_1 = arith.constant 0 : i32
    return %c0_i32, %c0_i32_0 : i32, i32
  }
  func.func @transform_2(%arg0: i32) -> (i32, i32) {
    %c0_i32 = arith.constant 0 : i32
    %c0_i32_0 = arith.constant 0 : i32
    %c0_i32_1 = arith.constant 0 : i32
    return %c0_i32, %c0_i32_0 : i32, i32
  }
  func.func @transform_3(%arg0: i32) -> (i32, i32) {
    %c0_i32 = arith.constant 0 : i32
    %c0_i32_0 = arith.constant 0 : i32
    %c0_i32_1 = arith.constant 0 : i32
    return %c0_i32, %c0_i32_0 : i32, i32
  }
  func.func @transform_4(%arg0: i32) -> (i32, i32) {
    %c0_i32 = arith.constant 0 : i32
    %c0_i32_0 = arith.constant 0 : i32
    %c0_i32_1 = arith.constant 0 : i32
    return %c0_i32, %c0_i32_0 : i32, i32
  }
  func.func @transform_5(%arg0: i32) -> (i32, i32) {
    %c0_i32 = arith.constant 0 : i32
    %c0_i32_0 = arith.constant 0 : i32
    %c0_i32_1 = arith.constant 0 : i32
    return %c0_i32, %c0_i32_0 : i32, i32
  }
}

module attributes {stable_mosaic.version = 11 : i64} {
  func.func @_ode_head_kernel(%arg0: i32, %arg1: memref<50x64xf32, #tpu.memory_space<vmem>>, %arg2: memref<9x64x64xf32, #tpu.memory_space<vmem>>, %arg3: memref<9x64x64xf32, #tpu.memory_space<vmem>>, %arg4: memref<50x64xf32, #tpu.memory_space<vmem>>, %arg5: memref<50x64xf32, #tpu.memory_space<vmem>>, %arg6: memref<1x64xf32, #tpu.memory_space<vmem>>, %arg7: memref<1x64xf32, #tpu.memory_space<vmem>>, %arg8: memref<1x64xf32, #tpu.memory_space<vmem>>, %arg9: memref<1x64xf32, #tpu.memory_space<vmem>>, %arg10: memref<50x1xf32, #tpu.memory_space<vmem>>, %arg11: memref<2x50xf32, #tpu.memory_space<vmem>>, %arg12: memref<1x64xf32, #tpu.memory_space<vmem>>, %arg13: memref<1x64xf32, #tpu.memory_space<vmem>>, %arg14: memref<64x10xf32, #tpu.memory_space<vmem>>, %arg15: memref<1x10xf32, #tpu.memory_space<vmem>>, %arg16: memref<2x10xf32, #tpu.memory_space<vmem>>, %arg17: memref<66x64xf32, #tpu.memory_space<vmem>>, %arg18: memref<66x64xf32, #tpu.memory_space<vmem>>) attributes {dimension_semantics = [#tpu.dimension_semantics<arbitrary>], iteration_bounds = array<i64: 1>, scalar_prefetch = 0 : i64, scratch_operands = 2 : i64, tpu.core_type = #tpu.core_type<tc>, window_params = [{pipeline_mode = #tpu.pipeline_mode<synchronous>, transform_indices = @transform_0, window_bounds = array<i64: 50, 64>}, {pipeline_mode = #tpu.pipeline_mode<synchronous>, transform_indices = @transform_1, window_bounds = array<i64: 9, 64, 64>}, {pipeline_mode = #tpu.pipeline_mode<synchronous>, transform_indices = @transform_2, window_bounds = array<i64: 9, 64, 64>}, {pipeline_mode = #tpu.pipeline_mode<synchronous>, transform_indices = @transform_3, window_bounds = array<i64: 50, 64>}, {pipeline_mode = #tpu.pipeline_mode<synchronous>, transform_indices = @transform_4, window_bounds = array<i64: 50, 64>}, {pipeline_mode = #tpu.pipeline_mode<synchronous>, transform_indices = @transform_5, window_bounds = array<i64: 1, 64>}, {pipeline_mode = #tpu.pipeline_mode<synchronous>, transform_indices = @transform_6, window_bounds = array<i64: 1, 64>}, {pipeline_mode = #tpu.pipeline_mode<synchronous>, transform_indices = @transform_7, window_bounds = array<i64: 1, 64>}, {pipeline_mode = #tpu.pipeline_mode<synchronous>, transform_indices = @transform_8, window_bounds = array<i64: 1, 64>}, {pipeline_mode = #tpu.pipeline_mode<synchronous>, transform_indices = @transform_9, window_bounds = array<i64: 50, 1>}, {pipeline_mode = #tpu.pipeline_mode<synchronous>, transform_indices = @transform_10, window_bounds = array<i64: 2, 50>}, {pipeline_mode = #tpu.pipeline_mode<synchronous>, transform_indices = @transform_11, window_bounds = array<i64: 1, 64>}, {pipeline_mode = #tpu.pipeline_mode<synchronous>, transform_indices = @transform_12, window_bounds = array<i64: 1, 64>}, {pipeline_mode = #tpu.pipeline_mode<synchronous>, transform_indices = @transform_13, window_bounds = array<i64: 64, 10>}, {pipeline_mode = #tpu.pipeline_mode<synchronous>, transform_indices = @transform_14, window_bounds = array<i64: 1, 10>}, {pipeline_mode = #tpu.pipeline_mode<synchronous>, transform_indices = @transform_15, window_bounds = array<i64: 2, 10>}]} {
    %cst = arith.constant 0.000000e+00 : f32
    %0 = vector.broadcast %cst : f32 to vector<66x64xf32>
    %c0 = arith.constant 0 : index
    %c0_0 = arith.constant 0 : index
    %1 = vector.load %arg17[%c0, %c0_0] : memref<66x64xf32, #tpu.memory_space<vmem>>, vector<66x64xf32>
    tpu.vector_store %arg17[%c0, %c0_0], %0 {strides = array<i32>} : memref<66x64xf32, #tpu.memory_space<vmem>>, vector<66x64xf32>,
    %cst_1 = arith.constant 0.000000e+00 : f32
    %2 = vector.broadcast %cst_1 : f32 to vector<66x64xf32>
    %c0_2 = arith.constant 0 : index
    %c0_3 = arith.constant 0 : index
    %3 = vector.load %arg18[%c0_2, %c0_3] : memref<66x64xf32, #tpu.memory_space<vmem>>, vector<66x64xf32>
    tpu.vector_store %arg18[%c0_2, %c0_3], %2 {strides = array<i32>} : memref<66x64xf32, #tpu.memory_space<vmem>>, vector<66x64xf32>,
    %c0_4 = arith.constant 0 : index
    %c0_5 = arith.constant 0 : index
    %4 = vector.load %arg1[%c0_4, %c0_5] : memref<50x64xf32, #tpu.memory_space<vmem>>, vector<50x64xf32>
    %c8 = arith.constant 8 : index
    %c0_6 = arith.constant 0 : index
    %5 = vector.load %arg17[%c8, %c0_6] : memref<66x64xf32, #tpu.memory_space<vmem>>, vector<50x64xf32>
    tpu.vector_store %arg17[%c8, %c0_6], %4 {strides = array<i32>} : memref<66x64xf32, #tpu.memory_space<vmem>>, vector<50x64xf32>,
    %c0_7 = arith.constant 0 : index
    %c0_8 = arith.constant 0 : index
    %6 = vector.load %arg10[%c0_7, %c0_8] : memref<50x1xf32, #tpu.memory_space<vmem>>, vector<50x1xf32>
    %c0_9 = arith.constant 0 : index
    %c0_10 = arith.constant 0 : index
    %7 = vector.load %arg4[%c0_9, %c0_10] : memref<50x64xf32, #tpu.memory_space<vmem>>, vector<50x64xf32>
    %c0_11 = arith.constant 0 : index
    %c0_12 = arith.constant 0 : index
    %8 = vector.load %arg5[%c0_11, %c0_12] : memref<50x64xf32, #tpu.memory_space<vmem>>, vector<50x64xf32>
    %c0_13 = arith.constant 0 : index
    %c0_14 = arith.constant 0 : index
    %9 = vector.load %arg6[%c0_13, %c0_14] : memref<1x64xf32, #tpu.memory_space<vmem>>, vector<1x64xf32>
    %c0_15 = arith.constant 0 : index
    %c0_16 = arith.constant 0 : index
    %10 = vector.load %arg7[%c0_15, %c0_16] : memref<1x64xf32, #tpu.memory_space<vmem>>, vector<1x64xf32>
    %c0_17 = arith.constant 0 : index
    %c0_18 = arith.constant 0 : index
    %11 = vector.load %arg8[%c0_17, %c0_18] : memref<1x64xf32, #tpu.memory_space<vmem>>, vector<1x64xf32>
    %c0_19 = arith.constant 0 : index
    %c0_20 = arith.constant 0 : index
    %12 = vector.load %arg9[%c0_19, %c0_20] : memref<1x64xf32, #tpu.memory_space<vmem>>, vector<1x64xf32>
    %cst_21 = arith.constant 0.000000e+00 : f32
    %13 = vector.broadcast %cst_21 : f32 to vector<1x1xf32>
    %c0_i32 = arith.constant 0 : i32
    %c20_i32 = arith.constant 20 : i32
    %14 = arith.addi %c0_i32, %c20_i32 : i32
    %c1_i32 = arith.constant 1 : i32
    %15 = scf.for %arg19 = %c0_i32 to %14 step %c1_i32 iter_args(%arg20 = %13) -> (vector<1x1xf32>)  : i32 {
      %52 = vector.broadcast %arg20 : vector<1x1xf32> to vector<50x64xf32>
      %53 = arith.mulf %52, %7 : vector<50x64xf32>
      %c2 = arith.constant 2 : index
      %c0_43 = arith.constant 0 : index
      %54 = vector.load %arg17[%c2, %c0_43] : memref<66x64xf32, #tpu.memory_space<vmem>>, vector<50x64xf32>
      %c0_44 = arith.constant 0 : index
      %c0_45 = arith.constant 0 : index
      %c0_46 = arith.constant 0 : index
      %55 = vector.load %arg2[%c0_44, %c0_45, %c0_46] : memref<9x64x64xf32, #tpu.memory_space<vmem>>, vector<1x64x64xf32>
      %56 = vector.shape_cast %55 : vector<1x64x64xf32> to vector<64x64xf32>
      %cst_47 = arith.constant dense<0.000000e+00> : vector<50x64xf32>
      %57 = tpu.matmul %54, %56, %cst_47 {dimension_numbers = #tpu.dot_dimension_numbers<[1], [0], [0], [1], [0, 0, 1, 1], [], []>} : vector<50x64xf32>, vector<64x64xf32>, vector<50x64xf32> -> vector<50x64xf32>
      %58 = arith.addf %53, %57 : vector<50x64xf32>
      %c3 = arith.constant 3 : index
      %c0_48 = arith.constant 0 : index
      %59 = vector.load %arg17[%c3, %c0_48] : memref<66x64xf32, #tpu.memory_space<vmem>>, vector<50x64xf32>
      %c1 = arith.constant 1 : index
      %c0_49 = arith.constant 0 : index
      %c0_50 = arith.constant 0 : index
      %60 = vector.load %arg2[%c1, %c0_49, %c0_50] : memref<9x64x64xf32, #tpu.memory_space<vmem>>, vector<1x64x64xf32>
      %61 = vector.shape_cast %60 : vector<1x64x64xf32> to vector<64x64xf32>
      %cst_51 = arith.constant dense<0.000000e+00> : vector<50x64xf32>
      %62 = tpu.matmul %59, %61, %cst_51 {dimension_numbers = #tpu.dot_dimension_numbers<[1], [0], [0], [1], [0, 0, 1, 1], [], []>} : vector<50x64xf32>, vector<64x64xf32>, vector<50x64xf32> -> vector<50x64xf32>
      %63 = arith.addf %58, %62 : vector<50x64xf32>
      %c4 = arith.constant 4 : index
      %c0_52 = arith.constant 0 : index
      %64 = vector.load %arg17[%c4, %c0_52] : memref<66x64xf32, #tpu.memory_space<vmem>>, vector<50x64xf32>
      %c2_53 = arith.constant 2 : index
      %c0_54 = arith.constant 0 : index
      %c0_55 = arith.constant 0 : index
      %65 = vector.load %arg2[%c2_53, %c0_54, %c0_55] : memref<9x64x64xf32, #tpu.memory_space<vmem>>, vector<1x64x64xf32>
      %66 = vector.shape_cast %65 : vector<1x64x64xf32> to vector<64x64xf32>
      %cst_56 = arith.constant dense<0.000000e+00> : vector<50x64xf32>
      %67 = tpu.matmul %64, %66, %cst_56 {dimension_numbers = #tpu.dot_dimension_numbers<[1], [0], [0], [1], [0, 0, 1, 1], [], []>} : vector<50x64xf32>, vector<64x64xf32>, vector<50x64xf32> -> vector<50x64xf32>
      %68 = arith.addf %63, %67 : vector<50x64xf32>
      %c7 = arith.constant 7 : index
      %c0_57 = arith.constant 0 : index
      %69 = vector.load %arg17[%c7, %c0_57] : memref<66x64xf32, #tpu.memory_space<vmem>>, vector<50x64xf32>
      %c3_58 = arith.constant 3 : index
      %c0_59 = arith.constant 0 : index
      %c0_60 = arith.constant 0 : index
      %70 = vector.load %arg2[%c3_58, %c0_59, %c0_60] : memref<9x64x64xf32, #tpu.memory_space<vmem>>, vector<1x64x64xf32>
      %71 = vector.shape_cast %70 : vector<1x64x64xf32> to vector<64x64xf32>
      %cst_61 = arith.constant dense<0.000000e+00> : vector<50x64xf32>
      %72 = tpu.matmul %69, %71, %cst_61 {dimension_numbers = #tpu.dot_dimension_numbers<[1], [0], [0], [1], [0, 0, 1, 1], [], []>} : vector<50x64xf32>, vector<64x64xf32>, vector<50x64xf32> -> vector<50x64xf32>
      %73 = arith.addf %68, %72 : vector<50x64xf32>
      %c8_62 = arith.constant 8 : index
      %c0_63 = arith.constant 0 : index
      %74 = vector.load %arg17[%c8_62, %c0_63] : memref<66x64xf32, #tpu.memory_space<vmem>>, vector<50x64xf32>
      %c4_64 = arith.constant 4 : index
      %c0_65 = arith.constant 0 : index
      %c0_66 = arith.constant 0 : index
      %75 = vector.load %arg2[%c4_64, %c0_65, %c0_66] : memref<9x64x64xf32, #tpu.memory_space<vmem>>, vector<1x64x64xf32>
      %76 = vector.shape_cast %75 : vector<1x64x64xf32> to vector<64x64xf32>
      %cst_67 = arith.constant dense<0.000000e+00> : vector<50x64xf32>
      %77 = tpu.matmul %74, %76, %cst_67 {dimension_numbers = #tpu.dot_dimension_numbers<[1], [0], [0], [1], [0, 0, 1, 1], [], []>} : vector<50x64xf32>, vector<64x64xf32>, vector<50x64xf32> -> vector<50x64xf32>
      %78 = arith.addf %73, %77 : vector<50x64xf32>
      %c9 = arith.constant 9 : index
      %c0_68 = arith.constant 0 : index
      %79 = vector.load %arg17[%c9, %c0_68] : memref<66x64xf32, #tpu.memory_space<vmem>>, vector<50x64xf32>
      %c5 = arith.constant 5 : index
      %c0_69 = arith.constant 0 : index
      %c0_70 = arith.constant 0 : index
      %80 = vector.load %arg2[%c5, %c0_69, %c0_70] : memref<9x64x64xf32, #tpu.memory_space<vmem>>, vector<1x64x64xf32>
      %81 = vector.shape_cast %80 : vector<1x64x64xf32> to vector<64x64xf32>
      %cst_71 = arith.constant dense<0.000000e+00> : vector<50x64xf32>
      %82 = tpu.matmul %79, %81, %cst_71 {dimension_numbers = #tpu.dot_dimension_numbers<[1], [0], [0], [1], [0, 0, 1, 1], [], []>} : vector<50x64xf32>, vector<64x64xf32>, vector<50x64xf32> -> vector<50x64xf32>
      %83 = arith.addf %78, %82 : vector<50x64xf32>
      %c12 = arith.constant 12 : index
      %c0_72 = arith.constant 0 : index
      %84 = vector.load %arg17[%c12, %c0_72] : memref<66x64xf32, #tpu.memory_space<vmem>>, vector<50x64xf32>
      %c6 = arith.constant 6 : index
      %c0_73 = arith.constant 0 : index
      %c0_74 = arith.constant 0 : index
      %85 = vector.load %arg2[%c6, %c0_73, %c0_74] : memref<9x64x64xf32, #tpu.memory_space<vmem>>, vector<1x64x64xf32>
      %86 = vector.shape_cast %85 : vector<1x64x64xf32> to vector<64x64xf32>
      %cst_75 = arith.constant dense<0.000000e+00> : vector<50x64xf32>
      %87 = tpu.matmul %84, %86, %cst_75 {dimension_numbers = #tpu.dot_dimension_numbers<[1], [0], [0], [1], [0, 0, 1, 1], [], []>} : vector<50x64xf32>, vector<64x64xf32>, vector<50x64xf32> -> vector<50x64xf32>
      %88 = arith.addf %83, %87 : vector<50x64xf32>
      %c13 = arith.constant 13 : index
      %c0_76 = arith.constant 0 : index
      %89 = vector.load %arg17[%c13, %c0_76] : memref<66x64xf32, #tpu.memory_space<vmem>>, vector<50x64xf32>
      %c7_77 = arith.constant 7 : index
      %c0_78 = arith.constant 0 : index
      %c0_79 = arith.constant 0 : index
      %90 = vector.load %arg2[%c7_77, %c0_78, %c0_79] : memref<9x64x64xf32, #tpu.memory_space<vmem>>, vector<1x64x64xf32>
      %91 = vector.shape_cast %90 : vector<1x64x64xf32> to vector<64x64xf32>
      %cst_80 = arith.constant dense<0.000000e+00> : vector<50x64xf32>
      %92 = tpu.matmul %89, %91, %cst_80 {dimension_numbers = #tpu.dot_dimension_numbers<[1], [0], [0], [1], [0, 0, 1, 1], [], []>} : vector<50x64xf32>, vector<64x64xf32>, vector<50x64xf32> -> vector<50x64xf32>
      %93 = arith.addf %88, %92 : vector<50x64xf32>
      %c14 = arith.constant 14 : index
      %c0_81 = arith.constant 0 : index
      %94 = vector.load %arg17[%c14, %c0_81] : memref<66x64xf32, #tpu.memory_space<vmem>>, vector<50x64xf32>
      %c8_82 = arith.constant 8 : index
      %c0_83 = arith.constant 0 : index
      %c0_84 = arith.constant 0 : index
      %95 = vector.load %arg2[%c8_82, %c0_83, %c0_84] : memref<9x64x64xf32, #tpu.memory_space<vmem>>, vector<1x64x64xf32>
      %96 = vector.shape_cast %95 : vector<1x64x64xf32> to vector<64x64xf32>
      %cst_85 = arith.constant dense<0.000000e+00> : vector<50x64xf32>
      %97 = tpu.matmul %94, %96, %cst_85 {dimension_numbers = #tpu.dot_dimension_numbers<[1], [0], [0], [1], [0, 0, 1, 1], [], []>} : vector<50x64xf32>, vector<64x64xf32>, vector<50x64xf32> -> vector<50x64xf32>
      %98 = arith.addf %93, %97 : vector<50x64xf32>
      %cst_86 = arith.constant 0.000000e+00 : f32
      %99 = vector.broadcast %cst_86 : f32 to vector<50x64xf32>
      %100 = arith.maximumf %98, %99 : vector<50x64xf32>
      %101 = vector.broadcast %6 : vector<50x1xf32> to vector<50x64xf32>
      %102 = arith.mulf %100, %101 : vector<50x64xf32>
      %cst_87 = arith.constant dense<0.000000e+00> : vector<64xf32>
      %103 = vector.multi_reduction <add>, %102, %cst_87 [0] : vector<50x64xf32> to vector<64xf32>
      %104 = vector.shape_cast %103 : vector<64xf32> to vector<1x64xf32>
      %cst_88 = arith.constant 0.055555556 : f32
      %105 = vector.broadcast %cst_88 : f32 to vector<1x64xf32>
      %106 = arith.mulf %104, %105 : vector<1x64xf32>
      %107 = vector.broadcast %106 : vector<1x64xf32> to vector<50x64xf32>
      %108 = arith.subf %100, %107 : vector<50x64xf32>
      %109 = arith.mulf %108, %108 : vector<50x64xf32>
      %110 = vector.broadcast %6 : vector<50x1xf32> to vector<50x64xf32>
      %111 = arith.mulf %109, %110 : vector<50x64xf32>
      %cst_89 = arith.constant dense<0.000000e+00> : vector<64xf32>
      %112 = vector.multi_reduction <add>, %111, %cst_89 [0] : vector<50x64xf32> to vector<64xf32>
      %113 = vector.shape_cast %112 : vector<64xf32> to vector<1x64xf32>
      %cst_90 = arith.constant 0.055555556 : f32
      %114 = vector.broadcast %cst_90 : f32 to vector<1x64xf32>
      %115 = arith.mulf %113, %114 : vector<1x64xf32>
      %cst_91 = arith.constant 9.99999974E-6 : f32
      %116 = vector.broadcast %cst_91 : f32 to vector<1x64xf32>
      %117 = arith.addf %115, %116 : vector<1x64xf32>
      %118 = math.rsqrt %117 : vector<1x64xf32>
      %119 = arith.mulf %9, %118 : vector<1x64xf32>
      %120 = vector.broadcast %119 : vector<1x64xf32> to vector<50x64xf32>
      %121 = arith.mulf %100, %120 : vector<50x64xf32>
      %122 = arith.mulf %106, %119 : vector<1x64xf32>
      %123 = arith.subf %10, %122 : vector<1x64xf32>
      %124 = vector.broadcast %123 : vector<1x64xf32> to vector<50x64xf32>
      %125 = arith.addf %121, %124 : vector<50x64xf32>
      %126 = vector.broadcast %6 : vector<50x1xf32> to vector<50x64xf32>
      %127 = arith.mulf %125, %126 : vector<50x64xf32>
      %c8_92 = arith.constant 8 : index
      %c0_93 = arith.constant 0 : index
      %128 = vector.load %arg18[%c8_92, %c0_93] : memref<66x64xf32, #tpu.memory_space<vmem>>, vector<50x64xf32>
      tpu.vector_store %arg18[%c8_92, %c0_93], %127 {strides = array<i32>} : memref<66x64xf32, #tpu.memory_space<vmem>>, vector<50x64xf32>,
      %129 = vector.broadcast %arg20 : vector<1x1xf32> to vector<50x64xf32>
      %130 = arith.mulf %129, %8 : vector<50x64xf32>
      %c2_94 = arith.constant 2 : index
      %c0_95 = arith.constant 0 : index
      %131 = vector.load %arg18[%c2_94, %c0_95] : memref<66x64xf32, #tpu.memory_space<vmem>>, vector<50x64xf32>
      %c0_96 = arith.constant 0 : index
      %c0_97 = arith.constant 0 : index
      %c0_98 = arith.constant 0 : index
      %132 = vector.load %arg3[%c0_96, %c0_97, %c0_98] : memref<9x64x64xf32, #tpu.memory_space<vmem>>, vector<1x64x64xf32>
      %133 = vector.shape_cast %132 : vector<1x64x64xf32> to vector<64x64xf32>
      %cst_99 = arith.constant dense<0.000000e+00> : vector<50x64xf32>
      %134 = tpu.matmul %131, %133, %cst_99 {dimension_numbers = #tpu.dot_dimension_numbers<[1], [0], [0], [1], [0, 0, 1, 1], [], []>} : vector<50x64xf32>, vector<64x64xf32>, vector<50x64xf32> -> vector<50x64xf32>
      %135 = arith.addf %130, %134 : vector<50x64xf32>
      %c3_100 = arith.constant 3 : index
      %c0_101 = arith.constant 0 : index
      %136 = vector.load %arg18[%c3_100, %c0_101] : memref<66x64xf32, #tpu.memory_space<vmem>>, vector<50x64xf32>
      %c1_102 = arith.constant 1 : index
      %c0_103 = arith.constant 0 : index
      %c0_104 = arith.constant 0 : index
      %137 = vector.load %arg3[%c1_102, %c0_103, %c0_104] : memref<9x64x64xf32, #tpu.memory_space<vmem>>, vector<1x64x64xf32>
      %138 = vector.shape_cast %137 : vector<1x64x64xf32> to vector<64x64xf32>
      %cst_105 = arith.constant dense<0.000000e+00> : vector<50x64xf32>
      %139 = tpu.matmul %136, %138, %cst_105 {dimension_numbers = #tpu.dot_dimension_numbers<[1], [0], [0], [1], [0, 0, 1, 1], [], []>} : vector<50x64xf32>, vector<64x64xf32>, vector<50x64xf32> -> vector<50x64xf32>
      %140 = arith.addf %135, %139 : vector<50x64xf32>
      %c4_106 = arith.constant 4 : index
      %c0_107 = arith.constant 0 : index
      %141 = vector.load %arg18[%c4_106, %c0_107] : memref<66x64xf32, #tpu.memory_space<vmem>>, vector<50x64xf32>
      %c2_108 = arith.constant 2 : index
      %c0_109 = arith.constant 0 : index
      %c0_110 = arith.constant 0 : index
      %142 = vector.load %arg3[%c2_108, %c0_109, %c0_110] : memref<9x64x64xf32, #tpu.memory_space<vmem>>, vector<1x64x64xf32>
      %143 = vector.shape_cast %142 : vector<1x64x64xf32> to vector<64x64xf32>
      %cst_111 = arith.constant dense<0.000000e+00> : vector<50x64xf32>
      %144 = tpu.matmul %141, %143, %cst_111 {dimension_numbers = #tpu.dot_dimension_numbers<[1], [0], [0], [1], [0, 0, 1, 1], [], []>} : vector<50x64xf32>, vector<64x64xf32>, vector<50x64xf32> -> vector<50x64xf32>
      %145 = arith.addf %140, %144 : vector<50x64xf32>
      %c7_112 = arith.constant 7 : index
      %c0_113 = arith.constant 0 : index
      %146 = vector.load %arg18[%c7_112, %c0_113] : memref<66x64xf32, #tpu.memory_space<vmem>>, vector<50x64xf32>
      %c3_114 = arith.constant 3 : index
      %c0_115 = arith.constant 0 : index
      %c0_116 = arith.constant 0 : index
      %147 = vector.load %arg3[%c3_114, %c0_115, %c0_116] : memref<9x64x64xf32, #tpu.memory_space<vmem>>, vector<1x64x64xf32>
      %148 = vector.shape_cast %147 : vector<1x64x64xf32> to vector<64x64xf32>
      %cst_117 = arith.constant dense<0.000000e+00> : vector<50x64xf32>
      %149 = tpu.matmul %146, %148, %cst_117 {dimension_numbers = #tpu.dot_dimension_numbers<[1], [0], [0], [1], [0, 0, 1, 1], [], []>} : vector<50x64xf32>, vector<64x64xf32>, vector<50x64xf32> -> vector<50x64xf32>
      %150 = arith.addf %145, %149 : vector<50x64xf32>
      %c8_118 = arith.constant 8 : index
      %c0_119 = arith.constant 0 : index
      %151 = vector.load %arg18[%c8_118, %c0_119] : memref<66x64xf32, #tpu.memory_space<vmem>>, vector<50x64xf32>
      %c4_120 = arith.constant 4 : index
      %c0_121 = arith.constant 0 : index
      %c0_122 = arith.constant 0 : index
      %152 = vector.load %arg3[%c4_120, %c0_121, %c0_122] : memref<9x64x64xf32, #tpu.memory_space<vmem>>, vector<1x64x64xf32>
      %153 = vector.shape_cast %152 : vector<1x64x64xf32> to vector<64x64xf32>
      %cst_123 = arith.constant dense<0.000000e+00> : vector<50x64xf32>
      %154 = tpu.matmul %151, %153, %cst_123 {dimension_numbers = #tpu.dot_dimension_numbers<[1], [0], [0], [1], [0, 0, 1, 1], [], []>} : vector<50x64xf32>, vector<64x64xf32>, vector<50x64xf32> -> vector<50x64xf32>
      %155 = arith.addf %150, %154 : vector<50x64xf32>
      %c9_124 = arith.constant 9 : index
      %c0_125 = arith.constant 0 : index
      %156 = vector.load %arg18[%c9_124, %c0_125] : memref<66x64xf32, #tpu.memory_space<vmem>>, vector<50x64xf32>
      %c5_126 = arith.constant 5 : index
      %c0_127 = arith.constant 0 : index
      %c0_128 = arith.constant 0 : index
      %157 = vector.load %arg3[%c5_126, %c0_127, %c0_128] : memref<9x64x64xf32, #tpu.memory_space<vmem>>, vector<1x64x64xf32>
      %158 = vector.shape_cast %157 : vector<1x64x64xf32> to vector<64x64xf32>
      %cst_129 = arith.constant dense<0.000000e+00> : vector<50x64xf32>
      %159 = tpu.matmul %156, %158, %cst_129 {dimension_numbers = #tpu.dot_dimension_numbers<[1], [0], [0], [1], [0, 0, 1, 1], [], []>} : vector<50x64xf32>, vector<64x64xf32>, vector<50x64xf32> -> vector<50x64xf32>
      %160 = arith.addf %155, %159 : vector<50x64xf32>
      %c12_130 = arith.constant 12 : index
      %c0_131 = arith.constant 0 : index
      %161 = vector.load %arg18[%c12_130, %c0_131] : memref<66x64xf32, #tpu.memory_space<vmem>>, vector<50x64xf32>
      %c6_132 = arith.constant 6 : index
      %c0_133 = arith.constant 0 : index
      %c0_134 = arith.constant 0 : index
      %162 = vector.load %arg3[%c6_132, %c0_133, %c0_134] : memref<9x64x64xf32, #tpu.memory_space<vmem>>, vector<1x64x64xf32>
      %163 = vector.shape_cast %162 : vector<1x64x64xf32> to vector<64x64xf32>
      %cst_135 = arith.constant dense<0.000000e+00> : vector<50x64xf32>
      %164 = tpu.matmul %161, %163, %cst_135 {dimension_numbers = #tpu.dot_dimension_numbers<[1], [0], [0], [1], [0, 0, 1, 1], [], []>} : vector<50x64xf32>, vector<64x64xf32>, vector<50x64xf32> -> vector<50x64xf32>
      %165 = arith.addf %160, %164 : vector<50x64xf32>
      %c13_136 = arith.constant 13 : index
      %c0_137 = arith.constant 0 : index
      %166 = vector.load %arg18[%c13_136, %c0_137] : memref<66x64xf32, #tpu.memory_space<vmem>>, vector<50x64xf32>
      %c7_138 = arith.constant 7 : index
      %c0_139 = arith.constant 0 : index
      %c0_140 = arith.constant 0 : index
      %167 = vector.load %arg3[%c7_138, %c0_139, %c0_140] : memref<9x64x64xf32, #tpu.memory_space<vmem>>, vector<1x64x64xf32>
      %168 = vector.shape_cast %167 : vector<1x64x64xf32> to vector<64x64xf32>
      %cst_141 = arith.constant dense<0.000000e+00> : vector<50x64xf32>
      %169 = tpu.matmul %166, %168, %cst_141 {dimension_numbers = #tpu.dot_dimension_numbers<[1], [0], [0], [1], [0, 0, 1, 1], [], []>} : vector<50x64xf32>, vector<64x64xf32>, vector<50x64xf32> -> vector<50x64xf32>
      %170 = arith.addf %165, %169 : vector<50x64xf32>
      %c14_142 = arith.constant 14 : index
      %c0_143 = arith.constant 0 : index
      %171 = vector.load %arg18[%c14_142, %c0_143] : memref<66x64xf32, #tpu.memory_space<vmem>>, vector<50x64xf32>
      %c8_144 = arith.constant 8 : index
      %c0_145 = arith.constant 0 : index
      %c0_146 = arith.constant 0 : index
      %172 = vector.load %arg3[%c8_144, %c0_145, %c0_146] : memref<9x64x64xf32, #tpu.memory_space<vmem>>, vector<1x64x64xf32>
      %173 = vector.shape_cast %172 : vector<1x64x64xf32> to vector<64x64xf32>
      %cst_147 = arith.constant dense<0.000000e+00> : vector<50x64xf32>
      %174 = tpu.matmul %171, %173, %cst_147 {dimension_numbers = #tpu.dot_dimension_numbers<[1], [0], [0], [1], [0, 0, 1, 1], [], []>} : vector<50x64xf32>, vector<64x64xf32>, vector<50x64xf32> -> vector<50x64xf32>
      %175 = arith.addf %170, %174 : vector<50x64xf32>
      %cst_148 = arith.constant 0.000000e+00 : f32
      %176 = vector.broadcast %cst_148 : f32 to vector<50x64xf32>
      %177 = arith.maximumf %175, %176 : vector<50x64xf32>
      %178 = vector.broadcast %6 : vector<50x1xf32> to vector<50x64xf32>
      %179 = arith.mulf %177, %178 : vector<50x64xf32>
      %cst_149 = arith.constant dense<0.000000e+00> : vector<64xf32>
      %180 = vector.multi_reduction <add>, %179, %cst_149 [0] : vector<50x64xf32> to vector<64xf32>
      %181 = vector.shape_cast %180 : vector<64xf32> to vector<1x64xf32>
      %cst_150 = arith.constant 0.055555556 : f32
      %182 = vector.broadcast %cst_150 : f32 to vector<1x64xf32>
      %183 = arith.mulf %181, %182 : vector<1x64xf32>
      %184 = vector.broadcast %183 : vector<1x64xf32> to vector<50x64xf32>
      %185 = arith.subf %177, %184 : vector<50x64xf32>
      %186 = arith.mulf %185, %185 : vector<50x64xf32>
      %187 = vector.broadcast %6 : vector<50x1xf32> to vector<50x64xf32>
      %188 = arith.mulf %186, %187 : vector<50x64xf32>
      %cst_151 = arith.constant dense<0.000000e+00> : vector<64xf32>
      %189 = vector.multi_reduction <add>, %188, %cst_151 [0] : vector<50x64xf32> to vector<64xf32>
      %190 = vector.shape_cast %189 : vector<64xf32> to vector<1x64xf32>
      %cst_152 = arith.constant 0.055555556 : f32
      %191 = vector.broadcast %cst_152 : f32 to vector<1x64xf32>
      %192 = arith.mulf %190, %191 : vector<1x64xf32>
      %cst_153 = arith.constant 9.99999974E-6 : f32
      %193 = vector.broadcast %cst_153 : f32 to vector<1x64xf32>
      %194 = arith.addf %192, %193 : vector<1x64xf32>
      %195 = math.rsqrt %194 : vector<1x64xf32>
      %196 = arith.mulf %11, %195 : vector<1x64xf32>
      %197 = vector.broadcast %196 : vector<1x64xf32> to vector<50x64xf32>
      %198 = arith.mulf %177, %197 : vector<50x64xf32>
      %199 = arith.mulf %183, %196 : vector<1x64xf32>
      %200 = arith.subf %12, %199 : vector<1x64xf32>
      %201 = vector.broadcast %200 : vector<1x64xf32> to vector<50x64xf32>
      %202 = arith.addf %198, %201 : vector<50x64xf32>
      %c8_154 = arith.constant 8 : index
      %c0_155 = arith.constant 0 : index
      %203 = vector.load %arg17[%c8_154, %c0_155] : memref<66x64xf32, #tpu.memory_space<vmem>>, vector<50x64xf32>
      %204 = vector.broadcast %6 : vector<50x1xf32> to vector<50x64xf32>
      %205 = arith.mulf %202, %204 : vector<50x64xf32>
      %cst_156 = arith.constant 5.000000e-02 : f32
      %206 = vector.broadcast %cst_156 : f32 to vector<50x64xf32>
      %207 = arith.mulf %206, %205 : vector<50x64xf32>
      %208 = arith.addf %203, %207 : vector<50x64xf32>
      %c8_157 = arith.constant 8 : index
      %c0_158 = arith.constant 0 : index
      %209 = vector.load %arg17[%c8_157, %c0_158] : memref<66x64xf32, #tpu.memory_space<vmem>>, vector<50x64xf32>
      tpu.vector_store %arg17[%c8_157, %c0_158], %208 {strides = array<i32>} : memref<66x64xf32, #tpu.memory_space<vmem>>, vector<50x64xf32>,
      %cst_159 = arith.constant 5.000000e-02 : f32
      %210 = vector.broadcast %cst_159 : f32 to vector<1x1xf32>
      %211 = arith.addf %arg20, %210 : vector<1x1xf32>
      scf.yield %211 : vector<1x1xf32>
    }
    %c8_22 = arith.constant 8 : index
    %c0_23 = arith.constant 0 : index
    %16 = vector.load %arg17[%c8_22, %c0_23] : memref<66x64xf32, #tpu.memory_space<vmem>>, vector<50x64xf32>
    %c0_24 = arith.constant 0 : index
    %c0_25 = arith.constant 0 : index
    %17 = vector.load %arg12[%c0_24, %c0_25] : memref<1x64xf32, #tpu.memory_space<vmem>>, vector<1x64xf32>
    %c0_26 = arith.constant 0 : index
    %c0_27 = arith.constant 0 : index
    %18 = vector.load %arg13[%c0_26, %c0_27] : memref<1x64xf32, #tpu.memory_space<vmem>>, vector<1x64xf32>
    %19 = vector.broadcast %6 : vector<50x1xf32> to vector<50x64xf32>
    %20 = arith.mulf %16, %19 : vector<50x64xf32>
    %cst_28 = arith.constant dense<0.000000e+00> : vector<64xf32>
    %21 = vector.multi_reduction <add>, %20, %cst_28 [0] : vector<50x64xf32> to vector<64xf32>
    %22 = vector.shape_cast %21 : vector<64xf32> to vector<1x64xf32>
    %cst_29 = arith.constant 0.055555556 : f32
    %23 = vector.broadcast %cst_29 : f32 to vector<1x64xf32>
    %24 = arith.mulf %22, %23 : vector<1x64xf32>
    %25 = vector.broadcast %24 : vector<1x64xf32> to vector<50x64xf32>
    %26 = arith.subf %16, %25 : vector<50x64xf32>
    %27 = arith.mulf %26, %26 : vector<50x64xf32>
    %28 = vector.broadcast %6 : vector<50x1xf32> to vector<50x64xf32>
    %29 = arith.mulf %27, %28 : vector<50x64xf32>
    %cst_30 = arith.constant dense<0.000000e+00> : vector<64xf32>
    %30 = vector.multi_reduction <add>, %29, %cst_30 [0] : vector<50x64xf32> to vector<64xf32>
    %31 = vector.shape_cast %30 : vector<64xf32> to vector<1x64xf32>
    %cst_31 = arith.constant 0.055555556 : f32
    %32 = vector.broadcast %cst_31 : f32 to vector<1x64xf32>
    %33 = arith.mulf %31, %32 : vector<1x64xf32>
    %cst_32 = arith.constant 9.99999974E-6 : f32
    %34 = vector.broadcast %cst_32 : f32 to vector<1x64xf32>
    %35 = arith.addf %33, %34 : vector<1x64xf32>
    %36 = math.rsqrt %35 : vector<1x64xf32>
    %37 = arith.mulf %17, %36 : vector<1x64xf32>
    %38 = vector.broadcast %37 : vector<1x64xf32> to vector<50x64xf32>
    %39 = arith.mulf %16, %38 : vector<50x64xf32>
    %40 = arith.mulf %24, %37 : vector<1x64xf32>
    %41 = arith.subf %18, %40 : vector<1x64xf32>
    %42 = vector.broadcast %41 : vector<1x64xf32> to vector<50x64xf32>
    %43 = arith.addf %39, %42 : vector<50x64xf32>
    %c0_33 = arith.constant 0 : index
    %c0_34 = arith.constant 0 : index
    %44 = vector.load %arg11[%c0_33, %c0_34] : memref<2x50xf32, #tpu.memory_space<vmem>>, vector<2x50xf32>
    %cst_35 = arith.constant dense<0.000000e+00> : vector<2x64xf32>
    %45 = tpu.matmul %44, %43, %cst_35 {dimension_numbers = #tpu.dot_dimension_numbers<[1], [0], [0], [1], [0, 0, 1, 1], [], []>} : vector<2x50xf32>, vector<50x64xf32>, vector<2x64xf32> -> vector<2x64xf32>
    %c0_36 = arith.constant 0 : index
    %c0_37 = arith.constant 0 : index
    %46 = vector.load %arg14[%c0_36, %c0_37] : memref<64x10xf32, #tpu.memory_space<vmem>>, vector<64x10xf32>
    %cst_38 = arith.constant dense<0.000000e+00> : vector<2x10xf32>
    %47 = tpu.matmul %45, %46, %cst_38 {dimension_numbers = #tpu.dot_dimension_numbers<[1], [0], [0], [1], [0, 0, 1, 1], [], []>} : vector<2x64xf32>, vector<64x10xf32>, vector<2x10xf32> -> vector<2x10xf32>
    %c0_39 = arith.constant 0 : index
    %c0_40 = arith.constant 0 : index
    %48 = vector.load %arg15[%c0_39, %c0_40] : memref<1x10xf32, #tpu.memory_space<vmem>>, vector<1x10xf32>
    %49 = vector.broadcast %48 : vector<1x10xf32> to vector<2x10xf32>
    %50 = arith.addf %47, %49 : vector<2x10xf32>
    %c0_41 = arith.constant 0 : index
    %c0_42 = arith.constant 0 : index
    %51 = vector.load %arg16[%c0_41, %c0_42] : memref<2x10xf32, #tpu.memory_space<vmem>>, vector<2x10xf32>
    tpu.vector_store %arg16[%c0_41, %c0_42], %50 {strides = array<i32>} : memref<2x10xf32, #tpu.memory_space<vmem>>, vector<2x10xf32>,
    return
  }
  func.func @transform_0(%arg0: i32) -> (i32, i32) {
    %c0_i32 = arith.constant 0 : i32
    %c0_i32_0 = arith.constant 0 : i32
    %c0_i32_1 = arith.constant 0 : i32
    return %c0_i32, %c0_i32_0 : i32, i32
  }
  func.func @transform_1(%arg0: i32) -> (i32, i32, i32) {
    %c0_i32 = arith.constant 0 : i32
    %c0_i32_0 = arith.constant 0 : i32
    %c0_i32_1 = arith.constant 0 : i32
    %c0_i32_2 = arith.constant 0 : i32
    return %c0_i32, %c0_i32_0, %c0_i32_1 : i32, i32, i32
  }
  func.func @transform_2(%arg0: i32) -> (i32, i32, i32) {
    %c0_i32 = arith.constant 0 : i32
    %c0_i32_0 = arith.constant 0 : i32
    %c0_i32_1 = arith.constant 0 : i32
    %c0_i32_2 = arith.constant 0 : i32
    return %c0_i32, %c0_i32_0, %c0_i32_1 : i32, i32, i32
  }
  func.func @transform_3(%arg0: i32) -> (i32, i32) {
    %c0_i32 = arith.constant 0 : i32
    %c0_i32_0 = arith.constant 0 : i32
    %c0_i32_1 = arith.constant 0 : i32
    return %c0_i32, %c0_i32_0 : i32, i32
  }
  func.func @transform_4(%arg0: i32) -> (i32, i32) {
    %c0_i32 = arith.constant 0 : i32
    %c0_i32_0 = arith.constant 0 : i32
    %c0_i32_1 = arith.constant 0 : i32
    return %c0_i32, %c0_i32_0 : i32, i32
  }
  func.func @transform_5(%arg0: i32) -> (i32, i32) {
    %c0_i32 = arith.constant 0 : i32
    %c0_i32_0 = arith.constant 0 : i32
    %c0_i32_1 = arith.constant 0 : i32
    return %c0_i32, %c0_i32_0 : i32, i32
  }
  func.func @transform_6(%arg0: i32) -> (i32, i32) {
    %c0_i32 = arith.constant 0 : i32
    %c0_i32_0 = arith.constant 0 : i32
    %c0_i32_1 = arith.constant 0 : i32
    return %c0_i32, %c0_i32_0 : i32, i32
  }
  func.func @transform_7(%arg0: i32) -> (i32, i32) {
    %c0_i32 = arith.constant 0 : i32
    %c0_i32_0 = arith.constant 0 : i32
    %c0_i32_1 = arith.constant 0 : i32
    return %c0_i32, %c0_i32_0 : i32, i32
  }
  func.func @transform_8(%arg0: i32) -> (i32, i32) {
    %c0_i32 = arith.constant 0 : i32
    %c0_i32_0 = arith.constant 0 : i32
    %c0_i32_1 = arith.constant 0 : i32
    return %c0_i32, %c0_i32_0 : i32, i32
  }
  func.func @transform_9(%arg0: i32) -> (i32, i32) {
    %c0_i32 = arith.constant 0 : i32
    %c0_i32_0 = arith.constant 0 : i32
    %c0_i32_1 = arith.constant 0 : i32
    return %c0_i32, %c0_i32_0 : i32, i32
  }
  func.func @transform_10(%arg0: i32) -> (i32, i32) {
    %c0_i32 = arith.constant 0 : i32
    %c0_i32_0 = arith.constant 0 : i32
    %c0_i32_1 = arith.constant 0 : i32
    return %c0_i32, %c0_i32_0 : i32, i32
  }
  func.func @transform_11(%arg0: i32) -> (i32, i32) {
    %c0_i32 = arith.constant 0 : i32
    %c0_i32_0 = arith.constant 0 : i32
    %c0_i32_1 = arith.constant 0 : i32
    return %c0_i32, %c0_i32_0 : i32, i32
  }
  func.func @transform_12(%arg0: i32) -> (i32, i32) {
    %c0_i32 = arith.constant 0 : i32
    %c0_i32_0 = arith.constant 0 : i32
    %c0_i32_1 = arith.constant 0 : i32
    return %c0_i32, %c0_i32_0 : i32, i32
  }
  func.func @transform_13(%arg0: i32) -> (i32, i32) {
    %c0_i32 = arith.constant 0 : i32
    %c0_i32_0 = arith.constant 0 : i32
    %c0_i32_1 = arith.constant 0 : i32
    return %c0_i32, %c0_i32_0 : i32, i32
  }
  func.func @transform_14(%arg0: i32) -> (i32, i32) {
    %c0_i32 = arith.constant 0 : i32
    %c0_i32_0 = arith.constant 0 : i32
    %c0_i32_1 = arith.constant 0 : i32
    return %c0_i32, %c0_i32_0 : i32, i32
  }
  func.func @transform_15(%arg0: i32) -> (i32, i32) {
    %c0_i32 = arith.constant 0 : i32
    %c0_i32_0 = arith.constant 0 : i32
    %c0_i32_1 = arith.constant 0 : i32
    return %c0_i32, %c0_i32_0 : i32, i32
  }
}

</mosaic_0001>

<bundles_post_ra>
// kernel: forward.4
= control target key start
LH: loop header
LB: loop body
LE: loop exit
PB: predicated region body
PF: predicated region fallthrough
CT: control target
= control target key end

     0   :  { %v1210_v0 = vmov 0.0   ;;  %vm1211_vm0 = vmmov 0   ;;  %vm402_vm1 = vcmask 523264   ;;  %s2428_s1 = inlined_call_operand.vmem [shape: f32[128,64], index: 1, kind: input, shape index: {}]   ;;  %s2429_s0 = inlined_call_operand.vmem [shape: f32[392,128], index: 0, kind: input, shape index: {}]   ;;  %s2430_s2 = inlined_call_operand.vmem [shape: f32[1,64], index: 2, kind: input, shape index: {}]   ;;  %s2431_s3 = inlined_call_operand.vmem [shape: f32[1,64], index: 3, kind: input, shape index: {}]   ;;  %s2432_s4 = inlined_call_operand.vmem [shape: f32[1,64], index: 4, kind: input, shape index: {}]   ;;  %s2433_s5 = inlined_call_operand.vmem [shape: f32[392,64], index: 5, kind: output, shape index: {}]  }
   0x1   :  { %995 = vmatprep.subr.mxu0 %v1210_v0  ;;  %v84_v1 = vld [vmem:[%s2428_s1 + $0x78] sm:$0xff]  ;;  %v83_v2 = vld [vmem:[%s2428_s1 + $0x70] sm:$0xff]  ;;  %1027 = vmatprep.mubr.msk.f32.mxu0 %vm1211_vm0, %v1210_v0  ;;  %v82_v3 = vld [vmem:[%s2428_s1 + $0x68] sm:$0xff] }
   0x2   :  { %996 = vmatpush3.msra.mxu0 %v84_v1  ;;  %1174 = vmatprep.subr.mxu1 %v1210_v0  ;;  %v81_v4 = vld [vmem:[%s2428_s1 + $0x60] sm:$0xff]  ;;  %v80_v5 = vld [vmem:[%s2428_s1 + $0x58] sm:$0xff]  ;;  %v79_v6 = vld [vmem:[%s2428_s1 + $0x50] sm:$0xff] }
   0x3   :  { %997 = vmatprep.subr.mxu0 %v1210_v0  ;;  %1190 = vmatpush3.msra.mxu1 %v84_v1  ;;  %v78_v7 = vld [vmem:[%s2428_s1 + $0x48] sm:$0xff]  ;;  %v77_v8 = vld [vmem:[%s2428_s1 + $0x40] sm:$0xff]  ;;  %v76_v9 = vld [vmem:[%s2428_s1 + $0x38] sm:$0xff] }
   0x4   :  { %998 = vmatpush3.msra.mxu0 %v83_v2  ;;  %1175 = vmatprep.subr.mxu1 %v1210_v0  ;;  %v75_v10 = vld [vmem:[%s2428_s1 + $0x30] sm:$0xff]  ;;  %v74_v11 = vld [vmem:[%s2428_s1 + $0x28] sm:$0xff]  ;;  %v73_v12 = vld [vmem:[%s2428_s1 + $0x20] sm:$0xff] }
   0x5   :  { %999 = vmatprep.subr.mxu0 %v1210_v0  ;;  %1191 = vmatpush3.msra.mxu1 %v83_v2  ;;  %v72_v13 = vld [vmem:[%s2428_s1 + $0x18] sm:$0xff]  ;;  %v71_v14 = vld [vmem:[%s2428_s1 + $0x10] sm:$0xff]  ;;  %v70_v15 = vld [vmem:[%s2428_s1 + $0x8] sm:$0xff] }
   0x6   :  { %1000 = vmatpush3.msra.mxu0 %v82_v3  ;;  %1176 = vmatprep.subr.mxu1 %v1210_v0  ;;  %v69_v16 = vld [vmem:[%s2428_s1] sm:$0xff]  ;;  %v45_v18 = vld [vmem:[%s2429_s0 + $0xc8] sm:$0xff]  ;;  %v46_v20 = vld [vmem:[%s2429_s0 + $0xd0] sm:$0xff] }
   0x7   :  { %1001 = vmatprep.subr.mxu0 %v1210_v0  ;;  %1192 = vmatpush3.msra.mxu1 %v82_v3  ;;  %v20_v17 = vld [vmem:[%s2429_s0] sm:$0xff]  ;;  %v21_v19 = vld [vmem:[%s2429_s0 + $0x8] sm:$0xff]  ;;  %v22_v21 = vld [vmem:[%s2429_s0 + $0x10] sm:$0xff] }
   0x8   :  { %1002 = vmatpush3.msra.mxu0 %v81_v4  ;;  %1177 = vmatprep.subr.mxu1 %v1210_v0  ;;  %v47_v22 = vld [vmem:[%s2429_s0 + $0xd8] sm:$0xff]  ;;  %v48_v24 = vld [vmem:[%s2429_s0 + $0xe0] sm:$0xff]  ;;  %v49_v26 = vld [vmem:[%s2429_s0 + $0xe8] sm:$0xff] }
   0x9   :  { %1003 = vmatprep.subr.mxu0 %v1210_v0  ;;  %1193 = vmatpush3.msra.mxu1 %v81_v4  ;;  %v23_v23 = vld [vmem:[%s2429_s0 + $0x18] sm:$0xff]  ;;  %v24_v25 = vld [vmem:[%s2429_s0 + $0x20] sm:$0xff]  ;;  %v25_v27 = vld [vmem:[%s2429_s0 + $0x28] sm:$0xff] }
   0xa   :  { %1004 = vmatpush3.msra.mxu0 %v80_v5  ;;  %1178 = vmatprep.subr.mxu1 %v1210_v0  ;;  %v50_v28 = vld [vmem:[%s2429_s0 + $0xf0] sm:$0xff]  ;;  %v51_v30 = vld [vmem:[%s2429_s0 + $0xf8] sm:$0xff]  ;;  %v52_v32 = vld [vmem:[%s2429_s0 + $0x100] sm:$0xff] }
   0xb   :  { %1005 = vmatprep.subr.mxu0 %v1210_v0  ;;  %1194 = vmatpush3.msra.mxu1 %v80_v5  ;;  %v26_v29 = vld [vmem:[%s2429_s0 + $0x30] sm:$0xff]  ;;  %v27_v31 = vld [vmem:[%s2429_s0 + $0x38] sm:$0xff]  ;;  %v28_v33 = vld [vmem:[%s2429_s0 + $0x40] sm:$0xff] }
   0xc   :  { %1006 = vmatpush3.msra.mxu0 %v79_v6  ;;  %1179 = vmatprep.subr.mxu1 %v1210_v0  ;;  %v53_v34 = vld [vmem:[%s2429_s0 + $0x108] sm:$0xff]  ;;  %v54_v36 = vld [vmem:[%s2429_s0 + $0x110] sm:$0xff]  ;;  %v55_v38 = vld [vmem:[%s2429_s0 + $0x118] sm:$0xff] }
   0xd   :  { %1007 = vmatprep.subr.mxu0 %v1210_v0  ;;  %1195 = vmatpush3.msra.mxu1 %v79_v6  ;;  %v29_v35 = vld [vmem:[%s2429_s0 + $0x48] sm:$0xff]  ;;  %v30_v37 = vld [vmem:[%s2429_s0 + $0x50] sm:$0xff]  ;;  %v31_v39 = vld [vmem:[%s2429_s0 + $0x58] sm:$0xff] }
   0xe   :  { %1008 = vmatpush3.msra.mxu0 %v78_v7  ;;  %1180 = vmatprep.subr.mxu1 %v1210_v0  ;;  %v56_v40 = vld [vmem:[%s2429_s0 + $0x120] sm:$0xff]  ;;  %v57_v42 = vld [vmem:[%s2429_s0 + $0x128] sm:$0xff]  ;;  %v58_v44 = vld [vmem:[%s2429_s0 + $0x130] sm:$0xff] }
   0xf   :  { %1009 = vmatprep.subr.mxu0 %v1210_v0  ;;  %1196 = vmatpush3.msra.mxu1 %v78_v7  ;;  %v32_v41 = vld [vmem:[%s2429_s0 + $0x60] sm:$0xff]  ;;  %v33_v43 = vld [vmem:[%s2429_s0 + $0x68] sm:$0xff]  ;;  %v34_v45 = vld [vmem:[%s2429_s0 + $0x70] sm:$0xff] }
  0x10   :  { %1010 = vmatpush3.msra.mxu0 %v77_v8  ;;  %1181 = vmatprep.subr.mxu1 %v1210_v0  ;;  %v59_v46 = vld [vmem:[%s2429_s0 + $0x138] sm:$0xff]  ;;  %v60_v48 = vld [vmem:[%s2429_s0 + $0x140] sm:$0xff]  ;;  %v61_v50 = vld [vmem:[%s2429_s0 + $0x148] sm:$0xff] }
  0x11   :  { %1011 = vmatprep.subr.mxu0 %v1210_v0  ;;  %1197 = vmatpush3.msra.mxu1 %v77_v8  ;;  %v35_v47 = vld [vmem:[%s2429_s0 + $0x78] sm:$0xff]  ;;  %v36_v49 = vld [vmem:[%s2429_s0 + $0x80] sm:$0xff]  ;;  %v37_v51 = vld [vmem:[%s2429_s0 + $0x88] sm:$0xff] }
  0x12   :  { %1012 = vmatpush3.msra.mxu0 %v76_v9  ;;  %1182 = vmatprep.subr.mxu1 %v1210_v0  ;;  %v62_v52 = vld [vmem:[%s2429_s0 + $0x150] sm:$0xff]  ;;  %v63_v54 = vld [vmem:[%s2429_s0 + $0x158] sm:$0xff]  ;;  %v64_v56 = vld [vmem:[%s2429_s0 + $0x160] sm:$0xff] }
  0x13   :  { %1013 = vmatprep.subr.mxu0 %v1210_v0  ;;  %1198 = vmatpush3.msra.mxu1 %v76_v9  ;;  %v38_v53 = vld [vmem:[%s2429_s0 + $0x90] sm:$0xff]  ;;  %v39_v55 = vld [vmem:[%s2429_s0 + $0x98] sm:$0xff]  ;;  %v40_v57 = vld [vmem:[%s2429_s0 + $0xa0] sm:$0xff] }
  0x14   :  { %1014 = vmatpush3.msra.mxu0 %v75_v10  ;;  %1183 = vmatprep.subr.mxu1 %v1210_v0  ;;  %v65_v58 = vld [vmem:[%s2429_s0 + $0x168] sm:$0xff]  ;;  %v66_v60 = vld [vmem:[%s2429_s0 + $0x170] sm:$0xff]  ;;  %v67_v62 = vld [vmem:[%s2429_s0 + $0x178] sm:$0xff] }
  0x15   :  { %1015 = vmatprep.subr.mxu0 %v1210_v0  ;;  %1199 = vmatpush3.msra.mxu1 %v75_v10  ;;  %v41_v59 = vld [vmem:[%s2429_s0 + $0xa8] sm:$0xff]  ;;  %v42_v61 = vld [vmem:[%s2429_s0 + $0xb0] sm:$0xff]  ;;  %v43_v63 = vld [vmem:[%s2429_s0 + $0xb8] sm:$0xff] }
  0x16   :  { %1016 = vmatpush3.msra.mxu0 %v74_v11  ;;  %1184 = vmatprep.subr.mxu1 %v1210_v0  ;;  %v68_v1 = vld [vmem:[%s2429_s0 + $0x180] sm:$0xff] }
  0x17   :  { %1017 = vmatprep.subr.mxu0 %v1210_v0  ;;  %1200 = vmatpush3.msra.mxu1 %v74_v11  ;;  %v44_v2 = vld [vmem:[%s2429_s0 + $0xc0] sm:$0xff] }
  0x18   :  { %1018 = vmatpush3.msra.mxu0 %v73_v12  ;;  %1185 = vmatprep.subr.mxu1 %v1210_v0 }
  0x19   :  { %1019 = vmatprep.subr.mxu0 %v1210_v0  ;;  %1201 = vmatpush3.msra.mxu1 %v73_v12 }
  0x1a   :  { %1020 = vmatpush3.msra.mxu0 %v72_v13  ;;  %1186 = vmatprep.subr.mxu1 %v1210_v0 }
  0x1b   :  { %1021 = vmatprep.subr.mxu0 %v1210_v0  ;;  %1202 = vmatpush3.msra.mxu1 %v72_v13 }
  0x1c   :  { %1022 = vmatpush3.msra.mxu0 %v71_v14  ;;  %1187 = vmatprep.subr.mxu1 %v1210_v0 }
  0x1d   :  { %1023 = vmatprep.subr.mxu0 %v1210_v0  ;;  %1203 = vmatpush3.msra.mxu1 %v71_v14 }
  0x1e   :  { %1024 = vmatpush3.msra.mxu0 %v70_v15  ;;  %1188 = vmatprep.subr.mxu1 %v1210_v0 }
  0x1f   :  { %1025 = vmatprep.subr.mxu0 %v1210_v0  ;;  %1204 = vmatpush3.msra.mxu1 %v70_v15 }
  0x20   :  { %1026 = vmatpush3.msra.mxu0 %v69_v16  ;;  %1189 = vmatprep.subr.mxu1 %v1210_v0 }
  0x21   :  { %1028 = vmatmul.mubr.f32.vlgmr.msra.gmra.mxu0 %v20_v17  ;;  %1205 = vmatpush3.msra.mxu1 %v69_v16 }
  0x22   :  { %1030 = vmatprep.mubr.msk.f32.mxu0 %vm1211_vm0, %v1210_v0  ;;  %1102 = vmatprep.mubr.msk.f32.mxu1 %vm1211_vm0, %v1210_v0 }
  0x23   :  { %1103 = vmatmul.mubr.f32.vlgmr.msra.gmra.mxu1 %v45_v18 }
  0x24   :  { %1105 = vmatprep.mubr.msk.f32.mxu1 %vm1211_vm0, %v1210_v0 }
  0x25   :  { %1031 = vmatmul.mubr.f32.gmra.mxu0 %v21_v19 }
  0x26   :  { %1033 = vmatprep.mubr.msk.f32.mxu0 %vm1211_vm0, %v1210_v0 }
  0x27   :  { %1106 = vmatmul.mubr.f32.gmra.mxu1 %v46_v20 }
  0x28   :  { %1108 = vmatprep.mubr.msk.f32.mxu1 %vm1211_vm0, %v1210_v0 }
  0x29   :  { %1034 = vmatmul.mubr.f32.gmra.mxu0 %v22_v21 }
  0x2a   :  { %1036 = vmatprep.mubr.msk.f32.mxu0 %vm1211_vm0, %v1210_v0 }
  0x2b   :  { %1109 = vmatmul.mubr.f32.gmra.mxu1 %v47_v22 }
  0x2c   :  { %1111 = vmatprep.mubr.msk.f32.mxu1 %vm1211_vm0, %v1210_v0 }
  0x2d   :  { %1037 = vmatmul.mubr.f32.gmra.mxu0 %v23_v23 }
  0x2e   :  { %1039 = vmatprep.mubr.msk.f32.mxu0 %vm1211_vm0, %v1210_v0 }
  0x2f   :  { %1112 = vmatmul.mubr.f32.gmra.mxu1 %v48_v24 }
  0x30   :  { %1114 = vmatprep.mubr.msk.f32.mxu1 %vm1211_vm0, %v1210_v0 }
  0x31   :  { %1040 = vmatmul.mubr.f32.gmra.mxu0 %v24_v25 }
  0x32   :  { %1042 = vmatprep.mubr.msk.f32.mxu0 %vm1211_vm0, %v1210_v0 }
  0x33   :  { %1115 = vmatmul.mubr.f32.gmra.mxu1 %v49_v26 }
  0x34   :  { %1117 = vmatprep.mubr.msk.f32.mxu1 %vm1211_vm0, %v1210_v0 }
  0x35   :  { %1043 = vmatmul.mubr.f32.gmra.mxu0 %v25_v27 }
  0x36   :  { %1045 = vmatprep.mubr.msk.f32.mxu0 %vm1211_vm0, %v1210_v0 }
  0x37   :  { %1118 = vmatmul.mubr.f32.gmra.mxu1 %v50_v28 }
  0x38   :  { %1120 = vmatprep.mubr.msk.f32.mxu1 %vm1211_vm0, %v1210_v0 }
  0x39   :  { %1046 = vmatmul.mubr.f32.gmra.mxu0 %v26_v29 }
  0x3a   :  { %1048 = vmatprep.mubr.msk.f32.mxu0 %vm1211_vm0, %v1210_v0 }
  0x3b   :  { %1121 = vmatmul.mubr.f32.gmra.mxu1 %v51_v30 }
  0x3c   :  { %1123 = vmatprep.mubr.msk.f32.mxu1 %vm1211_vm0, %v1210_v0 }
  0x3d   :  { %1049 = vmatmul.mubr.f32.gmra.mxu0 %v27_v31 }
  0x3e   :  { %1051 = vmatprep.mubr.msk.f32.mxu0 %vm1211_vm0, %v1210_v0 }
  0x3f   :  { %1124 = vmatmul.mubr.f32.gmra.mxu1 %v52_v32 }
  0x40   :  { %1126 = vmatprep.mubr.msk.f32.mxu1 %vm1211_vm0, %v1210_v0 }
  0x41   :  { %1052 = vmatmul.mubr.f32.gmra.mxu0 %v28_v33 }
  0x42   :  { %1054 = vmatprep.mubr.msk.f32.mxu0 %vm1211_vm0, %v1210_v0 }
  0x43   :  { %1127 = vmatmul.mubr.f32.gmra.mxu1 %v53_v34 }
  0x44   :  { %1129 = vmatprep.mubr.msk.f32.mxu1 %vm1211_vm0, %v1210_v0 }
  0x45   :  { %1055 = vmatmul.mubr.f32.gmra.mxu0 %v29_v35 }
  0x46   :  { %1057 = vmatprep.mubr.msk.f32.mxu0 %vm1211_vm0, %v1210_v0 }
  0x47   :  { %1130 = vmatmul.mubr.f32.gmra.mxu1 %v54_v36 }
  0x48   :  { %1132 = vmatprep.mubr.msk.f32.mxu1 %vm1211_vm0, %v1210_v0 }
  0x49   :  { %1058 = vmatmul.mubr.f32.gmra.mxu0 %v30_v37 }
  0x4a   :  { %1060 = vmatprep.mubr.msk.f32.mxu0 %vm1211_vm0, %v1210_v0 }
  0x4b   :  { %1133 = vmatmul.mubr.f32.gmra.mxu1 %v55_v38 }
  0x4c   :  { %1135 = vmatprep.mubr.msk.f32.mxu1 %vm1211_vm0, %v1210_v0 }
  0x4d   :  { %1061 = vmatmul.mubr.f32.gmra.mxu0 %v31_v39 }
  0x4e   :  { %1063 = vmatprep.mubr.msk.f32.mxu0 %vm1211_vm0, %v1210_v0 }
  0x4f   :  { %1136 = vmatmul.mubr.f32.gmra.mxu1 %v56_v40 }
  0x50   :  { %1138 = vmatprep.mubr.msk.f32.mxu1 %vm1211_vm0, %v1210_v0 }
  0x51   :  { %1064 = vmatmul.mubr.f32.gmra.mxu0 %v32_v41 }
  0x52   :  { %1066 = vmatprep.mubr.msk.f32.mxu0 %vm1211_vm0, %v1210_v0 }
  0x53   :  { %1139 = vmatmul.mubr.f32.gmra.mxu1 %v57_v42 }
  0x54   :  { %1141 = vmatprep.mubr.msk.f32.mxu1 %vm1211_vm0, %v1210_v0 }
  0x55   :  { %1067 = vmatmul.mubr.f32.gmra.mxu0 %v33_v43 }
  0x56   :  { %1069 = vmatprep.mubr.msk.f32.mxu0 %vm1211_vm0, %v1210_v0 }
  0x57   :  { %1142 = vmatmul.mubr.f32.gmra.mxu1 %v58_v44 }
  0x58   :  { %1144 = vmatprep.mubr.msk.f32.mxu1 %vm1211_vm0, %v1210_v0 }
  0x59   :  { %1070 = vmatmul.mubr.f32.gmra.mxu0 %v34_v45 }
  0x5a   :  { %1072 = vmatprep.mubr.msk.f32.mxu0 %vm1211_vm0, %v1210_v0 }
  0x5b   :  { %1145 = vmatmul.mubr.f32.gmra.mxu1 %v59_v46 }
  0x5c   :  { %1147 = vmatprep.mubr.msk.f32.mxu1 %vm1211_vm0, %v1210_v0 }
  0x5d   :  { %1073 = vmatmul.mubr.f32.gmra.mxu0 %v35_v47  ;;  %v1592_v47 = vld [vmem:[%s2430_s2] ss:$0 sm:$0xff] }
  0x5e   :  { %1075 = vmatprep.mubr.msk.f32.mxu0 %vm1211_vm0, %v1210_v0 }
  0x5f   :  { %1148 = vmatmul.mubr.f32.gmra.mxu1 %v60_v48 }
  0x60   :  { %1150 = vmatprep.mubr.msk.f32.mxu1 %vm1211_vm0, %v1210_v0 }
  0x61   :  { %1076 = vmatmul.mubr.f32.gmra.mxu0 %v36_v49 }
  0x62   :  { %1078 = vmatprep.mubr.msk.f32.mxu0 %vm1211_vm0, %v1210_v0 }
  0x63   :  { %1151 = vmatmul.mubr.f32.gmra.mxu1 %v61_v50 }
  0x64   :  { %1153 = vmatprep.mubr.msk.f32.mxu1 %vm1211_vm0, %v1210_v0 }
  0x65   :  { %1079 = vmatmul.mubr.f32.gmra.mxu0 %v37_v51 }
  0x66   :  { %1081 = vmatprep.mubr.msk.f32.mxu0 %vm1211_vm0, %v1210_v0 }
  0x67   :  { %1154 = vmatmul.mubr.f32.gmra.mxu1 %v62_v52 }
  0x68   :  { %1156 = vmatprep.mubr.msk.f32.mxu1 %vm1211_vm0, %v1210_v0 }
  0x69   :  { %1082 = vmatmul.mubr.f32.gmra.mxu0 %v38_v53 }
  0x6a   :  { %1084 = vmatprep.mubr.msk.f32.mxu0 %vm1211_vm0, %v1210_v0 }
  0x6b   :  { %1157 = vmatmul.mubr.f32.gmra.mxu1 %v63_v54 }
  0x6c   :  { %1159 = vmatprep.mubr.msk.f32.mxu1 %vm1211_vm0, %v1210_v0 }
  0x6d   :  { %1085 = vmatmul.mubr.f32.gmra.mxu0 %v39_v55 }
  0x6e   :  { %1087 = vmatprep.mubr.msk.f32.mxu0 %vm1211_vm0, %v1210_v0 }
  0x6f   :  { %1160 = vmatmul.mubr.f32.gmra.mxu1 %v64_v56 }
  0x70   :  { %1162 = vmatprep.mubr.msk.f32.mxu1 %vm1211_vm0, %v1210_v0 }
  0x71   :  { %1088 = vmatmul.mubr.f32.gmra.mxu0 %v40_v57 }
  0x72   :  { %1090 = vmatprep.mubr.msk.f32.mxu0 %vm1211_vm0, %v1210_v0 }
  0x73   :  { %1163 = vmatmul.mubr.f32.gmra.mxu1 %v65_v58 }
  0x74   :  { %1165 = vmatprep.mubr.msk.f32.mxu1 %vm1211_vm0, %v1210_v0 }
  0x75   :  { %1091 = vmatmul.mubr.f32.gmra.mxu0 %v41_v59 }
  0x76   :  { %1093 = vmatprep.mubr.msk.f32.mxu0 %vm1211_vm0, %v1210_v0 }
  0x77   :  { %1166 = vmatmul.mubr.f32.gmra.mxu1 %v66_v60 }
  0x78   :  { %1168 = vmatprep.mubr.msk.f32.mxu1 %vm1211_vm0, %v1210_v0 }
  0x79   :  { %1094 = vmatmul.mubr.f32.gmra.mxu0 %v42_v61 }
  0x7a   :  { %1096 = vmatprep.mubr.msk.f32.mxu0 %vm1211_vm0, %v1210_v0 }
  0x7b   :  { %1169 = vmatmul.mubr.f32.gmra.mxu1 %v67_v62 }
  0x7c   :  { %1171 = vmatprep.mubr.msk.f32.mxu1 %vm1211_vm0, %v1210_v0 }
  0x7d   :  { %1097 = vmatmul.mubr.f32.gmra.mxu0 %v43_v63 }
  0x7e   :  { %1099 = vmatprep.mubr.msk.f32.mxu0 %vm1211_vm0, %v1210_v0 }
  0x7f   :  { %1172 = vmatmul.mubr.f32.gmra.mxu1 %v68_v1 }
  0x81   :  { %1100 = vmatmul.mubr.f32.gmra.mxu0 %v44_v2 }
  0xe1   :  { %v158_v3 = vpop.f32.mrf.mxu0 }
  0xe2   :  { %v1600_v53 = vadd.f32 %v1592_v47, %v158_v3 }
  0xe3   :  { %v1029_v4 = vpop.f32.mrf.mxu0  ;;  %v1567_v5 = vpop.f32.mrf.mxu1 }
  0xe4   :  { %v403_v61 = vsel %vm402_vm1, %v1600_v53, 0.0 }
  0xe5   :  { %v163_v6 = vpop.f32.mrf.mxu0  ;;  %v1104_v7 = vpop.f32.mrf.mxu1 }
  0xe6   :  { %v1597_v50 = vadd.f32 %v1592_v47, %v163_v6 }
  0xe7   :  { %v1032_v8 = vpop.f32.mrf.mxu0  ;;  %v1569_v9 = vpop.f32.mrf.mxu1 }
  0xe8   :  { %v404_v57 = vsel %vm402_vm1, %v1597_v50, 0.0 }
  0xe9   :  { %v168_v10 = vpop.f32.mrf.mxu0  ;;  %v1107_v11 = vpop.f32.mrf.mxu1  ;;  %v405_v1 = vadd.f32 %v404_v57, %v403_v61 }
  0xea   :  { %v1603_v54 = vadd.f32 %v1592_v47, %v168_v10 }
  0xeb   :  { %v1035_v12 = vpop.f32.mrf.mxu0  ;;  %v1571_v13 = vpop.f32.mrf.mxu1 }
  0xec   :  { %v406_v62 = vsel %vm402_vm1, %v1603_v54, 0.0 }
  0xed   :  { %v173_v0 = vpop.f32.mrf.mxu0  ;;  %v1110_v14 = vpop.f32.mrf.mxu1  ;;  %v407_v7 = vadd.f32 %v406_v62, %v405_v1 }
  0xee   :  { %v1610_v58 = vadd.f32 %v1592_v47, %v173_v0 }
  0xef   :  { %v1038_v15 = vpop.f32.mrf.mxu0  ;;  %v1573_v16 = vpop.f32.mrf.mxu1 }
  0xf0   :  { %2443 = vst [vmem:[#allocation2_spill] sm:$0xff] %v1610_v58  ;;  %v408_v4 = vsel %vm402_vm1, %v1610_v58, 0.0 }
  0xf1   :  { %v178_v17 = vpop.f32.mrf.mxu0  ;;  %v1113_v18 = vpop.f32.mrf.mxu1  ;;  %v409_v0 = vadd.f32 %v408_v4, %v407_v7 }
  0xf2   :  { %v1617_v63 = vadd.f32 %v1592_v47, %v178_v17 }
  0xf3   :  { %v1041_v19 = vpop.f32.mrf.mxu0  ;;  %v1575_v20 = vpop.f32.mrf.mxu1 }
  0xf4   :  { %2444 = vst [vmem:[#allocation3_spill] sm:$0xff] %v1617_v63  ;;  %v410_v11 = vsel %vm402_vm1, %v1617_v63, 0.0 }
  0xf5   :  { %v183_v21 = vpop.f32.mrf.mxu0  ;;  %v1116_v22 = vpop.f32.mrf.mxu1  ;;  %v411_v19 = vadd.f32 %v410_v11, %v409_v0 }
  0xf6   :  { %v1624_v6 = vadd.f32 %v1592_v47, %v183_v21 }
  0xf7   :  { %v1044_v23 = vpop.f32.mrf.mxu0  ;;  %v1577_v24 = vpop.f32.mrf.mxu1 }
  0xf8   :  { %2445 = vst [vmem:[#allocation4_spill] sm:$0xff] %v1624_v6  ;;  %v412_v17 = vsel %vm402_vm1, %v1624_v6, 0.0 }
  0xf9   :  { %v188_v25 = vpop.f32.mrf.mxu0  ;;  %v1119_v26 = vpop.f32.mrf.mxu1 }
  0xfa   :  { %v1629_v12 = vadd.f32 %v1592_v47, %v188_v25  ;;  %v413_v25 = vadd.f32 %v412_v17, %v411_v19 }
  0xfb   :  { %v1047_v27 = vpop.f32.mrf.mxu0  ;;  %v1579_v28 = vpop.f32.mrf.mxu1 }
  0xfc   :  { %v414_v23 = vsel %vm402_vm1, %v1629_v12, 0.0 }
  0xfd   :  { %v193_v29 = vpop.f32.mrf.mxu0  ;;  %v1122_v30 = vpop.f32.mrf.mxu1 }
  0xfe   :  { %v1636_v18 = vadd.f32 %v1592_v47, %v193_v29  ;;  %v415_v29 = vadd.f32 %v414_v23, %v413_v25 }
  0xff   :  { %v1050_v31 = vpop.f32.mrf.mxu0  ;;  %v1581_v32 = vpop.f32.mrf.mxu1 }
 0x100   :  { %v416_v31 = vsel %vm402_vm1, %v1636_v18, 0.0 }
 0x101   :  { %v198_v33 = vpop.f32.mrf.mxu0  ;;  %v1125_v34 = vpop.f32.mrf.mxu1 }
 0x102   :  { %v1641_v26 = vadd.f32 %v1592_v47, %v198_v33  ;;  %v417_v33 = vadd.f32 %v416_v31, %v415_v29 }
 0x103   :  { %v1053_v35 = vpop.f32.mrf.mxu0  ;;  %v1583_v36 = vpop.f32.mrf.mxu1 }
 0x105   :  { %v203_v37 = vpop.f32.mrf.mxu0  ;;  %v1128_v38 = vpop.f32.mrf.mxu1 }
 0x106   :  { %v1648_v34 = vadd.f32 %v1592_v47, %v203_v37 }
 0x107   :  { %v1056_v39 = vpop.f32.mrf.mxu0  ;;  %v1585_v40 = vpop.f32.mrf.mxu1 }
 0x108   :  { %v418_v39 = vsel %vm402_vm1, %v1641_v26, 0.0 }
 0x109   :  { %v208_v41 = vpop.f32.mrf.mxu0  ;;  %v1131_v42 = vpop.f32.mrf.mxu1  ;;  %v419_v37 = vadd.f32 %v418_v39, %v417_v33 }
 0x10a   :  { %v1653_v42 = vadd.f32 %v1592_v47, %v208_v41 }
 0x10b   :  { %v1059_v43 = vpop.f32.mrf.mxu0  ;;  %v1587_v44 = vpop.f32.mrf.mxu1 }
 0x10d   :  { %v213_v45 = vpop.f32.mrf.mxu0  ;;  %v1134_v46 = vpop.f32.mrf.mxu1 }
 0x10f   :  { %v1062_v48 = vpop.f32.mrf.mxu0  ;;  %v1594_v49 = vpop.f32.mrf.mxu1 }
 0x110   :  { %v420_v48 = vsel %vm402_vm1, %v1648_v34, 0.0 }
 0x111   :  { %v218_v51 = vpop.f32.mrf.mxu0  ;;  %v1137_v52 = vpop.f32.mrf.mxu1  ;;  %v421_v41 = vadd.f32 %v420_v48, %v419_v37 }
 0x112   :  { %v1660_v52 = vadd.f32 %v1592_v47, %v213_v45  ;;  %v1665_v61 = vadd.f32 %v1592_v47, %v218_v51 }
 0x113   :  { %v1065_v55 = vpop.f32.mrf.mxu0  ;;  %v1605_v56 = vpop.f32.mrf.mxu1 }
 0x114   :  { %v426_v11 = vsel %vm402_vm1, %v1665_v61, 0.0 }
 0x115   :  { %v223_v59 = vpop.f32.mrf.mxu0  ;;  %v1140_v60 = vpop.f32.mrf.mxu1 }
 0x116   :  { %v422_v60 = vsel %vm402_vm1, %v1653_v42, 0.0  ;;  %v1672_v4 = vadd.f32 %v1592_v47, %v223_v59 }
 0x117   :  { %v1068_v2 = vpop.f32.mrf.mxu0  ;;  %v1619_v3 = vpop.f32.mrf.mxu1  ;;  %v423_v45 = vadd.f32 %v422_v60, %v421_v41 }
 0x118   :  { %v424_v2 = vsel %vm402_vm1, %v1660_v52, 0.0  ;;  %v428_v19 = vsel %vm402_vm1, %v1672_v4, 0.0 }
 0x119   :  { %v228_v8 = vpop.f32.mrf.mxu0  ;;  %v1143_v10 = vpop.f32.mrf.mxu1  ;;  %v425_v51 = vadd.f32 %v424_v2, %v423_v45 }
 0x11a   :  { %v1677_v0 = vadd.f32 %v1592_v47, %v228_v8 }
 0x11b   :  { %v1071_v14 = vpop.f32.mrf.mxu0  ;;  %v1631_v15 = vpop.f32.mrf.mxu1  ;;  %v427_v59 = vadd.f32 %v426_v11, %v425_v51 }
 0x11d   :  { %v233_v21 = vpop.f32.mrf.mxu0  ;;  %v1146_v22 = vpop.f32.mrf.mxu1  ;;  %v429_v8 = vadd.f32 %v428_v19, %v427_v59 }
 0x11e   :  { %v1684_v22 = vadd.f32 %v1592_v47, %v233_v21 }
 0x11f   :  { %v1074_v27 = vpop.f32.mrf.mxu0  ;;  %v1643_v30 = vpop.f32.mrf.mxu1 }
 0x120   :  { %v430_v27 = vsel %vm402_vm1, %v1677_v0, 0.0  ;;  %v432_v39 = vsel %vm402_vm1, %v1684_v22, 0.0 }
 0x121   :  { %v238_v35 = vpop.f32.mrf.mxu0  ;;  %v1149_v38 = vpop.f32.mrf.mxu1  ;;  %v431_v21 = vadd.f32 %v430_v27, %v429_v8 }
 0x122   :  { %v1689_v31 = vadd.f32 %v1592_v47, %v238_v35 }
 0x123   :  { %v1077_v43 = vpop.f32.mrf.mxu0  ;;  %v1655_v46 = vpop.f32.mrf.mxu1  ;;  %v433_v35 = vadd.f32 %v432_v39, %v431_v21 }
 0x124   :  { %v434_v37 = vsel %vm402_vm1, %v1689_v31, 0.0 }
 0x125   :  { %v243_v55 = vpop.f32.mrf.mxu0  ;;  %v1152_v57 = vpop.f32.mrf.mxu1 }
 0x126   :  { %v1696_v33 = vadd.f32 %v1592_v47, %v243_v55  ;;  %v435_v55 = vadd.f32 %v434_v37, %v433_v35 }
 0x127   :  { %v1080_v62 = vpop.f32.mrf.mxu0  ;;  %v1667_v1 = vpop.f32.mrf.mxu1 }
 0x128   :  { %v436_v62 = vsel %vm402_vm1, %v1696_v33, 0.0 }
 0x129   :  { %v248_v7 = vpop.f32.mrf.mxu0  ;;  %v1155_v10 = vpop.f32.mrf.mxu1 }
 0x12a   :  { %v1701_v57 = vadd.f32 %v1592_v47, %v248_v7  ;;  %v437_v7 = vadd.f32 %v436_v62, %v435_v55 }
 0x12b   :  { %v1083_v14 = vpop.f32.mrf.mxu0  ;;  %v1679_v17 = vpop.f32.mrf.mxu1 }
 0x12c   :  { %v438_v11 = vsel %vm402_vm1, %v1701_v57, 0.0 }
 0x12d   :  { %v253_v23 = vpop.f32.mrf.mxu0  ;;  %v1158_v25 = vpop.f32.mrf.mxu1 }
 0x12e   :  { %v1708_v2 = vadd.f32 %v1592_v47, %v253_v23  ;;  %v439_v23 = vadd.f32 %v438_v11, %v437_v7 }
 0x12f   :  { %v1086_v29 = vpop.f32.mrf.mxu0  ;;  %v1691_v38 = vpop.f32.mrf.mxu1 }
 0x130   :  { %v440_v59 = vsel %vm402_vm1, %v1708_v2, 0.0 }
 0x131   :  { %v258_v43 = vpop.f32.mrf.mxu0  ;;  %v1161_v48 = vpop.f32.mrf.mxu1  ;;  %v441_v21 = vadd.f32 %v440_v59, %v439_v23 }
 0x132   :  { %v1713_v51 = vadd.f32 %v1592_v47, %v258_v43 }
 0x133   :  { %v1089_v60 = vpop.f32.mrf.mxu0  ;;  %v1703_v41 = vpop.f32.mrf.mxu1 }
 0x134   :  { %v442_v29 = vsel %vm402_vm1, %v1713_v51, 0.0 }
 0x135   :  { %v263_v45 = vpop.f32.mrf.mxu0  ;;  %v1164_v10 = vpop.f32.mrf.mxu1  ;;  %v443_v35 = vadd.f32 %v442_v29, %v441_v21 }
 0x136   :  { %v1720_v25 = vadd.f32 %v1592_v47, %v263_v45 }
 0x137   :  { %v1092_v14 = vpop.f32.mrf.mxu0  ;;  %v1715_v19 = vpop.f32.mrf.mxu1 }
 0x138   :  { %v444_v37 = vsel %vm402_vm1, %v1720_v25, 0.0 }
 0x139   :  { %v268_v27 = vpop.f32.mrf.mxu0  ;;  %v1167_v8 = vpop.f32.mrf.mxu1  ;;  %v445_v10 = vadd.f32 %v444_v37, %v443_v35  ;;  %v1749_v37 = vadd.f32 %v1592_v47, %v1569_v9 }
 0x13a   :  { %v1725_v39 = vadd.f32 %v1592_v47, %v268_v27  ;;  %v1742_v8 = vadd.f32 %v1592_v47, %v1567_v5  ;;  %v1757_v5 = vadd.f32 %v1592_v47, %v1571_v13 }
 0x13b   :  { %v1095_v43 = vpop.f32.mrf.mxu0  ;;  %v1727_v48 = vpop.f32.mrf.mxu1 }
 0x13c   :  { %v446_v55 = vsel %vm402_vm1, %v1725_v39, 0.0 }
 0x13d   :  { %v273_v60 = vpop.f32.mrf.mxu0  ;;  %v1170_v62 = vpop.f32.mrf.mxu1  ;;  %v447_v59 = vadd.f32 %v446_v55, %v445_v10  ;;  %v454_v10 = vsel %vm402_vm1, %v1749_v37, 0.0 }
 0x13e   :  { %v1734_v45 = vadd.f32 %v1592_v47, %v273_v60  ;;  %v452_v62 = vsel %vm402_vm1, %v1742_v8, 0.0 }
 0x13f   :  { %v1098_v11 = vpop.f32.mrf.mxu0  ;;  %v1736_v7 = vpop.f32.mrf.mxu1 }
 0x140   :  { %v448_v14 = vsel %vm402_vm1, %v1734_v45, 0.0  ;;  %v1763_v11 = vadd.f32 %v1592_v47, %v1573_v16 }
 0x141   :  { %v278_v23 = vpop.f32.mrf.mxu0  ;;  %v1173_v27 = vpop.f32.mrf.mxu1  ;;  %v449_v21 = vadd.f32 %v448_v14, %v447_v59  ;;  %v456_v14 = vsel %vm402_vm1, %v1757_v5, 0.0  ;;  %v1769_v59 = vadd.f32 %v1592_v47, %v1575_v20 }
 0x142   :  { %v1745_v29 = vadd.f32 %v1592_v47, %v278_v23  ;;  %v458_v13 = vsel %vm402_vm1, %v1763_v11, 0.0  ;;  %v1775_v27 = vadd.f32 %v1592_v47, %v1577_v24 }
 0x143   :  { %v1101_v43 = vpop.f32.mrf.mxu0  ;;  %v460_v16 = vsel %vm402_vm1, %v1769_v59, 0.0 }
 0x144   :  { %v450_v35 = vsel %vm402_vm1, %v1745_v29, 0.0  ;;  %v1781_v43 = vadd.f32 %v1592_v47, %v1579_v28  ;;  %v462_v20 = vsel %vm402_vm1, %v1775_v27, 0.0 }
 0x145   :  { %v451_v60 = vadd.f32 %v450_v35, %v449_v21 }
 0x146   :  { %v464_v24 = vsel %vm402_vm1, %v1781_v43, 0.0 }
 0x147   :  { %v453_v55 = vadd.f32 %v452_v62, %v451_v60  ;;  %v1787_v60 = vadd.f32 %v1592_v47, %v1581_v32 }
 0x149   :  { %v455_v9 = vadd.f32 %v454_v10, %v453_v55  ;;  %v1793_v55 = vadd.f32 %v1592_v47, %v1583_v36  ;;  %v466_v28 = vsel %vm402_vm1, %v1787_v60, 0.0 }
 0x14b   :  { %v457_v23 = vadd.f32 %v456_v14, %v455_v9  ;;  %v1799_v9 = vadd.f32 %v1592_v47, %v1585_v40  ;;  %v468_v32 = vsel %vm402_vm1, %v1793_v55, 0.0 }
 0x14d   :  { %v459_v21 = vadd.f32 %v458_v13, %v457_v23  ;;  %v1805_v23 = vadd.f32 %v1592_v47, %v1587_v44  ;;  %v470_v36 = vsel %vm402_vm1, %v1799_v9, 0.0 }
 0x14f   :  { %v461_v35 = vadd.f32 %v460_v16, %v459_v21  ;;  %v1811_v21 = vadd.f32 %v1592_v47, %v1594_v49  ;;  %v472_v40 = vsel %vm402_vm1, %v1805_v23, 0.0 }
 0x151   :  { %v463_v62 = vadd.f32 %v462_v20, %v461_v35  ;;  %v1817_v35 = vadd.f32 %v1592_v47, %v1605_v56  ;;  %v474_v44 = vsel %vm402_vm1, %v1811_v21, 0.0 }
 0x153   :  { %v465_v10 = vadd.f32 %v464_v24, %v463_v62  ;;  %v1823_v62 = vadd.f32 %v1592_v47, %v1619_v3  ;;  %v476_v49 = vsel %vm402_vm1, %v1817_v35, 0.0 }
 0x155   :  { %v467_v14 = vadd.f32 %v466_v28, %v465_v10  ;;  %v1829_v10 = vadd.f32 %v1592_v47, %v1631_v15  ;;  %v478_v56 = vsel %vm402_vm1, %v1823_v62, 0.0 }
 0x157   :  { %v469_v13 = vadd.f32 %v468_v32, %v467_v14  ;;  %v1835_v14 = vadd.f32 %v1592_v47, %v1643_v30  ;;  %v480_v3 = vsel %vm402_vm1, %v1829_v10, 0.0 }
 0x159   :  { %v471_v16 = vadd.f32 %v470_v36, %v469_v13  ;;  %v1841_v13 = vadd.f32 %v1592_v47, %v1655_v46  ;;  %v482_v15 = vsel %vm402_vm1, %v1835_v14, 0.0 }
 0x15b   :  { %v473_v20 = vadd.f32 %v472_v40, %v471_v16  ;;  %v1847_v16 = vadd.f32 %v1592_v47, %v1667_v1  ;;  %v484_v30 = vsel %vm402_vm1, %v1841_v13, 0.0 }
 0x15d   :  { %v475_v24 = vadd.f32 %v474_v44, %v473_v20  ;;  %2446 = vst [vmem:[#allocation5_spill] sm:$0xff] %v1847_v16  ;;  %v1853_v20 = vadd.f32 %v1592_v47, %v1679_v17  ;;  %v486_v46 = vsel %vm402_vm1, %v1847_v16, 0.0 }
 0x15f   :  { %v477_v28 = vadd.f32 %v476_v49, %v475_v24  ;;  %v1859_v24 = vadd.f32 %v1592_v47, %v1691_v38  ;;  %v488_v1 = vsel %vm402_vm1, %v1853_v20, 0.0 }
 0x161   :  { %v479_v32 = vadd.f32 %v478_v56, %v477_v28  ;;  %v1865_v28 = vadd.f32 %v1592_v47, %v1703_v41  ;;  %v490_v17 = vsel %vm402_vm1, %v1859_v24, 0.0  ;;  %v1881_v41 = vadd.f32 %v1592_v47, %v1736_v7 }
 0x163   :  { %v481_v36 = vadd.f32 %v480_v3, %v479_v32  ;;  %2447 = vst [vmem:[#allocation6_spill] sm:$0xff] %v1865_v28  ;;  %v1871_v32 = vadd.f32 %v1592_v47, %v1715_v19  ;;  %v492_v38 = vsel %vm402_vm1, %v1865_v28, 0.0  ;;  %2450 = vst [vmem:[#allocation9_spill] sm:$0xff] %v1881_v41 }
 0x165   :  { %v483_v40 = vadd.f32 %v482_v15, %v481_v36  ;;  %2448 = vst [vmem:[#allocation7_spill] sm:$0xff] %v1871_v32  ;;  %v1877_v36 = vadd.f32 %v1592_v47, %v1727_v48 }
 0x167   :  { %v485_v44 = vadd.f32 %v484_v30, %v483_v40  ;;  %2449 = vst [vmem:[#allocation8_spill] sm:$0xff] %v1877_v36  ;;  %v494_v40 = vsel %vm402_vm1, %v1871_v32, 0.0  ;;  %v496_v19 = vsel %vm402_vm1, %v1877_v36, 0.0 }
 0x169   :  { %v487_v49 = vadd.f32 %v486_v46, %v485_v44  ;;  %v498_v44 = vsel %vm402_vm1, %v1881_v41, 0.0 }
 0x16b   :  { %v489_v56 = vadd.f32 %v488_v1, %v487_v49 }
 0x16d   :  { %v491_v3 = vadd.f32 %v490_v17, %v489_v56 }
 0x16f   :  { %v493_v15 = vadd.f32 %v492_v38, %v491_v3 }
 0x171   :  { %v495_v30 = vadd.f32 %v494_v40, %v493_v15 }
 0x173   :  { %v497_v46 = vadd.f32 %v496_v19, %v495_v30 }
 0x175   :  { %v499_v49 = vadd.f32 %v498_v44, %v497_v46 }
 0x177   :  { %v500_v1 = vrot.slane %v499_v49, 4 }
 0x179   :  { %v501_v48 = vadd.f32 %v500_v1, %v499_v49 }
 0x17b   :  { %v502_v56 = vrot.slane %v501_v48, 2 }
 0x17d   :  { %v503_v17 = vadd.f32 %v502_v56, %v501_v48 }
 0x17f   :  { %v504_v28 = vrot.slane %v503_v17, 1 }
 0x181   :  { %v505_v47 = vadd.f32 %v504_v28, %v503_v17 }
 0x183   :  { %v1889_v7 = vmul.f32 0.0025510204, %v505_v47 }
 0x185   :  { %v508_v3 = vsub.f32 %v1600_v53, %v1889_v7  ;;  %v509_v38 = vsub.f32 %v1597_v50, %v1889_v7  ;;  %v510_v15 = vsub.f32 %v1603_v54, %v1889_v7  ;;  %v511_v40 = vsub.f32 %v1610_v58, %v1889_v7 }
 0x186   :  { %v512_v44 = vsub.f32 %v1617_v63, %v1889_v7  ;;  %v513_v46 = vsub.f32 %v1624_v6, %v1889_v7  ;;  %v514_v17 = vsub.f32 %v1629_v12, %v1889_v7  ;;  %v515_v63 = vsub.f32 %v1636_v18, %v1889_v7 }
 0x187   :  { %v557_v30 = vmul.f32 %v508_v3, %v508_v3  ;;  %v558_v19 = vmul.f32 %v509_v38, %v509_v38  ;;  %v559_v28 = vmul.f32 %v510_v15, %v510_v15  ;;  %v560_v49 = vmul.f32 %v511_v40, %v511_v40 }
 0x188   :  { %v561_v47 = vmul.f32 %v512_v44, %v512_v44  ;;  %v562_v15 = vmul.f32 %v513_v46, %v513_v46  ;;  %v516_v40 = vsub.f32 %v1641_v26, %v1889_v7  ;;  %v517_v44 = vsub.f32 %v1648_v34, %v1889_v7 }
 0x189   :  { %v606_v1 = vsel %vm402_vm1, %v557_v30, 0.0  ;;  %v607_v48 = vsel %vm402_vm1, %v558_v19, 0.0  ;;  %v609_v3 = vsel %vm402_vm1, %v559_v28, 0.0  ;;  %v611_v58 = vsel %vm402_vm1, %v560_v49, 0.0 }
 0x18a   :  { %v608_v56 = vadd.f32 %v607_v48, %v606_v1  ;;  %v563_v30 = vmul.f32 %v514_v17, %v514_v17  ;;  %v613_v19 = vsel %vm402_vm1, %v561_v47, 0.0  ;;  %v564_v48 = vmul.f32 %v515_v63, %v515_v63 }
 0x18b   :  { %v615_v28 = vsel %vm402_vm1, %v562_v15, 0.0  ;;  %v518_v46 = vsub.f32 %v1653_v42, %v1889_v7  ;;  %v519_v17 = vsub.f32 %v1660_v52, %v1889_v7  ;;  %v520_v63 = vsub.f32 %v1665_v61, %v1889_v7 }
 0x18c   :  { %v610_v38 = vadd.f32 %v609_v3, %v608_v56  ;;  %v565_v3 = vmul.f32 %v516_v40, %v516_v40  ;;  %v521_v40 = vsub.f32 %v1672_v4, %v1889_v7 }
 0x18e   :  { %v612_v6 = vadd.f32 %v611_v58, %v610_v38  ;;  %v617_v58 = vsel %vm402_vm1, %v563_v30, 0.0  ;;  %v566_v38 = vmul.f32 %v517_v44, %v517_v44  ;;  %v621_v15 = vsel %vm402_vm1, %v565_v3, 0.0 }
 0x18f   :  { %v522_v44 = vsub.f32 %v1677_v0, %v1889_v7 }
 0x190   :  { %v614_v1 = vadd.f32 %v613_v19, %v612_v6  ;;  %v619_v6 = vsel %vm402_vm1, %v564_v48, 0.0  ;;  %v567_v19 = vmul.f32 %v518_v46, %v518_v46  ;;  %v623_v30 = vsel %vm402_vm1, %v566_v38, 0.0 }
 0x191   :  { %v523_v46 = vsub.f32 %v1684_v22, %v1889_v7 }
 0x192   :  { %v616_v56 = vadd.f32 %v615_v28, %v614_v1  ;;  %v568_v28 = vmul.f32 %v519_v17, %v519_v17  ;;  %v625_v48 = vsel %vm402_vm1, %v567_v19, 0.0  ;;  %v524_v17 = vsub.f32 %v1689_v31, %v1889_v7 }
 0x194   :  { %v618_v49 = vadd.f32 %v617_v58, %v616_v56  ;;  %v569_v58 = vmul.f32 %v520_v63, %v520_v63  ;;  %v627_v3 = vsel %vm402_vm1, %v568_v28, 0.0  ;;  %v525_v63 = vsub.f32 %v1696_v33, %v1889_v7 }
 0x196   :  { %v620_v47 = vadd.f32 %v619_v6, %v618_v49  ;;  %v570_v6 = vmul.f32 %v521_v40, %v521_v40  ;;  %v629_v38 = vsel %vm402_vm1, %v569_v58, 0.0  ;;  %v526_v40 = vsub.f32 %v1701_v57, %v1889_v7 }
 0x198   :  { %v622_v1 = vadd.f32 %v621_v15, %v620_v47  ;;  %v571_v15 = vmul.f32 %v522_v44, %v522_v44  ;;  %v631_v19 = vsel %vm402_vm1, %v570_v6, 0.0  ;;  %v527_v44 = vsub.f32 %v1708_v2, %v1889_v7 }
 0x19a   :  { %v624_v56 = vadd.f32 %v623_v30, %v622_v1  ;;  %v572_v30 = vmul.f32 %v523_v46, %v523_v46  ;;  %v633_v28 = vsel %vm402_vm1, %v571_v15, 0.0  ;;  %v528_v46 = vsub.f32 %v1713_v51, %v1889_v7 }
 0x19c   :  { %v626_v49 = vadd.f32 %v625_v48, %v624_v56  ;;  %v573_v48 = vmul.f32 %v524_v17, %v524_v17  ;;  %v635_v58 = vsel %vm402_vm1, %v572_v30, 0.0  ;;  %v529_v17 = vsub.f32 %v1720_v25, %v1889_v7 }
 0x19e   :  { %v628_v47 = vadd.f32 %v627_v3, %v626_v49  ;;  %v574_v3 = vmul.f32 %v525_v63, %v525_v63  ;;  %v637_v6 = vsel %vm402_vm1, %v573_v48, 0.0  ;;  %v530_v63 = vsub.f32 %v1725_v39, %v1889_v7 }
 0x1a0   :  { %v630_v1 = vadd.f32 %v629_v38, %v628_v47  ;;  %v575_v38 = vmul.f32 %v526_v40, %v526_v40  ;;  %v639_v15 = vsel %vm402_vm1, %v574_v3, 0.0  ;;  %v531_v40 = vsub.f32 %v1734_v45, %v1889_v7 }
 0x1a2   :  { %v632_v56 = vadd.f32 %v631_v19, %v630_v1  ;;  %v576_v19 = vmul.f32 %v527_v44, %v527_v44  ;;  %v641_v30 = vsel %vm402_vm1, %v575_v38, 0.0  ;;  %v532_v44 = vsub.f32 %v1745_v29, %v1889_v7 }
 0x1a4   :  { %v634_v49 = vadd.f32 %v633_v28, %v632_v56  ;;  %v577_v28 = vmul.f32 %v528_v46, %v528_v46  ;;  %v643_v48 = vsel %vm402_vm1, %v576_v19, 0.0  ;;  %v533_v46 = vsub.f32 %v1742_v8, %v1889_v7 }
 0x1a6   :  { %v636_v47 = vadd.f32 %v635_v58, %v634_v49  ;;  %v578_v58 = vmul.f32 %v529_v17, %v529_v17  ;;  %v645_v3 = vsel %vm402_vm1, %v577_v28, 0.0  ;;  %v534_v17 = vsub.f32 %v1749_v37, %v1889_v7 }
 0x1a8   :  { %v638_v1 = vadd.f32 %v637_v6, %v636_v47  ;;  %v579_v6 = vmul.f32 %v530_v63, %v530_v63  ;;  %v647_v38 = vsel %vm402_vm1, %v578_v58, 0.0  ;;  %v535_v63 = vsub.f32 %v1757_v5, %v1889_v7 }
 0x1aa   :  { %v640_v56 = vadd.f32 %v639_v15, %v638_v1  ;;  %v580_v15 = vmul.f32 %v531_v40, %v531_v40  ;;  %v649_v19 = vsel %vm402_vm1, %v579_v6, 0.0  ;;  %v536_v40 = vsub.f32 %v1763_v11, %v1889_v7 }
 0x1ac   :  { %v642_v49 = vadd.f32 %v641_v30, %v640_v56  ;;  %v581_v30 = vmul.f32 %v532_v44, %v532_v44  ;;  %v651_v28 = vsel %vm402_vm1, %v580_v15, 0.0  ;;  %v537_v44 = vsub.f32 %v1769_v59, %v1889_v7 }
 0x1ae   :  { %v644_v47 = vadd.f32 %v643_v48, %v642_v49  ;;  %v582_v48 = vmul.f32 %v533_v46, %v533_v46  ;;  %v653_v58 = vsel %vm402_vm1, %v581_v30, 0.0  ;;  %v538_v46 = vsub.f32 %v1775_v27, %v1889_v7 }
 0x1b0   :  { %v646_v1 = vadd.f32 %v645_v3, %v644_v47  ;;  %v583_v3 = vmul.f32 %v534_v17, %v534_v17  ;;  %v655_v6 = vsel %vm402_vm1, %v582_v48, 0.0  ;;  %v539_v17 = vsub.f32 %v1781_v43, %v1889_v7 }
 0x1b2   :  { %v648_v56 = vadd.f32 %v647_v38, %v646_v1  ;;  %v584_v38 = vmul.f32 %v535_v63, %v535_v63  ;;  %v657_v15 = vsel %vm402_vm1, %v583_v3, 0.0  ;;  %v540_v63 = vsub.f32 %v1787_v60, %v1889_v7 }
 0x1b4   :  { %v650_v49 = vadd.f32 %v649_v19, %v648_v56  ;;  %v585_v19 = vmul.f32 %v536_v40, %v536_v40  ;;  %v659_v30 = vsel %vm402_vm1, %v584_v38, 0.0  ;;  %v541_v40 = vsub.f32 %v1793_v55, %v1889_v7 }
 0x1b6   :  { %v652_v47 = vadd.f32 %v651_v28, %v650_v49  ;;  %v586_v28 = vmul.f32 %v537_v44, %v537_v44  ;;  %v661_v48 = vsel %vm402_vm1, %v585_v19, 0.0  ;;  %v542_v44 = vsub.f32 %v1799_v9, %v1889_v7 }
 0x1b8   :  { %v654_v1 = vadd.f32 %v653_v58, %v652_v47  ;;  %v587_v58 = vmul.f32 %v538_v46, %v538_v46  ;;  %v663_v3 = vsel %vm402_vm1, %v586_v28, 0.0  ;;  %v543_v46 = vsub.f32 %v1805_v23, %v1889_v7 }
 0x1ba   :  { %v656_v56 = vadd.f32 %v655_v6, %v654_v1  ;;  %v588_v6 = vmul.f32 %v539_v17, %v539_v17  ;;  %v665_v38 = vsel %vm402_vm1, %v587_v58, 0.0  ;;  %v544_v17 = vsub.f32 %v1811_v21, %v1889_v7 }
 0x1bc   :  { %v658_v49 = vadd.f32 %v657_v15, %v656_v56  ;;  %v589_v15 = vmul.f32 %v540_v63, %v540_v63  ;;  %v667_v19 = vsel %vm402_vm1, %v588_v6, 0.0  ;;  %v545_v63 = vsub.f32 %v1817_v35, %v1889_v7 }
 0x1be   :  { %v660_v47 = vadd.f32 %v659_v30, %v658_v49  ;;  %v590_v30 = vmul.f32 %v541_v40, %v541_v40  ;;  %v669_v28 = vsel %vm402_vm1, %v589_v15, 0.0  ;;  %v546_v40 = vsub.f32 %v1823_v62, %v1889_v7 }
 0x1c0   :  { %v662_v1 = vadd.f32 %v661_v48, %v660_v47  ;;  %v591_v48 = vmul.f32 %v542_v44, %v542_v44  ;;  %v671_v58 = vsel %vm402_vm1, %v590_v30, 0.0  ;;  %v547_v44 = vsub.f32 %v1829_v10, %v1889_v7 }
 0x1c2   :  { %v664_v56 = vadd.f32 %v663_v3, %v662_v1  ;;  %v592_v3 = vmul.f32 %v543_v46, %v543_v46  ;;  %v673_v6 = vsel %vm402_vm1, %v591_v48, 0.0  ;;  %v548_v46 = vsub.f32 %v1835_v14, %v1889_v7 }
 0x1c4   :  { %v666_v49 = vadd.f32 %v665_v38, %v664_v56  ;;  %v593_v38 = vmul.f32 %v544_v17, %v544_v17  ;;  %v675_v15 = vsel %vm402_vm1, %v592_v3, 0.0  ;;  %v549_v17 = vsub.f32 %v1841_v13, %v1889_v7 }
 0x1c6   :  { %v668_v47 = vadd.f32 %v667_v19, %v666_v49  ;;  %v594_v19 = vmul.f32 %v545_v63, %v545_v63  ;;  %v677_v30 = vsel %vm402_vm1, %v593_v38, 0.0  ;;  %v550_v63 = vsub.f32 %v1847_v16, %v1889_v7 }
 0x1c8   :  { %v670_v1 = vadd.f32 %v669_v28, %v668_v47  ;;  %v595_v28 = vmul.f32 %v546_v40, %v546_v40  ;;  %v679_v48 = vsel %vm402_vm1, %v594_v19, 0.0  ;;  %v551_v40 = vsub.f32 %v1853_v20, %v1889_v7 }
 0x1ca   :  { %v672_v56 = vadd.f32 %v671_v58, %v670_v1  ;;  %v596_v58 = vmul.f32 %v547_v44, %v547_v44  ;;  %v681_v3 = vsel %vm402_vm1, %v595_v28, 0.0  ;;  %v552_v44 = vsub.f32 %v1859_v24, %v1889_v7 }
 0x1cb   :  { %v600_v16 = vmul.f32 %v551_v40, %v551_v40  ;;  %v556_v40 = vsub.f32 %v1881_v41, %v1889_v7 }
 0x1cc   :  { %v674_v49 = vadd.f32 %v673_v6, %v672_v56  ;;  %v597_v6 = vmul.f32 %v548_v46, %v548_v46  ;;  %v683_v38 = vsel %vm402_vm1, %v596_v58, 0.0 }
 0x1ce   :  { %v676_v47 = vadd.f32 %v675_v15, %v674_v49  ;;  %v598_v15 = vmul.f32 %v549_v17, %v549_v17  ;;  %v685_v19 = vsel %vm402_vm1, %v597_v6, 0.0  ;;  %v554_v17 = vsub.f32 %v1871_v32, %v1889_v7 }
 0x1cf   :  { %v691_v6 = vsel %vm402_vm1, %v600_v16, 0.0 }
 0x1d0   :  { %v678_v1 = vadd.f32 %v677_v30, %v676_v47  ;;  %v599_v30 = vmul.f32 %v550_v63, %v550_v63  ;;  %v687_v28 = vsel %vm402_vm1, %v598_v15, 0.0  ;;  %v555_v63 = vsub.f32 %v1877_v36, %v1889_v7 }
 0x1d2   :  { %v680_v56 = vadd.f32 %v679_v48, %v678_v1  ;;  %v2451_v48 = vld [vmem:[#allocation6_spill] sm:$0xff]  ;;  %v689_v58 = vsel %vm402_vm1, %v599_v30, 0.0  ;;  %v605_v30 = vmul.f32 %v556_v40, %v556_v40 }
 0x1d3   :  { %v553_v46 = vsub.f32 %v2451_v48, %v1889_v7 }
 0x1d4   :  { %v682_v49 = vadd.f32 %v681_v3, %v680_v56  ;;  %v601_v3 = vmul.f32 %v552_v44, %v552_v44  ;;  %v701_v16 = vsel %vm402_vm1, %v605_v30, 0.0 }
 0x1d6   :  { %v684_v47 = vadd.f32 %v683_v38, %v682_v49  ;;  %v602_v38 = vmul.f32 %v553_v46, %v553_v46  ;;  %v693_v15 = vsel %vm402_vm1, %v601_v3, 0.0 }
 0x1d8   :  { %v686_v1 = vadd.f32 %v685_v19, %v684_v47  ;;  %v603_v19 = vmul.f32 %v554_v17, %v554_v17  ;;  %v695_v44 = vsel %vm402_vm1, %v602_v38, 0.0  ;;  %v715_v38 = vlaneseq }
 0x1da   :  { %v688_v56 = vadd.f32 %v687_v28, %v686_v1  ;;  %v604_v28 = vmul.f32 %v555_v63, %v555_v63  ;;  %v716_v40 = vshrl.u32 %v715_v38, 7 }
 0x1dc   :  { %v690_v49 = vadd.f32 %v689_v58, %v688_v56  ;;  %v697_v56 = vsel %vm402_vm1, %v603_v19, 0.0  ;;  %v699_v46 = vsel %vm402_vm1, %v604_v28, 0.0 }
 0x1de   :  { %v692_v47 = vadd.f32 %v691_v6, %v690_v49 }
 0x1e0   :  { %v694_v1 = vadd.f32 %v693_v15, %v692_v47 }
 0x1e2   :  { %v696_v32 = vadd.f32 %v695_v44, %v694_v1  ;;  %v717_v1 = vsub.s32 0, %v716_v40 }
 0x1e4   :  { %v698_v58 = vadd.f32 %v697_v56, %v696_v32  ;;  %v710_v32 = vld [vmem:[%s2431_s3] sm:$0x1] }
 0x1e5   :  { %v2452_v56 = vld [vmem:[#allocation2_spill] sm:$0xff] }
 0x1e6   :  { %v700_v36 = vadd.f32 %v699_v46, %v698_v58  ;;  %v2453_v46 = vld [vmem:[#allocation3_spill] sm:$0xff] }
 0x1e8   :  { %v702_v49 = vadd.f32 %v701_v16, %v700_v36 }
 0x1ea   :  { %v703_v6 = vrot.slane %v702_v49, 4 }
 0x1ec   :  { %v704_v41 = vadd.f32 %v703_v6, %v702_v49  ;;  %v2454_v49 = vld [vmem:[#allocation4_spill] sm:$0xff] }
 0x1ee   :  { %v705_v17 = vrot.slane %v704_v41, 2 }
 0x1f0   :  { %v706_v48 = vadd.f32 %v705_v17, %v704_v41 }
 0x1f2   :  { %v707_v3 = vrot.slane %v706_v48, 1 }
 0x1f4   :  { %v708_v47 = vadd.f32 %v707_v3, %v706_v48 }
 0x1f6   :  { %v709_v63 = vmul.f32 0.0025510204, %v708_v47 }
 0x1f8   :  { %v711_v15 = vadd.f32 1e-05, %v709_v63 }
 0x1fa   :  { %1208 = vrsqrt.f32 %v711_v15 }
 0x207   :  { %v1209_v19 = vpop.eup %1208 }
 0x208   :  { %v713_v28 = vmul.f32 %v1209_v19, %v710_v32 }
 0x20a   :  { %v718_v44 = vrot.slane %v713_v28, %v717_v1  ;;  %v770_v48 = vmul.f32 %v713_v28, %v1889_v7  ;;  %v2456_v28 = vld [vmem:[#allocation6_spill] sm:$0xff] }
 0x20c   :  { %v720_v36 = vmul.f32 %v718_v44, %v1600_v53  ;;  %v721_v30 = vmul.f32 %v718_v44, %v1597_v50  ;;  %v722_v41 = vmul.f32 %v718_v44, %v1603_v54  ;;  %v723_v58 = vmul.f32 %v718_v44, %v2452_v56  ;;  %v2457_v56 = vld [vmem:[#allocation7_spill] sm:$0xff] }
 0x20d   :  { %v724_v16 = vmul.f32 %v718_v44, %v2453_v46  ;;  %v725_v6 = vmul.f32 %v718_v44, %v2454_v49  ;;  %v726_v17 = vmul.f32 %v718_v44, %v1629_v12  ;;  %v727_v3 = vmul.f32 %v718_v44, %v1636_v18 }
 0x20e   :  { %v728_v47 = vmul.f32 %v718_v44, %v1641_v26  ;;  %v729_v53 = vmul.f32 %v718_v44, %v1648_v34  ;;  %v730_v50 = vmul.f32 %v718_v44, %v1653_v42  ;;  %v731_v54 = vmul.f32 %v718_v44, %v1660_v52 }
 0x20f   :  { %v732_v7 = vmul.f32 %v718_v44, %v1665_v61  ;;  %v733_v63 = vmul.f32 %v718_v44, %v1672_v4  ;;  %v734_v15 = vmul.f32 %v718_v44, %v1677_v0  ;;  %v735_v38 = vmul.f32 %v718_v44, %v1684_v22 }
 0x210   :  { %v736_v12 = vmul.f32 %v718_v44, %v1689_v31  ;;  %v737_v18 = vmul.f32 %v718_v44, %v1696_v33  ;;  %v738_v26 = vmul.f32 %v718_v44, %v1701_v57  ;;  %v739_v34 = vmul.f32 %v718_v44, %v1708_v2  ;;  %v769_v33 = vld [vmem:[%s2432_s4] sm:$0x1] }
 0x211   :  { %v740_v42 = vmul.f32 %v718_v44, %v1713_v51  ;;  %v741_v52 = vmul.f32 %v718_v44, %v1720_v25  ;;  %v742_v61 = vmul.f32 %v718_v44, %v1725_v39  ;;  %v743_v4 = vmul.f32 %v718_v44, %v1734_v45 }
 0x212   :  { %v744_v0 = vmul.f32 %v718_v44, %v1745_v29  ;;  %v745_v22 = vmul.f32 %v718_v44, %v1742_v8  ;;  %v746_v31 = vmul.f32 %v718_v44, %v1749_v37  ;;  %v747_v57 = vmul.f32 %v718_v44, %v1757_v5 }
 0x213   :  { %v748_v2 = vmul.f32 %v718_v44, %v1763_v11  ;;  %v749_v51 = vmul.f32 %v718_v44, %v1769_v59  ;;  %v750_v25 = vmul.f32 %v718_v44, %v1775_v27  ;;  %v751_v39 = vmul.f32 %v718_v44, %v1781_v43 }
 0x214   :  { %v752_v45 = vmul.f32 %v718_v44, %v1787_v60  ;;  %v753_v8 = vmul.f32 %v718_v44, %v1793_v55  ;;  %v754_v29 = vmul.f32 %v718_v44, %v1799_v9  ;;  %v755_v37 = vmul.f32 %v718_v44, %v1805_v23  ;;  %v2455_v60 = vld [vmem:[#allocation5_spill] sm:$0xff] }
 0x215   :  { %v756_v40 = vmul.f32 %v718_v44, %v1811_v21  ;;  %v757_v5 = vmul.f32 %v718_v44, %v1817_v35  ;;  %v771_v32 = vsub.f32 %v769_v33, %v770_v48  ;;  %v758_v11 = vmul.f32 %v718_v44, %v1823_v62  ;;  %v2458_v48 = vld [vmem:[#allocation8_spill] sm:$0xff]  ;;  %v2459_v62 = vld [vmem:[#allocation9_spill] sm:$0xff] }
 0x216   :  { %v759_v59 = vmul.f32 %v718_v44, %v1829_v10  ;;  %v760_v27 = vmul.f32 %v718_v44, %v1835_v14  ;;  %v761_v43 = vmul.f32 %v718_v44, %v1841_v13  ;;  %v762_v19 = vmul.f32 %v718_v44, %v2455_v60 }
 0x217   :  { %v763_v55 = vmul.f32 %v718_v44, %v1853_v20  ;;  %v764_v9 = vmul.f32 %v718_v44, %v1859_v24  ;;  %v776_v23 = vrot.slane %v771_v32, %v717_v1  ;;  %v765_v21 = vmul.f32 %v718_v44, %v2456_v28 }
 0x218   :  { %v766_v35 = vmul.f32 %v718_v44, %v2457_v56  ;;  %v767_v46 = vmul.f32 %v718_v44, %v2458_v48  ;;  %v768_v49 = vmul.f32 %v718_v44, %v2459_v62 }
 0x219   :  { %v778_v10 = vadd.f32 %v776_v23, %v720_v36  ;;  %v779_v33 = vadd.f32 %v776_v23, %v721_v30  ;;  %v780_v14 = vadd.f32 %v776_v23, %v722_v41  ;;  %v2094_v13 = vadd.f32 %v776_v23, %v723_v58 }
 0x21a   :  { %v2096_v60 = vadd.f32 %v776_v23, %v724_v16  ;;  %v2098_v20 = vadd.f32 %v776_v23, %v725_v6  ;;  %v2100_v24 = vadd.f32 %v776_v23, %v726_v17  ;;  %v2102_v1 = vadd.f32 %v776_v23, %v727_v3 }
 0x21b   :  { %v2104_v32 = vadd.f32 %v776_v23, %v728_v47  ;;  %v2106_v28 = vadd.f32 %v776_v23, %v729_v53  ;;  %v2108_v56 = vadd.f32 %v776_v23, %v730_v50  ;;  %v2110_v44 = vadd.f32 %v776_v23, %v731_v54 }
 0x21c   :  { %v2112_v36 = vadd.f32 %v776_v23, %v732_v7  ;;  %v2114_v30 = vadd.f32 %v776_v23, %v733_v63  ;;  %v2116_v41 = vadd.f32 %v776_v23, %v734_v15  ;;  %v2118_v58 = vadd.f32 %v776_v23, %v735_v38 }
 0x21d   :  { %v2120_v16 = vadd.f32 %v776_v23, %v736_v12  ;;  %v2122_v6 = vadd.f32 %v776_v23, %v737_v18  ;;  %v2124_v17 = vadd.f32 %v776_v23, %v738_v26  ;;  %v2126_v3 = vadd.f32 %v776_v23, %v739_v34 }
 0x21e   :  { %v2128_v47 = vadd.f32 %v776_v23, %v740_v42  ;;  %v2130_v53 = vadd.f32 %v776_v23, %v741_v52  ;;  %v2132_v50 = vadd.f32 %v776_v23, %v742_v61  ;;  %v2134_v54 = vadd.f32 %v776_v23, %v743_v4 }
 0x21f   :  { %v2136_v7 = vadd.f32 %v776_v23, %v744_v0  ;;  %v2138_v63 = vadd.f32 %v776_v23, %v745_v22  ;;  %v2140_v15 = vadd.f32 %v776_v23, %v746_v31  ;;  %v2142_v38 = vadd.f32 %v776_v23, %v747_v57 }
 0x220   :  { %v2144_v12 = vadd.f32 %v776_v23, %v748_v2  ;;  %v2146_v18 = vadd.f32 %v776_v23, %v749_v51  ;;  %v2148_v26 = vadd.f32 %v776_v23, %v750_v25  ;;  %v2150_v34 = vadd.f32 %v776_v23, %v751_v39 }
 0x221   :  { %v2152_v42 = vadd.f32 %v776_v23, %v752_v45  ;;  %v2154_v52 = vadd.f32 %v776_v23, %v753_v8  ;;  %v2156_v61 = vadd.f32 %v776_v23, %v754_v29  ;;  %v2158_v4 = vadd.f32 %v776_v23, %v755_v37 }
 0x222   :  { %v2160_v0 = vadd.f32 %v776_v23, %v756_v40  ;;  %v2162_v22 = vadd.f32 %v776_v23, %v757_v5  ;;  %v2164_v31 = vadd.f32 %v776_v23, %v758_v11  ;;  %v2166_v57 = vadd.f32 %v776_v23, %v759_v59 }
 0x223   :  { %v2168_v2 = vadd.f32 %v776_v23, %v760_v27  ;;  %v2170_v51 = vadd.f32 %v776_v23, %v761_v43  ;;  %v2172_v25 = vadd.f32 %v776_v23, %v762_v19  ;;  %v2174_v39 = vadd.f32 %v776_v23, %v763_v55 }
 0x224   :  { %v2176_v45 = vadd.f32 %v776_v23, %v764_v9  ;;  %v2178_v8 = vadd.f32 %v776_v23, %v765_v21  ;;  %v2180_v29 = vadd.f32 %v776_v23, %v766_v35  ;;  %v2182_v37 = vadd.f32 %v776_v23, %v767_v46 }
 0x225   :  { %v2184_v40 = vadd.f32 %v776_v23, %v768_v49  ;;  %v827_v5 = vmax.f32 %v778_v10, 0.0  ;;  %v828_v11 = vmax.f32 %v779_v33, 0.0  ;;  %v829_v59 = vmax.f32 %v780_v14, 0.0 }
 0x226   :  { %v830_v27 = vmax.f32 %v2094_v13, 0.0  ;;  %v831_v43 = vmax.f32 %v2096_v60, 0.0  ;;  %v832_v19 = vmax.f32 %v2098_v20, 0.0  ;;  %v833_v55 = vmax.f32 %v2100_v24, 0.0 }
 0x227   :  { %v834_v9 = vmax.f32 %v2102_v1, 0.0  ;;  %v835_v21 = vmax.f32 %v2104_v32, 0.0  ;;  %v836_v35 = vmax.f32 %v2106_v28, 0.0  ;;  %v837_v23 = vmax.f32 %v2108_v56, 0.0  ;;  %876 = vst.msk [vmem:[%s2433_s5] sm:$0xff] %vm402_vm1, %v827_v5  ;;  %877 = vst.msk [vmem:[%s2433_s5 + $0x8] sm:$0xff] %vm402_vm1, %v828_v11 }
 0x228   :  { %878 = vst.msk [vmem:[%s2433_s5 + $0x10] sm:$0xff] %vm402_vm1, %v829_v59  ;;  %v838_v48 = vmax.f32 %v2110_v44, 0.0  ;;  %v839_v46 = vmax.f32 %v2112_v36, 0.0  ;;  %v840_v62 = vmax.f32 %v2114_v30, 0.0  ;;  %v841_v49 = vmax.f32 %v2116_v41, 0.0  ;;  %879 = vst.msk [vmem:[%s2433_s5 + $0x18] sm:$0xff] %vm402_vm1, %v830_v27 }
 0x229   :  { %880 = vst.msk [vmem:[%s2433_s5 + $0x20] sm:$0xff] %vm402_vm1, %v831_v43  ;;  %881 = vst.msk [vmem:[%s2433_s5 + $0x28] sm:$0xff] %vm402_vm1, %v832_v19  ;;  %v842_v10 = vmax.f32 %v2118_v58, 0.0  ;;  %v843_v33 = vmax.f32 %v2120_v16, 0.0  ;;  %v844_v14 = vmax.f32 %v2122_v6, 0.0  ;;  %v845_v13 = vmax.f32 %v2124_v17, 0.0 }
 0x22a   :  { %882 = vst.msk [vmem:[%s2433_s5 + $0x30] sm:$0xff] %vm402_vm1, %v833_v55  ;;  %883 = vst.msk [vmem:[%s2433_s5 + $0x38] sm:$0xff] %vm402_vm1, %v834_v9  ;;  %v846_v60 = vmax.f32 %v2126_v3, 0.0  ;;  %v847_v20 = vmax.f32 %v2128_v47, 0.0  ;;  %v848_v24 = vmax.f32 %v2130_v53, 0.0  ;;  %v849_v1 = vmax.f32 %v2132_v50, 0.0 }
 0x22b   :  { %884 = vst.msk [vmem:[%s2433_s5 + $0x40] sm:$0xff] %vm402_vm1, %v835_v21  ;;  %885 = vst.msk [vmem:[%s2433_s5 + $0x48] sm:$0xff] %vm402_vm1, %v836_v35  ;;  %v850_v32 = vmax.f32 %v2134_v54, 0.0  ;;  %v851_v28 = vmax.f32 %v2136_v7, 0.0  ;;  %v852_v56 = vmax.f32 %v2138_v63, 0.0  ;;  %v853_v44 = vmax.f32 %v2140_v15, 0.0 }
 0x22c   :  { %886 = vst.msk [vmem:[%s2433_s5 + $0x50] sm:$0xff] %vm402_vm1, %v837_v23  ;;  %887 = vst.msk [vmem:[%s2433_s5 + $0x58] sm:$0xff] %vm402_vm1, %v838_v48  ;;  %v854_v36 = vmax.f32 %v2142_v38, 0.0  ;;  %v855_v30 = vmax.f32 %v2144_v12, 0.0  ;;  %v856_v41 = vmax.f32 %v2146_v18, 0.0  ;;  %v857_v58 = vmax.f32 %v2148_v26, 0.0 }
 0x22d   :  { %888 = vst.msk [vmem:[%s2433_s5 + $0x60] sm:$0xff] %vm402_vm1, %v839_v46  ;;  %889 = vst.msk [vmem:[%s2433_s5 + $0x68] sm:$0xff] %vm402_vm1, %v840_v62  ;;  %v858_v16 = vmax.f32 %v2150_v34, 0.0  ;;  %v859_v6 = vmax.f32 %v2152_v42, 0.0  ;;  %v860_v17 = vmax.f32 %v2154_v52, 0.0  ;;  %v861_v3 = vmax.f32 %v2156_v61, 0.0 }
 0x22e   :  { %890 = vst.msk [vmem:[%s2433_s5 + $0x70] sm:$0xff] %vm402_vm1, %v841_v49  ;;  %891 = vst.msk [vmem:[%s2433_s5 + $0x78] sm:$0xff] %vm402_vm1, %v842_v10  ;;  %v862_v47 = vmax.f32 %v2158_v4, 0.0  ;;  %v863_v53 = vmax.f32 %v2160_v0, 0.0  ;;  %v864_v50 = vmax.f32 %v2162_v22, 0.0  ;;  %v865_v54 = vmax.f32 %v2164_v31, 0.0 }
 0x22f   :  { %892 = vst.msk [vmem:[%s2433_s5 + $0x80] sm:$0xff] %vm402_vm1, %v843_v33  ;;  %893 = vst.msk [vmem:[%s2433_s5 + $0x88] sm:$0xff] %vm402_vm1, %v844_v14  ;;  %v866_v7 = vmax.f32 %v2166_v57, 0.0  ;;  %v867_v63 = vmax.f32 %v2168_v2, 0.0  ;;  %v868_v15 = vmax.f32 %v2170_v51, 0.0  ;;  %v869_v38 = vmax.f32 %v2172_v25, 0.0 }
 0x230   :  { %894 = vst.msk [vmem:[%s2433_s5 + $0x90] sm:$0xff] %vm402_vm1, %v845_v13  ;;  %895 = vst.msk [vmem:[%s2433_s5 + $0x98] sm:$0xff] %vm402_vm1, %v846_v60  ;;  %v870_v12 = vmax.f32 %v2174_v39, 0.0  ;;  %v871_v18 = vmax.f32 %v2176_v45, 0.0  ;;  %v872_v26 = vmax.f32 %v2178_v8, 0.0  ;;  %v873_v34 = vmax.f32 %v2180_v29, 0.0 }
 0x231   :  { %896 = vst.msk [vmem:[%s2433_s5 + $0xa0] sm:$0xff] %vm402_vm1, %v847_v20  ;;  %897 = vst.msk [vmem:[%s2433_s5 + $0xa8] sm:$0xff] %vm402_vm1, %v848_v24  ;;  %v874_v42 = vmax.f32 %v2182_v37, 0.0  ;;  %v875_v52 = vmax.f32 %v2184_v40, 0.0 }
 0x232   :  { %898 = vst.msk [vmem:[%s2433_s5 + $0xb0] sm:$0xff] %vm402_vm1, %v849_v1  ;;  %899 = vst.msk [vmem:[%s2433_s5 + $0xb8] sm:$0xff] %vm402_vm1, %v850_v32 }
 0x233   :  { %900 = vst.msk [vmem:[%s2433_s5 + $0xc0] sm:$0xff] %vm402_vm1, %v851_v28  ;;  %901 = vst.msk [vmem:[%s2433_s5 + $0xc8] sm:$0xff] %vm402_vm1, %v852_v56 }
 0x234   :  { %902 = vst.msk [vmem:[%s2433_s5 + $0xd0] sm:$0xff] %vm402_vm1, %v853_v44  ;;  %903 = vst.msk [vmem:[%s2433_s5 + $0xd8] sm:$0xff] %vm402_vm1, %v854_v36 }
 0x235   :  { %904 = vst.msk [vmem:[%s2433_s5 + $0xe0] sm:$0xff] %vm402_vm1, %v855_v30  ;;  %905 = vst.msk [vmem:[%s2433_s5 + $0xe8] sm:$0xff] %vm402_vm1, %v856_v41 }
 0x236   :  { %906 = vst.msk [vmem:[%s2433_s5 + $0xf0] sm:$0xff] %vm402_vm1, %v857_v58  ;;  %907 = vst.msk [vmem:[%s2433_s5 + $0xf8] sm:$0xff] %vm402_vm1, %v858_v16 }
 0x237   :  { %908 = vst.msk [vmem:[%s2433_s5 + $0x100] sm:$0xff] %vm402_vm1, %v859_v6  ;;  %909 = vst.msk [vmem:[%s2433_s5 + $0x108] sm:$0xff] %vm402_vm1, %v860_v17 }
 0x238   :  { %910 = vst.msk [vmem:[%s2433_s5 + $0x110] sm:$0xff] %vm402_vm1, %v861_v3  ;;  %911 = vst.msk [vmem:[%s2433_s5 + $0x118] sm:$0xff] %vm402_vm1, %v862_v47 }
 0x239   :  { %912 = vst.msk [vmem:[%s2433_s5 + $0x120] sm:$0xff] %vm402_vm1, %v863_v53  ;;  %913 = vst.msk [vmem:[%s2433_s5 + $0x128] sm:$0xff] %vm402_vm1, %v864_v50 }
 0x23a   :  { %914 = vst.msk [vmem:[%s2433_s5 + $0x130] sm:$0xff] %vm402_vm1, %v865_v54  ;;  %915 = vst.msk [vmem:[%s2433_s5 + $0x138] sm:$0xff] %vm402_vm1, %v866_v7 }
 0x23b   :  { %916 = vst.msk [vmem:[%s2433_s5 + $0x140] sm:$0xff] %vm402_vm1, %v867_v63  ;;  %917 = vst.msk [vmem:[%s2433_s5 + $0x148] sm:$0xff] %vm402_vm1, %v868_v15 }
 0x23c   :  { %918 = vst.msk [vmem:[%s2433_s5 + $0x150] sm:$0xff] %vm402_vm1, %v869_v38  ;;  %919 = vst.msk [vmem:[%s2433_s5 + $0x158] sm:$0xff] %vm402_vm1, %v870_v12 }
 0x23d   :  { %920 = vst.msk [vmem:[%s2433_s5 + $0x160] sm:$0xff] %vm402_vm1, %v871_v18  ;;  %921 = vst.msk [vmem:[%s2433_s5 + $0x168] sm:$0xff] %vm402_vm1, %v872_v26 }
 0x23e   :  { %922 = vst.msk [vmem:[%s2433_s5 + $0x170] sm:$0xff] %vm402_vm1, %v873_v34  ;;  %923 = vst.msk [vmem:[%s2433_s5 + $0x178] sm:$0xff] %vm402_vm1, %v874_v42 }
 0x23f   :  { %924 = vst.msk [vmem:[%s2433_s5 + $0x180] sm:$0xff] %vm402_vm1, %v875_v52 }

// kernel: forward.5
= control target key start
LH: loop header
LB: loop body
LE: loop exit
PB: predicated region body
PF: predicated region fallthrough
CT: control target
= control target key end

     0   :  { %vm779_vm0 = vcmask 523264   ;;  %vm803_vm1 = vcmask 517120   ;;  %s2215_s1 = inlined_call_operand.vmem [shape: f32[1024,64], index: 1, kind: input, shape index: {}]   ;;  %s2216_s0 = inlined_call_operand.vmem [shape: f32[98,1024], index: 0, kind: input, shape index: {}]   ;;  %s2217_s2 = inlined_call_operand.vmem [shape: f32[1,64], index: 2, kind: input, shape index: {}]   ;;  %s2218_s3 = inlined_call_operand.vmem [shape: f32[1,64], index: 3, kind: input, shape index: {}]   ;;  %s2219_s4 = inlined_call_operand.vmem [shape: f32[1,64], index: 4, kind: input, shape index: {}]   ;;  %s2220_s5 = inlined_call_operand.vmem [shape: f32[98,64], index: 5, kind: output, shape index: {}]  }
   0x1   :  { %v155_v0 = vld [vmem:[%s2215_s1 + $0xf8] sm:$0xff]  ;;  %v154_v3 = vld [vmem:[%s2215_s1 + $0xf0] sm:$0xff]  ;;  %v153_v7 = vld [vmem:[%s2215_s1 + $0xe8] sm:$0xff] }
   0x2   :  { %v139_v1 = vld [vmem:[%s2215_s1 + $0x78] sm:$0xff]  ;;  %948 = vmatprep.subr.mxu0 %v155_v0  ;;  %v138_v5 = vld [vmem:[%s2215_s1 + $0x70] sm:$0xff]  ;;  %v137_v9 = vld [vmem:[%s2215_s1 + $0x68] sm:$0xff] }
   0x3   :  { %v187_v2 = vld [vmem:[%s2215_s1 + $0x1f8] sm:$0xff]  ;;  %949 = vmatpush3.msra.mxu0 %v139_v1  ;;  %v186_v6 = vld [vmem:[%s2215_s1 + $0x1f0] sm:$0xff]  ;;  %v185_v10 = vld [vmem:[%s2215_s1 + $0x1e8] sm:$0xff] }
   0x4   :  { %1019 = vmatprep.subr.mxu1 %v187_v2  ;;  %v171_v4 = vld [vmem:[%s2215_s1 + $0x178] sm:$0xff]  ;;  %v170_v8 = vld [vmem:[%s2215_s1 + $0x170] sm:$0xff]  ;;  %950 = vmatprep.subr.mxu0 %v154_v3  ;;  %v152_v11 = vld [vmem:[%s2215_s1 + $0xe0] sm:$0xff] }
   0x5   :  { %1020 = vmatpush3.msra.mxu1 %v171_v4  ;;  %951 = vmatpush3.msra.mxu0 %v138_v5  ;;  %v169_v12 = vld [vmem:[%s2215_s1 + $0x168] sm:$0xff]  ;;  %v184_v13 = vld [vmem:[%s2215_s1 + $0x1e0] sm:$0xff]  ;;  %v151_v16 = vld [vmem:[%s2215_s1 + $0xd8] sm:$0xff] }
   0x6   :  { %1021 = vmatprep.subr.mxu1 %v186_v6  ;;  %952 = vmatprep.subr.mxu0 %v153_v7  ;;  %v136_v14 = vld [vmem:[%s2215_s1 + $0x60] sm:$0xff]  ;;  %v183_v17 = vld [vmem:[%s2215_s1 + $0x1d8] sm:$0xff]  ;;  %v150_v20 = vld [vmem:[%s2215_s1 + $0xd0] sm:$0xff] }
   0x7   :  { %1022 = vmatpush3.msra.mxu1 %v170_v8  ;;  %v168_v15 = vld [vmem:[%s2215_s1 + $0x160] sm:$0xff]  ;;  %953 = vmatpush3.msra.mxu0 %v137_v9  ;;  %v135_v18 = vld [vmem:[%s2215_s1 + $0x58] sm:$0xff]  ;;  %v182_v21 = vld [vmem:[%s2215_s1 + $0x1d0] sm:$0xff] }
   0x8   :  { %1023 = vmatprep.subr.mxu1 %v185_v10  ;;  %954 = vmatprep.subr.mxu0 %v152_v11  ;;  %v167_v19 = vld [vmem:[%s2215_s1 + $0x158] sm:$0xff]  ;;  %v134_v22 = vld [vmem:[%s2215_s1 + $0x50] sm:$0xff]  ;;  %v149_v24 = vld [vmem:[%s2215_s1 + $0xc8] sm:$0xff] }
   0x9   :  { %1024 = vmatpush3.msra.mxu1 %v169_v12  ;;  %955 = vmatpush3.msra.mxu0 %v136_v14  ;;  %v166_v23 = vld [vmem:[%s2215_s1 + $0x150] sm:$0xff]  ;;  %v181_v25 = vld [vmem:[%s2215_s1 + $0x1c8] sm:$0xff]  ;;  %v148_v28 = vld [vmem:[%s2215_s1 + $0xc0] sm:$0xff] }
   0xa   :  { %1025 = vmatprep.subr.mxu1 %v184_v13  ;;  %956 = vmatprep.subr.mxu0 %v151_v16  ;;  %v133_v26 = vld [vmem:[%s2215_s1 + $0x48] sm:$0xff]  ;;  %v180_v29 = vld [vmem:[%s2215_s1 + $0x1c0] sm:$0xff]  ;;  %v147_v32 = vld [vmem:[%s2215_s1 + $0xb8] sm:$0xff] }
   0xb   :  { %1026 = vmatpush3.msra.mxu1 %v168_v15  ;;  %957 = vmatpush3.msra.mxu0 %v135_v18  ;;  %v165_v27 = vld [vmem:[%s2215_s1 + $0x148] sm:$0xff]  ;;  %v132_v30 = vld [vmem:[%s2215_s1 + $0x40] sm:$0xff]  ;;  %v179_v33 = vld [vmem:[%s2215_s1 + $0x1b8] sm:$0xff] }
   0xc   :  { %1027 = vmatprep.subr.mxu1 %v183_v17  ;;  %958 = vmatprep.subr.mxu0 %v150_v20  ;;  %v164_v31 = vld [vmem:[%s2215_s1 + $0x140] sm:$0xff]  ;;  %v131_v34 = vld [vmem:[%s2215_s1 + $0x38] sm:$0xff]  ;;  %v146_v36 = vld [vmem:[%s2215_s1 + $0xb0] sm:$0xff] }
   0xd   :  { %1028 = vmatpush3.msra.mxu1 %v167_v19  ;;  %959 = vmatpush3.msra.mxu0 %v134_v22  ;;  %v163_v35 = vld [vmem:[%s2215_s1 + $0x138] sm:$0xff]  ;;  %v178_v37 = vld [vmem:[%s2215_s1 + $0x1b0] sm:$0xff]  ;;  %v145_v40 = vld [vmem:[%s2215_s1 + $0xa8] sm:$0xff] }
   0xe   :  { %1029 = vmatprep.subr.mxu1 %v182_v21  ;;  %960 = vmatprep.subr.mxu0 %v149_v24  ;;  %v130_v38 = vld [vmem:[%s2215_s1 + $0x30] sm:$0xff]  ;;  %v177_v41 = vld [vmem:[%s2215_s1 + $0x1a8] sm:$0xff]  ;;  %v144_v44 = vld [vmem:[%s2215_s1 + $0xa0] sm:$0xff] }
   0xf   :  { %1030 = vmatpush3.msra.mxu1 %v166_v23  ;;  %961 = vmatpush3.msra.mxu0 %v133_v26  ;;  %v162_v39 = vld [vmem:[%s2215_s1 + $0x130] sm:$0xff]  ;;  %v129_v42 = vld [vmem:[%s2215_s1 + $0x28] sm:$0xff]  ;;  %v176_v45 = vld [vmem:[%s2215_s1 + $0x1a0] sm:$0xff] }
  0x10   :  { %1031 = vmatprep.subr.mxu1 %v181_v25  ;;  %962 = vmatprep.subr.mxu0 %v148_v28  ;;  %v161_v43 = vld [vmem:[%s2215_s1 + $0x128] sm:$0xff]  ;;  %v128_v46 = vld [vmem:[%s2215_s1 + $0x20] sm:$0xff]  ;;  %v143_v48 = vld [vmem:[%s2215_s1 + $0x98] sm:$0xff] }
  0x11   :  { %1032 = vmatpush3.msra.mxu1 %v165_v27  ;;  %963 = vmatpush3.msra.mxu0 %v132_v30  ;;  %v160_v47 = vld [vmem:[%s2215_s1 + $0x120] sm:$0xff]  ;;  %v175_v49 = vld [vmem:[%s2215_s1 + $0x198] sm:$0xff]  ;;  %v142_v52 = vld [vmem:[%s2215_s1 + $0x90] sm:$0xff] }
  0x12   :  { %1033 = vmatprep.subr.mxu1 %v180_v29  ;;  %964 = vmatprep.subr.mxu0 %v147_v32  ;;  %v127_v50 = vld [vmem:[%s2215_s1 + $0x18] sm:$0xff]  ;;  %v174_v53 = vld [vmem:[%s2215_s1 + $0x190] sm:$0xff]  ;;  %v141_v56 = vld [vmem:[%s2215_s1 + $0x88] sm:$0xff] }
  0x13   :  { %1034 = vmatpush3.msra.mxu1 %v164_v31  ;;  %965 = vmatpush3.msra.mxu0 %v131_v34  ;;  %v159_v51 = vld [vmem:[%s2215_s1 + $0x118] sm:$0xff]  ;;  %v126_v54 = vld [vmem:[%s2215_s1 + $0x10] sm:$0xff]  ;;  %v173_v57 = vld [vmem:[%s2215_s1 + $0x188] sm:$0xff] }
  0x14   :  { %1035 = vmatprep.subr.mxu1 %v179_v33  ;;  %966 = vmatprep.subr.mxu0 %v146_v36  ;;  %v158_v55 = vld [vmem:[%s2215_s1 + $0x110] sm:$0xff]  ;;  %v125_v58 = vld [vmem:[%s2215_s1 + $0x8] sm:$0xff]  ;;  %v140_v60 = vld [vmem:[%s2215_s1 + $0x80] sm:$0xff] }
  0x15   :  { %1036 = vmatpush3.msra.mxu1 %v163_v35  ;;  %967 = vmatpush3.msra.mxu0 %v130_v38  ;;  %v157_v59 = vld [vmem:[%s2215_s1 + $0x108] sm:$0xff]  ;;  %v124_v62 = vld [vmem:[%s2215_s1] sm:$0xff]  ;;  %v23_v2 = vld [vmem:[%s2216_s0 + $0x18] sm:$0xff] }
  0x16   :  { %1037 = vmatprep.subr.mxu1 %v178_v37  ;;  %968 = vmatprep.subr.mxu0 %v145_v40  ;;  %v21_v61 = vld [vmem:[%s2216_s0 + $0x8] sm:$0xff]  ;;  %v172_v63 = vld [vmem:[%s2215_s1 + $0x180] sm:$0xff]  ;;  %v219_v3 = vld [vmem:[%s2215_s1 + $0x2f8] sm:$0xff] }
  0x17   :  { %1038 = vmatpush3.msra.mxu1 %v162_v39  ;;  %969 = vmatpush3.msra.mxu0 %v129_v42  ;;  %v20_v0 = vld [vmem:[%s2216_s0] sm:$0xff]  ;;  %v22_v4 = vld [vmem:[%s2216_s0 + $0x10] sm:$0xff]  ;;  %v203_v5 = vld [vmem:[%s2215_s1 + $0x278] sm:$0xff] }
  0x18   :  { %1039 = vmatprep.subr.mxu1 %v177_v41  ;;  %970 = vmatprep.subr.mxu0 %v144_v44  ;;  %v156_v1 = vld [vmem:[%s2215_s1 + $0x100] sm:$0xff]  ;;  %v251_v6 = vld [vmem:[%s2215_s1 + $0x3f8] sm:$0xff]  ;;  %v29_v7 = vld [vmem:[%s2216_s0 + $0x48] sm:$0xff] }
  0x19   :  { %1040 = vmatpush3.msra.mxu1 %v161_v43  ;;  %971 = vmatpush3.msra.mxu0 %v128_v46  ;;  %v235_v8 = vld [vmem:[%s2215_s1 + $0x378] sm:$0xff]  ;;  %v28_v9 = vld [vmem:[%s2216_s0 + $0x40] sm:$0xff]  ;;  %v218_v11 = vld [vmem:[%s2215_s1 + $0x2f0] sm:$0xff] }
  0x1a   :  { %1041 = vmatprep.subr.mxu1 %v176_v45  ;;  %972 = vmatprep.subr.mxu0 %v143_v48  ;;  %v31_v10 = vld [vmem:[%s2216_s0 + $0x58] sm:$0xff]  ;;  %v30_v12 = vld [vmem:[%s2216_s0 + $0x50] sm:$0xff]  ;;  %v37_v15 = vld [vmem:[%s2216_s0 + $0x88] sm:$0xff] }
  0x1b   :  { %1042 = vmatpush3.msra.mxu1 %v160_v47  ;;  %973 = vmatpush3.msra.mxu0 %v127_v50  ;;  %v202_v13 = vld [vmem:[%s2215_s1 + $0x270] sm:$0xff]  ;;  %v217_v16 = vld [vmem:[%s2215_s1 + $0x2e8] sm:$0xff]  ;;  %v36_v18 = vld [vmem:[%s2216_s0 + $0x80] sm:$0xff] }
  0x1c   :  { %1043 = vmatprep.subr.mxu1 %v175_v49  ;;  %974 = vmatprep.subr.mxu0 %v142_v52  ;;  %v250_v14 = vld [vmem:[%s2215_s1 + $0x3f0] sm:$0xff]  ;;  %v39_v19 = vld [vmem:[%s2216_s0 + $0x98] sm:$0xff]  ;;  %v201_v20 = vld [vmem:[%s2215_s1 + $0x268] sm:$0xff] }
  0x1d   :  { %1044 = vmatpush3.msra.mxu1 %v159_v51  ;;  %975 = vmatpush3.msra.mxu0 %v126_v54  ;;  %v234_v17 = vld [vmem:[%s2215_s1 + $0x370] sm:$0xff]  ;;  %v249_v22 = vld [vmem:[%s2215_s1 + $0x3e8] sm:$0xff]  ;;  %v216_v23 = vld [vmem:[%s2215_s1 + $0x2e0] sm:$0xff] }
  0x1e   :  { %1045 = vmatprep.subr.mxu1 %v174_v53  ;;  %976 = vmatprep.subr.mxu0 %v141_v56  ;;  %v38_v21 = vld [vmem:[%s2216_s0 + $0x90] sm:$0xff]  ;;  %v233_v24 = vld [vmem:[%s2215_s1 + $0x368] sm:$0xff]  ;;  %v200_v26 = vld [vmem:[%s2215_s1 + $0x260] sm:$0xff] }
  0x1f   :  { %1046 = vmatpush3.msra.mxu1 %v158_v55  ;;  %977 = vmatpush3.msra.mxu0 %v125_v58  ;;  %v45_v25 = vld [vmem:[%s2216_s0 + $0xc8] sm:$0xff]  ;;  %v47_v27 = vld [vmem:[%s2216_s0 + $0xd8] sm:$0xff]  ;;  %v44_v28 = vld [vmem:[%s2216_s0 + $0xc0] sm:$0xff] }
  0x20   :  { %1047 = vmatprep.subr.mxu1 %v173_v57  ;;  %978 = vmatprep.subr.mxu0 %v140_v60  ;;  %v248_v29 = vld [vmem:[%s2215_s1 + $0x3e0] sm:$0xff]  ;;  %v46_v30 = vld [vmem:[%s2216_s0 + $0xd0] sm:$0xff]  ;;  %v215_v31 = vld [vmem:[%s2215_s1 + $0x2d8] sm:$0xff] }
  0x21   :  { %1048 = vmatpush3.msra.mxu1 %v157_v59  ;;  %323 = vmatprep.mubr.f32.mxu0 %v21_v61  ;;  %v232_v32 = vld [vmem:[%s2215_s1 + $0x360] sm:$0xff]  ;;  %v199_v33 = vld [vmem:[%s2215_s1 + $0x258] sm:$0xff]  ;;  %v53_v34 = vld [vmem:[%s2216_s0 + $0x108] sm:$0xff] }
  0x22   :  { %979 = vmatpush3.msra.mxu0 %v124_v62  ;;  %1049 = vmatprep.subr.mxu1 %v172_v63  ;;  %v247_v35 = vld [vmem:[%s2215_s1 + $0x3d8] sm:$0xff]  ;;  %v52_v36 = vld [vmem:[%s2216_s0 + $0x100] sm:$0xff]  ;;  %v214_v39 = vld [vmem:[%s2215_s1 + $0x2d0] sm:$0xff] }
  0x23   :  { %324 = vmatmul.mubr.f32.vlgmr.msra.gmra.mxu0 %v20_v0  ;;  %1050 = vmatpush3.msra.mxu1 %v156_v1  ;;  %v55_v37 = vld [vmem:[%s2216_s0 + $0x118] sm:$0xff]  ;;  %v54_v40 = vld [vmem:[%s2216_s0 + $0x110] sm:$0xff]  ;;  %v61_v42 = vld [vmem:[%s2216_s0 + $0x148] sm:$0xff] }
  0x24   :  { %453 = vmatprep.mubr.f32.mxu1 %v23_v2  ;;  %1090 = vmatprep.subr.mxu0 %v219_v3  ;;  %v231_v38 = vld [vmem:[%s2215_s1 + $0x358] sm:$0xff]  ;;  %v198_v41 = vld [vmem:[%s2215_s1 + $0x250] sm:$0xff]  ;;  %v60_v44 = vld [vmem:[%s2216_s0 + $0x140] sm:$0xff] }
  0x25   :  { %454 = vmatmul.mubr.f32.vlgmr.msra.gmra.mxu1 %v22_v4  ;;  %1091 = vmatpush3.msra.mxu0 %v203_v5  ;;  %v246_v43 = vld [vmem:[%s2215_s1 + $0x3d0] sm:$0xff]  ;;  %v63_v45 = vld [vmem:[%s2216_s0 + $0x158] sm:$0xff]  ;;  %v213_v46 = vld [vmem:[%s2215_s1 + $0x2c8] sm:$0xff] }
  0x26   :  { %1161 = vmatprep.subr.mxu1 %v251_v6  ;;  %328 = vmatprep.mubr.f32.mxu0 %v29_v7  ;;  %v230_v47 = vld [vmem:[%s2215_s1 + $0x350] sm:$0xff]  ;;  %v197_v49 = vld [vmem:[%s2215_s1 + $0x248] sm:$0xff]  ;;  %v212_v52 = vld [vmem:[%s2215_s1 + $0x2c0] sm:$0xff] }
  0x27   :  { %1162 = vmatpush3.msra.mxu1 %v235_v8  ;;  %329 = vmatmul.mubr.f32.gmra.mxu0 %v28_v9  ;;  %v62_v48 = vld [vmem:[%s2216_s0 + $0x150] sm:$0xff]  ;;  %v245_v50 = vld [vmem:[%s2215_s1 + $0x3c8] sm:$0xff]  ;;  %v68_v54 = vld [vmem:[%s2216_s0 + $0x180] sm:$0xff] }
  0x28   :  { %458 = vmatprep.mubr.f32.mxu1 %v31_v10  ;;  %1092 = vmatprep.subr.mxu0 %v218_v11  ;;  %v69_v51 = vld [vmem:[%s2216_s0 + $0x188] sm:$0xff]  ;;  %v71_v55 = vld [vmem:[%s2216_s0 + $0x198] sm:$0xff]  ;;  %v196_v56 = vld [vmem:[%s2215_s1 + $0x240] sm:$0xff] }
  0x29   :  { %459 = vmatmul.mubr.f32.gmra.mxu1 %v30_v12  ;;  %1093 = vmatpush3.msra.mxu0 %v202_v13  ;;  %v229_v53 = vld [vmem:[%s2215_s1 + $0x348] sm:$0xff]  ;;  %v70_v57 = vld [vmem:[%s2216_s0 + $0x190] sm:$0xff]  ;;  %v244_v58 = vld [vmem:[%s2215_s1 + $0x3c0] sm:$0xff] }
  0x2a   :  { %1163 = vmatprep.subr.mxu1 %v250_v14  ;;  %333 = vmatprep.mubr.f32.mxu0 %v37_v15  ;;  %v211_v59 = vld [vmem:[%s2215_s1 + $0x2b8] sm:$0xff]  ;;  %v228_v60 = vld [vmem:[%s2215_s1 + $0x340] sm:$0xff]  ;;  %v77_v61 = vld [vmem:[%s2216_s0 + $0x1c8] sm:$0xff] }
  0x2b   :  { %1094 = vmatprep.subr.mxu0 %v217_v16  ;;  %1164 = vmatpush3.msra.mxu1 %v234_v17  ;;  %v195_v62 = vld [vmem:[%s2215_s1 + $0x238] sm:$0xff]  ;;  %v76_v0 = vld [vmem:[%s2216_s0 + $0x1c0] sm:$0xff]  ;;  %v78_v2 = vld [vmem:[%s2216_s0 + $0x1d0] sm:$0xff] }
  0x2c   :  { %334 = vmatmul.mubr.f32.gmra.mxu0 %v36_v18  ;;  %463 = vmatprep.mubr.f32.mxu1 %v39_v19  ;;  %v79_v63 = vld [vmem:[%s2216_s0 + $0x1d8] sm:$0xff]  ;;  %v210_v3 = vld [vmem:[%s2215_s1 + $0x2b0] sm:$0xff]  ;;  %v85_v5 = vld [vmem:[%s2216_s0 + $0x208] sm:$0xff] }
  0x2d   :  { %1095 = vmatpush3.msra.mxu0 %v201_v20  ;;  %464 = vmatmul.mubr.f32.gmra.mxu1 %v38_v21  ;;  %v243_v1 = vld [vmem:[%s2215_s1 + $0x3b8] sm:$0xff]  ;;  %v194_v6 = vld [vmem:[%s2215_s1 + $0x230] sm:$0xff]  ;;  %v84_v8 = vld [vmem:[%s2216_s0 + $0x200] sm:$0xff] }
  0x2e   :  { %1165 = vmatprep.subr.mxu1 %v249_v22  ;;  %1096 = vmatprep.subr.mxu0 %v216_v23  ;;  %v227_v4 = vld [vmem:[%s2215_s1 + $0x338] sm:$0xff]  ;;  %v242_v9 = vld [vmem:[%s2215_s1 + $0x3b0] sm:$0xff]  ;;  %v209_v11 = vld [vmem:[%s2215_s1 + $0x2a8] sm:$0xff] }
  0x2f   :  { %1166 = vmatpush3.msra.mxu1 %v233_v24  ;;  %338 = vmatprep.mubr.f32.mxu0 %v45_v25  ;;  %v87_v7 = vld [vmem:[%s2216_s0 + $0x218] sm:$0xff]  ;;  %v86_v10 = vld [vmem:[%s2216_s0 + $0x210] sm:$0xff]  ;;  %v193_v13 = vld [vmem:[%s2215_s1 + $0x228] sm:$0xff] }
  0x30   :  { %1097 = vmatpush3.msra.mxu0 %v200_v26  ;;  %468 = vmatprep.mubr.f32.mxu1 %v47_v27  ;;  %v226_v12 = vld [vmem:[%s2215_s1 + $0x330] sm:$0xff]  ;;  %v93_v14 = vld [vmem:[%s2216_s0 + $0x248] sm:$0xff]  ;;  %v92_v16 = vld [vmem:[%s2216_s0 + $0x240] sm:$0xff] }
  0x31   :  { %339 = vmatmul.mubr.f32.gmra.mxu0 %v44_v28  ;;  %1167 = vmatprep.subr.mxu1 %v248_v29  ;;  %v241_v15 = vld [vmem:[%s2215_s1 + $0x3a8] sm:$0xff]  ;;  %v95_v17 = vld [vmem:[%s2216_s0 + $0x258] sm:$0xff]  ;;  %v208_v18 = vld [vmem:[%s2215_s1 + $0x2a0] sm:$0xff] }
  0x32   :  { %469 = vmatmul.mubr.f32.gmra.mxu1 %v46_v30  ;;  %1098 = vmatprep.subr.mxu0 %v215_v31  ;;  %v225_v19 = vld [vmem:[%s2215_s1 + $0x328] sm:$0xff]  ;;  %v94_v20 = vld [vmem:[%s2216_s0 + $0x250] sm:$0xff]  ;;  %v192_v21 = vld [vmem:[%s2215_s1 + $0x220] sm:$0xff] }
  0x33   :  { %1168 = vmatpush3.msra.mxu1 %v232_v32  ;;  %1099 = vmatpush3.msra.mxu0 %v199_v33  ;;  %v240_v22 = vld [vmem:[%s2215_s1 + $0x3a0] sm:$0xff]  ;;  %v101_v23 = vld [vmem:[%s2216_s0 + $0x288] sm:$0xff]  ;;  %v207_v24 = vld [vmem:[%s2215_s1 + $0x298] sm:$0xff] }
  0x34   :  { %343 = vmatprep.mubr.f32.mxu0 %v53_v34  ;;  %1169 = vmatprep.subr.mxu1 %v247_v35  ;;  %v224_v25 = vld [vmem:[%s2215_s1 + $0x320] sm:$0xff]  ;;  %v103_v27 = vld [vmem:[%s2216_s0 + $0x298] sm:$0xff]  ;;  %v102_v29 = vld [vmem:[%s2216_s0 + $0x290] sm:$0xff] }
  0x35   :  { %344 = vmatmul.mubr.f32.gmra.mxu0 %v52_v36  ;;  %473 = vmatprep.mubr.f32.mxu1 %v55_v37  ;;  %v100_v26 = vld [vmem:[%s2216_s0 + $0x280] sm:$0xff]  ;;  %v191_v28 = vld [vmem:[%s2215_s1 + $0x218] sm:$0xff]  ;;  %v109_v31 = vld [vmem:[%s2216_s0 + $0x2c8] sm:$0xff] }
  0x36   :  { %1170 = vmatpush3.msra.mxu1 %v231_v38  ;;  %1100 = vmatprep.subr.mxu0 %v214_v39  ;;  %v239_v30 = vld [vmem:[%s2215_s1 + $0x398] sm:$0xff]  ;;  %v206_v33 = vld [vmem:[%s2215_s1 + $0x290] sm:$0xff]  ;;  %v108_v34 = vld [vmem:[%s2216_s0 + $0x2c0] sm:$0xff] }
  0x37   :  { %474 = vmatmul.mubr.f32.gmra.mxu1 %v54_v40  ;;  %1101 = vmatpush3.msra.mxu0 %v198_v41  ;;  %v223_v32 = vld [vmem:[%s2215_s1 + $0x318] sm:$0xff]  ;;  %v190_v36 = vld [vmem:[%s2215_s1 + $0x210] sm:$0xff]  ;;  %v205_v39 = vld [vmem:[%s2215_s1 + $0x288] sm:$0xff] }
  0x38   :  { %348 = vmatprep.mubr.f32.mxu0 %v61_v42  ;;  %1171 = vmatprep.subr.mxu1 %v246_v43  ;;  %v111_v35 = vld [vmem:[%s2216_s0 + $0x2d8] sm:$0xff]  ;;  %v110_v37 = vld [vmem:[%s2216_s0 + $0x2d0] sm:$0xff]  ;;  %v117_v41 = vld [vmem:[%s2216_s0 + $0x308] sm:$0x3] }
  0x39   :  { %349 = vmatmul.mubr.f32.gmra.mxu0 %v60_v44  ;;  %478 = vmatprep.mubr.f32.mxu1 %v63_v45  ;;  %v238_v38 = vld [vmem:[%s2215_s1 + $0x390] sm:$0xff]  ;;  %v189_v42 = vld [vmem:[%s2215_s1 + $0x208] sm:$0xff]  ;;  %v119_v43 = vld [vmem:[%s2216_s0 + $0x318] sm:$0x3] }
  0x3a   :  { %1102 = vmatprep.subr.mxu0 %v213_v46  ;;  %1172 = vmatpush3.msra.mxu1 %v230_v47  ;;  %v222_v40 = vld [vmem:[%s2215_s1 + $0x310] sm:$0xff]  ;;  %v116_v44 = vld [vmem:[%s2216_s0 + $0x300] sm:$0x3]  ;;  %v237_v45 = vld [vmem:[%s2215_s1 + $0x388] sm:$0xff] }
  0x3b   :  { %479 = vmatmul.mubr.f32.gmra.mxu1 %v62_v48  ;;  %1103 = vmatpush3.msra.mxu0 %v197_v49  ;;  %v118_v46 = vld [vmem:[%s2216_s0 + $0x310] sm:$0x3]  ;;  %v204_v47 = vld [vmem:[%s2215_s1 + $0x280] sm:$0xff]  ;;  %v221_v48 = vld [vmem:[%s2215_s1 + $0x308] sm:$0xff] }
  0x3c   :  { %1173 = vmatprep.subr.mxu1 %v245_v50  ;;  %353 = vmatprep.mubr.f32.mxu0 %v69_v51  ;;  %v188_v49 = vld [vmem:[%s2215_s1 + $0x200] sm:$0xff]  ;;  %v25_v50 = vld [vmem:[%s2216_s0 + $0x28] sm:$0xff] }
  0x3d   :  { %1104 = vmatprep.subr.mxu0 %v212_v52  ;;  %1174 = vmatpush3.msra.mxu1 %v229_v53  ;;  %v236_v51 = vld [vmem:[%s2215_s1 + $0x380] sm:$0xff] }
  0x3e   :  { %354 = vmatmul.mubr.f32.gmra.mxu0 %v68_v54  ;;  %483 = vmatprep.mubr.f32.mxu1 %v71_v55  ;;  %v24_v52 = vld [vmem:[%s2216_s0 + $0x20] sm:$0xff]  ;;  %v27_v54 = vld [vmem:[%s2216_s0 + $0x38] sm:$0xff]  ;;  %v33_v55 = vld [vmem:[%s2216_s0 + $0x68] sm:$0xff] }
  0x3f   :  { %1105 = vmatpush3.msra.mxu0 %v196_v56  ;;  %484 = vmatmul.mubr.f32.gmra.mxu1 %v70_v57  ;;  %v220_v53 = vld [vmem:[%s2215_s1 + $0x300] sm:$0xff]  ;;  %v26_v56 = vld [vmem:[%s2216_s0 + $0x30] sm:$0xff]  ;;  %v35_v57 = vld [vmem:[%s2216_s0 + $0x78] sm:$0xff] }
  0x40   :  { %1175 = vmatprep.subr.mxu1 %v244_v58  ;;  %1106 = vmatprep.subr.mxu0 %v211_v59  ;;  %v32_v58 = vld [vmem:[%s2216_s0 + $0x60] sm:$0xff]  ;;  %v41_v59 = vld [vmem:[%s2216_s0 + $0xa8] sm:$0xff] }
  0x41   :  { %1176 = vmatpush3.msra.mxu1 %v228_v60  ;;  %358 = vmatprep.mubr.f32.mxu0 %v77_v61  ;;  %v34_v60 = vld [vmem:[%s2216_s0 + $0x70] sm:$0xff]  ;;  %v43_v61 = vld [vmem:[%s2216_s0 + $0xb8] sm:$0xff] }
  0x42   :  { %1107 = vmatpush3.msra.mxu0 %v195_v62  ;;  %488 = vmatprep.mubr.f32.mxu1 %v79_v63  ;;  %v40_v62 = vld [vmem:[%s2216_s0 + $0xa0] sm:$0xff]  ;;  %v49_v63 = vld [vmem:[%s2216_s0 + $0xe8] sm:$0xff] }
  0x43   :  { %359 = vmatmul.mubr.f32.gmra.mxu0 %v76_v0  ;;  %1177 = vmatprep.subr.mxu1 %v243_v1  ;;  %v42_v0 = vld [vmem:[%s2216_s0 + $0xb0] sm:$0xff]  ;;  %v51_v1 = vld [vmem:[%s2216_s0 + $0xf8] sm:$0xff] }
  0x44   :  { %489 = vmatmul.mubr.f32.gmra.mxu1 %v78_v2  ;;  %1108 = vmatprep.subr.mxu0 %v210_v3  ;;  %v48_v2 = vld [vmem:[%s2216_s0 + $0xe0] sm:$0xff]  ;;  %v57_v3 = vld [vmem:[%s2216_s0 + $0x128] sm:$0xff] }
  0x45   :  { %1178 = vmatpush3.msra.mxu1 %v227_v4  ;;  %363 = vmatprep.mubr.f32.mxu0 %v85_v5  ;;  %v50_v4 = vld [vmem:[%s2216_s0 + $0xf0] sm:$0xff]  ;;  %v59_v5 = vld [vmem:[%s2216_s0 + $0x138] sm:$0xff] }
  0x46   :  { %1109 = vmatpush3.msra.mxu0 %v194_v6  ;;  %493 = vmatprep.mubr.f32.mxu1 %v87_v7  ;;  %v56_v6 = vld [vmem:[%s2216_s0 + $0x120] sm:$0xff]  ;;  %v65_v7 = vld [vmem:[%s2216_s0 + $0x168] sm:$0xff] }
  0x47   :  { %364 = vmatmul.mubr.f32.gmra.mxu0 %v84_v8  ;;  %1179 = vmatprep.subr.mxu1 %v242_v9  ;;  %v58_v8 = vld [vmem:[%s2216_s0 + $0x130] sm:$0xff]  ;;  %v67_v9 = vld [vmem:[%s2216_s0 + $0x178] sm:$0xff] }
  0x48   :  { %494 = vmatmul.mubr.f32.gmra.mxu1 %v86_v10  ;;  %1110 = vmatprep.subr.mxu0 %v209_v11  ;;  %v64_v10 = vld [vmem:[%s2216_s0 + $0x160] sm:$0xff]  ;;  %v73_v11 = vld [vmem:[%s2216_s0 + $0x1a8] sm:$0xff] }
  0x49   :  { %1180 = vmatpush3.msra.mxu1 %v226_v12  ;;  %1111 = vmatpush3.msra.mxu0 %v193_v13  ;;  %v66_v12 = vld [vmem:[%s2216_s0 + $0x170] sm:$0xff]  ;;  %v75_v13 = vld [vmem:[%s2216_s0 + $0x1b8] sm:$0xff] }
  0x4a   :  { %368 = vmatprep.mubr.f32.mxu0 %v93_v14  ;;  %1181 = vmatprep.subr.mxu1 %v241_v15  ;;  %v72_v14 = vld [vmem:[%s2216_s0 + $0x1a0] sm:$0xff]  ;;  %v81_v15 = vld [vmem:[%s2216_s0 + $0x1e8] sm:$0xff] }
  0x4b   :  { %369 = vmatmul.mubr.f32.gmra.mxu0 %v92_v16  ;;  %498 = vmatprep.mubr.f32.mxu1 %v95_v17  ;;  %v74_v16 = vld [vmem:[%s2216_s0 + $0x1b0] sm:$0xff]  ;;  %v83_v17 = vld [vmem:[%s2216_s0 + $0x1f8] sm:$0xff] }
  0x4c   :  { %1112 = vmatprep.subr.mxu0 %v208_v18  ;;  %1182 = vmatpush3.msra.mxu1 %v225_v19  ;;  %v80_v18 = vld [vmem:[%s2216_s0 + $0x1e0] sm:$0xff]  ;;  %v89_v19 = vld [vmem:[%s2216_s0 + $0x228] sm:$0xff] }
  0x4d   :  { %499 = vmatmul.mubr.f32.gmra.mxu1 %v94_v20  ;;  %1113 = vmatpush3.msra.mxu0 %v192_v21  ;;  %v82_v20 = vld [vmem:[%s2216_s0 + $0x1f0] sm:$0xff]  ;;  %v91_v21 = vld [vmem:[%s2216_s0 + $0x238] sm:$0xff] }
  0x4e   :  { %1183 = vmatprep.subr.mxu1 %v240_v22  ;;  %373 = vmatprep.mubr.f32.mxu0 %v101_v23  ;;  %v88_v22 = vld [vmem:[%s2216_s0 + $0x220] sm:$0xff]  ;;  %v97_v23 = vld [vmem:[%s2216_s0 + $0x268] sm:$0xff] }
  0x4f   :  { %1114 = vmatprep.subr.mxu0 %v207_v24  ;;  %1184 = vmatpush3.msra.mxu1 %v224_v25  ;;  %v90_v24 = vld [vmem:[%s2216_s0 + $0x230] sm:$0xff]  ;;  %v99_v25 = vld [vmem:[%s2216_s0 + $0x278] sm:$0xff] }
  0x50   :  { %374 = vmatmul.mubr.f32.gmra.mxu0 %v100_v26  ;;  %503 = vmatprep.mubr.f32.mxu1 %v103_v27  ;;  %v96_v26 = vld [vmem:[%s2216_s0 + $0x260] sm:$0xff]  ;;  %v105_v27 = vld [vmem:[%s2216_s0 + $0x2a8] sm:$0xff] }
  0x51   :  { %1115 = vmatpush3.msra.mxu0 %v191_v28  ;;  %504 = vmatmul.mubr.f32.gmra.mxu1 %v102_v29  ;;  %v98_v28 = vld [vmem:[%s2216_s0 + $0x270] sm:$0xff]  ;;  %v107_v29 = vld [vmem:[%s2216_s0 + $0x2b8] sm:$0xff] }
  0x52   :  { %1185 = vmatprep.subr.mxu1 %v239_v30  ;;  %378 = vmatprep.mubr.f32.mxu0 %v109_v31  ;;  %v104_v30 = vld [vmem:[%s2216_s0 + $0x2a0] sm:$0xff]  ;;  %v113_v31 = vld [vmem:[%s2216_s0 + $0x2e8] sm:$0xff] }
  0x53   :  { %1186 = vmatpush3.msra.mxu1 %v223_v32  ;;  %1116 = vmatprep.subr.mxu0 %v206_v33  ;;  %v106_v32 = vld [vmem:[%s2216_s0 + $0x2b0] sm:$0xff]  ;;  %v115_v33 = vld [vmem:[%s2216_s0 + $0x2f8] sm:$0xff] }
  0x54   :  { %379 = vmatmul.mubr.f32.gmra.mxu0 %v108_v34  ;;  %508 = vmatprep.mubr.f32.mxu1 %v111_v35  ;;  %v112_v34 = vld [vmem:[%s2216_s0 + $0x2e0] sm:$0xff]  ;;  %v121_v35 = vld [vmem:[%s2216_s0 + $0x328] sm:$0x3] }
  0x55   :  { %1117 = vmatpush3.msra.mxu0 %v190_v36  ;;  %509 = vmatmul.mubr.f32.gmra.mxu1 %v110_v37  ;;  %v114_v36 = vld [vmem:[%s2216_s0 + $0x2f0] sm:$0xff]  ;;  %v123_v37 = vld [vmem:[%s2216_s0 + $0x338] sm:$0x3] }
  0x56   :  { %1187 = vmatprep.subr.mxu1 %v238_v38  ;;  %1118 = vmatprep.subr.mxu0 %v205_v39  ;;  %v120_v38 = vld [vmem:[%s2216_s0 + $0x320] sm:$0x3]  ;;  %v122_v39 = vld [vmem:[%s2216_s0 + $0x330] sm:$0x3] }
  0x57   :  { %1188 = vmatpush3.msra.mxu1 %v222_v40  ;;  %383 = vmatprep.mubr.f32.mxu0 %v117_v41 }
  0x58   :  { %1119 = vmatpush3.msra.mxu0 %v189_v42  ;;  %513 = vmatprep.mubr.f32.mxu1 %v119_v43  ;;  %v1963_v42 = vld [vmem:[%s2217_s2] ss:$0 sm:$0xff] }
  0x59   :  { %384 = vmatmul.mubr.f32.gmra.mxu0 %v116_v44  ;;  %1189 = vmatprep.subr.mxu1 %v237_v45 }
  0x5a   :  { %514 = vmatmul.mubr.f32.gmra.mxu1 %v118_v46  ;;  %1120 = vmatprep.subr.mxu0 %v204_v47 }
  0x5b   :  { %1190 = vmatpush3.msra.mxu1 %v221_v48  ;;  %1121 = vmatpush3.msra.mxu0 %v188_v49 }
  0x5c   :  { %583 = vmatprep.mubr.f32.mxu0 %v25_v50  ;;  %1191 = vmatprep.subr.mxu1 %v236_v51 }
  0x5d   :  { %584 = vmatmul.mubr.f32.vlgmr.msra.gmra.mxu0 %v24_v52  ;;  %1192 = vmatpush3.msra.mxu1 %v220_v53 }
  0x5e   :  { %713 = vmatprep.mubr.f32.mxu1 %v27_v54  ;;  %588 = vmatprep.mubr.f32.mxu0 %v33_v55 }
  0x5f   :  { %714 = vmatmul.mubr.f32.vlgmr.msra.gmra.mxu1 %v26_v56 }
  0x60   :  { %718 = vmatprep.mubr.f32.mxu1 %v35_v57 }
  0x61   :  { %589 = vmatmul.mubr.f32.gmra.mxu0 %v32_v58 }
  0x62   :  { %593 = vmatprep.mubr.f32.mxu0 %v41_v59 }
  0x63   :  { %719 = vmatmul.mubr.f32.gmra.mxu1 %v34_v60 }
  0x64   :  { %723 = vmatprep.mubr.f32.mxu1 %v43_v61 }
  0x65   :  { %594 = vmatmul.mubr.f32.gmra.mxu0 %v40_v62 }
  0x66   :  { %598 = vmatprep.mubr.f32.mxu0 %v49_v63 }
  0x67   :  { %724 = vmatmul.mubr.f32.gmra.mxu1 %v42_v0 }
  0x68   :  { %728 = vmatprep.mubr.f32.mxu1 %v51_v1 }
  0x69   :  { %599 = vmatmul.mubr.f32.gmra.mxu0 %v48_v2 }
  0x6a   :  { %603 = vmatprep.mubr.f32.mxu0 %v57_v3 }
  0x6b   :  { %729 = vmatmul.mubr.f32.gmra.mxu1 %v50_v4 }
  0x6c   :  { %733 = vmatprep.mubr.f32.mxu1 %v59_v5 }
  0x6d   :  { %604 = vmatmul.mubr.f32.gmra.mxu0 %v56_v6 }
  0x6e   :  { %608 = vmatprep.mubr.f32.mxu0 %v65_v7 }
  0x6f   :  { %734 = vmatmul.mubr.f32.gmra.mxu1 %v58_v8 }
  0x70   :  { %738 = vmatprep.mubr.f32.mxu1 %v67_v9 }
  0x71   :  { %609 = vmatmul.mubr.f32.gmra.mxu0 %v64_v10 }
  0x72   :  { %613 = vmatprep.mubr.f32.mxu0 %v73_v11 }
  0x73   :  { %739 = vmatmul.mubr.f32.gmra.mxu1 %v66_v12 }
  0x74   :  { %743 = vmatprep.mubr.f32.mxu1 %v75_v13 }
  0x75   :  { %614 = vmatmul.mubr.f32.gmra.mxu0 %v72_v14 }
  0x76   :  { %618 = vmatprep.mubr.f32.mxu0 %v81_v15 }
  0x77   :  { %744 = vmatmul.mubr.f32.gmra.mxu1 %v74_v16 }
  0x78   :  { %748 = vmatprep.mubr.f32.mxu1 %v83_v17 }
  0x79   :  { %619 = vmatmul.mubr.f32.gmra.mxu0 %v80_v18 }
  0x7a   :  { %623 = vmatprep.mubr.f32.mxu0 %v89_v19 }
  0x7b   :  { %749 = vmatmul.mubr.f32.gmra.mxu1 %v82_v20 }
  0x7c   :  { %753 = vmatprep.mubr.f32.mxu1 %v91_v21 }
  0x7d   :  { %624 = vmatmul.mubr.f32.gmra.mxu0 %v88_v22 }
  0x7e   :  { %628 = vmatprep.mubr.f32.mxu0 %v97_v23 }
  0x7f   :  { %754 = vmatmul.mubr.f32.gmra.mxu1 %v90_v24 }
  0x80   :  { %758 = vmatprep.mubr.f32.mxu1 %v99_v25 }
  0x81   :  { %629 = vmatmul.mubr.f32.gmra.mxu0 %v96_v26 }
  0x82   :  { %633 = vmatprep.mubr.f32.mxu0 %v105_v27 }
  0x83   :  { %759 = vmatmul.mubr.f32.gmra.mxu1 %v98_v28 }
  0x84   :  { %763 = vmatprep.mubr.f32.mxu1 %v107_v29 }
  0x85   :  { %634 = vmatmul.mubr.f32.gmra.mxu0 %v104_v30 }
  0x86   :  { %638 = vmatprep.mubr.f32.mxu0 %v113_v31 }
  0x87   :  { %764 = vmatmul.mubr.f32.gmra.mxu1 %v106_v32 }
  0x88   :  { %768 = vmatprep.mubr.f32.mxu1 %v115_v33 }
  0x89   :  { %639 = vmatmul.mubr.f32.gmra.mxu0 %v112_v34 }
  0x8a   :  { %643 = vmatprep.mubr.f32.mxu0 %v121_v35 }
  0x8b   :  { %769 = vmatmul.mubr.f32.gmra.mxu1 %v114_v36 }
  0x8c   :  { %773 = vmatprep.mubr.f32.mxu1 %v123_v37 }
  0x8d   :  { %644 = vmatmul.mubr.f32.gmra.mxu0 %v120_v38 }
  0x8f   :  { %774 = vmatmul.mubr.f32.gmra.mxu1 %v122_v39 }
  0xe3   :  { %v980_v40 = vpop.f32.mrf.mxu0 }
  0xe5   :  { %v1051_v41 = vpop.f32.mrf.mxu1  ;;  %v981_v43 = vpop.f32.mrf.mxu0 }
  0xe6   :  { %v982_v44 = vadd.f32 %v981_v43, %v980_v40 }
  0xe7   :  { %v1052_v45 = vpop.f32.mrf.mxu1  ;;  %v983_v46 = vpop.f32.mrf.mxu0 }
  0xe8   :  { %v326_v47 = vadd.f32 %v982_v44, %v1963_v42  ;;  %v1053_v48 = vadd.f32 %v1052_v45, %v1051_v41 }
  0xe9   :  { %v1054_v49 = vpop.f32.mrf.mxu1  ;;  %v984_v50 = vpop.f32.mrf.mxu0 }
  0xea   :  { %v1966_v51 = vadd.f32 %v1053_v48, %v326_v47  ;;  %v985_v52 = vadd.f32 %v984_v50, %v983_v46 }
  0xeb   :  { %v1055_v53 = vpop.f32.mrf.mxu1 }
  0xec   :  { %v331_v54 = vadd.f32 %v985_v52, %v1963_v42  ;;  %v1056_v55 = vadd.f32 %v1055_v53, %v1054_v49  ;;  %v986_v56 = vpop.f32.mrf.mxu0 }
  0xed   :  { %v1057_v57 = vpop.f32.mrf.mxu1 }
  0xee   :  { %v1969_v58 = vadd.f32 %v1056_v55, %v331_v54  ;;  %v987_v59 = vpop.f32.mrf.mxu0 }
  0xef   :  { %v988_v60 = vadd.f32 %v987_v59, %v986_v56  ;;  %v1058_v61 = vpop.f32.mrf.mxu1 }
  0xf0   :  { %v1059_v62 = vadd.f32 %v1058_v61, %v1057_v57 }
  0xf1   :  { %v336_v63 = vadd.f32 %v988_v60, %v1963_v42  ;;  %v989_v0 = vpop.f32.mrf.mxu0 }
  0xf2   :  { %v1060_v1 = vpop.f32.mrf.mxu1 }
  0xf3   :  { %v1972_v2 = vadd.f32 %v1059_v62, %v336_v63  ;;  %v990_v3 = vpop.f32.mrf.mxu0 }
  0xf4   :  { %v991_v4 = vadd.f32 %v990_v3, %v989_v0  ;;  %v1061_v5 = vpop.f32.mrf.mxu1 }
  0xf5   :  { %v1062_v6 = vadd.f32 %v1061_v5, %v1060_v1  ;;  %v992_v7 = vpop.f32.mrf.mxu0 }
  0xf6   :  { %v341_v8 = vadd.f32 %v991_v4, %v1963_v42 }
  0xf7   :  { %v1063_v9 = vpop.f32.mrf.mxu1  ;;  %v993_v10 = vpop.f32.mrf.mxu0 }
  0xf8   :  { %v1975_v11 = vadd.f32 %v1062_v6, %v341_v8  ;;  %v994_v12 = vadd.f32 %v993_v10, %v992_v7 }
  0xf9   :  { %v1064_v13 = vpop.f32.mrf.mxu1  ;;  %v995_v14 = vpop.f32.mrf.mxu0 }
  0xfa   :  { %v346_v15 = vadd.f32 %v994_v12, %v1963_v42  ;;  %v1065_v16 = vadd.f32 %v1064_v13, %v1063_v9 }
  0xfb   :  { %v1066_v17 = vpop.f32.mrf.mxu1  ;;  %v996_v18 = vpop.f32.mrf.mxu0 }
  0xfc   :  { %v1978_v19 = vadd.f32 %v1065_v16, %v346_v15  ;;  %v997_v20 = vadd.f32 %v996_v18, %v995_v14 }
  0xfd   :  { %v1067_v21 = vpop.f32.mrf.mxu1 }
  0xfe   :  { %v351_v22 = vadd.f32 %v997_v20, %v1963_v42  ;;  %v1068_v23 = vadd.f32 %v1067_v21, %v1066_v17  ;;  %v998_v24 = vpop.f32.mrf.mxu0 }
  0xff   :  { %v1981_v25 = vpop.f32.mrf.mxu1 }
 0x100   :  { %v1983_v26 = vadd.f32 %v1068_v23, %v351_v22  ;;  %v999_v27 = vpop.f32.mrf.mxu0 }
 0x101   :  { %v1070_v28 = vpop.f32.mrf.mxu1  ;;  %v1000_v16 = vadd.f32 %v999_v27, %v998_v24 }
 0x103   :  { %v1001_v29 = vpop.f32.mrf.mxu0 }
 0x104   :  { %v1985_v30 = vpop.f32.mrf.mxu1 }
 0x105   :  { %v1002_v31 = vpop.f32.mrf.mxu0 }
 0x106   :  { %v1073_v32 = vpop.f32.mrf.mxu1  ;;  %v1003_v21 = vadd.f32 %v1002_v31, %v1001_v29 }
 0x107   :  { %v1004_v33 = vpop.f32.mrf.mxu0  ;;  %v1074_v31 = vadd.f32 %v1073_v32, %v1985_v30 }
 0x108   :  { %v1987_v34 = vpop.f32.mrf.mxu1  ;;  %v361_v24 = vadd.f32 %v1003_v21, %v1963_v42 }
 0x109   :  { %v1005_v35 = vpop.f32.mrf.mxu0 }
 0x10a   :  { %v1989_v36 = vpop.f32.mrf.mxu1  ;;  %v491_v30 = vadd.f32 %v1074_v31, %v361_v24 }
 0x10b   :  { %v1007_v37 = vpop.f32.mrf.mxu0 }
 0x10d   :  { %v1991_v38 = vpop.f32.mrf.mxu1  ;;  %v1008_v39 = vpop.f32.mrf.mxu0 }
 0x10f   :  { %v1993_v40 = vpop.f32.mrf.mxu1 }
 0x110   :  { %v1995_v41 = vpop.f32.mrf.mxu0 }
 0x111   :  { %v1997_v43 = vpop.f32.mrf.mxu1 }
 0x112   :  { %2221 = vst [vmem:[#allocation2_spill] sm:$0xff] %v1997_v43  ;;  %v1999_v44 = vpop.f32.mrf.mxu0 }
 0x113   :  { %v2001_v45 = vpop.f32.mrf.mxu1 }
 0x114   :  { %2222 = vst [vmem:[#allocation3_spill] sm:$0xff] %v2001_v45  ;;  %v2003_v46 = vpop.f32.mrf.mxu0 }
 0x115   :  { %v2005_v47 = vpop.f32.mrf.mxu1 }
 0x116   :  { %2223 = vst [vmem:[#allocation4_spill] sm:$0xff] %v2005_v47  ;;  %v2007_v48 = vpop.f32.mrf.mxu0  ;;  %v356_v47 = vadd.f32 %v1000_v16, %v1963_v42 }
 0x117   :  { %v2009_v49 = vpop.f32.mrf.mxu1  ;;  %v1015_v16 = vadd.f32 %v2007_v48, %v2003_v46 }
 0x118   :  { %2224 = vst [vmem:[#allocation5_spill] sm:$0xff] %v2009_v49 }
 0x119   :  { %v2011_v50 = vpop.f32.mrf.mxu0 }
 0x11a   :  { %2225 = vst [vmem:[#allocation6_spill] sm:$0xff] %v2011_v50  ;;  %v2013_v52 = vpop.f32.mrf.mxu1 }
 0x11b   :  { %2226 = vst [vmem:[#allocation7_spill] sm:$0xff] %v2013_v52  ;;  %v2015_v53 = vpop.f32.mrf.mxu0 }
 0x11c   :  { %2227 = vst [vmem:[#allocation8_spill] sm:$0xff] %v2015_v53  ;;  %v2017_v54 = vpop.f32.mrf.mxu1 }
 0x11d   :  { %2228 = vst [vmem:[#allocation9_spill] sm:$0xff] %v2017_v54  ;;  %v1122_v55 = vpop.f32.mrf.mxu0 }
 0x11f   :  { %v1193_v56 = vpop.f32.mrf.mxu1  ;;  %v1123_v57 = vpop.f32.mrf.mxu0 }
 0x120   :  { %v1124_v17 = vadd.f32 %v1123_v57, %v1122_v55  ;;  %v1006_v55 = vadd.f32 %v1005_v35, %v1004_v33  ;;  %v1009_v57 = vadd.f32 %v1008_v39, %v1007_v37  ;;  %v1077_v39 = vadd.f32 %v1989_v36, %v1987_v34 }
 0x121   :  { %v1194_v59 = vpop.f32.mrf.mxu1  ;;  %v1125_v60 = vpop.f32.mrf.mxu0 }
 0x122   :  { %v586_v53 = vadd.f32 %v1124_v17, %v1966_v51  ;;  %v366_v37 = vadd.f32 %v1006_v55, %v1963_v42 }
 0x123   :  { %v1196_v61 = vpop.f32.mrf.mxu1  ;;  %v1126_v62 = vpop.f32.mrf.mxu0 }
 0x124   :  { %v1127_v15 = vadd.f32 %v1126_v62, %v1125_v60  ;;  %v1071_v60 = vadd.f32 %v1070_v28, %v1981_v25 }
 0x125   :  { %v1197_v63 = vpop.f32.mrf.mxu1  ;;  %v1128_v0 = vpop.f32.mrf.mxu0 }
 0x126   :  { %v591_v52 = vadd.f32 %v1127_v15, %v1969_v58  ;;  %v1198_v27 = vadd.f32 %v1197_v63, %v1196_v61  ;;  %v1195_v58 = vadd.f32 %v1194_v59, %v1193_v56 }
 0x127   :  { %v1199_v1 = vpop.f32.mrf.mxu1  ;;  %v1129_v3 = vpop.f32.mrf.mxu0 }
 0x128   :  { %v1130_v22 = vadd.f32 %v1129_v3, %v1128_v0  ;;  %v2026_v3 = vadd.f32 %v1198_v27, %v591_v52  ;;  %v2029_v25 = vadd.f32 %v1195_v58, %v586_v53  ;;  %v2229_v27 = vld [vmem:[#allocation2_spill] sm:$0xff] }
 0x129   :  { %v1200_v4 = vpop.f32.mrf.mxu1  ;;  %v1131_v5 = vpop.f32.mrf.mxu0 }
 0x12a   :  { %v596_v29 = vadd.f32 %v1130_v22, %v1972_v2  ;;  %v1201_v51 = vadd.f32 %v1200_v4, %v1199_v1  ;;  %v780_v34 = vsel %vm779_vm0, %v2029_v25, 0.0 }
 0x12b   :  { %v1202_v6 = vpop.f32.mrf.mxu1  ;;  %v1132_v7 = vpop.f32.mrf.mxu0 }
 0x12c   :  { %v1133_v49 = vadd.f32 %v1132_v7, %v1131_v5  ;;  %v2032_v32 = vadd.f32 %v1201_v51, %v596_v29  ;;  %v2230_v29 = vld [vmem:[#allocation3_spill] sm:$0xff]  ;;  %v381_v51 = vadd.f32 %v1015_v16, %v1963_v42 }
 0x12d   :  { %v1203_v8 = vpop.f32.mrf.mxu1  ;;  %v1134_v9 = vpop.f32.mrf.mxu0 }
 0x12e   :  { %v601_v5 = vadd.f32 %v1133_v49, %v1975_v11  ;;  %v1204_v33 = vadd.f32 %v1203_v8, %v1202_v6  ;;  %v371_v11 = vadd.f32 %v1009_v57, %v1963_v42  ;;  %v783_v1 = vsel %vm779_vm0, %v2032_v32, 0.0 }
 0x12f   :  { %v1205_v10 = vpop.f32.mrf.mxu1  ;;  %v1135_v12 = vpop.f32.mrf.mxu0  ;;  %v496_v8 = vadd.f32 %v1077_v39, %v366_v37  ;;  %v2233_v39 = vld [vmem:[#allocation4_spill] sm:$0xff] }
 0x130   :  { %v1136_v50 = vadd.f32 %v1135_v12, %v1134_v9  ;;  %v486_v9 = vadd.f32 %v1071_v60, %v356_v47 }
 0x131   :  { %v1206_v13 = vpop.f32.mrf.mxu1  ;;  %v1137_v14 = vpop.f32.mrf.mxu0 }
 0x132   :  { %v606_v28 = vadd.f32 %v1136_v50, %v1978_v19  ;;  %v1207_v47 = vadd.f32 %v1206_v13, %v1205_v10  ;;  %v781_v19 = vsel %vm779_vm0, %v2026_v3, 0.0  ;;  %v2040_v50 = vadd.f32 %v1204_v33, %v601_v5  ;;  %v2231_v5 = vld [vmem:[#allocation6_spill] sm:$0xff] }
 0x133   :  { %v1208_v18 = vpop.f32.mrf.mxu1  ;;  %v1138_v20 = vpop.f32.mrf.mxu0  ;;  %v782_v12 = vadd.f32 %v781_v19, %v780_v34 }
 0x134   :  { %v1139_v7 = vadd.f32 %v1138_v20, %v1137_v14  ;;  %v2049_v36 = vadd.f32 %v1207_v47, %v606_v28 }
 0x135   :  { %v1209_v23 = vpop.f32.mrf.mxu1  ;;  %v1140_v54 = vpop.f32.mrf.mxu0  ;;  %v784_v17 = vadd.f32 %v783_v1, %v782_v12 }
 0x136   :  { %v611_v53 = vadd.f32 %v1139_v7, %v1983_v26  ;;  %v1210_v4 = vadd.f32 %v1209_v23, %v1208_v18  ;;  %v787_v18 = vsel %vm779_vm0, %v2049_v36, 0.0  ;;  %v2232_v7 = vld [vmem:[#allocation8_spill] sm:$0xff] }
 0x137   :  { %v1211_v45 = vpop.f32.mrf.mxu1  ;;  %v1141_v43 = vpop.f32.mrf.mxu0 }
 0x138   :  { %v1142_v35 = vadd.f32 %v1141_v43, %v1140_v54  ;;  %v1080_v43 = vadd.f32 %v1993_v40, %v1991_v38  ;;  %v1012_v54 = vadd.f32 %v1999_v44, %v1995_v41  ;;  %v785_v41 = vsel %vm779_vm0, %v2040_v50, 0.0 }
 0x139   :  { %v1212_v62 = vpop.f32.mrf.mxu1  ;;  %v1143_v0 = vpop.f32.mrf.mxu0  ;;  %v2055_v44 = vadd.f32 %v1210_v4, %v611_v53  ;;  %v786_v31 = vadd.f32 %v785_v41, %v784_v17  ;;  %v2236_v41 = vld [vmem:[#allocation9_spill] sm:$0xff] }
 0x13a   :  { %v616_v6 = vadd.f32 %v1142_v35, %v486_v9  ;;  %v501_v10 = vadd.f32 %v1080_v43, %v371_v11  ;;  %v1213_v13 = vadd.f32 %v1212_v62, %v1211_v45  ;;  %v376_v15 = vadd.f32 %v1012_v54, %v1963_v42  ;;  %v2234_v11 = vld [vmem:[#allocation5_spill] sm:$0xff] }
 0x13b   :  { %v1214_v2 = vpop.f32.mrf.mxu1  ;;  %v1144_v61 = vpop.f32.mrf.mxu0  ;;  %v1083_v45 = vadd.f32 %v2230_v29, %v2229_v27  ;;  %v789_v46 = vsel %vm779_vm0, %v2055_v44, 0.0  ;;  %v1018_v9 = vadd.f32 %v2232_v7, %v2231_v5  ;;  %v788_v28 = vadd.f32 %v787_v18, %v786_v31 }
 0x13c   :  { %v1145_v56 = vadd.f32 %v1144_v61, %v1143_v0  ;;  %v2062_v22 = vadd.f32 %v1213_v13, %v616_v6  ;;  %v1086_v47 = vadd.f32 %v2234_v11, %v2233_v39 }
 0x13d   :  { %v1215_v49 = vpop.f32.mrf.mxu1  ;;  %v1146_v52 = vpop.f32.mrf.mxu0  ;;  %v506_v0 = vadd.f32 %v1083_v45, %v376_v15  ;;  %v386_v4 = vadd.f32 %v1018_v9, %v1963_v42 }
 0x13e   :  { %v621_v14 = vadd.f32 %v1145_v56, %v491_v30  ;;  %v1216_v23 = vadd.f32 %v1215_v49, %v1214_v2  ;;  %v791_v30 = vsel %vm779_vm0, %v2062_v22, 0.0  ;;  %v790_v49 = vadd.f32 %v789_v46, %v788_v28 }
 0x13f   :  { %v1217_v59 = vpop.f32.mrf.mxu1  ;;  %v1147_v63 = vpop.f32.mrf.mxu0  ;;  %v511_v34 = vadd.f32 %v1086_v47, %v381_v51 }
 0x140   :  { %v1148_v26 = vadd.f32 %v1147_v63, %v1146_v52  ;;  %v2068_v48 = vadd.f32 %v1216_v23, %v621_v14 }
 0x141   :  { %v1218_v38 = vpop.f32.mrf.mxu1  ;;  %v1149_v40 = vpop.f32.mrf.mxu0 }
 0x142   :  { %v626_v60 = vadd.f32 %v1148_v26, %v496_v8  ;;  %v1219_v58 = vadd.f32 %v1218_v38, %v1217_v59  ;;  %v793_v53 = vsel %vm779_vm0, %v2068_v48, 0.0  ;;  %v792_v59 = vadd.f32 %v791_v30, %v790_v49 }
 0x143   :  { %v1220_v20 = vpop.f32.mrf.mxu1  ;;  %v1150_v21 = vpop.f32.mrf.mxu0 }
 0x144   :  { %v1151_v24 = vadd.f32 %v1150_v21, %v1149_v40  ;;  %v2075_v33 = vadd.f32 %v1219_v58, %v626_v60  ;;  %v2235_v40 = vld [vmem:[#allocation7_spill] sm:$0xff] }
 0x145   :  { %v1221_v55 = vpop.f32.mrf.mxu1  ;;  %v1152_v57 = vpop.f32.mrf.mxu0  ;;  %v1089_v13 = vadd.f32 %v2236_v41, %v2235_v40 }
 0x146   :  { %v631_v62 = vadd.f32 %v1151_v24, %v501_v10  ;;  %v1222_v35 = vadd.f32 %v1221_v55, %v1220_v20  ;;  %v795_v6 = vsel %vm779_vm0, %v2075_v33, 0.0  ;;  %v794_v10 = vadd.f32 %v793_v53, %v792_v59 }
 0x147   :  { %v1223_v2 = vpop.f32.mrf.mxu1  ;;  %v1153_v61 = vpop.f32.mrf.mxu0  ;;  %v516_v20 = vadd.f32 %v1089_v13, %v386_v4 }
 0x148   :  { %v1154_v37 = vadd.f32 %v1153_v61, %v1152_v57  ;;  %v2081_v56 = vadd.f32 %v1222_v35, %v631_v62  ;;  %v796_v17 = vadd.f32 %v795_v6, %v794_v10 }
 0x149   :  { %v1224_v52 = vpop.f32.mrf.mxu1  ;;  %v1155_v19 = vpop.f32.mrf.mxu0 }
 0x14a   :  { %v636_v43 = vadd.f32 %v1154_v37, %v506_v0  ;;  %v1225_v54 = vadd.f32 %v1224_v52, %v1223_v2  ;;  %v797_v14 = vsel %vm779_vm0, %v2081_v56, 0.0 }
 0x14b   :  { %v1226_v63 = vpop.f32.mrf.mxu1  ;;  %v1156_v1 = vpop.f32.mrf.mxu0  ;;  %v798_v24 = vadd.f32 %v797_v14, %v796_v17 }
 0x14c   :  { %v2086_v26 = vadd.f32 %v1225_v54, %v636_v43  ;;  %v1157_v8 = vadd.f32 %v1156_v1, %v1155_v19 }
 0x14d   :  { %v1227_v12 = vpop.f32.mrf.mxu1  ;;  %v1158_v38 = vpop.f32.mrf.mxu0 }
 0x14e   :  { %v641_v15 = vadd.f32 %v1157_v8, %v511_v34  ;;  %v1228_v16 = vadd.f32 %v1227_v12, %v1226_v63  ;;  %v799_v21 = vsel %vm779_vm0, %v2086_v26, 0.0 }
 0x14f   :  { %v1229_v18 = vpop.f32.mrf.mxu1  ;;  %v1159_v42 = vpop.f32.mrf.mxu0  ;;  %v800_v55 = vadd.f32 %v799_v21, %v798_v24 }
 0x150   :  { %v2094_v23 = vadd.f32 %v1228_v16, %v641_v15  ;;  %v1160_v60 = vadd.f32 %v1159_v42, %v1158_v38 }
 0x151   :  { %v1230_v27 = vpop.f32.mrf.mxu1 }
 0x152   :  { %v801_v29 = vsel %vm779_vm0, %v2094_v23, 0.0  ;;  %v646_v45 = vadd.f32 %v1160_v60, %v516_v20  ;;  %v1231_v31 = vadd.f32 %v1230_v27, %v1229_v18 }
 0x153   :  { %v802_v46 = vadd.f32 %v801_v29, %v800_v55 }
 0x154   :  { %v2098_v57 = vadd.f32 %v1231_v31, %v646_v45 }
 0x156   :  { %v804_v58 = vsel %vm803_vm1, %v2098_v57, 0.0 }
 0x157   :  { %v805_v62 = vadd.f32 %v804_v58, %v802_v46 }
 0x159   :  { %v806_v0 = vrot.slane %v805_v62, 4 }
 0x15b   :  { %v807_v51 = vadd.f32 %v806_v0, %v805_v62 }
 0x15d   :  { %v808_v5 = vrot.slane %v807_v51, 2 }
 0x15f   :  { %v809_v7 = vadd.f32 %v808_v5, %v807_v51 }
 0x161   :  { %v810_v9 = vrot.slane %v809_v7, 1 }
 0x163   :  { %v811_v28 = vadd.f32 %v810_v9, %v809_v7 }
 0x165   :  { %v2102_v2 = vmul.f32 0.010204081, %v811_v28 }
 0x167   :  { %v814_v61 = vsub.f32 %v2029_v25, %v2102_v2  ;;  %v815_v30 = vsub.f32 %v2026_v3, %v2102_v2  ;;  %v816_v35 = vsub.f32 %v2032_v32, %v2102_v2  ;;  %v817_v37 = vsub.f32 %v2040_v50, %v2102_v2 }
 0x168   :  { %v818_v47 = vsub.f32 %v2049_v36, %v2102_v2  ;;  %v819_v52 = vsub.f32 %v2055_v44, %v2102_v2  ;;  %v820_v34 = vsub.f32 %v2062_v22, %v2102_v2  ;;  %v821_v4 = vsub.f32 %v2068_v48, %v2102_v2 }
 0x169   :  { %v827_v39 = vmul.f32 %v814_v61, %v814_v61  ;;  %v828_v11 = vmul.f32 %v815_v30, %v815_v30  ;;  %v829_v49 = vmul.f32 %v816_v35, %v816_v35  ;;  %v830_v19 = vmul.f32 %v817_v37, %v817_v37 }
 0x16a   :  { %v831_v59 = vmul.f32 %v818_v47, %v818_v47  ;;  %v832_v6 = vmul.f32 %v819_v52, %v819_v52  ;;  %v822_v12 = vsub.f32 %v2075_v33, %v2102_v2  ;;  %v833_v38 = vmul.f32 %v820_v34, %v820_v34 }
 0x16b   :  { %v840_v53 = vsel %vm779_vm0, %v827_v39, 0.0  ;;  %v841_v43 = vsel %vm779_vm0, %v828_v11, 0.0  ;;  %v843_v63 = vsel %vm779_vm0, %v829_v49, 0.0  ;;  %v845_v8 = vsel %vm779_vm0, %v830_v19, 0.0 }
 0x16c   :  { %v842_v54 = vadd.f32 %v841_v43, %v840_v53  ;;  %v847_v40 = vsel %vm779_vm0, %v831_v59, 0.0  ;;  %v823_v13 = vsub.f32 %v2081_v56, %v2102_v2  ;;  %v834_v14 = vmul.f32 %v821_v4, %v821_v4  ;;  %v872_v43 = vld [vmem:[%s2218_s3] sm:$0x1] }
 0x16d   :  { %v849_v15 = vsel %vm779_vm0, %v832_v6, 0.0  ;;  %v824_v17 = vsub.f32 %v2086_v26, %v2102_v2  ;;  %v835_v18 = vmul.f32 %v822_v12, %v822_v12  ;;  %v851_v42 = vsel %vm779_vm0, %v833_v38, 0.0  ;;  %v895_v4 = vld [vmem:[%s2219_s4] sm:$0x1] }
 0x16e   :  { %v844_v1 = vadd.f32 %v843_v63, %v842_v54  ;;  %v825_v21 = vsub.f32 %v2094_v23, %v2102_v2  ;;  %v836_v60 = vmul.f32 %v823_v13, %v823_v13  ;;  %v853_v24 = vsel %vm779_vm0, %v834_v14, 0.0 }
 0x16f   :  { %v826_v29 = vsub.f32 %v2098_v57, %v2102_v2  ;;  %v837_v45 = vmul.f32 %v824_v17, %v824_v17  ;;  %v855_v31 = vsel %vm779_vm0, %v835_v18, 0.0  ;;  %v877_v19 = vlaneseq }
 0x170   :  { %v846_v10 = vadd.f32 %v845_v8, %v844_v1  ;;  %v838_v46 = vmul.f32 %v825_v21, %v825_v21  ;;  %v857_v58 = vsel %vm779_vm0, %v836_v60, 0.0 }
 0x171   :  { %v839_v0 = vmul.f32 %v826_v29, %v826_v29  ;;  %v859_v51 = vsel %vm779_vm0, %v837_v45, 0.0  ;;  %v878_v53 = vshrl.u32 %v877_v19, 7 }
 0x172   :  { %v848_v41 = vadd.f32 %v847_v40, %v846_v10  ;;  %v861_v7 = vsel %vm779_vm0, %v838_v46, 0.0 }
 0x173   :  { %v863_v28 = vsel %vm803_vm1, %v839_v0, 0.0  ;;  %v879_v34 = vsub.s32 0, %v878_v53 }
 0x174   :  { %v850_v16 = vadd.f32 %v849_v15, %v848_v41 }
 0x176   :  { %v852_v20 = vadd.f32 %v851_v42, %v850_v16 }
 0x178   :  { %v854_v27 = vadd.f32 %v853_v24, %v852_v20 }
 0x17a   :  { %v856_v55 = vadd.f32 %v855_v31, %v854_v27 }
 0x17c   :  { %v858_v62 = vadd.f32 %v857_v58, %v856_v55 }
 0x17e   :  { %v860_v5 = vadd.f32 %v859_v51, %v858_v62 }
 0x180   :  { %v862_v9 = vadd.f32 %v861_v7, %v860_v5 }
 0x182   :  { %v864_v61 = vadd.f32 %v863_v28, %v862_v9 }
 0x184   :  { %v865_v30 = vrot.slane %v864_v61, 4 }
 0x186   :  { %v866_v35 = vadd.f32 %v865_v30, %v864_v61 }
 0x188   :  { %v867_v37 = vrot.slane %v866_v35, 2 }
 0x18a   :  { %v868_v39 = vadd.f32 %v867_v37, %v866_v35 }
 0x18c   :  { %v869_v11 = vrot.slane %v868_v39, 1 }
 0x18e   :  { %v870_v47 = vadd.f32 %v869_v11, %v868_v39 }
 0x190   :  { %v871_v49 = vmul.f32 0.010204081, %v870_v47 }
 0x192   :  { %v873_v52 = vadd.f32 1e-05, %v871_v49 }
 0x194   :  { %1232 = vrsqrt.f32 %v873_v52 }
 0x1a1   :  { %v1233_v54 = vpop.eup %1232 }
 0x1a2   :  { %v875_v59 = vmul.f32 %v1233_v54, %v872_v43 }
 0x1a4   :  { %v880_v63 = vrot.slane %v875_v59, %v879_v34  ;;  %v896_v1 = vmul.f32 %v875_v59, %v2102_v2 }
 0x1a6   :  { %v882_v6 = vmul.f32 %v880_v63, %v2029_v25  ;;  %v883_v8 = vmul.f32 %v880_v63, %v2026_v3  ;;  %v897_v10 = vsub.f32 %v895_v4, %v896_v1  ;;  %v884_v12 = vmul.f32 %v880_v63, %v2032_v32 }
 0x1a7   :  { %v885_v38 = vmul.f32 %v880_v63, %v2040_v50  ;;  %v886_v40 = vmul.f32 %v880_v63, %v2049_v36  ;;  %v887_v41 = vmul.f32 %v880_v63, %v2055_v44  ;;  %v888_v13 = vmul.f32 %v880_v63, %v2062_v22 }
 0x1a8   :  { %v889_v2 = vmul.f32 %v880_v63, %v2068_v48  ;;  %v890_v14 = vmul.f32 %v880_v63, %v2075_v33  ;;  %v902_v15 = vrot.slane %v897_v10, %v879_v34  ;;  %v891_v25 = vmul.f32 %v880_v63, %v2081_v56 }
 0x1a9   :  { %v892_v3 = vmul.f32 %v880_v63, %v2086_v26  ;;  %v893_v16 = vmul.f32 %v880_v63, %v2094_v23  ;;  %v894_v32 = vmul.f32 %v880_v63, %v2098_v57 }
 0x1aa   :  { %v904_v50 = vadd.f32 %v902_v15, %v882_v6  ;;  %v905_v17 = vadd.f32 %v902_v15, %v883_v8  ;;  %v906_v36 = vadd.f32 %v902_v15, %v884_v12  ;;  %v907_v18 = vadd.f32 %v902_v15, %v885_v38 }
 0x1ab   :  { %v908_v44 = vadd.f32 %v902_v15, %v886_v40  ;;  %v909_v42 = vadd.f32 %v902_v15, %v887_v41  ;;  %v910_v22 = vadd.f32 %v902_v15, %v888_v13  ;;  %v911_v20 = vadd.f32 %v902_v15, %v889_v2 }
 0x1ac   :  { %v912_v48 = vadd.f32 %v902_v15, %v890_v14  ;;  %v913_v21 = vadd.f32 %v902_v15, %v891_v25  ;;  %v914_v33 = vadd.f32 %v902_v15, %v892_v3  ;;  %v915_v60 = vadd.f32 %v902_v15, %v893_v16 }
 0x1ad   :  { %v916_v24 = vadd.f32 %v902_v15, %v894_v32  ;;  %v917_v56 = vmax.f32 %v904_v50, 0.0  ;;  %v918_v27 = vmax.f32 %v905_v17, 0.0  ;;  %v919_v26 = vmax.f32 %v906_v36, 0.0 }
 0x1ae   :  { %v920_v29 = vmax.f32 %v907_v18, 0.0  ;;  %v921_v23 = vmax.f32 %v908_v44, 0.0  ;;  %v922_v45 = vmax.f32 %v909_v42, 0.0  ;;  %v923_v57 = vmax.f32 %v910_v22, 0.0 }
 0x1af   :  { %v924_v31 = vmax.f32 %v911_v20, 0.0  ;;  %v925_v55 = vmax.f32 %v912_v48, 0.0  ;;  %v926_v46 = vmax.f32 %v913_v21, 0.0  ;;  %v927_v58 = vmax.f32 %v914_v33, 0.0  ;;  %930 = vst.msk [vmem:[%s2220_s5] sm:$0xff] %vm779_vm0, %v917_v56  ;;  %931 = vst.msk [vmem:[%s2220_s5 + $0x8] sm:$0xff] %vm779_vm0, %v918_v27 }
 0x1b0   :  { %932 = vst.msk [vmem:[%s2220_s5 + $0x10] sm:$0xff] %vm779_vm0, %v919_v26  ;;  %v928_v62 = vmax.f32 %v915_v60, 0.0  ;;  %v929_v0 = vmax.f32 %v916_v24, 0.0  ;;  %933 = vst.msk [vmem:[%s2220_s5 + $0x18] sm:$0xff] %vm779_vm0, %v920_v29 }
 0x1b1   :  { %934 = vst.msk [vmem:[%s2220_s5 + $0x20] sm:$0xff] %vm779_vm0, %v921_v23  ;;  %935 = vst.msk [vmem:[%s2220_s5 + $0x28] sm:$0xff] %vm779_vm0, %v922_v45 }
 0x1b2   :  { %936 = vst.msk [vmem:[%s2220_s5 + $0x30] sm:$0xff] %vm779_vm0, %v923_v57  ;;  %937 = vst.msk [vmem:[%s2220_s5 + $0x38] sm:$0xff] %vm779_vm0, %v924_v31 }
 0x1b3   :  { %938 = vst.msk [vmem:[%s2220_s5 + $0x40] sm:$0xff] %vm779_vm0, %v925_v55  ;;  %939 = vst.msk [vmem:[%s2220_s5 + $0x48] sm:$0xff] %vm779_vm0, %v926_v46 }
 0x1b4   :  { %940 = vst.msk [vmem:[%s2220_s5 + $0x50] sm:$0xff] %vm779_vm0, %v927_v58  ;;  %941 = vst.msk [vmem:[%s2220_s5 + $0x58] sm:$0xff] %vm779_vm0, %v928_v62 }
 0x1b5   :  { %942 = vst.msk [vmem:[%s2220_s5 + $0x60] sm:$0x3] %vm803_vm1, %v929_v0 }

// kernel: tile.15
= control target key start
LH: loop header
LB: loop body
LE: loop exit
PB: predicated region body
PF: predicated region fallthrough
CT: control target
= control target key end

     0   :  { %vm3_vm0 = vcmask 523264   ;;  %s16_s6 = smov 3  ;;  %s100_s0 = inlined_call_operand.vmem [shape: f32[2,25,64], index: 0, kind: input, shape index: {}]   ;;  %s101_s1 = inlined_call_operand.vmem [shape: f32[50,64], index: 1, kind: output, shape index: {}]  }
   0x1   :  { %v2_v0 = vld [vmem:[%s100_s0] sm:$0xff]   ;;  %v36_v1 = vld [vmem:[%s100_s0 + $0x8] sm:$0xff]   ;;  %v38_v2 = vld [vmem:[%s100_s0 + $0x10] sm:$0xff]  }
   0x2   :  { %4 = vst.msk [vmem:[%s101_s1] sm:$0xff] %vm3_vm0, %v2_v0   ;;  %37 = vst.msk [vmem:[%s101_s1 + $0x8] sm:$0xff] %vm3_vm0, %v36_v1   ;;  %v40_v3 = vld [vmem:[%s100_s0 + $0x18] ss:$8 sm:%s16_s6]  }
   0x3   :  { %39 = vst.msk [vmem:[%s101_s1 + $0x10] sm:$0xff] %vm3_vm0, %v38_v2   ;;  %v42_v4 = vld [vmem:[%s100_s0 + $0x21] sm:$0xff]   ;;  %v44_v5 = vld [vmem:[%s100_s0 + $0x29] sm:$0xff]   ;;  %41 = vst.msk [vmem:[%s101_s1 + $0x18] sm:$0x3] %vm3_vm0, %v40_v3  }
   0x4   :  { %43 = vst.msk [vmem:[%s101_s1 + $0x1a] sm:$0xff] %vm3_vm0, %v42_v4   ;;  %45 = vst.msk [vmem:[%s101_s1 + $0x22] sm:$0xff] %vm3_vm0, %v44_v5   ;;  %v46_v6 = vld [vmem:[%s100_s0 + $0x31] sm:$0xff]  }
   0x5   :  { %47 = vst.msk [vmem:[%s101_s1 + $0x2a] sm:$0xff] %vm3_vm0, %v46_v6  }

// kernel: forward.6
= control target key start
LH: loop header
LB: loop body
LE: loop exit
PB: predicated region body
PF: predicated region fallthrough
CT: control target
= control target key end

     0   :  { %vm499_vm0 = vcmask 523264   ;;  %vm502_vm1 = vcmask 517120   ;;  %s1173_s1 = inlined_call_operand.vmem [shape: f32[1024,64], index: 1, kind: input, shape index: {}]   ;;  %s1174_s3 = inlined_call_operand.vmem [shape: f32[1,64], index: 3, kind: input, shape index: {}]   ;;  %s1175_s4 = inlined_call_operand.vmem [shape: f32[1,64], index: 4, kind: input, shape index: {}]   ;;  %s1176_s0 = inlined_call_operand.vmem [shape: f32[18,1024], index: 0, kind: input, shape index: {}]   ;;  %s1177_s2 = inlined_call_operand.vmem [shape: f32[1,64], index: 2, kind: input, shape index: {}]   ;;  %s1178_s5 = inlined_call_operand.vmem [shape: f32[18,64], index: 5, kind: output, shape index: {}]  }
   0x1   :  { %v75_v0 = vld [vmem:[%s1173_s1 + $0xf8] sm:$0xff]  ;;  %v74_v4 = vld [vmem:[%s1173_s1 + $0xf0] sm:$0xff]  ;;  %v73_v8 = vld [vmem:[%s1173_s1 + $0xe8] sm:$0xff] }
   0x2   :  { %v107_v1 = vld [vmem:[%s1173_s1 + $0x1f8] sm:$0xff]  ;;  %509 = vmatprep.subr.mxu0 %v75_v0  ;;  %v106_v5 = vld [vmem:[%s1173_s1 + $0x1f0] sm:$0xff]  ;;  %v105_v9 = vld [vmem:[%s1173_s1 + $0x1e8] sm:$0xff] }
   0x3   :  { %v59_v2 = vld [vmem:[%s1173_s1 + $0x78] sm:$0xff]  ;;  %550 = vmatprep.subr.mxu1 %v107_v1  ;;  %v58_v6 = vld [vmem:[%s1173_s1 + $0x70] sm:$0xff]  ;;  %v57_v10 = vld [vmem:[%s1173_s1 + $0x68] sm:$0xff] }
   0x4   :  { %v91_v3 = vld [vmem:[%s1173_s1 + $0x178] sm:$0xff]  ;;  %510 = vmatpush3.msra.mxu0 %v59_v2  ;;  %v90_v7 = vld [vmem:[%s1173_s1 + $0x170] sm:$0xff]  ;;  %v89_v11 = vld [vmem:[%s1173_s1 + $0x168] sm:$0xff] }
   0x5   :  { %551 = vmatpush3.msra.mxu1 %v91_v3  ;;  %511 = vmatprep.subr.mxu0 %v74_v4  ;;  %v72_v12 = vld [vmem:[%s1173_s1 + $0xe0] sm:$0xff]  ;;  %v71_v16 = vld [vmem:[%s1173_s1 + $0xd8] sm:$0xff]  ;;  %v70_v20 = vld [vmem:[%s1173_s1 + $0xd0] sm:$0xff] }
   0x6   :  { %552 = vmatprep.subr.mxu1 %v106_v5  ;;  %512 = vmatpush3.msra.mxu0 %v58_v6  ;;  %v104_v13 = vld [vmem:[%s1173_s1 + $0x1e0] sm:$0xff]  ;;  %v103_v17 = vld [vmem:[%s1173_s1 + $0x1d8] sm:$0xff]  ;;  %v102_v21 = vld [vmem:[%s1173_s1 + $0x1d0] sm:$0xff] }
   0x7   :  { %553 = vmatpush3.msra.mxu1 %v90_v7  ;;  %513 = vmatprep.subr.mxu0 %v73_v8  ;;  %v56_v14 = vld [vmem:[%s1173_s1 + $0x60] sm:$0xff]  ;;  %v55_v18 = vld [vmem:[%s1173_s1 + $0x58] sm:$0xff]  ;;  %v54_v22 = vld [vmem:[%s1173_s1 + $0x50] sm:$0xff] }
   0x8   :  { %554 = vmatprep.subr.mxu1 %v105_v9  ;;  %v88_v15 = vld [vmem:[%s1173_s1 + $0x160] sm:$0xff]  ;;  %514 = vmatpush3.msra.mxu0 %v57_v10  ;;  %v87_v19 = vld [vmem:[%s1173_s1 + $0x158] sm:$0xff]  ;;  %v86_v23 = vld [vmem:[%s1173_s1 + $0x150] sm:$0xff] }
   0x9   :  { %555 = vmatpush3.msra.mxu1 %v89_v11  ;;  %515 = vmatprep.subr.mxu0 %v72_v12  ;;  %v69_v24 = vld [vmem:[%s1173_s1 + $0xc8] sm:$0xff]  ;;  %v68_v28 = vld [vmem:[%s1173_s1 + $0xc0] sm:$0xff]  ;;  %v67_v32 = vld [vmem:[%s1173_s1 + $0xb8] sm:$0xff] }
   0xa   :  { %556 = vmatprep.subr.mxu1 %v104_v13  ;;  %516 = vmatpush3.msra.mxu0 %v56_v14  ;;  %v101_v25 = vld [vmem:[%s1173_s1 + $0x1c8] sm:$0xff]  ;;  %v100_v29 = vld [vmem:[%s1173_s1 + $0x1c0] sm:$0xff]  ;;  %v99_v33 = vld [vmem:[%s1173_s1 + $0x1b8] sm:$0xff] }
   0xb   :  { %557 = vmatpush3.msra.mxu1 %v88_v15  ;;  %517 = vmatprep.subr.mxu0 %v71_v16  ;;  %v53_v26 = vld [vmem:[%s1173_s1 + $0x48] sm:$0xff]  ;;  %v52_v30 = vld [vmem:[%s1173_s1 + $0x40] sm:$0xff]  ;;  %v51_v34 = vld [vmem:[%s1173_s1 + $0x38] sm:$0xff] }
   0xc   :  { %558 = vmatprep.subr.mxu1 %v103_v17  ;;  %518 = vmatpush3.msra.mxu0 %v55_v18  ;;  %v85_v27 = vld [vmem:[%s1173_s1 + $0x148] sm:$0xff]  ;;  %v84_v31 = vld [vmem:[%s1173_s1 + $0x140] sm:$0xff]  ;;  %v83_v35 = vld [vmem:[%s1173_s1 + $0x138] sm:$0xff] }
   0xd   :  { %559 = vmatpush3.msra.mxu1 %v87_v19  ;;  %519 = vmatprep.subr.mxu0 %v70_v20  ;;  %v66_v36 = vld [vmem:[%s1173_s1 + $0xb0] sm:$0xff]  ;;  %v65_v40 = vld [vmem:[%s1173_s1 + $0xa8] sm:$0xff]  ;;  %v64_v44 = vld [vmem:[%s1173_s1 + $0xa0] sm:$0xff] }
   0xe   :  { %560 = vmatprep.subr.mxu1 %v102_v21  ;;  %520 = vmatpush3.msra.mxu0 %v54_v22  ;;  %v98_v37 = vld [vmem:[%s1173_s1 + $0x1b0] sm:$0xff]  ;;  %v97_v41 = vld [vmem:[%s1173_s1 + $0x1a8] sm:$0xff]  ;;  %v96_v45 = vld [vmem:[%s1173_s1 + $0x1a0] sm:$0xff] }
   0xf   :  { %561 = vmatpush3.msra.mxu1 %v86_v23  ;;  %521 = vmatprep.subr.mxu0 %v69_v24  ;;  %v50_v38 = vld [vmem:[%s1173_s1 + $0x30] sm:$0xff]  ;;  %v49_v42 = vld [vmem:[%s1173_s1 + $0x28] sm:$0xff]  ;;  %v48_v46 = vld [vmem:[%s1173_s1 + $0x20] sm:$0xff] }
  0x10   :  { %562 = vmatprep.subr.mxu1 %v101_v25  ;;  %522 = vmatpush3.msra.mxu0 %v53_v26  ;;  %v82_v39 = vld [vmem:[%s1173_s1 + $0x130] sm:$0xff]  ;;  %v81_v43 = vld [vmem:[%s1173_s1 + $0x128] sm:$0xff]  ;;  %v80_v47 = vld [vmem:[%s1173_s1 + $0x120] sm:$0xff] }
  0x11   :  { %563 = vmatpush3.msra.mxu1 %v85_v27  ;;  %523 = vmatprep.subr.mxu0 %v68_v28  ;;  %v63_v48 = vld [vmem:[%s1173_s1 + $0x98] sm:$0xff]  ;;  %v62_v52 = vld [vmem:[%s1173_s1 + $0x90] sm:$0xff]  ;;  %v61_v56 = vld [vmem:[%s1173_s1 + $0x88] sm:$0xff] }
  0x12   :  { %564 = vmatprep.subr.mxu1 %v100_v29  ;;  %524 = vmatpush3.msra.mxu0 %v52_v30  ;;  %v95_v49 = vld [vmem:[%s1173_s1 + $0x198] sm:$0xff]  ;;  %v94_v53 = vld [vmem:[%s1173_s1 + $0x190] sm:$0xff]  ;;  %v93_v57 = vld [vmem:[%s1173_s1 + $0x188] sm:$0xff] }
  0x13   :  { %565 = vmatpush3.msra.mxu1 %v84_v31  ;;  %525 = vmatprep.subr.mxu0 %v67_v32  ;;  %v47_v50 = vld [vmem:[%s1173_s1 + $0x18] sm:$0xff]  ;;  %v46_v54 = vld [vmem:[%s1173_s1 + $0x10] sm:$0xff]  ;;  %v45_v58 = vld [vmem:[%s1173_s1 + $0x8] sm:$0xff] }
  0x14   :  { %566 = vmatprep.subr.mxu1 %v99_v33  ;;  %526 = vmatpush3.msra.mxu0 %v51_v34  ;;  %v79_v51 = vld [vmem:[%s1173_s1 + $0x118] sm:$0xff]  ;;  %v78_v55 = vld [vmem:[%s1173_s1 + $0x110] sm:$0xff]  ;;  %v77_v59 = vld [vmem:[%s1173_s1 + $0x108] sm:$0xff] }
  0x15   :  { %567 = vmatpush3.msra.mxu1 %v83_v35  ;;  %527 = vmatprep.subr.mxu0 %v66_v36  ;;  %v60_v60 = vld [vmem:[%s1173_s1 + $0x80] sm:$0xff]  ;;  %v21_v63 = vld [vmem:[%s1176_s0 + $0x8] sm:$0xff]  ;;  %v23_v2 = vld [vmem:[%s1176_s0 + $0x18] sm:$0xff] }
  0x16   :  { %568 = vmatprep.subr.mxu1 %v98_v37  ;;  %528 = vmatpush3.msra.mxu0 %v50_v38  ;;  %v92_v61 = vld [vmem:[%s1173_s1 + $0x180] sm:$0xff]  ;;  %v139_v3 = vld [vmem:[%s1173_s1 + $0x2f8] sm:$0xff]  ;;  %v22_v5 = vld [vmem:[%s1176_s0 + $0x10] sm:$0xff] }
  0x17   :  { %569 = vmatpush3.msra.mxu1 %v82_v39  ;;  %529 = vmatprep.subr.mxu0 %v65_v40  ;;  %v44_v62 = vld [vmem:[%s1173_s1] sm:$0xff]  ;;  %v171_v4 = vld [vmem:[%s1173_s1 + $0x3f8] sm:$0xff]  ;;  %v138_v8 = vld [vmem:[%s1173_s1 + $0x2f0] sm:$0xff] }
  0x18   :  { %570 = vmatprep.subr.mxu1 %v97_v41  ;;  %530 = vmatpush3.msra.mxu0 %v49_v42  ;;  %v76_v0 = vld [vmem:[%s1173_s1 + $0x100] sm:$0xff]  ;;  %v123_v6 = vld [vmem:[%s1173_s1 + $0x278] sm:$0xff]  ;;  %v170_v9 = vld [vmem:[%s1173_s1 + $0x3f0] sm:$0xff] }
  0x19   :  { %571 = vmatpush3.msra.mxu1 %v81_v43  ;;  %531 = vmatprep.subr.mxu0 %v64_v44  ;;  %v20_v1 = vld [vmem:[%s1176_s0] sm:$0xff]  ;;  %v155_v7 = vld [vmem:[%s1173_s1 + $0x378] sm:$0xff]  ;;  %v122_v10 = vld [vmem:[%s1173_s1 + $0x270] sm:$0xff] }
  0x1a   :  { %572 = vmatprep.subr.mxu1 %v96_v45  ;;  %532 = vmatpush3.msra.mxu0 %v48_v46  ;;  %v154_v11 = vld [vmem:[%s1173_s1 + $0x370] sm:$0xff]  ;;  %v137_v12 = vld [vmem:[%s1173_s1 + $0x2e8] sm:$0xff]  ;;  %v136_v16 = vld [vmem:[%s1173_s1 + $0x2e0] sm:$0xff] }
  0x1b   :  { %573 = vmatpush3.msra.mxu1 %v80_v47  ;;  %533 = vmatprep.subr.mxu0 %v63_v48  ;;  %v169_v13 = vld [vmem:[%s1173_s1 + $0x3e8] sm:$0xff]  ;;  %v168_v17 = vld [vmem:[%s1173_s1 + $0x3e0] sm:$0xff]  ;;  %v135_v20 = vld [vmem:[%s1173_s1 + $0x2d8] sm:$0xff] }
  0x1c   :  { %574 = vmatprep.subr.mxu1 %v95_v49  ;;  %534 = vmatpush3.msra.mxu0 %v47_v50  ;;  %v121_v14 = vld [vmem:[%s1173_s1 + $0x268] sm:$0xff]  ;;  %v120_v18 = vld [vmem:[%s1173_s1 + $0x260] sm:$0xff]  ;;  %v167_v21 = vld [vmem:[%s1173_s1 + $0x3d8] sm:$0xff] }
  0x1d   :  { %575 = vmatpush3.msra.mxu1 %v79_v51  ;;  %535 = vmatprep.subr.mxu0 %v62_v52  ;;  %v153_v15 = vld [vmem:[%s1173_s1 + $0x368] sm:$0xff]  ;;  %v152_v19 = vld [vmem:[%s1173_s1 + $0x360] sm:$0xff]  ;;  %v119_v22 = vld [vmem:[%s1173_s1 + $0x258] sm:$0xff] }
  0x1e   :  { %576 = vmatprep.subr.mxu1 %v94_v53  ;;  %536 = vmatpush3.msra.mxu0 %v46_v54  ;;  %v151_v23 = vld [vmem:[%s1173_s1 + $0x358] sm:$0xff]  ;;  %v134_v24 = vld [vmem:[%s1173_s1 + $0x2d0] sm:$0xff]  ;;  %v133_v28 = vld [vmem:[%s1173_s1 + $0x2c8] sm:$0xff] }
  0x1f   :  { %577 = vmatpush3.msra.mxu1 %v78_v55  ;;  %537 = vmatprep.subr.mxu0 %v61_v56  ;;  %v166_v25 = vld [vmem:[%s1173_s1 + $0x3d0] sm:$0xff]  ;;  %v165_v29 = vld [vmem:[%s1173_s1 + $0x3c8] sm:$0xff]  ;;  %v132_v32 = vld [vmem:[%s1173_s1 + $0x2c0] sm:$0xff] }
  0x20   :  { %578 = vmatprep.subr.mxu1 %v93_v57  ;;  %538 = vmatpush3.msra.mxu0 %v45_v58  ;;  %v118_v26 = vld [vmem:[%s1173_s1 + $0x250] sm:$0xff]  ;;  %v117_v30 = vld [vmem:[%s1173_s1 + $0x248] sm:$0xff]  ;;  %v164_v33 = vld [vmem:[%s1173_s1 + $0x3c0] sm:$0xff] }
  0x21   :  { %579 = vmatpush3.msra.mxu1 %v77_v59  ;;  %539 = vmatprep.subr.mxu0 %v60_v60  ;;  %v150_v27 = vld [vmem:[%s1173_s1 + $0x350] sm:$0xff]  ;;  %v149_v31 = vld [vmem:[%s1173_s1 + $0x348] sm:$0xff]  ;;  %v116_v34 = vld [vmem:[%s1173_s1 + $0x240] sm:$0xff] }
  0x22   :  { %580 = vmatprep.subr.mxu1 %v92_v61  ;;  %540 = vmatpush3.msra.mxu0 %v44_v62  ;;  %v148_v35 = vld [vmem:[%s1173_s1 + $0x340] sm:$0xff]  ;;  %v131_v36 = vld [vmem:[%s1173_s1 + $0x2b8] sm:$0xff]  ;;  %v130_v40 = vld [vmem:[%s1173_s1 + $0x2b0] sm:$0xff] }
  0x23   :  { %243 = vmatprep.mubr.f32.mxu0 %v21_v63  ;;  %581 = vmatpush3.msra.mxu1 %v76_v0  ;;  %v163_v37 = vld [vmem:[%s1173_s1 + $0x3b8] sm:$0xff]  ;;  %v162_v41 = vld [vmem:[%s1173_s1 + $0x3b0] sm:$0xff]  ;;  %v129_v44 = vld [vmem:[%s1173_s1 + $0x2a8] sm:$0xff] }
  0x24   :  { %244 = vmatmul.mubr.f32.vlgmr.msra.gmra.mxu0 %v20_v1  ;;  %323 = vmatprep.mubr.f32.mxu1 %v23_v2  ;;  %v115_v38 = vld [vmem:[%s1173_s1 + $0x238] sm:$0xff]  ;;  %v114_v42 = vld [vmem:[%s1173_s1 + $0x230] sm:$0xff]  ;;  %v161_v45 = vld [vmem:[%s1173_s1 + $0x3a8] sm:$0xff] }
  0x25   :  { %591 = vmatprep.subr.mxu0 %v139_v3  ;;  %632 = vmatprep.subr.mxu1 %v171_v4  ;;  %v147_v39 = vld [vmem:[%s1173_s1 + $0x338] sm:$0xff]  ;;  %v146_v43 = vld [vmem:[%s1173_s1 + $0x330] sm:$0xff]  ;;  %v29_v46 = vld [vmem:[%s1176_s0 + $0x48] sm:$0xff] }
  0x26   :  { %324 = vmatmul.mubr.f32.vlgmr.msra.gmra.mxu1 %v22_v5  ;;  %592 = vmatpush3.msra.mxu0 %v123_v6  ;;  %v113_v47 = vld [vmem:[%s1173_s1 + $0x228] sm:$0xff]  ;;  %v28_v49 = vld [vmem:[%s1176_s0 + $0x40] sm:$0xff]  ;;  %v31_v52 = vld [vmem:[%s1176_s0 + $0x58] sm:$0xff] }
  0x27   :  { %633 = vmatpush3.msra.mxu1 %v155_v7  ;;  %593 = vmatprep.subr.mxu0 %v138_v8  ;;  %v145_v48 = vld [vmem:[%s1173_s1 + $0x328] sm:$0xff]  ;;  %v128_v50 = vld [vmem:[%s1173_s1 + $0x2a0] sm:$0xff]  ;;  %v127_v55 = vld [vmem:[%s1173_s1 + $0x298] sm:$0xff] }
  0x28   :  { %634 = vmatprep.subr.mxu1 %v170_v9  ;;  %594 = vmatpush3.msra.mxu0 %v122_v10  ;;  %v160_v51 = vld [vmem:[%s1173_s1 + $0x3a0] sm:$0xff]  ;;  %v30_v56 = vld [vmem:[%s1176_s0 + $0x50] sm:$0xff]  ;;  %v159_v57 = vld [vmem:[%s1173_s1 + $0x398] sm:$0xff] }
  0x29   :  { %635 = vmatpush3.msra.mxu1 %v154_v11  ;;  %595 = vmatprep.subr.mxu0 %v137_v12  ;;  %v112_v53 = vld [vmem:[%s1173_s1 + $0x220] sm:$0xff]  ;;  %v37_v58 = vld [vmem:[%s1176_s0 + $0x88] sm:$0x3]  ;;  %v111_v59 = vld [vmem:[%s1173_s1 + $0x218] sm:$0xff] }
  0x2a   :  { %636 = vmatprep.subr.mxu1 %v169_v13  ;;  %596 = vmatpush3.msra.mxu0 %v121_v14  ;;  %v144_v54 = vld [vmem:[%s1173_s1 + $0x320] sm:$0xff]  ;;  %v143_v60 = vld [vmem:[%s1173_s1 + $0x318] sm:$0xff]  ;;  %v126_v62 = vld [vmem:[%s1173_s1 + $0x290] sm:$0xff] }
  0x2b   :  { %637 = vmatpush3.msra.mxu1 %v153_v15  ;;  %597 = vmatprep.subr.mxu0 %v136_v16  ;;  %v36_v61 = vld [vmem:[%s1176_s0 + $0x80] sm:$0x3]  ;;  %v158_v63 = vld [vmem:[%s1173_s1 + $0x390] sm:$0xff]  ;;  %v39_v0 = vld [vmem:[%s1176_s0 + $0x98] sm:$0x3] }
  0x2c   :  { %638 = vmatprep.subr.mxu1 %v168_v17  ;;  %598 = vmatpush3.msra.mxu0 %v120_v18  ;;  %v110_v1 = vld [vmem:[%s1173_s1 + $0x210] sm:$0xff]  ;;  %v125_v3 = vld [vmem:[%s1173_s1 + $0x288] sm:$0xff]  ;;  %v124_v8 = vld [vmem:[%s1173_s1 + $0x280] sm:$0xff] }
  0x2d   :  { %639 = vmatpush3.msra.mxu1 %v152_v19  ;;  %599 = vmatprep.subr.mxu0 %v135_v20  ;;  %v142_v2 = vld [vmem:[%s1173_s1 + $0x310] sm:$0xff]  ;;  %v157_v5 = vld [vmem:[%s1173_s1 + $0x388] sm:$0xff]  ;;  %v156_v9 = vld [vmem:[%s1173_s1 + $0x380] sm:$0xff] }
  0x2e   :  { %640 = vmatprep.subr.mxu1 %v167_v21  ;;  %600 = vmatpush3.msra.mxu0 %v119_v22  ;;  %v38_v4 = vld [vmem:[%s1176_s0 + $0x90] sm:$0x3]  ;;  %v109_v6 = vld [vmem:[%s1173_s1 + $0x208] sm:$0xff]  ;;  %v108_v10 = vld [vmem:[%s1173_s1 + $0x200] sm:$0xff] }
  0x2f   :  { %641 = vmatpush3.msra.mxu1 %v151_v23  ;;  %601 = vmatprep.subr.mxu0 %v134_v24  ;;  %v141_v7 = vld [vmem:[%s1173_s1 + $0x308] sm:$0xff]  ;;  %v140_v12 = vld [vmem:[%s1173_s1 + $0x300] sm:$0xff]  ;;  %v27_v13 = vld [vmem:[%s1176_s0 + $0x38] sm:$0xff] }
  0x30   :  { %642 = vmatprep.subr.mxu1 %v166_v25  ;;  %602 = vmatpush3.msra.mxu0 %v118_v26  ;;  %v25_v11 = vld [vmem:[%s1176_s0 + $0x28] sm:$0xff]  ;;  %v24_v14 = vld [vmem:[%s1176_s0 + $0x20] sm:$0xff]  ;;  %v26_v15 = vld [vmem:[%s1176_s0 + $0x30] sm:$0xff] }
  0x31   :  { %643 = vmatpush3.msra.mxu1 %v150_v27  ;;  %603 = vmatprep.subr.mxu0 %v133_v28  ;;  %v33_v16 = vld [vmem:[%s1176_s0 + $0x68] sm:$0xff]  ;;  %v35_v17 = vld [vmem:[%s1176_s0 + $0x78] sm:$0xff]  ;;  %v32_v18 = vld [vmem:[%s1176_s0 + $0x60] sm:$0xff] }
  0x32   :  { %644 = vmatprep.subr.mxu1 %v165_v29  ;;  %604 = vmatpush3.msra.mxu0 %v117_v30  ;;  %v34_v19 = vld [vmem:[%s1176_s0 + $0x70] sm:$0xff]  ;;  %v41_v20 = vld [vmem:[%s1176_s0 + $0xa8] sm:$0x3]  ;;  %v43_v21 = vld [vmem:[%s1176_s0 + $0xb8] sm:$0x3] }
  0x33   :  { %645 = vmatpush3.msra.mxu1 %v149_v31  ;;  %605 = vmatprep.subr.mxu0 %v132_v32  ;;  %v40_v22 = vld [vmem:[%s1176_s0 + $0xa0] sm:$0x3]  ;;  %v42_v23 = vld [vmem:[%s1176_s0 + $0xb0] sm:$0x3] }
  0x34   :  { %646 = vmatprep.subr.mxu1 %v164_v33  ;;  %606 = vmatpush3.msra.mxu0 %v116_v34 }
  0x35   :  { %647 = vmatpush3.msra.mxu1 %v148_v35  ;;  %607 = vmatprep.subr.mxu0 %v131_v36  ;;  %v508_v35 = vld [vmem:[%s1177_s2] ss:$0 sm:$0xff] }
  0x36   :  { %648 = vmatprep.subr.mxu1 %v163_v37  ;;  %608 = vmatpush3.msra.mxu0 %v115_v38 }
  0x37   :  { %649 = vmatpush3.msra.mxu1 %v147_v39  ;;  %609 = vmatprep.subr.mxu0 %v130_v40 }
  0x38   :  { %650 = vmatprep.subr.mxu1 %v162_v41  ;;  %610 = vmatpush3.msra.mxu0 %v114_v42 }
  0x39   :  { %651 = vmatpush3.msra.mxu1 %v146_v43  ;;  %611 = vmatprep.subr.mxu0 %v129_v44 }
  0x3a   :  { %652 = vmatprep.subr.mxu1 %v161_v45  ;;  %248 = vmatprep.mubr.f32.mxu0 %v29_v46 }
  0x3b   :  { %612 = vmatpush3.msra.mxu0 %v113_v47  ;;  %653 = vmatpush3.msra.mxu1 %v145_v48 }
  0x3c   :  { %249 = vmatmul.mubr.f32.gmra.mxu0 %v28_v49  ;;  %613 = vmatprep.subr.mxu0 %v128_v50 }
  0x3d   :  { %654 = vmatprep.subr.mxu1 %v160_v51  ;;  %328 = vmatprep.mubr.f32.mxu1 %v31_v52 }
  0x3e   :  { %614 = vmatpush3.msra.mxu0 %v112_v53  ;;  %655 = vmatpush3.msra.mxu1 %v144_v54 }
  0x3f   :  { %615 = vmatprep.subr.mxu0 %v127_v55  ;;  %329 = vmatmul.mubr.f32.gmra.mxu1 %v30_v56 }
  0x40   :  { %656 = vmatprep.subr.mxu1 %v159_v57  ;;  %253 = vmatprep.mubr.f32.mxu0 %v37_v58 }
  0x41   :  { %616 = vmatpush3.msra.mxu0 %v111_v59  ;;  %657 = vmatpush3.msra.mxu1 %v143_v60 }
  0x42   :  { %254 = vmatmul.mubr.f32.gmra.mxu0 %v36_v61  ;;  %617 = vmatprep.subr.mxu0 %v126_v62 }
  0x43   :  { %658 = vmatprep.subr.mxu1 %v158_v63  ;;  %333 = vmatprep.mubr.f32.mxu1 %v39_v0 }
  0x44   :  { %618 = vmatpush3.msra.mxu0 %v110_v1  ;;  %659 = vmatpush3.msra.mxu1 %v142_v2 }
  0x45   :  { %619 = vmatprep.subr.mxu0 %v125_v3  ;;  %334 = vmatmul.mubr.f32.gmra.mxu1 %v38_v4 }
  0x46   :  { %660 = vmatprep.subr.mxu1 %v157_v5  ;;  %620 = vmatpush3.msra.mxu0 %v109_v6 }
  0x47   :  { %661 = vmatpush3.msra.mxu1 %v141_v7  ;;  %621 = vmatprep.subr.mxu0 %v124_v8 }
  0x48   :  { %662 = vmatprep.subr.mxu1 %v156_v9  ;;  %622 = vmatpush3.msra.mxu0 %v108_v10 }
  0x49   :  { %403 = vmatprep.mubr.f32.mxu0 %v25_v11  ;;  %663 = vmatpush3.msra.mxu1 %v140_v12 }
  0x4a   :  { %483 = vmatprep.mubr.f32.mxu1 %v27_v13  ;;  %404 = vmatmul.mubr.f32.vlgmr.msra.gmra.mxu0 %v24_v14 }
  0x4b   :  { %484 = vmatmul.mubr.f32.vlgmr.msra.gmra.mxu1 %v26_v15  ;;  %408 = vmatprep.mubr.f32.mxu0 %v33_v16 }
  0x4c   :  { %488 = vmatprep.mubr.f32.mxu1 %v35_v17 }
  0x4e   :  { %409 = vmatmul.mubr.f32.gmra.mxu0 %v32_v18 }
  0x4f   :  { %489 = vmatmul.mubr.f32.gmra.mxu1 %v34_v19  ;;  %413 = vmatprep.mubr.f32.mxu0 %v41_v20 }
  0x50   :  { %493 = vmatprep.mubr.f32.mxu1 %v43_v21 }
  0x52   :  { %414 = vmatmul.mubr.f32.gmra.mxu0 %v40_v22 }
  0x53   :  { %494 = vmatmul.mubr.f32.gmra.mxu1 %v42_v23 }
  0xe4   :  { %v541_v24 = vpop.f32.mrf.mxu0 }
  0xe6   :  { %v582_v25 = vpop.f32.mrf.mxu1  ;;  %v542_v26 = vpop.f32.mrf.mxu0 }
  0xe7   :  { %v543_v33 = vadd.f32 %v542_v26, %v541_v24 }
  0xe8   :  { %v583_v28 = vpop.f32.mrf.mxu1 }
  0xe9   :  { %v246_v39 = vadd.f32 %v543_v33, %v508_v35  ;;  %v584_v40 = vadd.f32 %v583_v28, %v582_v25 }
  0xeb   :  { %v326_v47 = vadd.f32 %v584_v40, %v246_v39 }
  0xfc   :  { %v544_v27 = vpop.f32.mrf.mxu0 }
  0xfe   :  { %v545_v30 = vpop.f32.mrf.mxu0 }
  0xff   :  { %v585_v29 = vpop.f32.mrf.mxu1  ;;  %v546_v37 = vadd.f32 %v545_v30, %v544_v27 }
 0x101   :  { %v586_v31 = vpop.f32.mrf.mxu1  ;;  %v251_v43 = vadd.f32 %v546_v37, %v508_v35 }
 0x102   :  { %v547_v32 = vpop.f32.mrf.mxu0  ;;  %v587_v44 = vadd.f32 %v586_v31, %v585_v29 }
 0x104   :  { %v548_v38 = vpop.f32.mrf.mxu0  ;;  %v331_v54 = vadd.f32 %v587_v44, %v251_v43 }
 0x105   :  { %v588_v34 = vpop.f32.mrf.mxu1  ;;  %v549_v48 = vadd.f32 %v548_v38, %v547_v32 }
 0x107   :  { %v589_v36 = vpop.f32.mrf.mxu1  ;;  %v256_v57 = vadd.f32 %v549_v48, %v508_v35 }
 0x108   :  { %v590_v58 = vadd.f32 %v589_v36, %v588_v34 }
 0x10a   :  { %v623_v41 = vpop.f32.mrf.mxu0  ;;  %v336_v3 = vadd.f32 %v590_v58, %v256_v57 }
 0x10b   :  { %v664_v42 = vpop.f32.mrf.mxu1 }
 0x10c   :  { %v624_v45 = vpop.f32.mrf.mxu0 }
 0x10d   :  { %v665_v46 = vpop.f32.mrf.mxu1  ;;  %v625_v49 = vadd.f32 %v624_v45, %v623_v41 }
 0x10e   :  { %v626_v50 = vpop.f32.mrf.mxu0  ;;  %v666_v53 = vadd.f32 %v665_v46, %v664_v42 }
 0x10f   :  { %v667_v51 = vpop.f32.mrf.mxu1  ;;  %v406_v52 = vadd.f32 %v625_v49, %v326_v47 }
 0x110   :  { %v627_v55 = vpop.f32.mrf.mxu0 }
 0x111   :  { %v668_v56 = vpop.f32.mrf.mxu1  ;;  %v486_v59 = vadd.f32 %v666_v53, %v406_v52  ;;  %v628_v60 = vadd.f32 %v627_v55, %v626_v50 }
 0x112   :  { %v629_v61 = vpop.f32.mrf.mxu0  ;;  %v669_v0 = vadd.f32 %v668_v56, %v667_v51 }
 0x113   :  { %v670_v62 = vpop.f32.mrf.mxu1  ;;  %500 = vst.msk [vmem:[%s1178_s5] sm:$0xff] %vm499_vm0, %v486_v59  ;;  %v411_v63 = vadd.f32 %v628_v60, %v331_v54 }
 0x114   :  { %v630_v1 = vpop.f32.mrf.mxu0 }
 0x115   :  { %v671_v2 = vpop.f32.mrf.mxu1  ;;  %v491_v4 = vadd.f32 %v669_v0, %v411_v63  ;;  %v631_v5 = vadd.f32 %v630_v1, %v629_v61 }
 0x116   :  { %v672_v7 = vadd.f32 %v671_v2, %v670_v62 }
 0x117   :  { %501 = vst.msk [vmem:[%s1178_s5 + $0x8] sm:$0xff] %vm499_vm0, %v491_v4  ;;  %v416_v6 = vadd.f32 %v631_v5, %v336_v3 }
 0x119   :  { %v496_v8 = vadd.f32 %v672_v7, %v416_v6 }
 0x11b   :  { %503 = vst.msk [vmem:[%s1178_s5 + $0x10] sm:$0x3] %vm502_vm1, %v496_v8 }

// kernel: forward.7
= control target key start
LH: loop header
LB: loop body
LE: loop exit
PB: predicated region body
PF: predicated region fallthrough
CT: control target
= control target key end

     0   :  { %vm51_vm0 = vcmask 523264   ;;  %vm60_vm1 = vcmask 517120   ;;  %v6392_v3 = vmov 0.0   ;;  %s6376_s0 = inlined_call_operand.vmem [shape: f32[50,64], index: 0, kind: input, shape index: {}]   ;;  %s6377_s1 = inlined_call_operand.vmem [shape: f32[9,64,64], index: 1, kind: input, shape index: {}]   ;;  %s6378_s2 = inlined_call_operand.vmem [shape: f32[9,64,64], index: 2, kind: input, shape index: {}]   ;;  %s6379_s3 = inlined_call_operand.vmem [shape: f32[50,64], index: 3, kind: input, shape index: {}]   ;;  %s6380_s4 = inlined_call_operand.vmem [shape: f32[50,64], index: 4, kind: input, shape index: {}]   ;;  %s6381_s5 = inlined_call_operand.vmem [shape: f32[1,64], index: 5, kind: input, shape index: {}]   ;;  %s6382_s6 = inlined_call_operand.vmem [shape: f32[1,64], index: 6, kind: input, shape index: {}]   ;;  %s6383_s7 = inlined_call_operand.vmem [shape: f32[1,64], index: 7, kind: input, shape index: {}]   ;;  %s6384_s8 = inlined_call_operand.vmem [shape: f32[1,64], index: 8, kind: input, shape index: {}]   ;;  %s6385_s9 = inlined_call_operand.vmem [shape: f32[50,1], index: 9, kind: input, shape index: {}]   ;;  %s6386_s10 = inlined_call_operand.vmem [shape: f32[2,50], index: 10, kind: input, shape index: {}]   ;;  %s6387_s11 = inlined_call_operand.vmem [shape: f32[1,64], index: 11, kind: input, shape index: {}]   ;;  %s6388_s12 = inlined_call_operand.vmem [shape: f32[1,64], index: 12, kind: input, shape index: {}]   ;;  %s6389_s13 = inlined_call_operand.vmem [shape: f32[64,10], index: 13, kind: input, shape index: {}]   ;;  %s6390_s14 = inlined_call_operand.vmem [shape: f32[1,10], index: 14, kind: input, shape index: {}]   ;;  %s6391_s15 = inlined_call_operand.hbm [shape: f32[2,10], index: 15, kind: output, shape index: {}]  }
   0x1   :  { %v4760_v0 = vld [vmem:[%s6385_s9] sm:$0xff]  ;;  %v4765_v1 = vld [vmem:[%s6385_s9 + $0x8] sm:$0xff]  ;;  %v4770_v2 = vld [vmem:[%s6385_s9 + $0x10] sm:$0xff]  ;;  %53 = vst.msk [vmem:[#allocation2 + $0x8] sm:$0xff] %vm51_vm0, %v6392_v3 }
   0x2   :  { %6396 = vst [vmem:[#allocation7_spill] sm:$0xff] %v4765_v1  ;;  %52 = vst.msk [vmem:[#allocation2] sm:$0xff] %vm51_vm0, %v6392_v3  ;;  %v4807_v4 = vld [vmem:[%s6385_s9 + $0x18] sm:$0xff]  ;;  %v4812_v5 = vld [vmem:[%s6385_s9 + $0x20] sm:$0xff] }
   0x3   :  { %54 = vst.msk [vmem:[#allocation2 + $0x10] sm:$0xff] %vm51_vm0, %v6392_v3  ;;  %55 = vst.msk [vmem:[#allocation2 + $0x18] sm:$0xff] %vm51_vm0, %v6392_v3  ;;  %v4817_v6 = vld [vmem:[%s6385_s9 + $0x28] sm:$0xff]  ;;  %v4822_v7 = vld [vmem:[%s6385_s9 + $0x30] sm:$0x3] }
   0x4   :  { %56 = vst.msk [vmem:[#allocation2 + $0x20] sm:$0xff] %vm51_vm0, %v6392_v3  ;;  %57 = vst.msk [vmem:[#allocation2 + $0x28] sm:$0xff] %vm51_vm0, %v6392_v3  ;;  %v4827_v8 = vld [vmem:[%s6379_s3] sm:$0xff]  ;;  %v4832_v9 = vld [vmem:[%s6379_s3 + $0x8] sm:$0xff] }
   0x5   :  { %58 = vst.msk [vmem:[#allocation2 + $0x30] sm:$0xff] %vm51_vm0, %v6392_v3  ;;  %59 = vst.msk [vmem:[#allocation2 + $0x38] sm:$0xff] %vm51_vm0, %v6392_v3  ;;  %v4837_v10 = vld [vmem:[%s6379_s3 + $0x10] sm:$0xff]  ;;  %v4842_v11 = vld [vmem:[%s6379_s3 + $0x18] sm:$0xff] }
   0x6   :  { %62 = vst.msk [vmem:[#allocation3] sm:$0xff] %vm51_vm0, %v6392_v3  ;;  %63 = vst.msk [vmem:[#allocation3 + $0x8] sm:$0xff] %vm51_vm0, %v6392_v3  ;;  %v4847_v12 = vld [vmem:[%s6379_s3 + $0x20] sm:$0xff]  ;;  %v4852_v13 = vld [vmem:[%s6379_s3 + $0x28] sm:$0xff] }
   0x7   :  { %64 = vst.msk [vmem:[#allocation3 + $0x10] sm:$0xff] %vm51_vm0, %v6392_v3  ;;  %65 = vst.msk [vmem:[#allocation3 + $0x18] sm:$0xff] %vm51_vm0, %v6392_v3  ;;  %v4857_v14 = vld [vmem:[%s6379_s3 + $0x30] sm:$0x3]  ;;  %v4862_v15 = vld [vmem:[%s6380_s4] sm:$0xff] }
   0x8   :  { %66 = vst.msk [vmem:[#allocation3 + $0x20] sm:$0xff] %vm51_vm0, %v6392_v3  ;;  %67 = vst.msk [vmem:[#allocation3 + $0x28] sm:$0xff] %vm51_vm0, %v6392_v3  ;;  %v4867_v16 = vld [vmem:[%s6380_s4 + $0x8] sm:$0xff]  ;;  %v4872_v17 = vld [vmem:[%s6380_s4 + $0x10] sm:$0xff] }
   0x9   :  { %68 = vst.msk [vmem:[#allocation3 + $0x30] sm:$0xff] %vm51_vm0, %v6392_v3  ;;  %69 = vst.msk [vmem:[#allocation3 + $0x38] sm:$0xff] %vm51_vm0, %v6392_v3  ;;  %v4877_v18 = vld [vmem:[%s6380_s4 + $0x18] sm:$0xff]  ;;  %v4882_v19 = vld [vmem:[%s6380_s4 + $0x20] sm:$0xff] }
   0xa   :  { %6397 = vst [vmem:[#allocation8_spill] sm:$0xff] %v4812_v5  ;;  %6398 = vst [vmem:[#allocation9_spill] sm:$0xff] %v4817_v6  ;;  %v4887_v20 = vld [vmem:[%s6380_s4 + $0x28] sm:$0xff]  ;;  %v4892_v21 = vld [vmem:[%s6380_s4 + $0x30] sm:$0x3] }
   0xb   :  { %6399 = vst [vmem:[#allocation10_spill] sm:$0xff] %v4822_v7  ;;  %6400 = vst [vmem:[#allocation11_spill] sm:$0xff] %v4827_v8  ;;  %v4897_v22 = vld [vmem:[%s6381_s5] sm:$0x1] }
   0xc   :  { %6401 = vst [vmem:[#allocation12_spill] sm:$0xff] %v4832_v9  ;;  %6402 = vst [vmem:[#allocation13_spill] sm:$0xff] %v4837_v10  ;;  %v4902_v23 = vld [vmem:[%s6382_s6] sm:$0x1] }
   0xd   :  { %6403 = vst [vmem:[#allocation14_spill] sm:$0xff] %v4842_v11  ;;  %6404 = vst [vmem:[#allocation15_spill] sm:$0xff] %v4847_v12  ;;  %v4907_v24 = vld [vmem:[%s6383_s7] sm:$0x1] }
   0xe   :  { %6405 = vst [vmem:[#allocation16_spill] sm:$0xff] %v4852_v13  ;;  %6406 = vst [vmem:[#allocation17_spill] sm:$0xff] %v4857_v14  ;;  %v4912_v25 = vld [vmem:[%s6384_s8] sm:$0x1] }
   0xf   :  { %6407 = vst [vmem:[#allocation18_spill] sm:$0xff] %v4862_v15  ;;  %6408 = vst [vmem:[#allocation19_spill] sm:$0xff] %v4867_v16 }
  0x10   :  { %6409 = vst [vmem:[#allocation20_spill] sm:$0xff] %v4872_v17  ;;  %6410 = vst [vmem:[#allocation21_spill] sm:$0xff] %v4877_v18 }
  0x11   :  { %6411 = vst [vmem:[#allocation22_spill] sm:$0xff] %v4882_v19  ;;  %6412 = vst [vmem:[#allocation23_spill] sm:$0xff] %v4887_v20 }
  0x12   :  { %6413 = vst [vmem:[#allocation24_spill] sm:$0xff] %v4892_v21  ;;  %6414 = vst [vmem:[#allocation25_spill] sm:$0xff] %v4897_v22 }
  0x13   :  { %6415 = vst [vmem:[#allocation26_spill] sm:$0xff] %v4902_v23 }
  0x14   :  { %20 = vsyncpa [#allocation5], 0  ;;  %v71_v26 = vld [vmem:[%s6376_s0] sm:$0xff]  ;;  %v72_v27 = vld [vmem:[%s6376_s0 + $0x8] sm:$0xff]  ;;  %v4942_v33 = vmov 0.0   ;;  %s4944_s27 = smov 0  }
  0x15   :  { %78 = vst.msk [vmem:[#allocation2 + $0x8] sm:$0xff] %vm51_vm0, %v71_v26  ;;  %v73_v28 = vld [vmem:[%s6376_s0 + $0x10] sm:$0xff]  ;;  %v74_v29 = vld [vmem:[%s6376_s0 + $0x18] sm:$0xff]  ;;  %79 = vst.msk [vmem:[#allocation2 + $0x10] sm:$0xff] %vm51_vm0, %v72_v27 }
  0x16   :  { %80 = vst.msk [vmem:[#allocation2 + $0x18] sm:$0xff] %vm51_vm0, %v73_v28  ;;  %81 = vst.msk [vmem:[#allocation2 + $0x20] sm:$0xff] %vm51_vm0, %v74_v29  ;;  %v75_v30 = vld [vmem:[%s6376_s0 + $0x20] sm:$0xff]  ;;  %v76_v31 = vld [vmem:[%s6376_s0 + $0x28] sm:$0xff] }
  0x17   :  { %v77_v32 = vld [vmem:[%s6376_s0 + $0x30] sm:$0x3]  ;;  %82 = vst.msk [vmem:[#allocation2 + $0x28] sm:$0xff] %vm51_vm0, %v75_v30  ;;  %83 = vst.msk [vmem:[#allocation2 + $0x30] sm:$0xff] %vm51_vm0, %v76_v31 }
  0x18   :  { %84 = vst.msk [vmem:[#allocation2 + $0x38] sm:$0x3] %vm60_vm1, %v77_v32 }
  0x19 LB: > { %v138_v34 = vld [vmem:[%s6377_s1 + $0x38] sm:$0xff]  ;;  %v6394_v36 = vmov 0.0   ;;  %v137_v37 = vld [vmem:[%s6377_s1 + $0x30] sm:$0xff]  ;;  %v136_v39 = vld [vmem:[%s6377_s1 + $0x28] sm:$0xff]  ;;  %vm4672_vm2 = vmmov 0   ;;  %s115_s27 = sadd.s32 1, %s4668_s27   ;;  %s4668_s27 = sphi %s4944_s27, %s115_s27   ;;  %v4664_v33 = vphi %v4942_v33, %v6437_v33  }
  0x1a   : > { %v3366_v35 = vld [vmem:[%s6377_s1 + $0x78] sm:$0xff]  ;;  %3897 = vmatprep.subr.mxu0 %v6394_v36  ;;  %3934 = vmatprep.subr.mxu1 %v6394_v36  ;;  %v3365_v38 = vld [vmem:[%s6377_s1 + $0x70] sm:$0xff]  ;;  %v3364_v40 = vld [vmem:[%s6377_s1 + $0x68] sm:$0xff]  ;;  %p112_p0 = scmp.ge.s32.totalorder %s115_s27, 20  }
  0x1b   : > { %3898 = vmatpush3.msra.mxu0 %v138_v34  ;;  %3935 = vmatpush3.msra.mxu1 %v3366_v35  ;;  %v135_v41 = vld [vmem:[%s6377_s1 + $0x20] sm:$0xff]  ;;  %v134_v43 = vld [vmem:[%s6377_s1 + $0x18] sm:$0xff]  ;;  %v133_v45 = vld [vmem:[%s6377_s1 + $0x10] sm:$0xff]  ;;  %vm4675_vm3 = vmmov (%p112_p0), 0   ;;  %vm3166_vm4 = vcmask (%p112_p0), 1041408   ;;  %vm3162_vm5 = vcmask (%p112_p0), 408576  }
  0x1c   : > { %3899 = vmatprep.subr.mxu0 %v6394_v36  ;;  %3936 = vmatprep.subr.mxu1 %v6394_v36  ;;  %v3363_v42 = vld [vmem:[%s6377_s1 + $0x60] sm:$0xff]  ;;  %v3362_v44 = vld [vmem:[%s6377_s1 + $0x58] sm:$0xff]  ;;  %v3361_v46 = vld [vmem:[%s6377_s1 + $0x50] sm:$0xff]  ;;  %s4676_s26 = smov (%p112_p0), [#allocation4]   ;;  %vm3328_vm6 = vcmask (%p112_p0), 74752  }
  0x1d   : > { %3900 = vmatpush3.msra.mxu0 %v137_v37  ;;  %3937 = vmatpush3.msra.mxu1 %v3365_v38  ;;  %v132_v47 = vld [vmem:[%s6377_s1 + $0x8] sm:$0xff]  ;;  %v131_v49 = vld [vmem:[%s6377_s1] sm:$0xff]  ;;  %v3381_v52 = vld [vmem:[%s6377_s1 + $0xb8] sm:$0xff] }
  0x1e   : > { %3901 = vmatprep.subr.mxu0 %v6394_v36  ;;  %3938 = vmatprep.subr.mxu1 %v6394_v36  ;;  %v3360_v48 = vld [vmem:[%s6377_s1 + $0x48] sm:$0xff]  ;;  %v3359_v51 = vld [vmem:[%s6377_s1 + $0x40] sm:$0xff]  ;;  %v3380_v55 = vld [vmem:[%s6377_s1 + $0xb0] sm:$0xff] }
  0x1f   : > { %3902 = vmatpush3.msra.mxu0 %v136_v39  ;;  %3939 = vmatpush3.msra.mxu1 %v3364_v40  ;;  %v124_v50 = vld [vmem:[#allocation2 + $0x2] sm:$0xff]  ;;  %v125_v54 = vld [vmem:[#allocation2 + $0xa] sm:$0xff]  ;;  %v126_v58 = vld [vmem:[#allocation2 + $0x12] sm:$0xff] }
  0x20   : > { %3903 = vmatprep.subr.mxu0 %v6394_v36  ;;  %3940 = vmatprep.subr.mxu1 %v6394_v36  ;;  %v267_v53 = vld [vmem:[#allocation2 + $0x3] sm:$0xff]  ;;  %v268_v56 = vld [vmem:[#allocation2 + $0xb] sm:$0xff]  ;;  %v269_v60 = vld [vmem:[#allocation2 + $0x13] sm:$0xff] }
  0x21   : > { %3904 = vmatpush3.msra.mxu0 %v135_v41  ;;  %3941 = vmatpush3.msra.mxu1 %v3363_v42  ;;  %v3379_v57 = vld [vmem:[%s6377_s1 + $0xa8] sm:$0xff]  ;;  %v3378_v59 = vld [vmem:[%s6377_s1 + $0xa0] sm:$0xff]  ;;  %v3396_v62 = vld [vmem:[%s6377_s1 + $0xf8] sm:$0xff] }
  0x22   : > { %3905 = vmatprep.subr.mxu0 %v6394_v36  ;;  %3942 = vmatprep.subr.mxu1 %v6394_v36  ;;  %v127_v61 = vld [vmem:[#allocation2 + $0x1a] sm:$0xff]  ;;  %v3395_v27 = vld [vmem:[%s6377_s1 + $0xf0] sm:$0xff]  ;;  %v128_v28 = vld [vmem:[#allocation2 + $0x22] sm:$0xff] }
  0x23   : > { %3906 = vmatpush3.msra.mxu0 %v134_v43  ;;  %3943 = vmatpush3.msra.mxu1 %v3362_v44  ;;  %v3377_v63 = vld [vmem:[%s6377_s1 + $0x98] sm:$0xff]  ;;  %v271_v29 = vld [vmem:[#allocation2 + $0x23] sm:$0xff]  ;;  %v3376_v30 = vld [vmem:[%s6377_s1 + $0x90] sm:$0xff] }
  0x24   : > { %3907 = vmatprep.subr.mxu0 %v6394_v36  ;;  %3944 = vmatprep.subr.mxu1 %v6394_v36  ;;  %v270_v26 = vld [vmem:[#allocation2 + $0x1b] sm:$0xff]  ;;  %v3394_v31 = vld [vmem:[%s6377_s1 + $0xe8] sm:$0xff]  ;;  %v130_v39 = vld [vmem:[#allocation2 + $0x32] sm:$0x3] }
  0x25   : > { %3908 = vmatpush3.msra.mxu0 %v133_v45  ;;  %3945 = vmatpush3.msra.mxu1 %v3361_v46  ;;  %v129_v32 = vld [vmem:[#allocation2 + $0x2a] sm:$0xff]  ;;  %v3393_v34 = vld [vmem:[%s6377_s1 + $0xe0] sm:$0xff]  ;;  %v3392_v38 = vld [vmem:[%s6377_s1 + $0xd8] sm:$0xff] }
  0x26   : > { %3909 = vmatprep.subr.mxu0 %v6394_v36  ;;  %3946 = vmatprep.subr.mxu1 %v6394_v36  ;;  %v272_v35 = vld [vmem:[#allocation2 + $0x2b] sm:$0xff]  ;;  %v273_v41 = vld [vmem:[#allocation2 + $0x33] sm:$0x3]  ;;  %v3374_v42 = vld [vmem:[%s6377_s1 + $0x80] sm:$0xff] }
  0x27   : > { %3910 = vmatpush3.msra.mxu0 %v132_v47  ;;  %3913 = vmatprep.mubr.msk.f32.mxu0 %vm4672_vm2, %v6394_v36  ;;  %v3375_v37 = vld [vmem:[%s6377_s1 + $0x88] sm:$0xff]  ;;  %v3391_v40 = vld [vmem:[%s6377_s1 + $0xd0] sm:$0xff]  ;;  %v3389_v45 = vld [vmem:[%s6377_s1 + $0xc0] sm:$0xff] }
  0x28   : > { %3911 = vmatprep.subr.mxu0 %v6394_v36  ;;  %3947 = vmatpush3.msra.mxu1 %v3360_v48  ;;  %v3390_v43 = vld [vmem:[%s6377_s1 + $0xc8] sm:$0xff]  ;;  %v3411_v46 = vld [vmem:[%s6377_s1 + $0x138] sm:$0xff] }
  0x29   : > { %3912 = vmatpush3.msra.mxu0 %v131_v49  ;;  %3948 = vmatprep.subr.mxu1 %v6394_v36  ;;  %v411_v44 = vld [vmem:[#allocation2 + $0x4] sm:$0xff]  ;;  %v5131_v48 = vld [vmem:[#allocation2 + $0xc] sm:$0xff]  ;;  %v6417_v5 = vld [vmem:[#allocation8_spill] sm:$0xff] }
  0x2a   : > { %3914 = vmatmul.mubr.msk.f32.vlgmr.msra.gmra.mxu0 %vm51_vm0, %v124_v50  ;;  %3971 = vmatprep.subr.mxu0 %v6394_v36  ;;  %v555_v47 = vld [vmem:[#allocation2 + $0x7] sm:$0xff]  ;;  %v3410_v49 = vld [vmem:[%s6377_s1 + $0x130] sm:$0xff]  ;;  %v6421_v9 = vld [vmem:[#allocation12_spill] sm:$0xff] }
  0x2b   : > { %3949 = vmatpush3.msra.mxu1 %v3359_v51  ;;  %3950 = vmatprep.mubr.msk.f32.mxu1 %vm4672_vm2, %v6394_v36  ;;  %v556_v50 = vld [vmem:[#allocation2 + $0xf] sm:$0xff]  ;;  %v6418_v6 = vld [vmem:[#allocation9_spill] sm:$0xff]  ;;  %v6425_v13 = vld [vmem:[#allocation16_spill] sm:$0xff] }
  0x2c   : > { %3972 = vmatpush3.msra.mxu0 %v3381_v52  ;;  %3951 = vmatmul.mubr.msk.f32.vlgmr.msra.gmra.mxu1 %vm51_vm0, %v267_v53  ;;  %v3409_v51 = vld [vmem:[%s6377_s1 + $0x128] sm:$0xff]  ;;  %v5149_v52 = vld [vmem:[#allocation2 + $0x14] sm:$0xff]  ;;  %v3408_v53 = vld [vmem:[%s6377_s1 + $0x120] sm:$0xff] }
  0x2d   : > { %3916 = vmatprep.mubr.msk.f32.mxu0 %vm4672_vm2, %v6394_v36  ;;  %3973 = vmatprep.subr.mxu0 %v6394_v36  ;;  %v6416_v1 = vld [vmem:[#allocation7_spill] sm:$0xff]  ;;  %v6419_v7 = vld [vmem:[#allocation10_spill] sm:$0xff]  ;;  %v6422_v10 = vld [vmem:[#allocation13_spill] sm:$0xff] }
  0x2e   : > { %3917 = vmatmul.mubr.msk.f32.gmra.mxu0 %vm51_vm0, %v125_v54  ;;  %3953 = vmatprep.mubr.msk.f32.mxu1 %vm4672_vm2, %v6394_v36  ;;  %v557_v54 = vld [vmem:[#allocation2 + $0x17] sm:$0xff]  ;;  %v6423_v11 = vld [vmem:[#allocation14_spill] sm:$0xff]  ;;  %v6426_v14 = vld [vmem:[#allocation17_spill] sm:$0xff] }
  0x2f   : > { %3974 = vmatpush3.msra.mxu0 %v3380_v55  ;;  %3919 = vmatprep.mubr.msk.f32.mxu0 %vm4672_vm2, %v6394_v36  ;;  %v5163_v55 = vld [vmem:[#allocation2 + $0x1c] sm:$0xff]  ;;  %v6420_v8 = vld [vmem:[#allocation11_spill] sm:$0xff]  ;;  %v6428_v23 = vld [vmem:[#allocation26_spill] sm:$0xff] }
  0x30   : > { %3954 = vmatmul.mubr.msk.f32.gmra.mxu1 %vm51_vm0, %v268_v56  ;;  %3975 = vmatprep.subr.mxu0 %v6394_v36  ;;  %v3426_v56 = vld [vmem:[%s6377_s1 + $0x178] sm:$0xff]  ;;  %v6427_v22 = vld [vmem:[#allocation25_spill] sm:$0xff]  ;;  %v6430_v15 = vld [vmem:[#allocation18_spill] sm:$0xff] }
  0x31   : > { %3976 = vmatpush3.msra.mxu0 %v3379_v57  ;;  %3956 = vmatprep.mubr.msk.f32.mxu1 %vm4672_vm2, %v6394_v36  ;;  %v3407_v57 = vld [vmem:[%s6377_s1 + $0x118] sm:$0xff]  ;;  %v6433_v18 = vld [vmem:[#allocation21_spill] sm:$0xff]  ;;  %v6434_v19 = vld [vmem:[#allocation22_spill] sm:$0xff] }
  0x32   : > { %3920 = vmatmul.mubr.msk.f32.gmra.mxu0 %vm51_vm0, %v126_v58  ;;  %3977 = vmatprep.subr.mxu0 %v6394_v36  ;;  %v558_v58 = vld [vmem:[#allocation2 + $0x1f] sm:$0xff]  ;;  %v6424_v12 = vld [vmem:[#allocation15_spill] sm:$0xff] }
  0x33   : > { %3922 = vmatprep.mubr.msk.f32.mxu0 %vm4672_vm2, %v6394_v36  ;;  %3978 = vmatpush3.msra.mxu0 %v3378_v59  ;;  %v3425_v59 = vld [vmem:[%s6377_s1 + $0x170] sm:$0xff]  ;;  %v6432_v17 = vld [vmem:[#allocation20_spill] sm:$0xff] }
  0x34   : > { %3957 = vmatmul.mubr.msk.f32.gmra.mxu1 %vm51_vm0, %v269_v60  ;;  %3979 = vmatprep.subr.mxu0 %v6394_v36  ;;  %v5183_v60 = vld [vmem:[#allocation2 + $0x24] sm:$0xff]  ;;  %v6431_v16 = vld [vmem:[#allocation19_spill] sm:$0xff]  ;;  %v6436_v21 = vld [vmem:[#allocation24_spill] sm:$0xff] }
  0x35   : > { %3959 = vmatprep.mubr.msk.f32.mxu1 %vm4672_vm2, %v6394_v36  ;;  %4008 = vmatprep.subr.mxu1 %v6394_v36  ;;  %v6435_v20 = vld [vmem:[#allocation23_spill] sm:$0xff] }
  0x36   : > { %3923 = vmatmul.mubr.msk.f32.gmra.mxu0 %vm51_vm0, %v127_v61  ;;  %4009 = vmatpush3.msra.mxu1 %v3396_v62  ;;  %v559_v61 = vld [vmem:[#allocation2 + $0x27] sm:$0xff]  ;;  %v3406_v62 = vld [vmem:[%s6377_s1 + $0x110] sm:$0xff] }
  0x37   : > { %3925 = vmatprep.mubr.msk.f32.mxu0 %vm4672_vm2, %v6394_v36  ;;  %3980 = vmatpush3.msra.mxu0 %v3377_v63  ;;  %v3424_v63 = vld [vmem:[%s6377_s1 + $0x168] sm:$0xff] }
  0x38   : > { %3960 = vmatmul.mubr.msk.f32.gmra.mxu1 %vm51_vm0, %v270_v26  ;;  %4010 = vmatprep.subr.mxu1 %v6394_v36  ;;  %v5201_v26 = vld [vmem:[#allocation2 + $0x2c] sm:$0xff] }
  0x39   : > { %3962 = vmatprep.mubr.msk.f32.mxu1 %vm4672_vm2, %v6394_v36  ;;  %4011 = vmatpush3.msra.mxu1 %v3395_v27  ;;  %v3423_v27 = vld [vmem:[%s6377_s1 + $0x160] sm:$0xff] }
  0x3a   : > { %3926 = vmatmul.mubr.msk.f32.gmra.mxu0 %vm51_vm0, %v128_v28  ;;  %3981 = vmatprep.subr.mxu0 %v6394_v36  ;;  %v560_v28 = vld [vmem:[#allocation2 + $0x2f] sm:$0xff] }
  0x3b   : > { %4012 = vmatprep.subr.mxu1 %v6394_v36  ;;  %3928 = vmatprep.mubr.msk.f32.mxu0 %vm4672_vm2, %v6394_v36 }
  0x3c   : > { %3963 = vmatmul.mubr.msk.f32.gmra.mxu1 %vm51_vm0, %v271_v29  ;;  %3982 = vmatpush3.msra.mxu0 %v3376_v30  ;;  %v3405_v29 = vld [vmem:[%s6377_s1 + $0x108] sm:$0xff]  ;;  %v3422_v30 = vld [vmem:[%s6377_s1 + $0x158] sm:$0xff] }
  0x3d   : > { %4013 = vmatpush3.msra.mxu1 %v3394_v31  ;;  %3965 = vmatprep.mubr.msk.f32.mxu1 %vm4672_vm2, %v6394_v36  ;;  %v417_v31 = vld [vmem:[#allocation2 + $0x34] sm:$0x3] }
  0x3e   : > { %3929 = vmatmul.mubr.msk.f32.gmra.mxu0 %vm51_vm0, %v129_v32  ;;  %4014 = vmatprep.subr.mxu1 %v6394_v36  ;;  %v3421_v32 = vld [vmem:[%s6377_s1 + $0x150] sm:$0xff] }
  0x3f   : > { %3983 = vmatprep.subr.mxu0 %v6394_v36  ;;  %4015 = vmatpush3.msra.mxu1 %v3393_v34  ;;  %v561_v34 = vld [vmem:[#allocation2 + $0x37] sm:$0x3] }
  0x40   : > { %3966 = vmatmul.mubr.msk.f32.gmra.mxu1 %vm51_vm0, %v272_v35  ;;  %3984 = vmatpush3.msra.mxu0 %v3375_v37  ;;  %v3404_v35 = vld [vmem:[%s6377_s1 + $0x100] sm:$0xff]  ;;  %v3420_v37 = vld [vmem:[%s6377_s1 + $0x148] sm:$0xff] }
  0x41   : > { %4016 = vmatprep.subr.mxu1 %v6394_v36  ;;  %3931 = vmatprep.mubr.msk.f32.mxu0 %vm4672_vm2, %v6394_v36 }
  0x42   : > { %4017 = vmatpush3.msra.mxu1 %v3392_v38  ;;  %3932 = vmatmul.mubr.msk.f32.gmra.mxu0 %vm51_vm0, %v130_v39  ;;  %v699_v38 = vld [vmem:[#allocation2 + $0x8] sm:$0xff]  ;;  %v3419_v39 = vld [vmem:[%s6377_s1 + $0x140] sm:$0xff] }
  0x43   : > { %4018 = vmatprep.subr.mxu1 %v6394_v36  ;;  %3968 = vmatprep.mubr.msk.f32.mxu1 %vm4672_vm2, %v6394_v36 }
  0x44   : > { %3985 = vmatprep.subr.mxu0 %v6394_v36  ;;  %4019 = vmatpush3.msra.mxu1 %v3391_v40  ;;  %v3441_v40 = vld [vmem:[%s6377_s1 + $0x1b8] sm:$0xff] }
  0x45   : > { %3969 = vmatmul.mubr.msk.f32.gmra.mxu1 %vm51_vm0, %v273_v41  ;;  %3986 = vmatpush3.msra.mxu0 %v3374_v42  ;;  %v843_v41 = vld [vmem:[#allocation2 + $0x9] sm:$0xff] }
  0x46   : > { %4020 = vmatprep.subr.mxu1 %v6394_v36  ;;  %3987 = vmatprep.mubr.msk.f32.mxu0 %vm4672_vm2, %v6394_v36  ;;  %v700_v42 = vld [vmem:[#allocation2 + $0x10] sm:$0xff] }
  0x47   : > { %4021 = vmatpush3.msra.mxu1 %v3390_v43  ;;  %3988 = vmatmul.mubr.msk.f32.vlgmr.msra.gmra.mxu0 %vm51_vm0, %v411_v44  ;;  %v3440_v43 = vld [vmem:[%s6377_s1 + $0x1b0] sm:$0xff] }
  0x48   : > { %4022 = vmatprep.subr.mxu1 %v6394_v36  ;;  %4045 = vmatprep.subr.mxu0 %v6394_v36  ;;  %v844_v44 = vld [vmem:[#allocation2 + $0x11] sm:$0xff] }
  0x49   : > { %4023 = vmatpush3.msra.mxu1 %v3389_v45  ;;  %4024 = vmatprep.mubr.msk.f32.mxu1 %vm4672_vm2, %v6394_v36  ;;  %v3439_v45 = vld [vmem:[%s6377_s1 + $0x1a8] sm:$0xff] }
  0x4a   : > { %4046 = vmatpush3.msra.mxu0 %v3411_v46  ;;  %4025 = vmatmul.mubr.msk.f32.vlgmr.msra.gmra.mxu1 %vm51_vm0, %v555_v47  ;;  %v701_v46 = vld [vmem:[#allocation2 + $0x18] sm:$0xff]  ;;  %v3438_v47 = vld [vmem:[%s6377_s1 + $0x1a0] sm:$0xff] }
  0x4b   : > { %3990 = vmatprep.mubr.msk.f32.mxu0 %vm4672_vm2, %v6394_v36  ;;  %4047 = vmatprep.subr.mxu0 %v6394_v36 }
  0x4c   : > { %3991 = vmatmul.mubr.msk.f32.gmra.mxu0 %vm51_vm0, %v5131_v48  ;;  %4027 = vmatprep.mubr.msk.f32.mxu1 %vm4672_vm2, %v6394_v36 }
  0x4d   : > { %4048 = vmatpush3.msra.mxu0 %v3410_v49  ;;  %3993 = vmatprep.mubr.msk.f32.mxu0 %vm4672_vm2, %v6394_v36  ;;  %v845_v49 = vld [vmem:[#allocation2 + $0x19] sm:$0xff] }
  0x4e   : > { %4028 = vmatmul.mubr.msk.f32.gmra.mxu1 %vm51_vm0, %v556_v50  ;;  %4049 = vmatprep.subr.mxu0 %v6394_v36  ;;  %v702_v50 = vld [vmem:[#allocation2 + $0x20] sm:$0xff] }
  0x4f   : > { %4050 = vmatpush3.msra.mxu0 %v3409_v51  ;;  %4030 = vmatprep.mubr.msk.f32.mxu1 %vm4672_vm2, %v6394_v36  ;;  %v3456_v51 = vld [vmem:[%s6377_s1 + $0x1f8] sm:$0xff] }
  0x50   : > { %3994 = vmatmul.mubr.msk.f32.gmra.mxu0 %vm51_vm0, %v5149_v52  ;;  %4051 = vmatprep.subr.mxu0 %v6394_v36 }
  0x51   : > { %3996 = vmatprep.mubr.msk.f32.mxu0 %vm4672_vm2, %v6394_v36  ;;  %4052 = vmatpush3.msra.mxu0 %v3408_v53  ;;  %v3437_v53 = vld [vmem:[%s6377_s1 + $0x198] sm:$0xff] }
  0x52   : > { %4031 = vmatmul.mubr.msk.f32.gmra.mxu1 %vm51_vm0, %v557_v54  ;;  %4053 = vmatprep.subr.mxu0 %v6394_v36  ;;  %v846_v54 = vld [vmem:[#allocation2 + $0x21] sm:$0xff] }
  0x53   : > { %4033 = vmatprep.mubr.msk.f32.mxu1 %vm4672_vm2, %v6394_v36  ;;  %4082 = vmatprep.subr.mxu1 %v6394_v36 }
  0x54   : > { %3997 = vmatmul.mubr.msk.f32.gmra.mxu0 %vm51_vm0, %v5163_v55  ;;  %4083 = vmatpush3.msra.mxu1 %v3426_v56  ;;  %v3455_v56 = vld [vmem:[%s6377_s1 + $0x1f0] sm:$0xff] }
  0x55   : > { %3999 = vmatprep.mubr.msk.f32.mxu0 %vm4672_vm2, %v6394_v36  ;;  %4054 = vmatpush3.msra.mxu0 %v3407_v57  ;;  %v703_v57 = vld [vmem:[#allocation2 + $0x28] sm:$0xff] }
  0x56   : > { %4034 = vmatmul.mubr.msk.f32.gmra.mxu1 %vm51_vm0, %v558_v58  ;;  %4084 = vmatprep.subr.mxu1 %v6394_v36  ;;  %v847_v58 = vld [vmem:[#allocation2 + $0x29] sm:$0xff] }
  0x57   : > { %4036 = vmatprep.mubr.msk.f32.mxu1 %vm4672_vm2, %v6394_v36  ;;  %4085 = vmatpush3.msra.mxu1 %v3425_v59  ;;  %v3436_v59 = vld [vmem:[%s6377_s1 + $0x190] sm:$0xff] }
  0x58   : > { %4000 = vmatmul.mubr.msk.f32.gmra.mxu0 %vm51_vm0, %v5183_v60  ;;  %4055 = vmatprep.subr.mxu0 %v6394_v36 }
  0x59   : > { %4086 = vmatprep.subr.mxu1 %v6394_v36  ;;  %4002 = vmatprep.mubr.msk.f32.mxu0 %vm4672_vm2, %v6394_v36 }
  0x5a   : > { %4037 = vmatmul.mubr.msk.f32.gmra.mxu1 %vm51_vm0, %v559_v61  ;;  %4056 = vmatpush3.msra.mxu0 %v3406_v62  ;;  %v3454_v61 = vld [vmem:[%s6377_s1 + $0x1e8] sm:$0xff]  ;;  %v704_v62 = vld [vmem:[#allocation2 + $0x30] sm:$0xff] }
  0x5b   : > { %4087 = vmatpush3.msra.mxu1 %v3424_v63  ;;  %4039 = vmatprep.mubr.msk.f32.mxu1 %vm4672_vm2, %v6394_v36  ;;  %v3453_v63 = vld [vmem:[%s6377_s1 + $0x1e0] sm:$0xff] }
  0x5c   : > { %4003 = vmatmul.mubr.msk.f32.gmra.mxu0 %vm51_vm0, %v5201_v26  ;;  %4088 = vmatprep.subr.mxu1 %v6394_v36 }
  0x5d   : > { %4057 = vmatprep.subr.mxu0 %v6394_v36  ;;  %4089 = vmatpush3.msra.mxu1 %v3423_v27  ;;  %v848_v27 = vld [vmem:[#allocation2 + $0x31] sm:$0xff] }
  0x5e   : > { %4040 = vmatmul.mubr.msk.f32.gmra.mxu1 %vm51_vm0, %v560_v28  ;;  %4058 = vmatpush3.msra.mxu0 %v3405_v29  ;;  %v3435_v28 = vld [vmem:[%s6377_s1 + $0x188] sm:$0xff]  ;;  %v3452_v29 = vld [vmem:[%s6377_s1 + $0x1d8] sm:$0xff] }
  0x5f   : > { %4090 = vmatprep.subr.mxu1 %v6394_v36  ;;  %4005 = vmatprep.mubr.msk.f32.mxu0 %vm4672_vm2, %v6394_v36 }
  0x60   : > { %4091 = vmatpush3.msra.mxu1 %v3422_v30  ;;  %4006 = vmatmul.mubr.msk.f32.gmra.mxu0 %vm51_vm0, %v417_v31  ;;  %v705_v30 = vld [vmem:[#allocation2 + $0x38] sm:$0x3]  ;;  %v3451_v31 = vld [vmem:[%s6377_s1 + $0x1d0] sm:$0xff] }
  0x61   : > { %4092 = vmatprep.subr.mxu1 %v6394_v36  ;;  %4042 = vmatprep.mubr.msk.f32.mxu1 %vm4672_vm2, %v6394_v36 }
  0x62   : > { %4059 = vmatprep.subr.mxu0 %v6394_v36  ;;  %4093 = vmatpush3.msra.mxu1 %v3421_v32  ;;  %v849_v32 = vld [vmem:[#allocation2 + $0x39] sm:$0x3] }
  0x63   : > { %4043 = vmatmul.mubr.msk.f32.gmra.mxu1 %vm51_vm0, %v561_v34  ;;  %4060 = vmatpush3.msra.mxu0 %v3404_v35  ;;  %v3434_v34 = vld [vmem:[%s6377_s1 + $0x180] sm:$0xff]  ;;  %v3450_v35 = vld [vmem:[%s6377_s1 + $0x1c8] sm:$0xff] }
  0x64   : > { %4094 = vmatprep.subr.mxu1 %v6394_v36  ;;  %4061 = vmatprep.mubr.msk.f32.mxu0 %vm4672_vm2, %v6394_v36 }
  0x65   : > { %4095 = vmatpush3.msra.mxu1 %v3420_v37  ;;  %4062 = vmatmul.mubr.msk.f32.vlgmr.msra.gmra.mxu0 %vm51_vm0, %v699_v38  ;;  %v3449_v37 = vld [vmem:[%s6377_s1 + $0x1c0] sm:$0xff]  ;;  %v3471_v38 = vld [vmem:[%s6377_s1 + $0x238] sm:$0xff] }
  0x66   : > { %4096 = vmatprep.subr.mxu1 %v6394_v36  ;;  %4119 = vmatprep.subr.mxu0 %v6394_v36 }
  0x67   : > { %4097 = vmatpush3.msra.mxu1 %v3419_v39  ;;  %4098 = vmatprep.mubr.msk.f32.mxu1 %vm4672_vm2, %v6394_v36  ;;  %v1131_v39 = vld [vmem:[#allocation2 + $0xd] sm:$0xff] }
  0x68   : > { %4120 = vmatpush3.msra.mxu0 %v3441_v40  ;;  %4099 = vmatmul.mubr.msk.f32.vlgmr.msra.gmra.mxu1 %vm51_vm0, %v843_v41  ;;  %v5356_v40 = vadd.f32 0.05, %v4664_v33   ;;  %v1132_v41 = vld [vmem:[#allocation2 + $0x15] sm:$0xff] }
  0x69   : > { %4064 = vmatprep.mubr.msk.f32.mxu0 %vm4672_vm2, %v6394_v36  ;;  %4121 = vmatprep.subr.mxu0 %v6394_v36 }
  0x6a   : > { %4065 = vmatmul.mubr.msk.f32.gmra.mxu0 %vm51_vm0, %v700_v42  ;;  %4101 = vmatprep.mubr.msk.f32.mxu1 %vm4672_vm2, %v6394_v36  ;;  %v3469_v42 = vld [vmem:[%s6377_s1 + $0x228] sm:$0xff] }
  0x6b   : > { %4122 = vmatpush3.msra.mxu0 %v3440_v43  ;;  %4067 = vmatprep.mubr.msk.f32.mxu0 %vm4672_vm2, %v6394_v36  ;;  %v3468_v43 = vld [vmem:[%s6377_s1 + $0x220] sm:$0xff] }
  0x6c   : > { %4102 = vmatmul.mubr.msk.f32.gmra.mxu1 %vm51_vm0, %v844_v44  ;;  %4123 = vmatprep.subr.mxu0 %v6394_v36  ;;  %v3467_v44 = vld [vmem:[%s6377_s1 + $0x218] sm:$0xff] }
  0x6d   : > { %4124 = vmatpush3.msra.mxu0 %v3439_v45  ;;  %4104 = vmatprep.mubr.msk.f32.mxu1 %vm4672_vm2, %v6394_v36  ;;  %v3466_v45 = vld [vmem:[%s6377_s1 + $0x210] sm:$0xff] }
  0x6e   : > { %4068 = vmatmul.mubr.msk.f32.gmra.mxu0 %vm51_vm0, %v701_v46  ;;  %4125 = vmatprep.subr.mxu0 %v6394_v36  ;;  %v3465_v46 = vld [vmem:[%s6377_s1 + $0x208] sm:$0xff] }
  0x6f   : > { %4070 = vmatprep.mubr.msk.f32.mxu0 %vm4672_vm2, %v6394_v36  ;;  %4126 = vmatpush3.msra.mxu0 %v3438_v47  ;;  %v3464_v47 = vld [vmem:[%s6377_s1 + $0x200] sm:$0xff] }
  0x70   : > { %4105 = vmatmul.mubr.msk.f32.gmra.mxu1 %vm51_vm0, %v845_v49  ;;  %4127 = vmatprep.subr.mxu0 %v6394_v36  ;;  %v992_v49 = vld [vmem:[#allocation2 + $0x34] sm:$0xff] }
  0x71   : > { %4107 = vmatprep.mubr.msk.f32.mxu1 %vm4672_vm2, %v6394_v36  ;;  %4156 = vmatprep.subr.mxu1 %v6394_v36 }
  0x72   : > { %4071 = vmatmul.mubr.msk.f32.gmra.mxu0 %vm51_vm0, %v702_v50  ;;  %4157 = vmatpush3.msra.mxu1 %v3456_v51  ;;  %v4673_v50 = vmov 0   ;;  %v1136_v51 = vld [vmem:[#allocation2 + $0x35] sm:$0xff] }
  0x73   : > { %4073 = vmatprep.mubr.msk.f32.mxu0 %vm4672_vm2, %v6394_v36  ;;  %4128 = vmatpush3.msra.mxu0 %v3437_v53  ;;  %v1137_v53 = vld [vmem:[#allocation2 + $0x3d] sm:$0x3] }
  0x74   : > { %4108 = vmatmul.mubr.msk.f32.gmra.mxu1 %vm51_vm0, %v846_v54  ;;  %4158 = vmatprep.subr.mxu1 %v6394_v36  ;;  %v1275_v54 = vld [vmem:[#allocation2 + $0xe] sm:$0xff] }
  0x75   : > { %4110 = vmatprep.mubr.msk.f32.mxu1 %vm4672_vm2, %v6394_v36  ;;  %4159 = vmatpush3.msra.mxu1 %v3455_v56  ;;  %v1276_v56 = vld [vmem:[#allocation2 + $0x16] sm:$0xff] }
  0x76   : > { %4074 = vmatmul.mubr.msk.f32.gmra.mxu0 %vm51_vm0, %v703_v57  ;;  %4129 = vmatprep.subr.mxu0 %v6394_v36  ;;  %v1277_v57 = vld [vmem:[#allocation2 + $0x1e] sm:$0xff] }
  0x77   : > { %4160 = vmatprep.subr.mxu1 %v6394_v36  ;;  %4076 = vmatprep.mubr.msk.f32.mxu0 %vm4672_vm2, %v6394_v36 }
  0x78   : > { %4111 = vmatmul.mubr.msk.f32.gmra.mxu1 %vm51_vm0, %v847_v58  ;;  %4130 = vmatpush3.msra.mxu0 %v3436_v59  ;;  %v1278_v58 = vld [vmem:[#allocation2 + $0x26] sm:$0xff]  ;;  %v1279_v59 = vld [vmem:[#allocation2 + $0x2e] sm:$0xff] }
  0x79   : > { %4161 = vmatpush3.msra.mxu1 %v3454_v61  ;;  %4113 = vmatprep.mubr.msk.f32.mxu1 %vm4672_vm2, %v6394_v36  ;;  %v1280_v61 = vld [vmem:[#allocation2 + $0x36] sm:$0xff] }
  0x7a   : > { %4077 = vmatmul.mubr.msk.f32.gmra.mxu0 %vm51_vm0, %v704_v62  ;;  %4162 = vmatprep.subr.mxu1 %v6394_v36  ;;  %v1281_v62 = vld [vmem:[#allocation2 + $0x3e] sm:$0x3] }
  0x7b   : > { %4131 = vmatprep.subr.mxu0 %v6394_v36  ;;  %4163 = vmatpush3.msra.mxu1 %v3453_v63  ;;  %v117_v63 = vmul.f32 %v4664_v33, %v6420_v8 }
  0x7c   : > { %4114 = vmatmul.mubr.msk.f32.gmra.mxu1 %vm51_vm0, %v848_v27  ;;  %4132 = vmatpush3.msra.mxu0 %v3435_v28 }
  0x7d   : > { %4164 = vmatprep.subr.mxu1 %v6394_v36  ;;  %4079 = vmatprep.mubr.msk.f32.mxu0 %vm4672_vm2, %v6394_v36 }
  0x7e   : > { %4165 = vmatpush3.msra.mxu1 %v3452_v29  ;;  %4080 = vmatmul.mubr.msk.f32.gmra.mxu0 %vm51_vm0, %v705_v30  ;;  %v118_v29 = vmul.f32 %v4664_v33, %v6421_v9 }
  0x7f   : > { %4166 = vmatprep.subr.mxu1 %v6394_v36  ;;  %4116 = vmatprep.mubr.msk.f32.mxu1 %vm4672_vm2, %v6394_v36 }
  0x80   : > { %4133 = vmatprep.subr.mxu0 %v6394_v36  ;;  %4167 = vmatpush3.msra.mxu1 %v3451_v31 }
  0x81   : > { %4117 = vmatmul.mubr.msk.f32.gmra.mxu1 %vm51_vm0, %v849_v32  ;;  %4134 = vmatpush3.msra.mxu0 %v3434_v34 }
  0x82   : > { %4168 = vmatprep.subr.mxu1 %v6394_v36  ;;  %4135 = vmatprep.mubr.msk.f32.mxu0 %vm4672_vm2, %v6394_v36 }
  0x83   : > { %4169 = vmatpush3.msra.mxu1 %v3450_v35  ;;  %4136 = vmatmul.mubr.msk.f32.vlgmr.msra.gmra.mxu0 %vm51_vm0, %v5131_v48  ;;  %v3470_v48 = vld [vmem:[%s6377_s1 + $0x230] sm:$0xff] }
  0x84   : > { %4170 = vmatprep.subr.mxu1 %v6394_v36  ;;  %4193 = vmatprep.subr.mxu0 %v6394_v36 }
  0x85   : > { %4171 = vmatpush3.msra.mxu1 %v3449_v37  ;;  %4172 = vmatprep.mubr.msk.f32.mxu1 %vm4672_vm2, %v6394_v36 }
  0x86   : > { %4194 = vmatpush3.msra.mxu0 %v3471_v38  ;;  %4173 = vmatmul.mubr.msk.f32.vlgmr.msra.gmra.mxu1 %vm51_vm0, %v1131_v39  ;;  %v119_v38 = vmul.f32 %v4664_v33, %v6422_v10 }
  0x87   : > { %4138 = vmatprep.mubr.msk.f32.mxu0 %vm4672_vm2, %v6394_v36  ;;  %4195 = vmatprep.subr.mxu0 %v6394_v36 }
  0x88   : > { %4139 = vmatmul.mubr.msk.f32.gmra.mxu0 %vm51_vm0, %v5149_v52  ;;  %4175 = vmatprep.mubr.msk.f32.mxu1 %vm4672_vm2, %v6394_v36  ;;  %v1133_v52 = vld [vmem:[#allocation2 + $0x1d] sm:$0xff] }
  0x89   : > { %4196 = vmatpush3.msra.mxu0 %v3470_v48  ;;  %4141 = vmatprep.mubr.msk.f32.mxu0 %vm4672_vm2, %v6394_v36 }
  0x8a   : > { %4176 = vmatmul.mubr.msk.f32.gmra.mxu1 %vm51_vm0, %v1132_v41  ;;  %4197 = vmatprep.subr.mxu0 %v6394_v36 }
  0x8b   : > { %4198 = vmatpush3.msra.mxu0 %v3469_v42  ;;  %4178 = vmatprep.mubr.msk.f32.mxu1 %vm4672_vm2, %v6394_v36 }
  0x8c   : > { %4142 = vmatmul.mubr.msk.f32.gmra.mxu0 %vm51_vm0, %v5163_v55  ;;  %4199 = vmatprep.subr.mxu0 %v6394_v36  ;;  %v1134_v55 = vld [vmem:[#allocation2 + $0x25] sm:$0xff] }
  0x8d   : > { %4144 = vmatprep.mubr.msk.f32.mxu0 %vm4672_vm2, %v6394_v36  ;;  %4200 = vmatpush3.msra.mxu0 %v3468_v43 }
  0x8e   : > { %4179 = vmatmul.mubr.msk.f32.gmra.mxu1 %vm51_vm0, %v1133_v52  ;;  %4201 = vmatprep.subr.mxu0 %v6394_v36 }
  0x8f   : > { %4181 = vmatprep.mubr.msk.f32.mxu1 %vm4672_vm2, %v6394_v36  ;;  %4202 = vmatpush3.msra.mxu0 %v3467_v44  ;;  %v120_v44 = vmul.f32 %v4664_v33, %v6423_v11 }
  0x90   : > { %4145 = vmatmul.mubr.msk.f32.gmra.mxu0 %vm51_vm0, %v5183_v60  ;;  %4203 = vmatprep.subr.mxu0 %v6394_v36  ;;  %v1135_v60 = vld [vmem:[#allocation2 + $0x2d] sm:$0xff] }
  0x91   : > { %4147 = vmatprep.mubr.msk.f32.mxu0 %vm4672_vm2, %v6394_v36  ;;  %4204 = vmatpush3.msra.mxu0 %v3466_v45 }
  0x92   : > { %4182 = vmatmul.mubr.msk.f32.gmra.mxu1 %vm51_vm0, %v1134_v55  ;;  %4205 = vmatprep.subr.mxu0 %v6394_v36 }
  0x93   : > { %4184 = vmatprep.mubr.msk.f32.mxu1 %vm4672_vm2, %v6394_v36  ;;  %4206 = vmatpush3.msra.mxu0 %v3465_v46 }
  0x94   : > { %4148 = vmatmul.mubr.msk.f32.gmra.mxu0 %vm51_vm0, %v5201_v26  ;;  %4207 = vmatprep.subr.mxu0 %v6394_v36  ;;  %v993_v26 = vld [vmem:[#allocation2 + $0x3c] sm:$0x3] }
  0x95   : > { %4150 = vmatprep.mubr.msk.f32.mxu0 %vm4672_vm2, %v6394_v36  ;;  %4208 = vmatpush3.msra.mxu0 %v3464_v47 }
  0x96   : > { %4185 = vmatmul.mubr.msk.f32.gmra.mxu1 %vm51_vm0, %v1135_v60  ;;  %4622 = vset.pattern.permute.xlu0 %v4673_v50 }
  0x97   : > { %4187 = vmatprep.mubr.msk.f32.mxu1 %vm4672_vm2, %v6394_v36  ;;  %1428 = vperm.xlu0 %4622, %v4760_v0  }
  0x98   : > { %4151 = vmatmul.mubr.msk.f32.gmra.mxu0 %vm51_vm0, %v992_v49  ;;  %4623 = vset.pattern.permute.xlu1 %v4673_v50  ;;  %v121_v50 = vmul.f32 %v4664_v33, %v6424_v12 }
  0x99   : > { %4153 = vmatprep.mubr.msk.f32.mxu0 %vm4672_vm2, %v6394_v36  ;;  %1438 = vperm.xlu1 %4623, %v4770_v2  }
  0x9a   : > { %4188 = vmatmul.mubr.msk.f32.gmra.mxu1 %vm51_vm0, %v1136_v51  ;;  %4230 = vmatprep.subr.mxu1 %v6394_v36 }
  0x9b   : > { %4190 = vmatprep.mubr.msk.f32.mxu1 %vm4672_vm2, %v6394_v36  ;;  %1433 = vperm.xlu0 %4622, %v6416_v1  }
  0x9c   : > { %4154 = vmatmul.mubr.msk.f32.gmra.mxu0 %vm51_vm0, %v993_v26  ;;  %4267 = vmatprep.subr.mxu0 %v6394_v36 }
  0x9d   : > { %4209 = vmatprep.mubr.msk.f32.mxu0 %vm4672_vm2, %v6394_v36  ;;  %1443 = vperm.xlu1 %4623, %v4807_v4  }
  0x9e   : > { %4191 = vmatmul.mubr.msk.f32.gmra.mxu1 %vm51_vm0, %v1137_v53 }
  0x9f   : > { %1448 = vperm.xlu0 %4622, %v6417_v5   ;;  %4246 = vmatprep.mubr.msk.f32.mxu1 %vm4672_vm2, %v6394_v36 }
  0xa0   : > { %4210 = vmatmul.mubr.msk.f32.vlgmr.msra.gmra.mxu0 %vm51_vm0, %v1275_v54 }
  0xa1   : > { %4212 = vmatprep.mubr.msk.f32.mxu0 %vm4672_vm2, %v6394_v36  ;;  %1453 = vperm.xlu1 %4623, %v6418_v6  }
  0xa3   : > { %1458 = vperm.xlu0 %4622, %v6419_v7  }
  0xa4   : > { %4213 = vmatmul.mubr.msk.f32.gmra.mxu0 %vm51_vm0, %v1276_v56 }
  0xa5   : > { %4215 = vmatprep.mubr.msk.f32.mxu0 %vm4672_vm2, %v6394_v36 }
  0xa8   : > { %4216 = vmatmul.mubr.msk.f32.gmra.mxu0 %vm51_vm0, %v1277_v57 }
  0xa9   : > { %4218 = vmatprep.mubr.msk.f32.mxu0 %vm4672_vm2, %v6394_v36 }
  0xac   : > { %4219 = vmatmul.mubr.msk.f32.gmra.mxu0 %vm51_vm0, %v1278_v58  ;;  %v122_v58 = vmul.f32 %v4664_v33, %v6425_v13 }
  0xad   : > { %4221 = vmatprep.mubr.msk.f32.mxu0 %vm4672_vm2, %v6394_v36 }
  0xb0   : > { %4222 = vmatmul.mubr.msk.f32.gmra.mxu0 %vm51_vm0, %v1279_v59 }
  0xb1   : > { %4224 = vmatprep.mubr.msk.f32.mxu0 %vm4672_vm2, %v6394_v36 }
  0xb4   : > { %4225 = vmatmul.mubr.msk.f32.gmra.mxu0 %vm51_vm0, %v1280_v61 }
  0xb5   : > { %4227 = vmatprep.mubr.msk.f32.mxu0 %vm4672_vm2, %v6394_v36 }
  0xb8   : > { %4228 = vmatmul.mubr.msk.f32.gmra.mxu0 %vm51_vm0, %v1281_v62 }
  0xb9   : > { %4283 = vmatprep.mubr.msk.f32.mxu0 %vm4672_vm2, %v6394_v36 }
  0xea   : > { %v226_v27 = vpop.f32.mrf.mxu0 }
  0xeb   : > { %v260_v28 = vadd.f32 %v226_v27, %v117_v63 }
  0xec   : > { %v3915_v30 = vpop.f32.mrf.mxu0  ;;  %v370_v31 = vpop.f32.mrf.mxu1 }
  0xed   : > { %v404_v32 = vadd.f32 %v370_v31, %v260_v28 }
  0xee   : > { %v231_v34 = vpop.f32.mrf.mxu0  ;;  %v3952_v35 = vpop.f32.mrf.mxu1 }
  0xef   : > { %v261_v37 = vadd.f32 %v231_v34, %v118_v29  ;;  %v123_v29 = vmul.f32 %v4664_v33, %v6426_v14 }
  0xf0   : > { %v3918_v39 = vpop.f32.mrf.mxu0  ;;  %v375_v48 = vpop.f32.mrf.mxu1 }
  0xf1   : > { %v405_v41 = vadd.f32 %v375_v48, %v261_v37 }
  0xf2   : > { %v236_v42 = vpop.f32.mrf.mxu0  ;;  %v3955_v43 = vpop.f32.mrf.mxu1 }
  0xf3   : > { %v262_v52 = vadd.f32 %v236_v42, %v119_v38 }
  0xf4   : > { %v3921_v45 = vpop.f32.mrf.mxu0  ;;  %v380_v55 = vpop.f32.mrf.mxu1 }
  0xf5   : > { %v406_v46 = vadd.f32 %v380_v55, %v262_v52 }
  0xf6   : > { %v241_v47 = vpop.f32.mrf.mxu0  ;;  %v3958_v60 = vpop.f32.mrf.mxu1 }
  0xf7   : > { %v263_v49 = vadd.f32 %v241_v47, %v120_v44 }
  0xf8   : > { %v3924_v51 = vpop.f32.mrf.mxu0  ;;  %v385_v26 = vpop.f32.mrf.mxu1 }
  0xf9   : > { %v407_v53 = vadd.f32 %v385_v26, %v263_v49 }
  0xfa   : > { %v246_v54 = vpop.f32.mrf.mxu0  ;;  %v3961_v56 = vpop.f32.mrf.mxu1 }
  0xfb   : > { %v264_v57 = vadd.f32 %v246_v54, %v121_v50 }
  0xfc   : > { %v3927_v59 = vpop.f32.mrf.mxu0  ;;  %v390_v61 = vpop.f32.mrf.mxu1 }
  0xfd   : > { %v408_v62 = vadd.f32 %v390_v61, %v264_v57 }
  0xfe   : > { %v251_v63 = vpop.f32.mrf.mxu0  ;;  %v3964_v27 = vpop.f32.mrf.mxu1 }
  0xff   : > { %v265_v28 = vadd.f32 %v251_v63, %v122_v58 }
 0x100   : > { %v3930_v30 = vpop.f32.mrf.mxu0  ;;  %v395_v31 = vpop.f32.mrf.mxu1 }
 0x101   : > { %v409_v34 = vadd.f32 %v395_v31, %v265_v28 }
 0x102   : > { %v256_v35 = vpop.f32.mrf.mxu0  ;;  %v3967_v37 = vpop.f32.mrf.mxu1 }
 0x103   : > { %v266_v38 = vadd.f32 %v256_v35, %v123_v29 }
 0x104   : > { %v3933_v39 = vpop.f32.mrf.mxu0 }
 0x105   : > { %v400_v48 = vpop.f32.mrf.mxu1 }
 0x106   : > { %v410_v42 = vadd.f32 %v400_v48, %v266_v38 }
 0x107   : > { %v3970_v43 = vpop.f32.mrf.mxu1  ;;  %v514_v52 = vpop.f32.mrf.mxu0 }
 0x108   : > { %v548_v44 = vadd.f32 %v514_v52, %v404_v32 }
 0x109   : > { %v3989_v45 = vpop.f32.mrf.mxu0 }
 0x10a   : > { %v658_v55 = vpop.f32.mrf.mxu1 }
 0x10b   : > { %v692_v47 = vadd.f32 %v658_v55, %v548_v44 }
 0x10c   : > { %v519_v60 = vpop.f32.mrf.mxu0  ;;  %v4026_v49 = vpop.f32.mrf.mxu1 }
 0x10d   : > { %v549_v50 = vadd.f32 %v519_v60, %v405_v41 }
 0x10e   : > { %v3992_v51 = vpop.f32.mrf.mxu0  ;;  %v663_v26 = vpop.f32.mrf.mxu1 }
 0x10f   : > { %v5479_v54 = vadd.f32 %v663_v26, %v549_v50 }
 0x110   : > { %v524_v56 = vpop.f32.mrf.mxu0  ;;  %v4029_v57 = vpop.f32.mrf.mxu1 }
 0x111   : > { %v550_v58 = vadd.f32 %v524_v56, %v406_v46 }
 0x112   : > { %v3995_v59 = vpop.f32.mrf.mxu0  ;;  %v668_v61 = vpop.f32.mrf.mxu1 }
 0x113   : > { %v5481_v63 = vadd.f32 %v668_v61, %v550_v58 }
 0x114   : > { %v529_v27 = vpop.f32.mrf.mxu0  ;;  %v4032_v28 = vpop.f32.mrf.mxu1 }
 0x115   : > { %v551_v32 = vadd.f32 %v529_v27, %v407_v53 }
 0x116   : > { %v3998_v29 = vpop.f32.mrf.mxu0  ;;  %v673_v30 = vpop.f32.mrf.mxu1 }
 0x117   : > { %v5483_v31 = vadd.f32 %v673_v30, %v551_v32 }
 0x118   : > { %v534_v35 = vpop.f32.mrf.mxu0  ;;  %v4035_v41 = vpop.f32.mrf.mxu1 }
 0x119   : > { %v552_v37 = vadd.f32 %v534_v35, %v408_v62 }
 0x11a   : > { %v4001_v38 = vpop.f32.mrf.mxu0  ;;  %v678_v39 = vpop.f32.mrf.mxu1 }
 0x11b   : > { %v5485_v48 = vadd.f32 %v678_v39, %v552_v37 }
 0x11c   : > { %v539_v43 = vpop.f32.mrf.mxu0  ;;  %v4038_v46 = vpop.f32.mrf.mxu1 }
 0x11d   : > { %v553_v52 = vadd.f32 %v539_v43, %v409_v34 }
 0x11e   : > { %v4004_v44 = vpop.f32.mrf.mxu0  ;;  %v683_v45 = vpop.f32.mrf.mxu1 }
 0x11f   : > { %v5487_v55 = vadd.f32 %v683_v45, %v553_v52 }
 0x120   : > { %v544_v60 = vpop.f32.mrf.mxu0  ;;  %v4041_v53 = vpop.f32.mrf.mxu1 }
 0x121   : > { %v554_v49 = vadd.f32 %v544_v60, %v410_v42 }
 0x122   : > { %v4007_v50 = vpop.f32.mrf.mxu0 }
 0x123   : > { %v688_v51 = vpop.f32.mrf.mxu1 }
 0x124   : > { %v5489_v26 = vadd.f32 %v688_v51, %v554_v49 }
 0x125   : > { %v4044_v56 = vpop.f32.mrf.mxu1  ;;  %v802_v62 = vpop.f32.mrf.mxu0 }
 0x126   : > { %v836_v57 = vadd.f32 %v802_v62, %v692_v47 }
 0x127   : > { %v4063_v58 = vpop.f32.mrf.mxu0 }
 0x128   : > { %v946_v59 = vpop.f32.mrf.mxu1 }
 0x129   : > { %v5491_v61 = vadd.f32 %v946_v59, %v836_v57 }
 0x12a   : > { %v5493_v27 = vpop.f32.mrf.mxu0  ;;  %v4100_v34 = vpop.f32.mrf.mxu1 }
 0x12b   : > { %v1595_v34 = vld [vmem:[%s6378_s2 + $0x38] sm:$0xff] }
 0x12c   : > { %v4066_v28 = vpop.f32.mrf.mxu0  ;;  %v5495_v32 = vpop.f32.mrf.mxu1  ;;  %4231 = vmatpush3.msra.mxu1 %v1595_v34  ;;  %v1591_v34 = vld [vmem:[%s6378_s2 + $0x18] sm:$0xff] }
 0x12d   : > { %v3493_v28 = vld [vmem:[%s6378_s2 + $0x78] sm:$0xff]  ;;  %4232 = vmatprep.subr.mxu1 %v6394_v36 }
 0x12e   : > { %v5497_v29 = vpop.f32.mrf.mxu0  ;;  %v4103_v42 = vpop.f32.mrf.mxu1  ;;  %4268 = vmatpush3.msra.mxu0 %v3493_v28  ;;  %v3489_v28 = vld [vmem:[%s6378_s2 + $0x58] sm:$0xff] }
 0x12f   : > { %4269 = vmatprep.subr.mxu0 %v6394_v36  ;;  %v838_v11 = vadd.f32 %v5497_v29, %v5481_v63 }
 0x130   : > { %v4069_v30 = vpop.f32.mrf.mxu0  ;;  %v5499_v35 = vpop.f32.mrf.mxu1 }
 0x132   : > { %v5501_v41 = vpop.f32.mrf.mxu0  ;;  %v4106_v37 = vpop.f32.mrf.mxu1 }
 0x133   : > { %v1594_v37 = vld [vmem:[%s6378_s2 + $0x30] sm:$0xff] }
 0x134   : > { %v4072_v47 = vpop.f32.mrf.mxu0  ;;  %v5503_v38 = vpop.f32.mrf.mxu1  ;;  %4233 = vmatpush3.msra.mxu1 %v1594_v37 }
 0x135   : > { %v3492_v47 = vld [vmem:[%s6378_s2 + $0x70] sm:$0xff]  ;;  %4234 = vmatprep.subr.mxu1 %v6394_v36 }
 0x136   : > { %v5505_v39 = vpop.f32.mrf.mxu0  ;;  %v4109_v43 = vpop.f32.mrf.mxu1  ;;  %4270 = vmatpush3.msra.mxu0 %v3492_v47  ;;  %v1590_v47 = vld [vmem:[%s6378_s2 + $0x10] sm:$0xff] }
 0x137   : > { %4271 = vmatprep.subr.mxu0 %v6394_v36 }
 0x138   : > { %v4075_v46 = vpop.f32.mrf.mxu0  ;;  %v5507_v52 = vpop.f32.mrf.mxu1 }
 0x13a   : > { %v5509_v44 = vpop.f32.mrf.mxu0  ;;  %v4112_v45 = vpop.f32.mrf.mxu1 }
 0x13b   : > { %v1593_v45 = vld [vmem:[%s6378_s2 + $0x28] sm:$0xff] }
 0x13c   : > { %v4078_v60 = vpop.f32.mrf.mxu0  ;;  %v5511_v53 = vpop.f32.mrf.mxu1  ;;  %4235 = vmatpush3.msra.mxu1 %v1593_v45 }
 0x13d   : > { %v3491_v60 = vld [vmem:[%s6378_s2 + $0x68] sm:$0xff]  ;;  %4236 = vmatprep.subr.mxu1 %v6394_v36 }
 0x13e   : > { %v5513_v49 = vpop.f32.mrf.mxu0  ;;  %v4115_v50 = vpop.f32.mrf.mxu1  ;;  %4272 = vmatpush3.msra.mxu0 %v3491_v60 }
 0x13f   : > { %4273 = vmatprep.subr.mxu0 %v6394_v36 }
 0x140   : > { %v4081_v51 = vpop.f32.mrf.mxu0 }
 0x141   : > { %v5515_v56 = vpop.f32.mrf.mxu1 }
 0x143   : > { %v4118_v62 = vpop.f32.mrf.mxu1  ;;  %v5517_v57 = vpop.f32.mrf.mxu0 }
 0x144   : > { %v1592_v62 = vld [vmem:[%s6378_s2 + $0x20] sm:$0xff] }
 0x145   : > { %v4137_v58 = vpop.f32.mrf.mxu0  ;;  %4237 = vmatpush3.msra.mxu1 %v1592_v62  ;;  %v3487_v62 = vld [vmem:[%s6378_s2 + $0x48] sm:$0xff] }
 0x146   : > { %v5519_v59 = vpop.f32.mrf.mxu1  ;;  %v3490_v58 = vld [vmem:[%s6378_s2 + $0x60] sm:$0xff]  ;;  %4238 = vmatprep.subr.mxu1 %v6394_v36 }
 0x147   : > { %4274 = vmatpush3.msra.mxu0 %v3490_v58  ;;  %4239 = vmatpush3.msra.mxu1 %v1591_v34  ;;  %v1588_v34 = vld [vmem:[%s6378_s2] sm:$0xff] }
 0x148   : > { %v5527_v42 = vpop.f32.mrf.mxu0  ;;  %v4174_v30 = vpop.f32.mrf.mxu1  ;;  %4275 = vmatprep.subr.mxu0 %v6394_v36  ;;  %4240 = vmatprep.subr.mxu1 %v6394_v36 }
 0x149   : > { %4276 = vmatpush3.msra.mxu0 %v3489_v28  ;;  %4241 = vmatpush3.msra.mxu1 %v1590_v47  ;;  %v3486_v28 = vld [vmem:[%s6378_s2 + $0x40] sm:$0xff] }
 0x14a   : > { %v4140_v43 = vpop.f32.mrf.mxu0  ;;  %v5537_v46 = vpop.f32.mrf.mxu1  ;;  %4277 = vmatprep.subr.mxu0 %v6394_v36  ;;  %4242 = vmatprep.subr.mxu1 %v6394_v36 }
 0x14b   : > { %v3488_v43 = vld [vmem:[%s6378_s2 + $0x50] sm:$0xff] }
 0x14c   : > { %v1100_v50 = vpop.f32.mrf.mxu0  ;;  %v4177_v51 = vpop.f32.mrf.mxu1  ;;  %4278 = vmatpush3.msra.mxu0 %v3488_v43 }
 0x14d   : > { %v1589_v51 = vld [vmem:[%s6378_s2 + $0x8] sm:$0xff]  ;;  %4279 = vmatprep.subr.mxu0 %v6394_v36 }
 0x14e   : > { %v4143_v30 = vpop.f32.mrf.mxu0  ;;  %v1244_v37 = vpop.f32.mrf.mxu1  ;;  %4243 = vmatpush3.msra.mxu1 %v1589_v51  ;;  %4280 = vmatpush3.msra.mxu0 %v3487_v62  ;;  %v837_v51 = vadd.f32 %v5493_v27, %v5479_v54  ;;  %v1124_v54 = vadd.f32 %v5517_v57, %v5491_v61 }
 0x14f   : > { %4244 = vmatprep.subr.mxu1 %v6394_v36  ;;  %4281 = vmatprep.subr.mxu0 %v6394_v36 }
 0x150   : > { %v1105_v45 = vpop.f32.mrf.mxu0  ;;  %v4180_v60 = vpop.f32.mrf.mxu1  ;;  %4245 = vmatpush3.msra.mxu1 %v1588_v34  ;;  %4282 = vmatpush3.msra.mxu0 %v3486_v28 }
 0x151   : > { %4304 = vmatprep.subr.mxu1 %v6394_v36  ;;  %4341 = vmatprep.subr.mxu0 %v6394_v36  ;;  %v982_v36 = vadd.f32 %v5499_v35, %v838_v11  ;;  %v1268_v11 = vadd.f32 %v5519_v59, %v1124_v54 }
 0x152   : > { %v4146_v58 = vpop.f32.mrf.mxu0  ;;  %v1249_v30 = vpop.f32.mrf.mxu1 }
 0x153   : > { %v1126_v27 = vadd.f32 %v1100_v50, %v982_v36 }
 0x154   : > { %v1110_v60 = vpop.f32.mrf.mxu0  ;;  %v4183_v3 = vpop.f32.mrf.mxu1 }
 0x155   : > { %v1270_v35 = vadd.f32 %v1244_v37, %v1126_v27  ;;  %v5613_v37 = vpop.permute.xlu1 %1438 }
 0x156   : > { %v4149_v47 = vpop.f32.mrf.mxu0  ;;  %v1254_v43 = vpop.f32.mrf.mxu1 }
 0x157   : > { %v981_v47 = vadd.f32 %v5495_v32, %v837_v51  ;;  %v840_v32 = vadd.f32 %v5505_v39, %v5485_v48 }
 0x158   : > { %v1115_v58 = vpop.f32.mrf.mxu0  ;;  %v4186_v8 = vpop.f32.mrf.mxu1 }
 0x159   : > { %v839_v8 = vadd.f32 %v5501_v41, %v5483_v31  ;;  %v984_v61 = vadd.f32 %v5507_v52, %v840_v32  ;;  %v5632_v27 = vpop.permute.xlu1 %1443 }
 0x15a   : > { %v4152_v9 = vpop.f32.mrf.mxu0  ;;  %v1259_v10 = vpop.f32.mrf.mxu1 }
 0x15b   : > { %v1125_v9 = vadd.f32 %v5527_v42, %v981_v47  ;;  %v983_v63 = vadd.f32 %v5503_v38, %v839_v8  ;;  %v5607_v42 = vpop.permute.xlu0 %1428  ;;  %v1128_v39 = vadd.f32 %v1110_v60, %v984_v61 }
 0x15c   : > { %v1120_v3 = vpop.f32.mrf.mxu0  ;;  %v4189_v62 = vpop.f32.mrf.mxu1 }
 0x15d   : > { %v1127_v31 = vadd.f32 %v1105_v45, %v983_v63  ;;  %v1272_v60 = vadd.f32 %v1254_v43, %v1128_v39 }
 0x15e   : > { %v4155_v34 = vpop.f32.mrf.mxu0  ;;  %v1264_v28 = vpop.f32.mrf.mxu1 }
 0x15f   : > { %v1271_v48 = vadd.f32 %v1249_v30, %v1127_v31  ;;  %v5621_v34 = vpop.permute.xlu0 %1433 }
 0x160   : > { %v1378_v12 = vpop.f32.mrf.mxu0  ;;  %v4192_v13 = vpop.f32.mrf.mxu1 }
 0x161   : > { %v1269_v13 = vadd.f32 %v5537_v46, %v1125_v9  ;;  %v1412_v38 = vadd.f32 %v1378_v12, %v1268_v11 }
 0x162   : > { %v4211_v14 = vpop.f32.mrf.mxu0 }
 0x163   : > { %v841_v14 = vadd.f32 %v5509_v44, %v5487_v55  ;;  %v842_v55 = vadd.f32 %v5513_v49, %v5489_v26  ;;  %v5617_v44 = vmax.f32 %v1412_v38, 0.0 }
 0x164   : > { %v1383_v62 = vpop.f32.mrf.mxu0 }
 0x165   : > { %v1413_v41 = vadd.f32 %v1383_v62, %v1269_v13  ;;  %v985_v59 = vadd.f32 %v5511_v53, %v841_v14  ;;  %v986_v9 = vadd.f32 %v5515_v56, %v842_v55  ;;  %v1461_v26 = vmul.f32 %v5607_v42, %v5617_v44  ;;  %v5639_v56 = vpop.permute.xlu0 %1448 }
 0x166   : > { %v4214_v29 = vpop.f32.mrf.mxu0 }
 0x167   : > { %v5610_v46 = vmax.f32 %v1413_v41, 0.0  ;;  %v1129_v12 = vadd.f32 %v1115_v58, %v985_v59  ;;  %v1130_v43 = vadd.f32 %v1120_v3, %v986_v9  ;;  %v1468_v11 = vsel %vm51_vm0, %v1461_v26, 0.0 }
 0x168   : > { %v1388_v36 = vpop.f32.mrf.mxu0 }
 0x169   : > { %v1414_v57 = vadd.f32 %v1388_v36, %v1270_v35  ;;  %v1462_v47 = vmul.f32 %v5621_v34, %v5610_v46  ;;  %v1273_v58 = vadd.f32 %v1259_v10, %v1129_v12  ;;  %v1274_v14 = vadd.f32 %v1264_v28, %v1130_v43  ;;  %v5656_v28 = vpop.permute.xlu0 %1458 }
 0x16a   : > { %v4217_v50 = vpop.f32.mrf.mxu0 }
 0x16b   : > { %v5619_v51 = vmax.f32 %v1414_v57, 0.0  ;;  %v1469_v63 = vsel %vm51_vm0, %v1462_v47, 0.0  ;;  %v5648_v57 = vpop.permute.xlu1 %1453 }
 0x16c   : > { %v1393_v45 = vpop.f32.mrf.mxu0  ;;  %v1470_v41 = vadd.f32 %v1469_v63, %v1468_v11 }
 0x16d   : > { %v1415_v52 = vadd.f32 %v1393_v45, %v1271_v48  ;;  %v1463_v49 = vmul.f32 %v5613_v37, %v5619_v51 }
 0x16e   : > { %v4220_v30 = vpop.f32.mrf.mxu0 }
 0x16f   : > { %v5625_v53 = vmax.f32 %v1415_v52, 0.0  ;;  %v1471_v10 = vsel %vm51_vm0, %v1463_v49, 0.0 }
 0x170   : > { %v1398_v8 = vpop.f32.mrf.mxu0  ;;  %v1472_v38 = vadd.f32 %v1471_v10, %v1470_v41 }
 0x171   : > { %v1416_v54 = vadd.f32 %v1398_v8, %v1272_v60  ;;  %v1464_v13 = vmul.f32 %v5632_v27, %v5625_v53 }
 0x172   : > { %v4223_v62 = vpop.f32.mrf.mxu0 }
 0x173   : > { %v5635_v32 = vmax.f32 %v1416_v54, 0.0  ;;  %v1473_v36 = vsel %vm51_vm0, %v1464_v13, 0.0 }
 0x174   : > { %v1403_v29 = vpop.f32.mrf.mxu0  ;;  %v1474_v45 = vadd.f32 %v1473_v36, %v1472_v38 }
 0x175   : > { %v1465_v35 = vmul.f32 %v5639_v56, %v5635_v32  ;;  %v1417_v31 = vadd.f32 %v1403_v29, %v1273_v58 }
 0x176   : > { %v4226_v3 = vpop.f32.mrf.mxu0 }
 0x177   : > { %v5646_v61 = vmax.f32 %v1417_v31, 0.0  ;;  %v1475_v48 = vsel %vm51_vm0, %v1465_v35, 0.0 }
 0x178   : > { %v1408_v50 = vpop.f32.mrf.mxu0  ;;  %v1476_v30 = vadd.f32 %v1475_v48, %v1474_v45 }
 0x179   : > { %v1466_v39 = vmul.f32 %v5648_v57, %v5646_v61  ;;  %v1418_v59 = vadd.f32 %v1408_v50, %v1274_v14 }
 0x17a   : > { %v4229_v55 = vpop.f32.mrf.mxu0 }
 0x17b   : > { %v1477_v52 = vsel %vm51_vm0, %v1466_v39, 0.0  ;;  %v5654_v12 = vmax.f32 %v1418_v59, 0.0 }
 0x17c   : > { %v1478_v47 = vadd.f32 %v1477_v52, %v1476_v30 }
 0x17d   : > { %v1467_v60 = vmul.f32 %v5656_v28, %v5654_v12 }
 0x17f   : > { %v1479_v8 = vsel %vm60_vm1, %v1467_v60, 0.0 }
 0x180   : > { %v1480_v9 = vadd.f32 %v1479_v8, %v1478_v47 }
 0x182   : > { %v1481_v26 = vrot.slane %v1480_v9, 4 }
 0x184   : > { %v1482_v49 = vadd.f32 %v1481_v26, %v1480_v9 }
 0x186   : > { %v1483_v54 = vrot.slane %v1482_v49, 2 }
 0x188   : > { %v1484_v58 = vadd.f32 %v1483_v54, %v1482_v49 }
 0x18a   : > { %v1485_v62 = vrot.slane %v1484_v58, 1 }
 0x18c   : > { %v1486_v43 = vadd.f32 %v1485_v62, %v1484_v58 }
 0x18e   : > { %v1487_v63 = vmul.f32 0.055555556, %v1486_v43 }
 0x190   : > { %v1488_v13 = vsub.f32 %v5617_v44, %v1487_v63  ;;  %v1489_v29 = vsub.f32 %v5610_v46, %v1487_v63  ;;  %v1490_v11 = vsub.f32 %v5619_v51, %v1487_v63  ;;  %v1491_v35 = vsub.f32 %v5625_v53, %v1487_v63 }
 0x191   : > { %v1492_v10 = vsub.f32 %v5635_v32, %v1487_v63  ;;  %v1493_v31 = vsub.f32 %v5646_v61, %v1487_v63  ;;  %v1494_v38 = vsub.f32 %v5654_v12, %v1487_v63 }
 0x192   : > { %v1495_v41 = vmul.f32 %v1488_v13, %v1488_v13  ;;  %v1496_v3 = vmul.f32 %v1489_v29, %v1489_v29  ;;  %v1497_v14 = vmul.f32 %v1490_v11, %v1490_v11  ;;  %v1498_v36 = vmul.f32 %v1491_v35, %v1491_v35 }
 0x193   : > { %v1499_v50 = vmul.f32 %v1492_v10, %v1492_v10  ;;  %v1500_v45 = vmul.f32 %v1493_v31, %v1493_v31  ;;  %v1501_v47 = vmul.f32 %v1494_v38, %v1494_v38 }
 0x194   : > { %v1502_v48 = vmul.f32 %v1495_v41, %v5607_v42  ;;  %v1503_v39 = vmul.f32 %v1496_v3, %v5621_v34  ;;  %v1504_v59 = vmul.f32 %v1497_v14, %v5613_v37  ;;  %v1505_v55 = vmul.f32 %v1498_v36, %v5632_v27 }
 0x195   : > { %v1506_v8 = vmul.f32 %v1499_v50, %v5639_v56  ;;  %v1507_v49 = vmul.f32 %v1500_v45, %v5648_v57  ;;  %v1508_v62 = vmul.f32 %v1501_v47, %v5656_v28 }
 0x196   : > { %v1509_v52 = vsel %vm51_vm0, %v1502_v48, 0.0  ;;  %v1510_v30 = vsel %vm51_vm0, %v1503_v39, 0.0  ;;  %v1512_v9 = vsel %vm51_vm0, %v1504_v59, 0.0  ;;  %v1514_v54 = vsel %vm51_vm0, %v1505_v55, 0.0 }
 0x197   : > { %v1511_v60 = vadd.f32 %v1510_v30, %v1509_v52  ;;  %v1516_v43 = vsel %vm51_vm0, %v1506_v8, 0.0  ;;  %v1518_v29 = vsel %vm51_vm0, %v1507_v49, 0.0  ;;  %v1520_v35 = vsel %vm60_vm1, %v1508_v62, 0.0 }
 0x198   : > { %v1533_v39 = vlaneseq }
 0x199   : > { %v1513_v26 = vadd.f32 %v1512_v9, %v1511_v60 }
 0x19a   : > { %v1534_v59 = vshrl.u32 %v1533_v39, 7 }
 0x19b   : > { %v1515_v58 = vadd.f32 %v1514_v54, %v1513_v26 }
 0x19c   : > { %v5682_v45 = vsub.s32 0, %v1534_v59  ;;  %v3506_v59 = vld [vmem:[%s6378_s2 + $0xa8] sm:$0xff] }
 0x19d   : > { %v1517_v13 = vadd.f32 %v1516_v43, %v1515_v58 }
 0x19f   : > { %v1519_v11 = vadd.f32 %v1518_v29, %v1517_v13 }
 0x1a1   : > { %v1521_v10 = vadd.f32 %v1520_v35, %v1519_v11 }
 0x1a3   : > { %v1522_v31 = vrot.slane %v1521_v10, 4 }
 0x1a5   : > { %v1523_v41 = vadd.f32 %v1522_v31, %v1521_v10 }
 0x1a7   : > { %v1524_v3 = vrot.slane %v1523_v41, 2 }
 0x1a9   : > { %v1525_v14 = vadd.f32 %v1524_v3, %v1523_v41  ;;  %v3508_v41 = vld [vmem:[%s6378_s2 + $0xb8] sm:$0xff] }
 0x1ab   : > { %v1526_v36 = vrot.slane %v1525_v14, 1 }
 0x1ad   : > { %v1527_v38 = vadd.f32 %v1526_v36, %v1525_v14  ;;  %v3507_v36 = vld [vmem:[%s6378_s2 + $0xb0] sm:$0xff] }
 0x1af   : > { %v1528_v50 = vmul.f32 0.055555556, %v1527_v38  ;;  %v3523_v38 = vld [vmem:[%s6378_s2 + $0xf8] sm:$0xff] }
 0x1b1   : > { %v1529_v48 = vadd.f32 1e-05, %v1528_v50  ;;  %v6429_v50 = vmov 0.0  }
 0x1b3   : > { %4624 = vrsqrt.f32 %v1529_v48 }
 0x1c0   : > { %v4625_v55 = vpop.eup %4624 }
 0x1c1   : > { %v1531_v52 = vmul.f32 %v4625_v55, %v6427_v22  ;;  %v3522_v55 = vld [vmem:[%s6378_s2 + $0xf0] sm:$0xff] }
 0x1c3   : > { %v1536_v30 = vrot.slane %v1531_v52, %v5682_v45  ;;  %v1545_v60 = vmul.f32 %v1531_v52, %v1487_v63 }
 0x1c5   : > { %v1546_v47 = vsub.f32 %v6428_v23, %v1545_v60  ;;  %v1544_v8 = vmul.f32 %v1536_v30, %v5654_v12  ;;  %v1538_v26 = vmul.f32 %v1536_v30, %v5617_v44  ;;  %v1539_v49 = vmul.f32 %v1536_v30, %v5610_v46  ;;  %v3505_v60 = vld [vmem:[%s6378_s2 + $0xa0] sm:$0xff] }
 0x1c6   : > { %v1540_v54 = vmul.f32 %v1536_v30, %v5619_v51  ;;  %v1541_v58 = vmul.f32 %v1536_v30, %v5625_v53  ;;  %v1542_v62 = vmul.f32 %v1536_v30, %v5635_v32  ;;  %v1543_v43 = vmul.f32 %v1536_v30, %v5646_v61 }
 0x1c7   : > { %v1551_v9 = vrot.slane %v1546_v47, %v5682_v45  ;;  %v3521_v47 = vld [vmem:[%s6378_s2 + $0xe8] sm:$0xff] }
 0x1c9   : > { %v1559_v13 = vadd.f32 %v1551_v9, %v1544_v8  ;;  %v1553_v63 = vadd.f32 %v1551_v9, %v1538_v26  ;;  %v1554_v29 = vadd.f32 %v1551_v9, %v1539_v49  ;;  %v1555_v11 = vadd.f32 %v1551_v9, %v1540_v54  ;;  %v3504_v26 = vld [vmem:[%s6378_s2 + $0x98] sm:$0xff]  ;;  %v3503_v49 = vld [vmem:[%s6378_s2 + $0x90] sm:$0xff] }
 0x1ca   : > { %v1556_v35 = vadd.f32 %v1551_v9, %v1541_v58  ;;  %v1557_v12 = vadd.f32 %v1551_v9, %v1542_v62  ;;  %v1558_v10 = vadd.f32 %v1551_v9, %v1543_v43  ;;  %v3520_v62 = vld [vmem:[%s6378_s2 + $0xe0] sm:$0xff]  ;;  %v3519_v43 = vld [vmem:[%s6378_s2 + $0xd8] sm:$0xff] }
 0x1cb   : > { %v1566_v31 = vmul.f32 %v1559_v13, %v5656_v28  ;;  %v1560_v44 = vmul.f32 %v1553_v63, %v5607_v42  ;;  %v1561_v46 = vmul.f32 %v1554_v29, %v5621_v34  ;;  %v1562_v51 = vmul.f32 %v1555_v11, %v5613_v37  ;;  %v3502_v13 = vld [vmem:[%s6378_s2 + $0x88] sm:$0xff]  ;;  %v3518_v11 = vld [vmem:[%s6378_s2 + $0xd0] sm:$0xff] }
 0x1cc   : > { %v1563_v53 = vmul.f32 %v1556_v35, %v5632_v27  ;;  %v1564_v32 = vmul.f32 %v1557_v12, %v5639_v56  ;;  %v1565_v61 = vmul.f32 %v1558_v10, %v5648_v57  ;;  %v3517_v35 = vld [vmem:[%s6378_s2 + $0xc8] sm:$0xff] }
 0x1cd   : > { %1573 = vst.msk [vmem:[#allocation3 + $0x38] sm:$0x3] %vm60_vm1, %v1566_v31  ;;  %v3501_v31 = vld [vmem:[%s6378_s2 + $0x80] sm:$0xff] }
 0x1ce   : > { %1567 = vst.msk [vmem:[#allocation3 + $0x8] sm:$0xff] %vm51_vm0, %v1560_v44  ;;  %1568 = vst.msk [vmem:[#allocation3 + $0x10] sm:$0xff] %vm51_vm0, %v1561_v46  ;;  %v3516_v44 = vld [vmem:[%s6378_s2 + $0xc0] sm:$0xff] }
 0x1cf   : > { %1569 = vst.msk [vmem:[#allocation3 + $0x18] sm:$0xff] %vm51_vm0, %v1562_v51  ;;  %1570 = vst.msk [vmem:[#allocation3 + $0x20] sm:$0xff] %vm51_vm0, %v1563_v53  ;;  %v3538_v53 = vld [vmem:[%s6378_s2 + $0x138] sm:$0xff] }
 0x1d0   : > { %1571 = vst.msk [vmem:[#allocation3 + $0x28] sm:$0xff] %vm51_vm0, %v1564_v32  ;;  %1572 = vst.msk [vmem:[#allocation3 + $0x30] sm:$0xff] %vm51_vm0, %v1565_v61  ;;  %v3537_v32 = vld [vmem:[%s6378_s2 + $0x130] sm:$0xff] }
 0x1d5   : > { %v1581_v3 = vld [vmem:[#allocation3 + $0x2] sm:$0xff]  ;;  %v1582_v48 = vld [vmem:[#allocation3 + $0xa] sm:$0xff] }
 0x1d6   : > { %v1724_v14 = vld [vmem:[#allocation3 + $0x3] sm:$0xff]  ;;  %4247 = vmatmul.mubr.msk.f32.vlgmr.msra.gmra.mxu1 %vm51_vm0, %v1581_v3  ;;  %v1725_v39 = vld [vmem:[#allocation3 + $0xb] sm:$0xff]  ;;  %v1726_v30 = vld [vmem:[#allocation3 + $0x13] sm:$0xff] }
 0x1d7   : > { %4284 = vmatmul.mubr.msk.f32.vlgmr.msra.gmra.mxu0 %vm51_vm0, %v1724_v14  ;;  %4305 = vmatpush3.msra.mxu1 %v3508_v41  ;;  %v1583_v52 = vld [vmem:[#allocation3 + $0x12] sm:$0xff]  ;;  %v1584_v8 = vld [vmem:[#allocation3 + $0x1a] sm:$0xff]  ;;  %v1585_v54 = vld [vmem:[#allocation3 + $0x22] sm:$0xff] }
 0x1d8   : > { %4249 = vmatprep.mubr.msk.f32.mxu1 %vm4672_vm2, %v6429_v50  ;;  %4286 = vmatprep.mubr.msk.f32.mxu0 %vm4672_vm2, %v6429_v50  ;;  %v1727_v9 = vld [vmem:[#allocation3 + $0x1b] sm:$0xff]  ;;  %v1728_v58 = vld [vmem:[#allocation3 + $0x23] sm:$0xff]  ;;  %v1729_v29 = vld [vmem:[#allocation3 + $0x2b] sm:$0xff] }
 0x1d9   : > { %4306 = vmatprep.subr.mxu1 %v6429_v50  ;;  %4342 = vmatpush3.msra.mxu0 %v3523_v38  ;;  %v1586_v63 = vld [vmem:[#allocation3 + $0x2a] sm:$0xff]  ;;  %v1587_v12 = vld [vmem:[#allocation3 + $0x32] sm:$0x3]  ;;  %v3536_v3 = vld [vmem:[%s6378_s2 + $0x128] sm:$0xff] }
 0x1da   : > { %4307 = vmatpush3.msra.mxu1 %v3507_v36  ;;  %4343 = vmatprep.subr.mxu0 %v6429_v50  ;;  %v1730_v10 = vld [vmem:[#allocation3 + $0x33] sm:$0x3]  ;;  %v1868_v46 = vld [vmem:[#allocation3 + $0x4] sm:$0xff]  ;;  %v2014_v38 = vld [vmem:[#allocation3 + $0x17] sm:$0xff] }
 0x1db   : > { %4250 = vmatmul.mubr.msk.f32.gmra.mxu1 %vm51_vm0, %v1582_v48  ;;  %4287 = vmatmul.mubr.msk.f32.gmra.mxu0 %vm51_vm0, %v1725_v39  ;;  %v2012_v51 = vld [vmem:[#allocation3 + $0x7] sm:$0xff]  ;;  %v2013_v41 = vld [vmem:[#allocation3 + $0xf] sm:$0xff]  ;;  %v3535_v48 = vld [vmem:[%s6378_s2 + $0x120] sm:$0xff] }
 0x1dc   : > { %4252 = vmatprep.mubr.msk.f32.mxu1 %vm4672_vm2, %v6429_v50  ;;  %4289 = vmatprep.mubr.msk.f32.mxu0 %vm4672_vm2, %v6429_v50  ;;  %v5826_v61 = vld [vmem:[#allocation3 + $0xc] sm:$0xff]  ;;  %v5844_v36 = vld [vmem:[#allocation3 + $0x14] sm:$0xff] }
 0x1dd   : > { %4308 = vmatprep.subr.mxu1 %v6429_v50  ;;  %4344 = vmatpush3.msra.mxu0 %v3522_v55  ;;  %v3553_v14 = vld [vmem:[%s6378_s2 + $0x178] sm:$0xff]  ;;  %v3552_v39 = vld [vmem:[%s6378_s2 + $0x170] sm:$0xff]  ;;  %v2015_v55 = vld [vmem:[#allocation3 + $0x1f] sm:$0xff] }
 0x1de   : > { %4309 = vmatpush3.msra.mxu1 %v3506_v59  ;;  %4345 = vmatprep.subr.mxu0 %v6429_v50  ;;  %v5861_v59 = vld [vmem:[#allocation3 + $0x1c] sm:$0xff] }
 0x1df   : > { %4253 = vmatmul.mubr.msk.f32.gmra.mxu1 %vm51_vm0, %v1583_v52  ;;  %4290 = vmatmul.mubr.msk.f32.gmra.mxu0 %vm51_vm0, %v1726_v30  ;;  %v3534_v52 = vld [vmem:[%s6378_s2 + $0x118] sm:$0xff]  ;;  %v3551_v30 = vld [vmem:[%s6378_s2 + $0x168] sm:$0xff] }
 0x1e0   : > { %4255 = vmatprep.mubr.msk.f32.mxu1 %vm4672_vm2, %v6429_v50  ;;  %4292 = vmatprep.mubr.msk.f32.mxu0 %vm4672_vm2, %v6429_v50 }
 0x1e1   : > { %4310 = vmatprep.subr.mxu1 %v6429_v50  ;;  %4346 = vmatpush3.msra.mxu0 %v3521_v47  ;;  %v2016_v47 = vld [vmem:[#allocation3 + $0x27] sm:$0xff] }
 0x1e2   : > { %4311 = vmatpush3.msra.mxu1 %v3505_v60  ;;  %4347 = vmatprep.subr.mxu0 %v6429_v50  ;;  %v5877_v60 = vld [vmem:[#allocation3 + $0x24] sm:$0xff] }
 0x1e3   : > { %4256 = vmatmul.mubr.msk.f32.gmra.mxu1 %vm51_vm0, %v1584_v8  ;;  %4293 = vmatmul.mubr.msk.f32.gmra.mxu0 %vm51_vm0, %v1727_v9  ;;  %v3533_v8 = vld [vmem:[%s6378_s2 + $0x110] sm:$0xff]  ;;  %v3550_v9 = vld [vmem:[%s6378_s2 + $0x160] sm:$0xff] }
 0x1e4   : > { %4312 = vmatprep.subr.mxu1 %v6429_v50  ;;  %4258 = vmatprep.mubr.msk.f32.mxu1 %vm4672_vm2, %v6429_v50 }
 0x1e5   : > { %4295 = vmatprep.mubr.msk.f32.mxu0 %vm4672_vm2, %v6429_v50  ;;  %4313 = vmatpush3.msra.mxu1 %v3504_v26  ;;  %v3549_v26 = vld [vmem:[%s6378_s2 + $0x158] sm:$0xff] }
 0x1e6   : > { %4314 = vmatprep.subr.mxu1 %v6429_v50  ;;  %4348 = vmatpush3.msra.mxu0 %v3520_v62  ;;  %v3548_v62 = vld [vmem:[%s6378_s2 + $0x150] sm:$0xff] }
 0x1e7   : > { %4259 = vmatmul.mubr.msk.f32.gmra.mxu1 %vm51_vm0, %v1585_v54  ;;  %4296 = vmatmul.mubr.msk.f32.gmra.mxu0 %vm51_vm0, %v1728_v58  ;;  %v2017_v54 = vld [vmem:[#allocation3 + $0x2f] sm:$0xff]  ;;  %v3532_v58 = vld [vmem:[%s6378_s2 + $0x108] sm:$0xff] }
 0x1e8   : > { %4261 = vmatprep.mubr.msk.f32.mxu1 %vm4672_vm2, %v6429_v50  ;;  %4298 = vmatprep.mubr.msk.f32.mxu0 %vm4672_vm2, %v6429_v50 }
 0x1e9   : > { %4315 = vmatpush3.msra.mxu1 %v3503_v49  ;;  %4349 = vmatprep.subr.mxu0 %v6429_v50  ;;  %v5898_v49 = vld [vmem:[#allocation3 + $0x2c] sm:$0xff] }
 0x1ea   : > { %4316 = vmatprep.subr.mxu1 %v6429_v50  ;;  %4350 = vmatpush3.msra.mxu0 %v3519_v43  ;;  %v3547_v43 = vld [vmem:[%s6378_s2 + $0x148] sm:$0xff] }
 0x1eb   : > { %4262 = vmatmul.mubr.msk.f32.gmra.mxu1 %vm51_vm0, %v1586_v63  ;;  %4299 = vmatmul.mubr.msk.f32.gmra.mxu0 %vm51_vm0, %v1729_v29  ;;  %v2018_v63 = vld [vmem:[#allocation3 + $0x37] sm:$0x3] }
 0x1ec   : > { %4317 = vmatpush3.msra.mxu1 %v3502_v13  ;;  %4351 = vmatprep.subr.mxu0 %v6429_v50  ;;  %v1874_v13 = vld [vmem:[#allocation3 + $0x34] sm:$0x3]  ;;  %v3531_v29 = vld [vmem:[%s6378_s2 + $0x100] sm:$0xff] }
 0x1ed   : > { %4264 = vmatprep.mubr.msk.f32.mxu1 %vm4672_vm2, %v6429_v50  ;;  %4301 = vmatprep.mubr.msk.f32.mxu0 %vm4672_vm2, %v6429_v50 }
 0x1ee   : > { %4352 = vmatpush3.msra.mxu0 %v3518_v11  ;;  %4318 = vmatprep.subr.mxu1 %v6429_v50  ;;  %v3546_v11 = vld [vmem:[%s6378_s2 + $0x140] sm:$0xff] }
 0x1ef   : > { %4265 = vmatmul.mubr.msk.f32.gmra.mxu1 %vm51_vm0, %v1587_v12  ;;  %4302 = vmatmul.mubr.msk.f32.gmra.mxu0 %vm51_vm0, %v1730_v10  ;;  %v2300_v12 = vld [vmem:[#allocation3 + $0x9] sm:$0xff] }
 0x1f0   : > { %4353 = vmatprep.subr.mxu0 %v6429_v50  ;;  %4319 = vmatpush3.msra.mxu1 %v3501_v31  ;;  %v3568_v10 = vld [vmem:[%s6378_s2 + $0x1b8] sm:$0xff]  ;;  %v3567_v31 = vld [vmem:[%s6378_s2 + $0x1b0] sm:$0xff] }
 0x1f1   : > { %4354 = vmatpush3.msra.mxu0 %v3517_v35  ;;  %4320 = vmatprep.mubr.msk.f32.mxu1 %vm4672_vm2, %v6429_v50  ;;  %v2156_v35 = vld [vmem:[#allocation3 + $0x8] sm:$0xff] }
 0x1f2   : > { %4355 = vmatprep.subr.mxu0 %v6429_v50  ;;  %4357 = vmatprep.mubr.msk.f32.mxu0 %vm4672_vm2, %v6429_v50 }
 0x1f3   : > { %4356 = vmatpush3.msra.mxu0 %v3516_v44  ;;  %4321 = vmatmul.mubr.msk.f32.vlgmr.msra.gmra.mxu1 %vm51_vm0, %v1868_v46  ;;  %v2157_v44 = vld [vmem:[#allocation3 + $0x10] sm:$0xff] }
 0x1f4   : > { %4358 = vmatmul.mubr.msk.f32.vlgmr.msra.gmra.mxu0 %vm51_vm0, %v2012_v51  ;;  %4378 = vmatprep.subr.mxu1 %v6429_v50  ;;  %v2301_v46 = vld [vmem:[#allocation3 + $0x11] sm:$0xff]  ;;  %v3566_v51 = vld [vmem:[%s6378_s2 + $0x1a8] sm:$0xff] }
 0x1f5   : > { %4323 = vmatprep.mubr.msk.f32.mxu1 %vm4672_vm2, %v6429_v50  ;;  %4379 = vmatpush3.msra.mxu1 %v3538_v53  ;;  %v3583_v53 = vld [vmem:[%s6378_s2 + $0x1f8] sm:$0xff] }
 0x1f6   : > { %4360 = vmatprep.mubr.msk.f32.mxu0 %vm4672_vm2, %v6429_v50  ;;  %4380 = vmatprep.subr.mxu1 %v6429_v50 }
 0x1f7   : > { %4415 = vmatprep.subr.mxu0 %v6429_v50  ;;  %4324 = vmatmul.mubr.msk.f32.gmra.mxu1 %vm51_vm0, %v5826_v61 }
 0x1f8   : > { %4361 = vmatmul.mubr.msk.f32.gmra.mxu0 %vm51_vm0, %v2013_v41  ;;  %4381 = vmatpush3.msra.mxu1 %v3537_v32  ;;  %v2158_v32 = vld [vmem:[#allocation3 + $0x18] sm:$0xff] }
 0x1f9   : > { %4326 = vmatprep.mubr.msk.f32.mxu1 %vm4672_vm2, %v6429_v50  ;;  %4363 = vmatprep.mubr.msk.f32.mxu0 %vm4672_vm2, %v6429_v50  ;;  %v2302_v41 = vld [vmem:[#allocation3 + $0x19] sm:$0xff] }
 0x1fa   : > { %4382 = vmatprep.subr.mxu1 %v6429_v50  ;;  %4416 = vmatpush3.msra.mxu0 %v3553_v14  ;;  %v3582_v14 = vld [vmem:[%s6378_s2 + $0x1f0] sm:$0xff] }
 0x1fb   : > { %4383 = vmatpush3.msra.mxu1 %v3536_v3  ;;  %4417 = vmatprep.subr.mxu0 %v6429_v50  ;;  %v3565_v3 = vld [vmem:[%s6378_s2 + $0x1a0] sm:$0xff] }
 0x1fc   : > { %4327 = vmatmul.mubr.msk.f32.gmra.mxu1 %vm51_vm0, %v5844_v36  ;;  %4364 = vmatmul.mubr.msk.f32.gmra.mxu0 %vm51_vm0, %v2014_v38  ;;  %v2159_v38 = vld [vmem:[#allocation3 + $0x20] sm:$0xff] }
 0x1fd   : > { %4329 = vmatprep.mubr.msk.f32.mxu1 %vm4672_vm2, %v6429_v50  ;;  %4366 = vmatprep.mubr.msk.f32.mxu0 %vm4672_vm2, %v6429_v50 }
 0x1fe   : > { %4384 = vmatprep.subr.mxu1 %v6429_v50  ;;  %4418 = vmatpush3.msra.mxu0 %v3552_v39  ;;  %v3564_v39 = vld [vmem:[%s6378_s2 + $0x198] sm:$0xff] }
 0x1ff   : > { %4385 = vmatpush3.msra.mxu1 %v3535_v48  ;;  %4419 = vmatprep.subr.mxu0 %v6429_v50  ;;  %v2303_v48 = vld [vmem:[#allocation3 + $0x21] sm:$0xff] }
 0x200   : > { %4330 = vmatmul.mubr.msk.f32.gmra.mxu1 %vm51_vm0, %v5861_v59  ;;  %4367 = vmatmul.mubr.msk.f32.gmra.mxu0 %vm51_vm0, %v2015_v55  ;;  %v3581_v55 = vld [vmem:[%s6378_s2 + $0x1e8] sm:$0xff] }
 0x201   : > { %4386 = vmatprep.subr.mxu1 %v6429_v50  ;;  %4332 = vmatprep.mubr.msk.f32.mxu1 %vm4672_vm2, %v6429_v50 }
 0x202   : > { %4369 = vmatprep.mubr.msk.f32.mxu0 %vm4672_vm2, %v6429_v50  ;;  %4387 = vmatpush3.msra.mxu1 %v3534_v52  ;;  %v2160_v52 = vld [vmem:[#allocation3 + $0x28] sm:$0xff] }
 0x203   : > { %4388 = vmatprep.subr.mxu1 %v6429_v50  ;;  %4420 = vmatpush3.msra.mxu0 %v3551_v30  ;;  %v2304_v30 = vld [vmem:[#allocation3 + $0x29] sm:$0xff] }
 0x204   : > { %4333 = vmatmul.mubr.msk.f32.gmra.mxu1 %vm51_vm0, %v5877_v60  ;;  %4370 = vmatmul.mubr.msk.f32.gmra.mxu0 %vm51_vm0, %v2016_v47  ;;  %v3563_v47 = vld [vmem:[%s6378_s2 + $0x190] sm:$0xff] }
 0x205   : > { %4335 = vmatprep.mubr.msk.f32.mxu1 %vm4672_vm2, %v6429_v50  ;;  %4421 = vmatprep.subr.mxu0 %v6429_v50 }
 0x206   : > { %4372 = vmatprep.mubr.msk.f32.mxu0 %vm4672_vm2, %v6429_v50  ;;  %4389 = vmatpush3.msra.mxu1 %v3533_v8  ;;  %v3580_v8 = vld [vmem:[%s6378_s2 + $0x1e0] sm:$0xff] }
 0x207   : > { %4422 = vmatpush3.msra.mxu0 %v3550_v9  ;;  %4390 = vmatprep.subr.mxu1 %v6429_v50  ;;  %v3579_v9 = vld [vmem:[%s6378_s2 + $0x1d8] sm:$0xff] }
 0x208   : > { %4336 = vmatmul.mubr.msk.f32.gmra.mxu1 %vm51_vm0, %v5898_v49  ;;  %4373 = vmatmul.mubr.msk.f32.gmra.mxu0 %vm51_vm0, %v2017_v54  ;;  %v2305_v54 = vld [vmem:[#allocation3 + $0x31] sm:$0xff] }
 0x209   : > { %4423 = vmatprep.subr.mxu0 %v6429_v50  ;;  %4391 = vmatpush3.msra.mxu1 %v3532_v58  ;;  %v3562_v58 = vld [vmem:[%s6378_s2 + $0x188] sm:$0xff] }
 0x20a   : > { %4424 = vmatpush3.msra.mxu0 %v3549_v26  ;;  %4338 = vmatprep.mubr.msk.f32.mxu1 %vm4672_vm2, %v6429_v50  ;;  %v2161_v26 = vld [vmem:[#allocation3 + $0x30] sm:$0xff] }
 0x20b   : > { %4425 = vmatprep.subr.mxu0 %v6429_v50  ;;  %4375 = vmatprep.mubr.msk.f32.mxu0 %vm4672_vm2, %v6429_v50 }
 0x20c   : > { %4426 = vmatpush3.msra.mxu0 %v3548_v62  ;;  %4339 = vmatmul.mubr.msk.f32.gmra.mxu1 %vm51_vm0, %v1874_v13  ;;  %v3578_v62 = vld [vmem:[%s6378_s2 + $0x1d0] sm:$0xff]  ;;  %v2162_v13 = vld [vmem:[#allocation3 + $0x38] sm:$0x3] }
 0x20d   : > { %4376 = vmatmul.mubr.msk.f32.gmra.mxu0 %vm51_vm0, %v2018_v63  ;;  %4427 = vmatprep.subr.mxu0 %v6429_v50  ;;  %v2306_v63 = vld [vmem:[#allocation3 + $0x39] sm:$0x3] }
 0x20e   : > { %4392 = vmatprep.subr.mxu1 %v6429_v50  ;;  %4428 = vmatpush3.msra.mxu0 %v3547_v43  ;;  %v3577_v43 = vld [vmem:[%s6378_s2 + $0x1c8] sm:$0xff] }
 0x20f   : > { %4393 = vmatpush3.msra.mxu1 %v3531_v29  ;;  %4429 = vmatprep.subr.mxu0 %v6429_v50  ;;  %v3561_v29 = vld [vmem:[%s6378_s2 + $0x180] sm:$0xff] }
 0x210   : > { %4394 = vmatprep.mubr.msk.f32.mxu1 %vm4672_vm2, %v6429_v50  ;;  %4430 = vmatpush3.msra.mxu0 %v3546_v11  ;;  %v3576_v11 = vld [vmem:[%s6378_s2 + $0x1c0] sm:$0xff] }
 0x211   : > { %4431 = vmatprep.mubr.msk.f32.mxu0 %vm4672_vm2, %v6429_v50  ;;  %4395 = vmatmul.mubr.msk.f32.vlgmr.msra.gmra.mxu1 %vm51_vm0, %v2156_v35  ;;  %v2588_v35 = vld [vmem:[#allocation3 + $0xd] sm:$0xff] }
 0x212   : > { %4432 = vmatmul.mubr.msk.f32.vlgmr.msra.gmra.mxu0 %vm51_vm0, %v2300_v12  ;;  %4452 = vmatprep.subr.mxu1 %v6429_v50  ;;  %v3598_v12 = vld [vmem:[%s6378_s2 + $0x238] sm:$0xff] }
 0x213   : > { %4397 = vmatprep.mubr.msk.f32.mxu1 %vm4672_vm2, %v6429_v50  ;;  %4453 = vmatpush3.msra.mxu1 %v3568_v10  ;;  %v3597_v10 = vld [vmem:[%s6378_s2 + $0x230] sm:$0xff] }
 0x214   : > { %4434 = vmatprep.mubr.msk.f32.mxu0 %vm4672_vm2, %v6429_v50  ;;  %4454 = vmatprep.subr.mxu1 %v6429_v50 }
 0x215   : > { %4489 = vmatprep.subr.mxu0 %v6429_v50  ;;  %4398 = vmatmul.mubr.msk.f32.gmra.mxu1 %vm51_vm0, %v2157_v44  ;;  %v2590_v44 = vld [vmem:[#allocation3 + $0x1d] sm:$0xff] }
 0x216   : > { %4435 = vmatmul.mubr.msk.f32.gmra.mxu0 %vm51_vm0, %v2301_v46  ;;  %4455 = vmatpush3.msra.mxu1 %v3567_v31  ;;  %v2589_v31 = vld [vmem:[#allocation3 + $0x15] sm:$0xff]  ;;  %v2591_v46 = vld [vmem:[#allocation3 + $0x25] sm:$0xff] }
 0x217   : > { %4400 = vmatprep.mubr.msk.f32.mxu1 %vm4672_vm2, %v6429_v50  ;;  %4437 = vmatprep.mubr.msk.f32.mxu0 %vm4672_vm2, %v6429_v50 }
 0x218   : > { %4456 = vmatprep.subr.mxu1 %v6429_v50  ;;  %4490 = vmatpush3.msra.mxu0 %v3583_v53  ;;  %v3593_v53 = vld [vmem:[%s6378_s2 + $0x210] sm:$0xff] }
 0x219   : > { %4457 = vmatpush3.msra.mxu1 %v3566_v51  ;;  %4491 = vmatprep.subr.mxu0 %v6429_v50  ;;  %v2592_v51 = vld [vmem:[#allocation3 + $0x2d] sm:$0xff] }
 0x21a   : > { %4401 = vmatmul.mubr.msk.f32.gmra.mxu1 %vm51_vm0, %v2158_v32  ;;  %4438 = vmatmul.mubr.msk.f32.gmra.mxu0 %vm51_vm0, %v2302_v41  ;;  %v2449_v32 = vld [vmem:[#allocation3 + $0x34] sm:$0xff] }
 0x21b   : > { %4403 = vmatprep.mubr.msk.f32.mxu1 %vm4672_vm2, %v6429_v50  ;;  %4440 = vmatprep.mubr.msk.f32.mxu0 %vm4672_vm2, %v6429_v50  ;;  %v2593_v41 = vld [vmem:[#allocation3 + $0x35] sm:$0xff] }
 0x21c   : > { %4458 = vmatprep.subr.mxu1 %v6429_v50  ;;  %4492 = vmatpush3.msra.mxu0 %v3582_v14  ;;  %v2594_v14 = vld [vmem:[#allocation3 + $0x3d] sm:$0x3] }
 0x21d   : > { %4459 = vmatpush3.msra.mxu1 %v3565_v3  ;;  %4493 = vmatprep.subr.mxu0 %v6429_v50  ;;  %v2450_v3 = vld [vmem:[#allocation3 + $0x3c] sm:$0x3] }
 0x21e   : > { %4404 = vmatmul.mubr.msk.f32.gmra.mxu1 %vm51_vm0, %v2159_v38  ;;  %4441 = vmatmul.mubr.msk.f32.gmra.mxu0 %vm51_vm0, %v2303_v48  ;;  %v2732_v38 = vld [vmem:[#allocation3 + $0xe] sm:$0xff]  ;;  %v2733_v48 = vld [vmem:[#allocation3 + $0x16] sm:$0xff] }
 0x21f   : > { %4460 = vmatprep.subr.mxu1 %v6429_v50  ;;  %4406 = vmatprep.mubr.msk.f32.mxu1 %vm4672_vm2, %v6429_v50 }
 0x220   : > { %4443 = vmatprep.mubr.msk.f32.mxu0 %vm4672_vm2, %v6429_v50  ;;  %4461 = vmatpush3.msra.mxu1 %v3564_v39  ;;  %v2734_v39 = vld [vmem:[#allocation3 + $0x1e] sm:$0xff] }
 0x221   : > { %4462 = vmatprep.subr.mxu1 %v6429_v50  ;;  %4494 = vmatpush3.msra.mxu0 %v3581_v55  ;;  %v2735_v55 = vld [vmem:[#allocation3 + $0x26] sm:$0xff] }
 0x222   : > { %4407 = vmatmul.mubr.msk.f32.gmra.mxu1 %vm51_vm0, %v2160_v52  ;;  %4444 = vmatmul.mubr.msk.f32.gmra.mxu0 %vm51_vm0, %v2304_v30  ;;  %v2736_v52 = vld [vmem:[#allocation3 + $0x2e] sm:$0xff]  ;;  %v2737_v30 = vld [vmem:[#allocation3 + $0x36] sm:$0xff] }
 0x223   : > { %4409 = vmatprep.mubr.msk.f32.mxu1 %vm4672_vm2, %v6429_v50  ;;  %4495 = vmatprep.subr.mxu0 %v6429_v50 }
 0x224   : > { %4446 = vmatprep.mubr.msk.f32.mxu0 %vm4672_vm2, %v6429_v50  ;;  %4463 = vmatpush3.msra.mxu1 %v3563_v47  ;;  %v2738_v47 = vld [vmem:[#allocation3 + $0x3e] sm:$0x3] }
 0x225   : > { %4496 = vmatpush3.msra.mxu0 %v3580_v8  ;;  %4464 = vmatprep.subr.mxu1 %v6429_v50  ;;  %v1574_v8 = vmul.f32 %v4664_v33, %v6430_v15 }
 0x226   : > { %4410 = vmatmul.mubr.msk.f32.gmra.mxu1 %vm51_vm0, %v2161_v26  ;;  %4447 = vmatmul.mubr.msk.f32.gmra.mxu0 %vm51_vm0, %v2305_v54 }
 0x227   : > { %4497 = vmatprep.subr.mxu0 %v6429_v50  ;;  %4465 = vmatpush3.msra.mxu1 %v3562_v58  ;;  %v1575_v58 = vmul.f32 %v4664_v33, %v6431_v16 }
 0x228   : > { %4498 = vmatpush3.msra.mxu0 %v3579_v9  ;;  %4412 = vmatprep.mubr.msk.f32.mxu1 %vm4672_vm2, %v6429_v50 }
 0x229   : > { %4499 = vmatprep.subr.mxu0 %v6429_v50  ;;  %4449 = vmatprep.mubr.msk.f32.mxu0 %vm4672_vm2, %v6429_v50 }
 0x22a   : > { %4500 = vmatpush3.msra.mxu0 %v3578_v62  ;;  %4413 = vmatmul.mubr.msk.f32.gmra.mxu1 %vm51_vm0, %v2162_v13 }
 0x22b   : > { %4450 = vmatmul.mubr.msk.f32.gmra.mxu0 %vm51_vm0, %v2306_v63  ;;  %4501 = vmatprep.subr.mxu0 %v6429_v50 }
 0x22c   : > { %4466 = vmatprep.subr.mxu1 %v6429_v50  ;;  %4502 = vmatpush3.msra.mxu0 %v3577_v43 }
 0x22d   : > { %4467 = vmatpush3.msra.mxu1 %v3561_v29  ;;  %4503 = vmatprep.subr.mxu0 %v6429_v50 }
 0x22e   : > { %4468 = vmatprep.mubr.msk.f32.mxu1 %vm4672_vm2, %v6429_v50  ;;  %4504 = vmatpush3.msra.mxu0 %v3576_v11 }
 0x22f   : > { %4505 = vmatprep.mubr.msk.f32.mxu0 %vm4672_vm2, %v6429_v50  ;;  %4469 = vmatmul.mubr.msk.f32.vlgmr.msra.gmra.mxu1 %vm51_vm0, %v5826_v61  ;;  %v3596_v61 = vld [vmem:[%s6378_s2 + $0x228] sm:$0xff] }
 0x230   : > { %4506 = vmatmul.mubr.msk.f32.vlgmr.msra.gmra.mxu0 %vm51_vm0, %v2588_v35  ;;  %4526 = vmatprep.subr.mxu1 %v6429_v50 }
 0x231   : > { %4471 = vmatprep.mubr.msk.f32.mxu1 %vm4672_vm2, %v6429_v50  ;;  %4527 = vmatpush3.msra.mxu1 %v3598_v12 }
 0x232   : > { %4508 = vmatprep.mubr.msk.f32.mxu0 %vm4672_vm2, %v6429_v50  ;;  %4528 = vmatprep.subr.mxu1 %v6429_v50 }
 0x233   : > { %4472 = vmatmul.mubr.msk.f32.gmra.mxu1 %vm51_vm0, %v5844_v36  ;;  %v3595_v36 = vld [vmem:[%s6378_s2 + $0x220] sm:$0xff] }
 0x234   : > { %4509 = vmatmul.mubr.msk.f32.gmra.mxu0 %vm51_vm0, %v2589_v31  ;;  %4529 = vmatpush3.msra.mxu1 %v3597_v10 }
 0x235   : > { %4474 = vmatprep.mubr.msk.f32.mxu1 %vm4672_vm2, %v6429_v50  ;;  %4511 = vmatprep.mubr.msk.f32.mxu0 %vm4672_vm2, %v6429_v50 }
 0x236   : > { %4530 = vmatprep.subr.mxu1 %v6429_v50 }
 0x237   : > { %4531 = vmatpush3.msra.mxu1 %v3596_v61 }
 0x238   : > { %4475 = vmatmul.mubr.msk.f32.gmra.mxu1 %vm51_vm0, %v5861_v59  ;;  %4512 = vmatmul.mubr.msk.f32.gmra.mxu0 %vm51_vm0, %v2590_v44  ;;  %v3594_v59 = vld [vmem:[%s6378_s2 + $0x218] sm:$0xff] }
 0x239   : > { %4477 = vmatprep.mubr.msk.f32.mxu1 %vm4672_vm2, %v6429_v50  ;;  %4514 = vmatprep.mubr.msk.f32.mxu0 %vm4672_vm2, %v6429_v50 }
 0x23a   : > { %4532 = vmatprep.subr.mxu1 %v6429_v50 }
 0x23b   : > { %4533 = vmatpush3.msra.mxu1 %v3595_v36  ;;  %v1577_v36 = vmul.f32 %v4664_v33, %v6433_v18 }
 0x23c   : > { %4478 = vmatmul.mubr.msk.f32.gmra.mxu1 %vm51_vm0, %v5877_v60  ;;  %4515 = vmatmul.mubr.msk.f32.gmra.mxu0 %vm51_vm0, %v2591_v46  ;;  %v3592_v60 = vld [vmem:[%s6378_s2 + $0x208] sm:$0xff] }
 0x23d   : > { %4534 = vmatprep.subr.mxu1 %v6429_v50  ;;  %4480 = vmatprep.mubr.msk.f32.mxu1 %vm4672_vm2, %v6429_v50 }
 0x23e   : > { %4517 = vmatprep.mubr.msk.f32.mxu0 %vm4672_vm2, %v6429_v50  ;;  %4535 = vmatpush3.msra.mxu1 %v3594_v59 }
 0x23f   : > { %4536 = vmatprep.subr.mxu1 %v6429_v50 }
 0x240   : > { %4481 = vmatmul.mubr.msk.f32.gmra.mxu1 %vm51_vm0, %v5898_v49  ;;  %4518 = vmatmul.mubr.msk.f32.gmra.mxu0 %vm51_vm0, %v2592_v51  ;;  %v3591_v49 = vld [vmem:[%s6378_s2 + $0x200] sm:$0xff] }
 0x241   : > { %4483 = vmatprep.mubr.msk.f32.mxu1 %vm4672_vm2, %v6429_v50  ;;  %4520 = vmatprep.mubr.msk.f32.mxu0 %vm4672_vm2, %v6429_v50 }
 0x242   : > { %4537 = vmatpush3.msra.mxu1 %v3593_v53 }
 0x243   : > { %4538 = vmatprep.subr.mxu1 %v6429_v50 }
 0x244   : > { %4484 = vmatmul.mubr.msk.f32.gmra.mxu1 %vm51_vm0, %v2449_v32  ;;  %4521 = vmatmul.mubr.msk.f32.gmra.mxu0 %vm51_vm0, %v2593_v41  ;;  %v1578_v41 = vmul.f32 %v4664_v33, %v6434_v19 }
 0x245   : > { %4539 = vmatpush3.msra.mxu1 %v3592_v60  ;;  %4486 = vmatprep.mubr.msk.f32.mxu1 %vm4672_vm2, %v6429_v50 }
 0x246   : > { %4523 = vmatprep.mubr.msk.f32.mxu0 %vm4672_vm2, %v6429_v50  ;;  %4540 = vmatprep.subr.mxu1 %v6429_v50 }
 0x247   : > { %4541 = vmatpush3.msra.mxu1 %v3591_v49 }
 0x248   : > { %4487 = vmatmul.mubr.msk.f32.gmra.mxu1 %vm51_vm0, %v2450_v3  ;;  %4524 = vmatmul.mubr.msk.f32.gmra.mxu0 %vm51_vm0, %v2594_v14 }
 0x249   : > { %4542 = vmatprep.mubr.msk.f32.mxu1 %vm4672_vm2, %v6429_v50 }
 0x24c   : > { %4543 = vmatmul.mubr.msk.f32.vlgmr.msra.gmra.mxu1 %vm51_vm0, %v2732_v38 }
 0x24d   : > { %4545 = vmatprep.mubr.msk.f32.mxu1 %vm4672_vm2, %v6429_v50 }
 0x250   : > { %4546 = vmatmul.mubr.msk.f32.gmra.mxu1 %vm51_vm0, %v2733_v48 }
 0x251   : > { %4548 = vmatprep.mubr.msk.f32.mxu1 %vm4672_vm2, %v6429_v50 }
 0x254   : > { %4549 = vmatmul.mubr.msk.f32.gmra.mxu1 %vm51_vm0, %v2734_v39 }
 0x255   : > { %4551 = vmatprep.mubr.msk.f32.mxu1 %vm4672_vm2, %v6429_v50 }
 0x258   : > { %4552 = vmatmul.mubr.msk.f32.gmra.mxu1 %vm51_vm0, %v2735_v55  ;;  %v1579_v55 = vmul.f32 %v4664_v33, %v6435_v20 }
 0x259   : > { %4554 = vmatprep.mubr.msk.f32.mxu1 %vm4672_vm2, %v6429_v50 }
 0x25c   : > { %4555 = vmatmul.mubr.msk.f32.gmra.mxu1 %vm51_vm0, %v2736_v52 }
 0x25d   : > { %4557 = vmatprep.mubr.msk.f32.mxu1 %vm4672_vm2, %v6429_v50 }
 0x260   : > { %4558 = vmatmul.mubr.msk.f32.gmra.mxu1 %vm51_vm0, %v2737_v30 }
 0x261   : > { %4560 = vmatprep.mubr.msk.f32.mxu1 %vm4672_vm2, %v6429_v50  ;;  %v1576_v50 = vmul.f32 %v4664_v33, %v6432_v17 }
 0x264   : > { %4561 = vmatmul.mubr.msk.f32.gmra.mxu1 %vm51_vm0, %v2738_v47 }
 0x296   : > { %v1683_v9 = vpop.f32.mrf.mxu1 }
 0x297   : > { %v1827_v26 = vpop.f32.mrf.mxu0  ;;  %v1717_v54 = vadd.f32 %v1683_v9, %v1574_v8 }
 0x298   : > { %v4248_v62 = vpop.f32.mrf.mxu1 }
 0x299   : > { %v4285_v43 = vpop.f32.mrf.mxu0  ;;  %v1861_v13 = vadd.f32 %v1827_v26, %v1717_v54  ;;  %v1580_v54 = vmul.f32 %v4664_v33, %v6436_v21 }
 0x29b   : > { %v1688_v63 = vpop.f32.mrf.mxu1  ;;  %v1832_v29 = vpop.f32.mrf.mxu0 }
 0x29c   : > { %v1718_v11 = vadd.f32 %v1688_v63, %v1575_v58 }
 0x29d   : > { %v4251_v35 = vpop.f32.mrf.mxu1  ;;  %v4288_v12 = vpop.f32.mrf.mxu0 }
 0x29e   : > { %v1862_v10 = vadd.f32 %v1832_v29, %v1718_v11 }
 0x29f   : > { %v1693_v31 = vpop.f32.mrf.mxu1  ;;  %v1837_v61 = vpop.f32.mrf.mxu0 }
 0x2a0   : > { %v1719_v44 = vadd.f32 %v1693_v31, %v1576_v50 }
 0x2a1   : > { %v4254_v46 = vpop.f32.mrf.mxu1  ;;  %v4291_v59 = vpop.f32.mrf.mxu0 }
 0x2a2   : > { %v1863_v51 = vadd.f32 %v1837_v61, %v1719_v44 }
 0x2a3   : > { %v1698_v53 = vpop.f32.mrf.mxu1  ;;  %v1842_v60 = vpop.f32.mrf.mxu0 }
 0x2a4   : > { %v1720_v32 = vadd.f32 %v1698_v53, %v1577_v36 }
 0x2a5   : > { %v4257_v49 = vpop.f32.mrf.mxu1  ;;  %v4294_v3 = vpop.f32.mrf.mxu0 }
 0x2a6   : > { %v1864_v14 = vadd.f32 %v1842_v60, %v1720_v32 }
 0x2a7   : > { %v1703_v38 = vpop.f32.mrf.mxu1  ;;  %v1847_v48 = vpop.f32.mrf.mxu0 }
 0x2a8   : > { %v1721_v39 = vadd.f32 %v1703_v38, %v1578_v41 }
 0x2a9   : > { %v4260_v52 = vpop.f32.mrf.mxu1  ;;  %v4297_v30 = vpop.f32.mrf.mxu0 }
 0x2aa   : > { %v1865_v47 = vadd.f32 %v1847_v48, %v1721_v39 }
 0x2ab   : > { %v1708_v8 = vpop.f32.mrf.mxu1  ;;  %v1852_v9 = vpop.f32.mrf.mxu0 }
 0x2ac   : > { %v1722_v26 = vadd.f32 %v1708_v8, %v1579_v55 }
 0x2ad   : > { %v4263_v58 = vpop.f32.mrf.mxu1  ;;  %v4300_v62 = vpop.f32.mrf.mxu0 }
 0x2ae   : > { %v1866_v43 = vadd.f32 %v1852_v9, %v1722_v26 }
 0x2af   : > { %v1713_v63 = vpop.f32.mrf.mxu1  ;;  %v1857_v29 = vpop.f32.mrf.mxu0 }
 0x2b0   : > { %v1723_v11 = vadd.f32 %v1713_v63, %v1580_v54 }
 0x2b1   : > { %v4266_v50 = vpop.f32.mrf.mxu1  ;;  %v4303_v35 = vpop.f32.mrf.mxu0 }
 0x2b2   : > { %v1867_v12 = vadd.f32 %v1857_v29, %v1723_v11 }
 0x2b3   : > { %v1971_v31 = vpop.f32.mrf.mxu1 }
 0x2b4   : > { %v2115_v61 = vpop.f32.mrf.mxu0  ;;  %v2005_v44 = vadd.f32 %v1971_v31, %v1861_v13 }
 0x2b5   : > { %v4322_v36 = vpop.f32.mrf.mxu1 }
 0x2b6   : > { %v4359_v46 = vpop.f32.mrf.mxu0  ;;  %v2149_v59 = vadd.f32 %v2115_v61, %v2005_v44 }
 0x2b7   : > { %v1976_v53 = vpop.f32.mrf.mxu1 }
 0x2b8   : > { %v2120_v60 = vpop.f32.mrf.mxu0  ;;  %v2006_v32 = vadd.f32 %v1976_v53, %v1862_v10 }
 0x2b9   : > { %v4325_v41 = vpop.f32.mrf.mxu1 }
 0x2ba   : > { %v4362_v33 = vpop.f32.mrf.mxu0  ;;  %v6150_v49 = vadd.f32 %v2120_v60, %v2006_v32 }
 0x2bc   : > { %v1981_v3 = vpop.f32.mrf.mxu1  ;;  %v2125_v38 = vpop.f32.mrf.mxu0 }
 0x2bd   : > { %v2007_v48 = vadd.f32 %v1981_v3, %v1863_v51 }
 0x2be   : > { %v4328_v39 = vpop.f32.mrf.mxu1  ;;  %v4365_v55 = vpop.f32.mrf.mxu0 }
 0x2bf   : > { %v6152_v52 = vadd.f32 %v2125_v38, %v2007_v48 }
 0x2c0   : > { %v1986_v30 = vpop.f32.mrf.mxu1  ;;  %v2130_v8 = vpop.f32.mrf.mxu0 }
 0x2c1   : > { %v2008_v13 = vadd.f32 %v1986_v30, %v1864_v14 }
 0x2c2   : > { %v4331_v9 = vpop.f32.mrf.mxu1  ;;  %v4368_v26 = vpop.f32.mrf.mxu0 }
 0x2c3   : > { %v6154_v54 = vadd.f32 %v2130_v8, %v2008_v13 }
 0x2c4   : > { %v1991_v58 = vpop.f32.mrf.mxu1  ;;  %v2135_v10 = vpop.f32.mrf.mxu0 }
 0x2c5   : > { %v2009_v62 = vadd.f32 %v1991_v58, %v1865_v47 }
 0x2c6   : > { %v4334_v63 = vpop.f32.mrf.mxu1  ;;  %v4371_v29 = vpop.f32.mrf.mxu0 }
 0x2c7   : > { %v6156_v11 = vadd.f32 %v2135_v10, %v2009_v62 }
 0x2c8   : > { %v1996_v50 = vpop.f32.mrf.mxu1  ;;  %v2140_v51 = vpop.f32.mrf.mxu0 }
 0x2c9   : > { %v2010_v35 = vadd.f32 %v1996_v50, %v1866_v43 }
 0x2ca   : > { %v4337_v31 = vpop.f32.mrf.mxu1  ;;  %v4374_v61 = vpop.f32.mrf.mxu0 }
 0x2cb   : > { %v6158_v44 = vadd.f32 %v2140_v51, %v2010_v35 }
 0x2cc   : > { %v2001_v36 = vpop.f32.mrf.mxu1 }
 0x2cd   : > { %v2145_v14 = vpop.f32.mrf.mxu0  ;;  %v2011_v46 = vadd.f32 %v2001_v36, %v1867_v12 }
 0x2ce   : > { %v4340_v53 = vpop.f32.mrf.mxu1 }
 0x2cf   : > { %v4377_v60 = vpop.f32.mrf.mxu0  ;;  %v6160_v32 = vadd.f32 %v2145_v14, %v2011_v46 }
 0x2d1   : > { %v2259_v41 = vpop.f32.mrf.mxu1 }
 0x2d2   : > { %v2403_v47 = vpop.f32.mrf.mxu0  ;;  %v2293_v33 = vadd.f32 %v2259_v41, %v2149_v59 }
 0x2d3   : > { %v4396_v3 = vpop.f32.mrf.mxu1 }
 0x2d4   : > { %v4433_v38 = vpop.f32.mrf.mxu0  ;;  %v2437_v48 = vadd.f32 %v2403_v47, %v2293_v33 }
 0x2d5   : > { %v2264_v39 = vpop.f32.mrf.mxu1 }
 0x2d6   : > { %v2408_v55 = vpop.f32.mrf.mxu0  ;;  %v2294_v19 = vadd.f32 %v2264_v39, %v6150_v49 }
 0x2d7   : > { %v4399_v43 = vpop.f32.mrf.mxu1 }
 0x2d8   : > { %v4436_v30 = vpop.f32.mrf.mxu0  ;;  %v2438_v21 = vadd.f32 %v2408_v55, %v2294_v19 }
 0x2da   : > { %v2269_v8 = vpop.f32.mrf.mxu1  ;;  %v2413_v13 = vpop.f32.mrf.mxu0 }
 0x2db   : > { %v2295_v20 = vadd.f32 %v2269_v8, %v6152_v52 }
 0x2dc   : > { %v4402_v9 = vpop.f32.mrf.mxu1  ;;  %v4439_v26 = vpop.f32.mrf.mxu0 }
 0x2de   : > { %v2274_v58 = vpop.f32.mrf.mxu1  ;;  %v2418_v12 = vpop.f32.mrf.mxu0 }
 0x2e0   : > { %v4405_v10 = vpop.f32.mrf.mxu1  ;;  %v4442_v62 = vpop.f32.mrf.mxu0 }
 0x2e2   : > { %v2279_v63 = vpop.f32.mrf.mxu1  ;;  %v2423_v29 = vpop.f32.mrf.mxu0 }
 0x2e4   : > { %v4408_v50 = vpop.f32.mrf.mxu1  ;;  %v4445_v51 = vpop.f32.mrf.mxu0 }
 0x2e6   : > { %v2284_v59 = vpop.f32.mrf.mxu1  ;;  %v6162_v35 = vpop.f32.mrf.mxu0 }
 0x2e7   : > { %v2298_v19 = vadd.f32 %v2284_v59, %v6158_v44 }
 0x2e8   : > { %v4411_v31 = vpop.f32.mrf.mxu1  ;;  %v4448_v61 = vpop.f32.mrf.mxu0 }
 0x2ea   : > { %v2289_v36 = vpop.f32.mrf.mxu1 }
 0x2eb   : > { %v6164_v14 = vpop.f32.mrf.mxu0 }
 0x2ec   : > { %v4414_v46 = vpop.f32.mrf.mxu1 }
 0x2ed   : > { %v4451_v53 = vpop.f32.mrf.mxu0 }
 0x2ef   : > { %v2547_v60 = vpop.f32.mrf.mxu1 }
 0x2f0   : > { %v2691_v41 = vpop.f32.mrf.mxu0 }
 0x2f1   : > { %v4470_v47 = vpop.f32.mrf.mxu1 }
 0x2f2   : > { %v4507_v33 = vpop.f32.mrf.mxu0 }
 0x2f3   : > { %v2552_v3 = vpop.f32.mrf.mxu1 }
 0x2f4   : > { %v2696_v38 = vpop.f32.mrf.mxu0  ;;  %v2582_v23 = vadd.f32 %v2552_v3, %v2438_v21 }
 0x2f5   : > { %v4473_v43 = vpop.f32.mrf.mxu1 }
 0x2f6   : > { %v4510_v30 = vpop.f32.mrf.mxu0  ;;  %v2726_v49 = vadd.f32 %v2696_v38, %v2582_v23  ;;  %v2299_v23 = vadd.f32 %v2289_v36, %v6160_v32 }
 0x2f8   : > { %v2557_v9 = vpop.f32.mrf.mxu1  ;;  %v2701_v26 = vpop.f32.mrf.mxu0 }
 0x2fa   : > { %v4476_v10 = vpop.f32.mrf.mxu1  ;;  %v4513_v62 = vpop.f32.mrf.mxu0 }
 0x2fc   : > { %v2562_v50 = vpop.f32.mrf.mxu1  ;;  %v2706_v51 = vpop.f32.mrf.mxu0 }
 0x2fe   : > { %v4479_v31 = vpop.f32.mrf.mxu1  ;;  %v4516_v61 = vpop.f32.mrf.mxu0 }
 0x2ff   : > { %v2439_v31 = vadd.f32 %v2413_v13, %v2295_v20  ;;  %v2296_v61 = vadd.f32 %v2274_v58, %v6154_v54 }
 0x300   : > { %v2567_v15 = vpop.f32.mrf.mxu1  ;;  %v2711_v16 = vpop.f32.mrf.mxu0 }
 0x301   : > { %v2583_v7 = vadd.f32 %v2557_v9, %v2439_v31 }
 0x302   : > { %v4482_v46 = vpop.f32.mrf.mxu1  ;;  %v4519_v53 = vpop.f32.mrf.mxu0 }
 0x303   : > { %v2581_v53 = vadd.f32 %v2547_v60, %v2437_v48  ;;  %v2727_v1 = vadd.f32 %v2701_v26, %v2583_v7 }
 0x304   : > { %v2572_v17 = vpop.f32.mrf.mxu1  ;;  %v2716_v18 = vpop.f32.mrf.mxu0 }
 0x305   : > { %v2725_v6 = vadd.f32 %v2691_v41, %v2581_v53 }
 0x306   : > { %v4485_v47 = vpop.f32.mrf.mxu1  ;;  %v4522_v33 = vpop.f32.mrf.mxu0 }
 0x307   : > { %v2440_v47 = vadd.f32 %v2418_v12, %v2296_v61  ;;  %v2297_v33 = vadd.f32 %v2279_v63, %v6156_v11  ;;  %v2442_v12 = vadd.f32 %v6162_v35, %v2298_v19 }
 0x308   : > { %v2577_v43 = vpop.f32.mrf.mxu1  ;;  %v2721_v30 = vpop.f32.mrf.mxu0 }
 0x309   : > { %v2584_v52 = vadd.f32 %v2562_v50, %v2440_v47  ;;  %v2441_v20 = vadd.f32 %v2423_v29, %v2297_v33  ;;  %v2586_v44 = vadd.f32 %v2572_v17, %v2442_v12 }
 0x30a   : > { %v4488_v10 = vpop.f32.mrf.mxu1  ;;  %v4525_v62 = vpop.f32.mrf.mxu0 }
 0x30b   : > { %v2728_v58 = vadd.f32 %v2706_v51, %v2584_v52  ;;  %v2585_v48 = vadd.f32 %v2567_v15, %v2441_v20  ;;  %v2730_v41 = vadd.f32 %v2716_v18, %v2586_v44 }
 0x30c   : > { %v2835_v22 = vpop.f32.mrf.mxu1 }
 0x30d   : > { %v2869_v13 = vadd.f32 %v2835_v22, %v2725_v6  ;;  %v2729_v29 = vadd.f32 %v2711_v16, %v2585_v48  ;;  %v2443_v22 = vadd.f32 %v6164_v14, %v2299_v23 }
 0x30e   : > { %v4544_v46 = vpop.f32.mrf.mxu1 }
 0x30f   : > { %v6175_v63 = vmax.f32 %v2869_v13, 0.0  ;;  %v2587_v17 = vadd.f32 %v2577_v43, %v2443_v22 }
 0x310   : > { %v2840_v5 = vpop.f32.mrf.mxu1 }
 0x311   : > { %v2870_v8 = vadd.f32 %v2840_v5, %v2726_v49  ;;  %v2883_v35 = vmul.f32 %v6175_v63, %v5607_v42  ;;  %v2731_v31 = vadd.f32 %v2721_v30, %v2587_v17 }
 0x312   : > { %v4547_v39 = vpop.f32.mrf.mxu1 }
 0x313   : > { %v6171_v60 = vmax.f32 %v2870_v8, 0.0  ;;  %v2890_v14 = vsel %vm51_vm0, %v2883_v35, 0.0 }
 0x314   : > { %v2845_v55 = vpop.f32.mrf.mxu1 }
 0x315   : > { %v2871_v54 = vadd.f32 %v2845_v55, %v2727_v1  ;;  %v2884_v1 = vmul.f32 %v6171_v60, %v5621_v34 }
 0x316   : > { %v4550_v21 = vpop.f32.mrf.mxu1 }
 0x317   : > { %v6177_v7 = vmax.f32 %v2871_v54, 0.0  ;;  %v2891_v16 = vsel %vm51_vm0, %v2884_v1, 0.0 }
 0x318   : > { %v2850_v11 = vpop.f32.mrf.mxu1  ;;  %v2892_v62 = vadd.f32 %v2891_v16, %v2890_v14 }
 0x319   : > { %v2872_v5 = vadd.f32 %v2850_v11, %v2728_v58  ;;  %v2885_v32 = vmul.f32 %v6177_v7, %v5613_v37 }
 0x31a   : > { %v4553_v59 = vpop.f32.mrf.mxu1 }
 0x31b   : > { %v6181_v6 = vmax.f32 %v2872_v5, 0.0  ;;  %v2893_v50 = vsel %vm51_vm0, %v2885_v32, 0.0 }
 0x31c   : > { %v2855_v15 = vpop.f32.mrf.mxu1  ;;  %v2894_v46 = vadd.f32 %v2893_v50, %v2892_v62 }
 0x31d   : > { %v2873_v36 = vadd.f32 %v2855_v15, %v2729_v29  ;;  %v2886_v38 = vmul.f32 %v6181_v6, %v5632_v27 }
 0x31e   : > { %v4556_v3 = vpop.f32.mrf.mxu1 }
 0x31f   : > { %v6191_v9 = vmax.f32 %v2873_v36, 0.0  ;;  %v2895_v43 = vsel %vm51_vm0, %v2886_v38, 0.0 }
 0x320   : > { %v2860_v26 = vpop.f32.mrf.mxu1  ;;  %v2896_v39 = vadd.f32 %v2895_v43, %v2894_v46 }
 0x321   : > { %v2887_v51 = vmul.f32 %v6191_v9, %v5639_v56  ;;  %v2874_v10 = vadd.f32 %v2860_v26, %v2730_v41 }
 0x322   : > { %v4559_v18 = vpop.f32.mrf.mxu1 }
 0x323   : > { %v6198_v61 = vmax.f32 %v2874_v10, 0.0  ;;  %v2897_v47 = vsel %vm51_vm0, %v2887_v51, 0.0 }
 0x324   : > { %v2865_v53 = vpop.f32.mrf.mxu1  ;;  %v2898_v55 = vadd.f32 %v2897_v47, %v2896_v39 }
 0x325   : > { %v2888_v33 = vmul.f32 %v6198_v61, %v5648_v57  ;;  %v2875_v49 = vadd.f32 %v2865_v53, %v2731_v31 }
 0x326   : > { %v4562_v52 = vpop.f32.mrf.mxu1 }
 0x327   : > { %v2899_v8 = vsel %vm51_vm0, %v2888_v33, 0.0  ;;  %v6204_v19 = vmax.f32 %v2875_v49, 0.0 }
 0x328   : > { %v2900_v20 = vadd.f32 %v2899_v8, %v2898_v55 }
 0x329   : > { %v2889_v30 = vmul.f32 %v6204_v19, %v5656_v28 }
 0x32b   : > { %v2901_v13 = vsel %vm60_vm1, %v2889_v30, 0.0 }
 0x32c   : > { %v2902_v54 = vadd.f32 %v2901_v13, %v2900_v20 }
 0x32e   : > { %v2903_v21 = vrot.slane %v2902_v54, 4 }
 0x330   : > { %v2904_v58 = vadd.f32 %v2903_v21, %v2902_v54 }
 0x332   : > { %v2905_v48 = vrot.slane %v2904_v58, 2 }
 0x334   : > { %v2906_v12 = vadd.f32 %v2905_v48, %v2904_v58 }
 0x336   : > { %v2907_v11 = vrot.slane %v2906_v12, 1 }
 0x338   : > { %v2908_v23 = vadd.f32 %v2907_v11, %v2906_v12 }
 0x33a   : > { %v2909_v5 = vmul.f32 0.055555556, %v2908_v23 }
 0x33c   : > { %v2910_v44 = vsub.f32 %v6175_v63, %v2909_v5  ;;  %v2911_v59 = vsub.f32 %v6171_v60, %v2909_v5  ;;  %v2912_v29 = vsub.f32 %v6177_v7, %v2909_v5  ;;  %v2913_v1 = vsub.f32 %v6181_v6, %v2909_v5 }
 0x33d   : > { %v2914_v15 = vsub.f32 %v6191_v9, %v2909_v5  ;;  %v2915_v22 = vsub.f32 %v6198_v61, %v2909_v5  ;;  %v2916_v3 = vsub.f32 %v6204_v19, %v2909_v5 }
 0x33e   : > { %v2917_v35 = vmul.f32 %v2910_v44, %v2910_v44  ;;  %v2918_v32 = vmul.f32 %v2911_v59, %v2911_v59  ;;  %v2919_v36 = vmul.f32 %v2912_v29, %v2912_v29  ;;  %v2920_v41 = vmul.f32 %v2913_v1, %v2913_v1 }
 0x33f   : > { %v2921_v17 = vmul.f32 %v2914_v15, %v2914_v15  ;;  %v2922_v14 = vmul.f32 %v2915_v22, %v2915_v22  ;;  %v2923_v18 = vmul.f32 %v2916_v3, %v2916_v3 }
 0x340   : > { %v2924_v16 = vmul.f32 %v2917_v35, %v5607_v42  ;;  %v2925_v38 = vmul.f32 %v2918_v32, %v5621_v34  ;;  %v2926_v26 = vmul.f32 %v2919_v36, %v5613_v37  ;;  %v2927_v50 = vmul.f32 %v2920_v41, %v5632_v27 }
 0x341   : > { %v2928_v31 = vmul.f32 %v2921_v17, %v5639_v56  ;;  %v2929_v53 = vmul.f32 %v2922_v14, %v5648_v57  ;;  %v2930_v49 = vmul.f32 %v2923_v18, %v5656_v28 }
 0x342   : > { %v2931_v51 = vsel %vm51_vm0, %v2924_v16, 0.0  ;;  %v2932_v10 = vsel %vm51_vm0, %v2925_v38, 0.0  ;;  %v2934_v43 = vsel %vm51_vm0, %v2926_v26, 0.0  ;;  %v2936_v47 = vsel %vm51_vm0, %v2927_v50, 0.0 }
 0x343   : > { %v2933_v62 = vadd.f32 %v2932_v10, %v2931_v51  ;;  %v2938_v39 = vsel %vm51_vm0, %v2928_v31, 0.0  ;;  %v2940_v8 = vsel %vm51_vm0, %v2929_v53, 0.0  ;;  %v2942_v30 = vsel %vm60_vm1, %v2930_v49, 0.0  ;;  %v2983_v10 = vld [vmem:[#allocation2 + $0x10] sm:$0xff] }
 0x344   : > { %v2987_v31 = vld [vmem:[#allocation2 + $0x30] sm:$0xff] }
 0x345   : > { %v2935_v46 = vadd.f32 %v2934_v43, %v2933_v62  ;;  %v2985_v62 = vld [vmem:[#allocation2 + $0x20] sm:$0xff]  ;;  %v2988_v43 = vld [vmem:[#allocation2 + $0x38] sm:$0x3] }
 0x347   : > { %v2937_v33 = vadd.f32 %v2936_v47, %v2935_v46 }
 0x349   : > { %v2939_v52 = vadd.f32 %v2938_v39, %v2937_v33 }
 0x34b   : > { %v2941_v55 = vadd.f32 %v2940_v8, %v2939_v52 }
 0x34d   : > { %v2943_v20 = vadd.f32 %v2942_v30, %v2941_v55 }
 0x34f   : > { %v2944_v13 = vrot.slane %v2943_v20, 4 }
 0x351   : > { %v2945_v54 = vadd.f32 %v2944_v13, %v2943_v20 }
 0x353   : > { %v2946_v21 = vrot.slane %v2945_v54, 2 }
 0x355   : > { %v2947_v58 = vadd.f32 %v2946_v21, %v2945_v54  ;;  %v6440_v21 = vld [vmem:[#allocation9_spill] sm:$0xff] (%p112_p0) }
 0x357   : > { %v2948_v48 = vrot.slane %v2947_v58, 1 }
 0x359   : > { %v2949_v12 = vadd.f32 %v2948_v48, %v2947_v58  ;;  %v6442_v58 = vld [vmem:[#allocation10_spill] sm:$0xff] (%p112_p0) }
 0x35a   :  { %v3242_v48 = vld [vmem:[%s6389_s13 + $0x10] sm:$0xff] (%p112_p0) }
 0x35b   : > { %v2950_v11 = vmul.f32 0.055555556, %v2949_v12  ;;  %v3241_v12 = vld [vmem:[%s6389_s13 + $0x8] sm:$0xff] (%p112_p0) }
 0x35d   : > { %v2951_v23 = vadd.f32 1e-05, %v2950_v11 }
 0x35f   : > { %4626 = vrsqrt.f32 %v2951_v23 }
 0x36c   : > { %v4627_v44 = vpop.eup %4626 }
 0x36d   : > { %v2953_v59 = vmul.f32 %v4627_v44, %v4907_v24  ;;  %v3247_v24 = vld [vmem:[%s6389_s13 + $0x38] sm:$0xff] (%p112_p0) }
 0x36f   : > { %v2958_v29 = vrot.slane %v2953_v59, %v5682_v45  ;;  %v2967_v1 = vmul.f32 %v2953_v59, %v2909_v5 }
 0x371   : > { %v2968_v15 = vsub.f32 %v4912_v25, %v2967_v1  ;;  %v2960_v22 = vmul.f32 %v2958_v29, %v6175_v63  ;;  %v2961_v35 = vmul.f32 %v2958_v29, %v6171_v60  ;;  %v2962_v32 = vmul.f32 %v2958_v29, %v6177_v7  ;;  %v2982_v60 = vld [vmem:[#allocation2 + $0x8] sm:$0xff]  ;;  %v2984_v7 = vld [vmem:[#allocation2 + $0x18] sm:$0xff] }
 0x372   : > { %v2963_v36 = vmul.f32 %v2958_v29, %v6181_v6  ;;  %v2964_v3 = vmul.f32 %v2958_v29, %v6191_v9  ;;  %v2965_v17 = vmul.f32 %v2958_v29, %v6198_v61  ;;  %v2966_v16 = vmul.f32 %v2958_v29, %v6204_v19  ;;  %v2986_v19 = vld [vmem:[#allocation2 + $0x28] sm:$0xff]  ;;  %v3243_v25 = vld [vmem:[%s6389_s13 + $0x18] sm:$0xff] (%p112_p0) }
 0x373   : > { %v2973_v41 = vrot.slane %v2968_v15, %v5682_v45 }
 0x375   : > { %v2975_v38 = vadd.f32 %v2973_v41, %v2960_v22  ;;  %v2976_v5 = vadd.f32 %v2973_v41, %v2961_v35  ;;  %v2977_v26 = vadd.f32 %v2973_v41, %v2962_v32  ;;  %v2978_v14 = vadd.f32 %v2973_v41, %v2963_v36 }
 0x376   : > { %v2979_v50 = vadd.f32 %v2973_v41, %v2964_v3  ;;  %v2980_v63 = vadd.f32 %v2973_v41, %v2965_v17  ;;  %v2981_v51 = vadd.f32 %v2973_v41, %v2966_v16 }
 0x377   : > { %v2989_v6 = vmul.f32 %v2975_v38, %v5607_v42  ;;  %v2990_v18 = vmul.f32 %v2976_v5, %v5621_v34  ;;  %v2991_v9 = vmul.f32 %v2977_v26, %v5613_v37  ;;  %v2992_v61 = vmul.f32 %v2978_v14, %v5632_v27 }
 0x378   : > { %v2993_v46 = vmul.f32 %v2979_v50, %v5639_v56  ;;  %v2994_v53 = vmul.f32 %v2980_v63, %v5648_v57  ;;  %v2995_v47 = vmul.f32 %v2981_v51, %v5656_v28  ;;  %v6438_v56 = vmov (%p112_p0), 0.0   ;;  %v6439_v28 = vld [vmem:[#allocation7_spill] sm:$0xff] (%p112_p0) }
 0x379   : > { %v2996_v33 = vmul.f32 0.05, %v2989_v6  ;;  %v2997_v49 = vmul.f32 0.05, %v2990_v18  ;;  %v2998_v39 = vmul.f32 0.05, %v2991_v9  ;;  %4563 = vmatprep.subr.mxu0 (%p112_p0), %v6438_v56  ;;  %4580 = vmatprep.subr.mxu1 (%p112_p0), %v6438_v56 }
 0x37a   : > { %v2999_v52 = vmul.f32 0.05, %v2992_v61  ;;  %v3000_v42 = vmul.f32 0.05, %v2993_v46  ;;  %v3001_v8 = vmul.f32 0.05, %v2994_v53  ;;  %4577 = vmatprep.mubr.msk.f32.mxu0 (%p112_p0), %vm4675_vm3, %v6438_v56  ;;  %4596 = vmatprep.mubr.msk.f32.mxu1 (%p112_p0), %vm4675_vm3, %v6438_v56 }
 0x37b   : > { %v3002_v34 = vmul.f32 0.05, %v2995_v47  ;;  %v3003_v55 = vadd.f32 %v2996_v33, %v2982_v60  ;;  %v3004_v37 = vadd.f32 %v2997_v49, %v2983_v10  ;;  %v3005_v30 = vadd.f32 %v2998_v39, %v2984_v7  ;;  %4581 = vmatpush3.msra.mxu1 (%p112_p0), %v3247_v24 }
 0x37c   : > { %v3006_v27 = vadd.f32 %v2999_v52, %v2985_v62  ;;  %v3007_v20 = vadd.f32 %v3000_v42, %v2986_v19  ;;  %v3008_v13 = vadd.f32 %v3001_v8, %v2987_v31  ;;  %v6437_v33 = vmov %v5356_v40  ;;  %114 = sbr.rel (!%p112_p0) target bundleno = 25 (0x19), region = 103  ;;  %v6441_v40 = vld [vmem:[#allocation8_spill] sm:$0xff] (%p112_p0)  ;;  %4582 = vmatprep.subr.mxu1 (%p112_p0), %v6438_v56 }
 0x37d   : > { %v3009_v54 = vadd.f32 %v3002_v34, %v2988_v43  ;;  %3010 = vst.msk [vmem:[#allocation2 + $0x8] sm:$0xff] %vm51_vm0, %v3003_v55  ;;  %3011 = vst.msk [vmem:[#allocation2 + $0x10] sm:$0xff] %vm51_vm0, %v3004_v37  ;;  %v4674_v57 = vmov (%p112_p0), 0  }
 0x37e   : > { %3012 = vst.msk [vmem:[#allocation2 + $0x18] sm:$0xff] %vm51_vm0, %v3005_v30  ;;  %3013 = vst.msk [vmem:[#allocation2 + $0x20] sm:$0xff] %vm51_vm0, %v3006_v27  ;;  %4629 = vset.pattern.permute.xlu1 (%p112_p0), %v4674_v57  ;;  %4628 = vset.pattern.permute.xlu0 (%p112_p0), %v4674_v57 }
 0x37f   : > { %3014 = vst.msk [vmem:[#allocation2 + $0x28] sm:$0xff] %vm51_vm0, %v3007_v20  ;;  %3015 = vst.msk [vmem:[#allocation2 + $0x30] sm:$0xff] %vm51_vm0, %v3008_v13  ;;  %3039 = vperm.xlu1 (%p112_p0), %4629, %v4770_v2   ;;  %3029 = vperm.xlu0 (%p112_p0), %4628, %v4760_v0   ;;  %v3246_v0 = vld [vmem:[%s6389_s13 + $0x30] sm:$0xff] (%p112_p0)  ;;  %v3245_v2 = vld [vmem:[%s6389_s13 + $0x28] sm:$0xff] (%p112_p0) }
 0x380   : > { %3016 = vst.msk [vmem:[#allocation2 + $0x38] sm:$0x3] %vm60_vm1, %v3009_v54  ;;  %4583 = vmatpush3.msra.mxu1 (%p112_p0), %v3246_v0 }
 0x381   :  { %4584 = vmatprep.subr.mxu1 %v6438_v56 }
 0x382   :  { %4585 = vmatpush3.msra.mxu1 %v3245_v2 }
 0x383   :  { %3044 = vperm.xlu1 %4629, %v4807_v4   ;;  %3034 = vperm.xlu0 %4628, %v6439_v28   ;;  %v3244_v4 = vld [vmem:[%s6389_s13 + $0x20] sm:$0xff] }
 0x384   :  { %4586 = vmatprep.subr.mxu1 %v6438_v56  ;;  %v6300_v44 = vld [vmem:[#allocation2 + $0x8] sm:$0xff]  ;;  %v6304_v29 = vld [vmem:[#allocation2 + $0x10] sm:$0xff] }
 0x385   :  { %4587 = vmatpush3.msra.mxu1 %v3244_v4  ;;  %v6302_v59 = vld [vmem:[#allocation2 + $0x18] sm:$0xff]  ;;  %v6307_v22 = vld [vmem:[#allocation2 + $0x20] sm:$0xff] }
 0x386   :  { %4588 = vmatprep.subr.mxu1 %v6438_v56  ;;  %v6311_v41 = vld [vmem:[#allocation2 + $0x28] sm:$0xff]  ;;  %v6316_v26 = vld [vmem:[#allocation2 + $0x30] sm:$0xff] }
 0x387   :  { %3054 = vperm.xlu1 %4629, %v6440_v21   ;;  %3049 = vperm.xlu0 %4628, %v6441_v40   ;;  %v6320_v60 = vld [vmem:[#allocation2 + $0x38] sm:$0x3] }
 0x388   :  { %4589 = vmatpush3.msra.mxu1 %v3243_v25 }
 0x389   :  { %4590 = vmatprep.subr.mxu1 %v6438_v56 }
 0x38a   :  { %4591 = vmatpush3.msra.mxu1 %v3242_v48 }
 0x38b   :  { %3059 = vperm.xlu0 %4628, %v6442_v58   ;;  %4592 = vmatprep.subr.mxu1 %v6438_v56 }
 0x38c   :  { %4593 = vmatpush3.msra.mxu1 %v3241_v12 }
 0x38d   :  { %4594 = vmatprep.subr.mxu1 %v6438_v56 }
 0x3fa   :  { %v3040_v11 = vpop.permute.xlu1 %3039  ;;  %v3030_v23 = vpop.permute.xlu0 %3029 }
 0x3fb   :  { %v3062_v1 = vmul.f32 %v3030_v23, %v6300_v44  ;;  %v3064_v32 = vmul.f32 %v3040_v11, %v6302_v59 }
 0x3fd   :  { %v3069_v3 = vsel %vm51_vm0, %v3062_v1, 0.0  ;;  %v3072_v50 = vsel %vm51_vm0, %v3064_v32, 0.0 }
 0x3fe   :  { %v3045_v15 = vpop.permute.xlu1 %3044  ;;  %v3035_v35 = vpop.permute.xlu0 %3034 }
 0x3ff   :  { %v3063_v36 = vmul.f32 %v3035_v35, %v6304_v29  ;;  %v3065_v17 = vmul.f32 %v3045_v15, %v6307_v22 }
 0x401   :  { %v3070_v16 = vsel %vm51_vm0, %v3063_v36, 0.0  ;;  %v3074_v10 = vsel %vm51_vm0, %v3065_v17, 0.0 }
 0x402   :  { %v3071_v38 = vadd.f32 %v3070_v16, %v3069_v3  ;;  %v3055_v5 = vpop.permute.xlu1 %3054  ;;  %v3050_v14 = vpop.permute.xlu0 %3049 }
 0x403   :  { %v3066_v63 = vmul.f32 %v3050_v14, %v6311_v41  ;;  %v3067_v7 = vmul.f32 %v3055_v5, %v6316_v26 }
 0x404   :  { %v3073_v51 = vadd.f32 %v3072_v50, %v3071_v38 }
 0x405   :  { %v3076_v18 = vsel %vm51_vm0, %v3066_v63, 0.0  ;;  %v3078_v19 = vsel %vm51_vm0, %v3067_v7, 0.0 }
 0x406   :  { %v3075_v62 = vadd.f32 %v3074_v10, %v3073_v51  ;;  %v3060_v6 = vpop.permute.xlu0 %3059 }
 0x407   :  { %v3068_v9 = vmul.f32 %v3060_v6, %v6320_v60 }
 0x408   :  { %v3077_v61 = vadd.f32 %v3076_v18, %v3075_v62 }
 0x409   :  { %v3080_v43 = vsel %vm60_vm1, %v3068_v9, 0.0 }
 0x40a   :  { %v3079_v31 = vadd.f32 %v3078_v19, %v3077_v61 }
 0x40c   :  { %v3081_v46 = vadd.f32 %v3080_v43, %v3079_v31  ;;  %v3026_v31 = vld [vmem:[%s6388_s12] sm:$0x1] }
 0x40e   :  { %v3082_v53 = vrot.slane %v3081_v46, 4 }
 0x410   :  { %v3083_v47 = vadd.f32 %v3082_v53, %v3081_v46 }
 0x412   :  { %v3084_v33 = vrot.slane %v3083_v47, 2 }
 0x414   :  { %v3085_v49 = vadd.f32 %v3084_v33, %v3083_v47 }
 0x416   :  { %v3086_v39 = vrot.slane %v3085_v49, 1 }
 0x418   :  { %v3087_v52 = vadd.f32 %v3086_v39, %v3085_v49 }
 0x41a   :  { %v3088_v42 = vmul.f32 0.055555556, %v3087_v52 }
 0x41c   :  { %v3089_v8 = vsub.f32 %v6300_v44, %v3088_v42  ;;  %v3090_v34 = vsub.f32 %v6304_v29, %v3088_v42  ;;  %v3091_v55 = vsub.f32 %v6302_v59, %v3088_v42  ;;  %v3092_v37 = vsub.f32 %v6307_v22, %v3088_v42 }
 0x41d   :  { %v3093_v30 = vsub.f32 %v6311_v41, %v3088_v42  ;;  %v3094_v27 = vsub.f32 %v6316_v26, %v3088_v42  ;;  %v3095_v28 = vsub.f32 %v6320_v60, %v3088_v42 }
 0x41e   :  { %v3096_v20 = vmul.f32 %v3089_v8, %v3089_v8  ;;  %v3097_v13 = vmul.f32 %v3090_v34, %v3090_v34  ;;  %v3098_v54 = vmul.f32 %v3091_v55, %v3091_v55  ;;  %v3099_v57 = vmul.f32 %v3092_v37, %v3092_v37 }
 0x41f   :  { %v3100_v21 = vmul.f32 %v3093_v30, %v3093_v30  ;;  %v3101_v0 = vmul.f32 %v3094_v27, %v3094_v27  ;;  %v3102_v12 = vmul.f32 %v3095_v28, %v3095_v28  ;;  %v3608_v27 = vld [vmem:[%s6390_s14] ss:$0 sm:$0xff] }
 0x420   :  { %v3103_v40 = vmul.f32 %v3096_v20, %v3030_v23  ;;  %v3104_v58 = vmul.f32 %v3097_v13, %v3035_v35  ;;  %v3105_v24 = vmul.f32 %v3098_v54, %v3040_v11  ;;  %v3106_v2 = vmul.f32 %v3099_v57, %v3045_v15 }
 0x421   :  { %v3107_v1 = vmul.f32 %v3100_v21, %v3050_v14  ;;  %v3108_v3 = vmul.f32 %v3101_v0, %v3055_v5  ;;  %v3109_v38 = vmul.f32 %v3102_v12, %v3060_v6  ;;  %v3025_v6 = vld [vmem:[%s6387_s11] sm:$0x1] }
 0x422   :  { %v3110_v4 = vsel %vm51_vm0, %v3103_v40, 0.0  ;;  %v3111_v25 = vsel %vm51_vm0, %v3104_v58, 0.0  ;;  %v3113_v32 = vsel %vm51_vm0, %v3105_v24, 0.0  ;;  %v3115_v17 = vsel %vm51_vm0, %v3106_v2, 0.0 }
 0x423   :  { %v3112_v48 = vadd.f32 %v3111_v25, %v3110_v4  ;;  %v3117_v23 = vsel %vm51_vm0, %v3107_v1, 0.0  ;;  %v3119_v15 = vsel %vm51_vm0, %v3108_v3, 0.0  ;;  %v3121_v50 = vsel %vm60_vm1, %v3109_v38, 0.0 }
 0x425   :  { %v3114_v36 = vadd.f32 %v3113_v32, %v3112_v48 }
 0x427   :  { %v3116_v16 = vadd.f32 %v3115_v17, %v3114_v36 }
 0x429   :  { %v3118_v11 = vadd.f32 %v3117_v23, %v3116_v16 }
 0x42b   :  { %v3120_v35 = vadd.f32 %v3119_v15, %v3118_v11 }
 0x42d   :  { %v3122_v63 = vadd.f32 %v3121_v50, %v3120_v35 }
 0x42f   :  { %v3123_v51 = vrot.slane %v3122_v63, 4 }
 0x431   :  { %v3124_v10 = vadd.f32 %v3123_v51, %v3122_v63 }
 0x433   :  { %v3125_v14 = vrot.slane %v3124_v10, 2 }
 0x435   :  { %v3126_v7 = vadd.f32 %v3125_v14, %v3124_v10 }
 0x437   :  { %v3127_v62 = vrot.slane %v3126_v7, 1 }
 0x439   :  { %v3128_v18 = vadd.f32 %v3127_v62, %v3126_v7 }
 0x43b   :  { %v3129_v5 = vmul.f32 0.055555556, %v3128_v18 }
 0x43d   :  { %v3130_v9 = vadd.f32 1e-05, %v3129_v5 }
 0x43f   :  { %4630 = vrsqrt.f32 %v3130_v9 }
 0x44c   :  { %v4631_v61 = vpop.eup %4630 }
 0x44d   :  { %v3132_v19 = vmul.f32 %v4631_v61, %v3025_v6 }
 0x44f   :  { %v3137_v43 = vrot.slane %v3132_v19, %v5682_v45  ;;  %v3146_v46 = vmul.f32 %v3132_v19, %v3088_v42 }
 0x451   :  { %v3147_v53 = vsub.f32 %v3026_v31, %v3146_v46  ;;  %v3145_v47 = vmul.f32 %v3137_v43, %v6320_v60  ;;  %v3144_v39 = vmul.f32 %v3137_v43, %v6316_v26  ;;  %v3143_v8 = vmul.f32 %v3137_v43, %v6311_v41 }
 0x452   :  { %v3142_v55 = vmul.f32 %v3137_v43, %v6307_v22  ;;  %v3140_v42 = vmul.f32 %v3137_v43, %v6304_v29  ;;  %v3139_v37 = vmul.f32 %v3137_v43, %v6300_v44  ;;  %v3240_v29 = vld [vmem:[%s6389_s13] sm:$0xff] }
 0x453   :  { %v3152_v33 = vrot.slane %v3147_v53, %v5682_v45  ;;  %v3141_v45 = vmul.f32 %v3137_v43, %v6302_v59  ;;  %v3161_v59 = vld [vmem:[%s6386_s10] sm:$0x3]  ;;  %4595 = vmatpush3.msra.mxu1 %v3240_v29  ;;  %s3336_s10 = sshll.u32 %s4676_s26, 4  ;;  %s3337_s10 = int_to_ptr.vmem [resolvable:$true] %s3336_s10 }
 0x454   :  { %s4632_s28 = scalar_lea.vmem %s3337_s10, 32  ;;  %p4637_p2 = scmp.lt.s32.totalorder %s3337_s10, %s3337_s10 }
 0x455   :  { %v3160_v49 = vadd.f32 %v3152_v33, %v3145_v47  ;;  %v3159_v52 = vadd.f32 %v3152_v33, %v3144_v39  ;;  %v3158_v34 = vadd.f32 %v3152_v33, %v3143_v8  ;;  %v3157_v60 = vadd.f32 %v3152_v33, %v3142_v55  ;;  %p4633_p1 = scmp.ne.s32.totalorder %s3337_s10, %s4632_s28  ;;  %p4638_p3 = scmp.lt.s32.totalorder %s4632_s28, %s4632_s28 }
 0x456   :  { %v3156_v26 = vadd.f32 %v3152_v33, %v3141_v45  ;;  %v3155_v41 = vadd.f32 %v3152_v33, %v3140_v42  ;;  %v3154_v22 = vadd.f32 %v3152_v33, %v3139_v37 }
 0x457   :  { %4564 = vmatpush3.msk.msra.mxu0 %vm3166_vm4, %v3160_v49  ;;  %p4639_p4 = por %p4638_p3, %p4637_p2 }
 0x458   :  { %4565 = vmatprep.subr.mxu0 %v6438_v56 }
 0x459   :  { %4566 = vmatpush3.msra.mxu0 %v3159_v52  ;;  %p4640_p5 = pnand %p4639_p4, %p4633_p1 }
 0x45a   :  { %4567 = vmatprep.subr.mxu0 %v6438_v56 }
 0x45b   :  { %4568 = vmatpush3.msra.mxu0 %v3158_v34 }
 0x45c   :  { %4569 = vmatprep.subr.mxu0 %v6438_v56 }
 0x45d   :  { %4570 = vmatpush3.msra.mxu0 %v3157_v60 }
 0x45e   :  { %4571 = vmatprep.subr.mxu0 %v6438_v56 }
 0x45f   :  { %4572 = vmatpush3.msra.mxu0 %v3156_v26 }
 0x460   :  { %4573 = vmatprep.subr.mxu0 %v6438_v56 }
 0x461   :  { %4574 = vmatpush3.msra.mxu0 %v3155_v41 }
 0x462   :  { %4575 = vmatprep.subr.mxu0 %v6438_v56 }
 0x463   :  { %4576 = vmatpush3.msra.mxu0 %v3154_v22 }
 0x464   :  { %4578 = vmatmul.mubr.msk.f32.vlgmr.msra.gmra.mxu0 %vm3162_vm5, %v3161_v59 }
 0x524   :  { %v3236_v30 = vpop.f32.mrf.mxu0 }
 0x525   :  { %4597 = vmatmul.mubr.msk.f32.vlgmr.msra.gmra.mxu1 %vm51_vm0, %v3236_v30 }
 0x526   :  { %v4579_v44 = vpop.f32.mrf.mxu0 }
 0x5e5   :  { %v3324_v20 = vpop.f32.mrf.mxu1 }
 0x5e6   :  { %v3325_v56 = vadd.f32 %v3608_v27, %v3324_v20 }
 0x5e7   :  { %v4598_v13 = vpop.f32.mrf.mxu1 }
 0x5e8   :  { %3329 = vst.msk [vmem:[#allocation4] sm:$0x3] %vm3328_vm6, %v3325_v56 }
 0x5e9   :  { %4643 = shalt.err (!%p4640_p5)
}
 0x5ea   :  { %3339 = dma.vmem_to_hbm [thread:$0]  %s3337_s10, 32, %s6391_s15, [#allocation5]  }
 0x5eb   :  { %4660 = dma.done.wait [#allocation5], 32  }
 0x5ec   :  { %4661 = vsyncadd [#allocation5], 4294967264 }
 0x5ed   :  { %3343 = vsyncpa [#allocation5], 1 }

</bundles_post_ra>
